<compile_context>
chip_gen: v6e
topology: v6e:2x2x1
jax: 0.10.0
libtpu: 0.0.40
codegen_flags: <defaults>
</compile_context>

<pallas_src>
import functools
import numpy as np
import jax
import jax.numpy as jnp
from jax.experimental import pallas as pl
from jax.experimental.pallas import tpu as pltpu

# ---------------- configuration (mirrors `args`) ----------------
ARGS = dict(
    M=64, N=32, lenCP=4, sps=2,
    snr=10.0, fading=0, hstd=1.0,
    clip=1.5, thres=8.0,
    precoding=1, mapping=1,
)
IMG_SHAPE = (3, 32, 32)      # encoder input per sample
FEAT_DIM = 512               # encoder output = 256 complex symbols = 512 reals
_10_OVER_LN10 = 10.0 / float(np.log(10.0))


def _fs(shape):
    """Full-array VMEM BlockSpec for a grid=(1,) pallas_call."""
    nd = len(shape)
    return pl.BlockSpec(shape, lambda *_: (0,) * nd)


# ======================= host-side constant construction =======================
def get_rrc(sps, beta=0.35, span=8):
    """Deterministic root-raised-cosine filter (stand-in for get_RRC())."""
    n = span * sps + 1
    t = (np.arange(n) - (n - 1) / 2.0) / float(sps)
    h = np.zeros(n, dtype=np.float64)
    for i, ti in enumerate(t):
        if abs(ti) < 1e-10:
            h[i] = 1.0 - beta + 4.0 * beta / np.pi
        elif abs(abs(ti) - 1.0 / (4.0 * beta)) < 1e-10:
            h[i] = (beta / np.sqrt(2.0)) * (
                (1 + 2 / np.pi) * np.sin(np.pi / (4 * beta))
                + (1 - 2 / np.pi) * np.cos(np.pi / (4 * beta)))
        else:
            h[i] = (np.sin(np.pi * ti * (1 - beta))
                    + 4 * beta * ti * np.cos(np.pi * ti * (1 + beta))) / (
                        np.pi * ti * (1 - (4 * beta * ti) ** 2))
    h = h / np.sqrt(np.sum(h ** 2))
    return h, n


def _full_conv_np(x, h):
    """Row-wise full convolution: out[:, n] = sum_j h[j] * x[:, n-j].
    Matches F.conv1d(x, h.flip(), stride=1, padding=len(h)-1)."""
    r, l = x.shape
    k = h.shape[0]
    out = np.zeros((r, l + k - 1), dtype=np.float64)
    for j in range(k):
        out[:, j:j + l] += h[j] * x
    return out


def _tx_chain_np(feat, loc, args, rrc, carrier_cos, carrier_sin):
    """Linear TX chain (real-linear): feat (R, 512) -> passband waveform data_x (R, Lx)."""
    r = feat.shape[0]
    m, n, len_cp, sps = args["M"], args["N"], args["lenCP"], args["sps"]
    num_ofdm = 256 // n
    c = feat.reshape(r, 256, 2)
    x = (c[..., 0] + 1j * c[..., 1]).reshape(r, num_ofdm, n)
    if args["precoding"] == 1:
        x = np.fft.fft(x, axis=-1, norm="ortho")
        x = np.fft.fftshift(x, axes=-1)
    data_f = np.zeros((r, num_ofdm, m), dtype=np.complex128)
    data_f[:, :, loc] = x
    data_t = np.fft.ifft(data_f, axis=-1, norm="ortho")
    if len_cp != 0:
        data_t = np.concatenate([data_t[:, :, -len_cp:], data_t], axis=-1)
    len_data_t = num_ofdm * (m + len_cp)
    data_t = data_t.reshape(r, len_data_t)
    over = np.zeros((r, len_data_t * sps), dtype=np.complex128)
    over[:, ::sps] = data_t                                  # zero-insertion oversampling
    fr = _full_conv_np(over.real, rrc)                       # TX RRC pulse shaping
    fi = _full_conv_np(over.imag, rrc)
    lx = fr.shape[1]
    return fr * carrier_cos[:lx] - fi * carrier_sin[:lx]     # carrier up-conversion


def _rx_chain_np(data_r, loc, args, rrc, len_rrc, carrier_cos, carrier_sin):
    """Linear RX chain (real-linear): received waveform (R, Lx) -> packed features (R, 512)."""
    r, lx = data_r.shape
    m, n, len_cp, sps = args["M"], args["N"], args["lenCP"], args["sps"]
    num_ofdm = 256 // n
    rr = data_r * carrier_cos[:lx]                           # down-conversion
    ri = data_r * (-carrier_sin[:lx])
    g = _full_conv_np(rr, rrc) + 1j * _full_conv_np(ri, rrc)  # matched filtering
    sampling = np.arange(len_rrc - 1, g.shape[1] - len_rrc, sps)
    assert sampling.size == num_ofdm * (m + len_cp), "RX sampling grid mismatch"
    y = g[:, sampling].reshape(r, num_ofdm, m + len_cp)[:, :, len_cp:]   # drop CP
    y = np.fft.fft(y, axis=-1, norm="ortho")[:, :, loc]
    if args["precoding"] == 1:
        y = np.fft.fftshift(y, axes=-1)
        y = np.fft.ifft(y, axis=-1, norm="ortho")
    y = y.reshape(r, num_ofdm * n)
    return np.stack([y.real, y.imag], axis=-1).reshape(r, 2 * num_ofdm * n)


def build_composite_mats(args, loc, rrc, len_rrc, carrier_cos, carrier_sin):
    """Pre-compose the linear TX / RX chains into constant matrices (applied as x @ W)."""
    w_tx = _tx_chain_np(np.eye(FEAT_DIM), loc, args, rrc, carrier_cos, carrier_sin)
    lx = w_tx.shape[1]
    w_rx = _rx_chain_np(np.eye(lx), loc, args, rrc, len_rrc, carrier_cos, carrier_sin)
    return jnp.asarray(w_tx, jnp.float32), jnp.asarray(w_rx, jnp.float32), lx


# ======================= the single fused Pallas kernel =======================
def _semantic_comm_kernel(x_ref, wenc_ref, wtx_ref, noise_ref, wrx_ref, wdec_ref,
                          out_ref, papr_db_ref, papr_loss_ref,
                          *, clip_val, thres, h, trunc_start, trunc_len, feat_dim):
    # ---- encoder (dense bf16 stand-in) + power_norm epilogue ----
    # TODO(synk): ResNetTx body not provided in the source — dense projection stand-in.
    feat = jnp.dot(x_ref[...], wenc_ref[...], preferred_element_type=jnp.float32)  # (B, 512)
    mean = jnp.mean(feat, axis=1, keepdims=True)
    diff = feat - mean
    var = jnp.sum(diff * diff, axis=1, keepdims=True) / (feat_dim - 1)   # torch.std is unbiased
    feat = diff * pl.reciprocal(jnp.sqrt(var) + 1e-8, approx=True)

    # ---- TX composite: FFT(N)+shift -> map(loc) -> IFFT(M) -> CP -> oversample -> RRC -> carrier
    data_x = jnp.dot(feat, wtx_ref[...], preferred_element_type=jnp.float32)       # (B, Lx)

    # ---- amplitude clipping ----
    if clip_val != 0.0:
        mean_pow = jnp.mean(data_x * data_x, axis=1, keepdims=True)
        th = clip_val * jnp.sqrt(mean_pow)
        absx = jnp.abs(data_x)
        nnd = jnp.maximum(absx - th, 0.0)
        data_x = (1.0 - nnd * pl.reciprocal(absx + 1e-8, approx=True)) * data_x

    # ---- PAPR over the payload section ----
    p = data_x[:, trunc_start:trunc_start + trunc_len]
    p = p * p
    mean_p = jnp.mean(p, axis=1, keepdims=True)
    max_p = jnp.max(p, axis=1, keepdims=True)
    papr_db = _10_OVER_LN10 * jnp.log(max_p * pl.reciprocal(mean_p, approx=True))   # 10*log10
    papr_db_ref[...] = papr_db
    papr_loss_ref[...] = (jnp.mean(jnp.maximum(papr_db - thres, 0.0))
                          * jnp.ones((1, 1), jnp.float32))

    # ---- AWGN channel ----
    # TODO(synk): AWGN is DMA'd in (could be generated in-kernel with pltpu.prng_*).
    data_r = h * data_x + noise_ref[...]

    # ---- RX composite: carrier mix -> RRC -> sample -> FFT(M) -> unmap -> shift -> IFFT(N)
    y = jnp.dot(data_r, wrx_ref[...], preferred_element_type=jnp.float32)           # (B, 512)

    # ---- decoder (dense bf16 stand-in) ----
    # TODO(synk): ResNetRx body not provided in the source — dense projection stand-in.
    out_ref[...] = jnp.dot(y.astype(wdec_ref.dtype), wdec_ref[...],
                           preferred_element_type=jnp.float32)


def semantic_comm_forward(x, w_enc, w_dec, w_tx, w_rx, noise, args, len_rrc):
    b = x.shape[0]
    d_in = w_dec.shape[1]
    num_ofdm = 256 // args["N"]
    len_data_t = num_ofdm * (args["M"] + args["lenCP"])
    trunc_start = (len_rrc + 1) // 2
    trunc_len = len_data_t * args["sps"]
    # NOTE: as in the torch module, the fading coefficient is a host/numpy draw per call;
    # with fading=0 it is the constant 1.0.
    h = 1.0 if args["fading"] == 0 else float(np.random.rayleigh(args["hstd"], 1)[0])

    kern = functools.partial(
        _semantic_comm_kernel,
        clip_val=float(args["clip"]), thres=float(args["thres"]), h=float(h),
        trunc_start=int(trunc_start), trunc_len=int(trunc_len), feat_dim=FEAT_DIM)

    outs = (jax.ShapeDtypeStruct((b, d_in), jnp.float32),   # lane-dense decoder output
            jax.ShapeDtypeStruct((b, 1), jnp.float32),      # PAPR dB per sample
            jax.ShapeDtypeStruct((1, 1), jnp.float32))      # PAPR hinge loss (scalar)

    x_flat = x.reshape(b, -1).astype(jnp.bfloat16)          # bf16 activations into the MXU

    out, papr_db, papr_loss = pl.pallas_call(
        kern,
        out_shape=outs,
        grid=(1,),
        in_specs=[_fs(x_flat.shape), _fs(w_enc.shape), _fs(w_tx.shape),
                  _fs(noise.shape), _fs(w_rx.shape), _fs(w_dec.shape)],
        out_specs=(_fs((b, d_in)), _fs((b, 1)), _fs((1, 1))),
        compiler_params=pltpu.CompilerParams(
            dimension_semantics=("arbitrary",),
            vmem_limit_bytes=48 * 1024 * 1024),             # ~11 MiB resident (x2 buffers)
    )(x_flat, w_enc, w_tx, noise, w_rx, w_dec)

    return out.reshape(b, *IMG_SHAPE), papr_db[:, 0], papr_loss[0, 0]


# ======================= demo =======================
if __name__ == "__main__":
    key = jax.random.PRNGKey(0)
    k_x, k_enc, k_dec, k_loc, k_noise = jax.random.split(key, 5)

    args = ARGS
    m, n, len_cp, sps = args["M"], args["N"], args["lenCP"], args["sps"]
    num_ofdm = 256 // n

    rrc, len_rrc = get_rrc(sps)
    fb, fc = 1.0e7, 2.5e7
    fs = fb * sps
    num_samples = num_ofdm * (m + len_cp) * sps + len_rrc * 2
    tt = np.arange(num_samples) / fs
    carrier_cos = np.sqrt(2.0) * np.cos(2 * np.pi * fc * tt)
    carrier_sin = np.sqrt(2.0) * np.sin(2 * np.pi * fc * tt)

    # mapping == 1: contiguous block of N subcarriers at a (deterministic) random offset.
    startloc = int(jax.random.randint(k_loc, (), 0, m - n + 1))
    loc = np.arange(startloc, startloc + n)

    # Pre-compose the TX / RX linear OFDM+RRC+carrier chains into two constant matrices.
    w_tx, w_rx, lx = build_composite_mats(args, loc, rrc, len_rrc, carrier_cos, carrier_sin)

    b = 2
    x = jax.random.normal(k_x, (b, *IMG_SHAPE), jnp.float32)
    d_in = int(np.prod(IMG_SHAPE))
    w_enc = (jax.random.normal(k_enc, (d_in, FEAT_DIM), jnp.float32) * 0.02).astype(jnp.bfloat16)
    w_dec = (jax.random.normal(k_dec, (FEAT_DIM, d_in), jnp.float32) * 0.02).astype(jnp.bfloat16)

    noise_std = float(np.sqrt(1.0 / (2.0 * 10.0 ** (args["snr"] / 10.0))))
    noise = jax.random.normal(k_noise, (b, lx), jnp.float32) * noise_std

    out, papr_db, papr_loss = semantic_comm_forward(
        x, w_enc, w_dec, w_tx, w_rx, noise, args, len_rrc)
    jax.block_until_ready((out, papr_db, papr_loss))

    assert out.shape == (b, *IMG_SHAPE)
    assert papr_db.shape == (b,)
    assert papr_loss.shape == ()
    assert bool(jnp.all(jnp.isfinite(out)))
    assert bool(jnp.all(jnp.isfinite(papr_db))) and bool(jnp.isfinite(papr_loss))
    print("KERNEL_OK")
</pallas_src>

<mosaic_0001>
module attributes {stable_mosaic.version = 11 : i64} {
  func.func @_semantic_comm_kernel(%arg0: i32, %arg1: memref<2x3072xbf16, #tpu.memory_space<vmem>>, %arg2: memref<3072x512xbf16, #tpu.memory_space<vmem>>, %arg3: memref<512x1104xf32, #tpu.memory_space<vmem>>, %arg4: memref<2x1104xf32, #tpu.memory_space<vmem>>, %arg5: memref<1104x512xf32, #tpu.memory_space<vmem>>, %arg6: memref<512x3072xbf16, #tpu.memory_space<vmem>>, %arg7: memref<2x3072xf32, #tpu.memory_space<vmem>>, %arg8: memref<2x1xf32, #tpu.memory_space<vmem>>, %arg9: memref<1x1xf32, #tpu.memory_space<vmem>>) attributes {dimension_semantics = [#tpu.dimension_semantics<arbitrary>], iteration_bounds = array<i64: 1>, scalar_prefetch = 0 : i64, scratch_operands = 0 : i64, tpu.core_type = #tpu.core_type<tc>, window_params = [{pipeline_mode = #tpu.pipeline_mode<synchronous>, transform_indices = @transform_0, window_bounds = array<i64: 2, 3072>}, {pipeline_mode = #tpu.pipeline_mode<synchronous>, transform_indices = @transform_1, window_bounds = array<i64: 3072, 512>}, {pipeline_mode = #tpu.pipeline_mode<synchronous>, transform_indices = @transform_2, window_bounds = array<i64: 512, 1104>}, {pipeline_mode = #tpu.pipeline_mode<synchronous>, transform_indices = @transform_3, window_bounds = array<i64: 2, 1104>}, {pipeline_mode = #tpu.pipeline_mode<synchronous>, transform_indices = @transform_4, window_bounds = array<i64: 1104, 512>}, {pipeline_mode = #tpu.pipeline_mode<synchronous>, transform_indices = @transform_5, window_bounds = array<i64: 512, 3072>}, {pipeline_mode = #tpu.pipeline_mode<synchronous>, transform_indices = @transform_6, window_bounds = array<i64: 2, 3072>}, {pipeline_mode = #tpu.pipeline_mode<synchronous>, transform_indices = @transform_7, window_bounds = array<i64: 2, 1>}, {pipeline_mode = #tpu.pipeline_mode<synchronous>, transform_indices = @transform_8, window_bounds = array<i64: 1, 1>}]} {
    %c0 = arith.constant 0 : index
    %c0_0 = arith.constant 0 : index
    %0 = vector.load %arg1[%c0, %c0_0] : memref<2x3072xbf16, #tpu.memory_space<vmem>>, vector<2x3072xbf16>
    %c0_1 = arith.constant 0 : index
    %c0_2 = arith.constant 0 : index
    %1 = vector.load %arg2[%c0_1, %c0_2] : memref<3072x512xbf16, #tpu.memory_space<vmem>>, vector<3072x512xbf16>
    %cst = arith.constant dense<0.000000e+00> : vector<2x512xf32>
    %2 = tpu.matmul %0, %1, %cst {dimension_numbers = #tpu.dot_dimension_numbers<[1], [0], [0], [1], [0, 0, 1, 1], [], []>} : vector<2x3072xbf16>, vector<3072x512xbf16>, vector<2x512xf32> -> vector<2x512xf32>
    %cst_3 = arith.constant dense<0.000000e+00> : vector<2xf32>
    %3 = vector.multi_reduction <add>, %2, %cst_3 [1] : vector<2x512xf32> to vector<2xf32>
    %4 = vector.shape_cast %3 : vector<2xf32> to vector<2x1xf32>
    %cst_4 = arith.constant 5.120000e+02 : f32
    %5 = vector.broadcast %cst_4 : f32 to vector<2x1xf32>
    %6 = arith.divf %4, %5 : vector<2x1xf32>
    %7 = vector.broadcast %6 : vector<2x1xf32> to vector<2x512xf32>
    %8 = arith.subf %2, %7 : vector<2x512xf32>
    %9 = arith.mulf %8, %8 : vector<2x512xf32>
    %cst_5 = arith.constant dense<0.000000e+00> : vector<2xf32>
    %10 = vector.multi_reduction <add>, %9, %cst_5 [1] : vector<2x512xf32> to vector<2xf32>
    %11 = vector.shape_cast %10 : vector<2xf32> to vector<2x1xf32>
    %cst_6 = arith.constant 5.110000e+02 : f32
    %12 = vector.broadcast %cst_6 : f32 to vector<2x1xf32>
    %13 = arith.divf %11, %12 : vector<2x1xf32>
    %14 = math.sqrt %13 : vector<2x1xf32>
    %cst_7 = arith.constant 9.99999993E-9 : f32
    %15 = vector.broadcast %cst_7 : f32 to vector<2x1xf32>
    %16 = arith.addf %14, %15 : vector<2x1xf32>
    %17 = tpu.reciprocal %16 {approx = true} : vector<2x1xf32> -> vector<2x1xf32>
    %18 = vector.broadcast %17 : vector<2x1xf32> to vector<2x512xf32>
    %19 = arith.mulf %8, %18 : vector<2x512xf32>
    %c0_8 = arith.constant 0 : index
    %c0_9 = arith.constant 0 : index
    %20 = vector.load %arg3[%c0_8, %c0_9] : memref<512x1104xf32, #tpu.memory_space<vmem>>, vector<512x1104xf32>
    %cst_10 = arith.constant dense<0.000000e+00> : vector<2x1104xf32>
    %21 = tpu.matmul %19, %20, %cst_10 {dimension_numbers = #tpu.dot_dimension_numbers<[1], [0], [0], [1], [0, 0, 1, 1], [], []>} : vector<2x512xf32>, vector<512x1104xf32>, vector<2x1104xf32> -> vector<2x1104xf32>
    %22 = arith.mulf %21, %21 : vector<2x1104xf32>
    %cst_11 = arith.constant dense<0.000000e+00> : vector<2xf32>
    %23 = vector.multi_reduction <add>, %22, %cst_11 [1] : vector<2x1104xf32> to vector<2xf32>
    %24 = vector.shape_cast %23 : vector<2xf32> to vector<2x1xf32>
    %cst_12 = arith.constant 1.104000e+03 : f32
    %25 = vector.broadcast %cst_12 : f32 to vector<2x1xf32>
    %26 = arith.divf %24, %25 : vector<2x1xf32>
    %27 = math.sqrt %26 : vector<2x1xf32>
    %cst_13 = arith.constant 1.500000e+00 : f32
    %28 = vector.broadcast %cst_13 : f32 to vector<2x1xf32>
    %29 = arith.mulf %28, %27 : vector<2x1xf32>
    %30 = math.absf %21 : vector<2x1104xf32>
    %31 = vector.broadcast %29 : vector<2x1xf32> to vector<2x1104xf32>
    %32 = arith.subf %30, %31 : vector<2x1104xf32>
    %cst_14 = arith.constant 0.000000e+00 : f32
    %33 = vector.broadcast %cst_14 : f32 to vector<2x1104xf32>
    %34 = arith.maximumf %32, %33 : vector<2x1104xf32>
    %cst_15 = arith.constant 9.99999993E-9 : f32
    %35 = vector.broadcast %cst_15 : f32 to vector<2x1104xf32>
    %36 = arith.addf %30, %35 : vector<2x1104xf32>
    %37 = tpu.reciprocal %36 {approx = true} : vector<2x1104xf32> -> vector<2x1104xf32>
    %38 = arith.mulf %34, %37 : vector<2x1104xf32>
    %cst_16 = arith.constant 1.000000e+00 : f32
    %39 = vector.broadcast %cst_16 : f32 to vector<2x1104xf32>
    %40 = arith.subf %39, %38 : vector<2x1104xf32>
    %41 = arith.mulf %40, %21 : vector<2x1104xf32>
    %42 = vector.extract_strided_slice %41 {offsets = [0, 9], sizes = [2, 1088], strides = [1, 1]} : vector<2x1104xf32> to vector<2x1088xf32>
    %43 = arith.mulf %42, %42 : vector<2x1088xf32>
    %cst_17 = arith.constant dense<0.000000e+00> : vector<2xf32>
    %44 = vector.multi_reduction <add>, %43, %cst_17 [1] : vector<2x1088xf32> to vector<2xf32>
    %45 = vector.shape_cast %44 : vector<2xf32> to vector<2x1xf32>
    %cst_18 = arith.constant 1.088000e+03 : f32
    %46 = vector.broadcast %cst_18 : f32 to vector<2x1xf32>
    %47 = arith.divf %45, %46 : vector<2x1xf32>
    %cst_19 = arith.constant dense<0xFF800000> : vector<2xf32>
    %48 = vector.multi_reduction <maximumf>, %43, %cst_19 [1] : vector<2x1088xf32> to vector<2xf32>
    %49 = vector.shape_cast %48 : vector<2xf32> to vector<2x1xf32>
    %50 = tpu.reciprocal %47 {approx = true} : vector<2x1xf32> -> vector<2x1xf32>
    %51 = arith.mulf %49, %50 : vector<2x1xf32>
    %52 = math.log %51 : vector<2x1xf32>
    %cst_20 = arith.constant 4.34294462 : f32
    %53 = vector.broadcast %cst_20 : f32 to vector<2x1xf32>
    %54 = arith.mulf %53, %52 : vector<2x1xf32>
    %c0_21 = arith.constant 0 : index
    %c0_22 = arith.constant 0 : index
    %55 = vector.load %arg8[%c0_21, %c0_22] : memref<2x1xf32, #tpu.memory_space<vmem>>, vector<2x1xf32>
    tpu.vector_store %arg8[%c0_21, %c0_22], %54 {strides = array<i32>} : memref<2x1xf32, #tpu.memory_space<vmem>>, vector<2x1xf32>,
    %cst_23 = arith.constant 8.000000e+00 : f32
    %56 = vector.broadcast %cst_23 : f32 to vector<2x1xf32>
    %57 = arith.subf %54, %56 : vector<2x1xf32>
    %cst_24 = arith.constant 0.000000e+00 : f32
    %58 = vector.broadcast %cst_24 : f32 to vector<2x1xf32>
    %59 = arith.maximumf %57, %58 : vector<2x1xf32>
    %60 = vector.shape_cast %59 : vector<2x1xf32> to vector<1x2x1xf32>
    %cst_25 = arith.constant dense<0.000000e+00> : vector<1xf32>
    %61 = vector.multi_reduction <add>, %60, %cst_25 [1, 2] : vector<1x2x1xf32> to vector<1xf32>
    %62 = vector.shape_cast %61 : vector<1xf32> to vector<1x1x1xf32>
    %63 = vector.extract %62[0, 0, 0] : f32 from vector<1x1x1xf32>
    %cst_26 = arith.constant 2.000000e+00 : f32
    %64 = arith.divf %63, %cst_26 : f32
    %cst_27 = arith.constant 1.000000e+00 : f32
    %65 = vector.broadcast %cst_27 : f32 to vector<1x1xf32>
    %66 = vector.broadcast %64 : f32 to vector<1x1xf32>
    %67 = arith.mulf %66, %65 : vector<1x1xf32>
    %c0_28 = arith.constant 0 : index
    %c0_29 = arith.constant 0 : index
    %68 = vector.load %arg9[%c0_28, %c0_29] : memref<1x1xf32, #tpu.memory_space<vmem>>, vector<1x1xf32>
    tpu.vector_store %arg9[%c0_28, %c0_29], %67 {strides = array<i32>} : memref<1x1xf32, #tpu.memory_space<vmem>>, vector<1x1xf32>,
    %cst_30 = arith.constant 1.000000e+00 : f32
    %69 = vector.broadcast %cst_30 : f32 to vector<2x1104xf32>
    %70 = arith.mulf %69, %41 : vector<2x1104xf32>
    %c0_31 = arith.constant 0 : index
    %c0_32 = arith.constant 0 : index
    %71 = vector.load %arg4[%c0_31, %c0_32] : memref<2x1104xf32, #tpu.memory_space<vmem>>, vector<2x1104xf32>
    %72 = arith.addf %70, %71 : vector<2x1104xf32>
    %c0_33 = arith.constant 0 : index
    %c0_34 = arith.constant 0 : index
    %73 = vector.load %arg5[%c0_33, %c0_34] : memref<1104x512xf32, #tpu.memory_space<vmem>>, vector<1104x512xf32>
    %cst_35 = arith.constant dense<0.000000e+00> : vector<2x512xf32>
    %74 = tpu.matmul %72, %73, %cst_35 {dimension_numbers = #tpu.dot_dimension_numbers<[1], [0], [0], [1], [0, 0, 1, 1], [], []>} : vector<2x1104xf32>, vector<1104x512xf32>, vector<2x512xf32> -> vector<2x512xf32>
    %75 = arith.truncf %74 : vector<2x512xf32> to vector<2x512xbf16>
    %c0_36 = arith.constant 0 : index
    %c0_37 = arith.constant 0 : index
    %76 = vector.load %arg6[%c0_36, %c0_37] : memref<512x3072xbf16, #tpu.memory_space<vmem>>, vector<512x3072xbf16>
    %cst_38 = arith.constant dense<0.000000e+00> : vector<2x3072xf32>
    %77 = tpu.matmul %75, %76, %cst_38 {dimension_numbers = #tpu.dot_dimension_numbers<[1], [0], [0], [1], [0, 0, 1, 1], [], []>} : vector<2x512xbf16>, vector<512x3072xbf16>, vector<2x3072xf32> -> vector<2x3072xf32>
    %c0_39 = arith.constant 0 : index
    %c0_40 = arith.constant 0 : index
    %78 = vector.load %arg7[%c0_39, %c0_40] : memref<2x3072xf32, #tpu.memory_space<vmem>>, vector<2x3072xf32>
    tpu.vector_store %arg7[%c0_39, %c0_40], %77 {strides = array<i32>} : memref<2x3072xf32, #tpu.memory_space<vmem>>, vector<2x3072xf32>,
    return
  }
  func.func @transform_0(%arg0: i32) -> (i32, i32) {
    %c0_i32 = arith.constant 0 : i32
    %c0_i32_0 = arith.constant 0 : i32
    %c0_i32_1 = arith.constant 0 : i32
    return %c0_i32, %c0_i32_0 : i32, i32
  }
  func.func @transform_1(%arg0: i32) -> (i32, i32) {
    %c0_i32 = arith.constant 0 : i32
    %c0_i32_0 = arith.constant 0 : i32
    %c0_i32_1 = arith.constant 0 : i32
    return %c0_i32, %c0_i32_0 : i32, i32
  }
  func.func @transform_2(%arg0: i32) -> (i32, i32) {
    %c0_i32 = arith.constant 0 : i32
    %c0_i32_0 = arith.constant 0 : i32
    %c0_i32_1 = arith.constant 0 : i32
    return %c0_i32, %c0_i32_0 : i32, i32
  }
  func.func @transform_3(%arg0: i32) -> (i32, i32) {
    %c0_i32 = arith.constant 0 : i32
    %c0_i32_0 = arith.constant 0 : i32
    %c0_i32_1 = arith.constant 0 : i32
    return %c0_i32, %c0_i32_0 : i32, i32
  }
  func.func @transform_4(%arg0: i32) -> (i32, i32) {
    %c0_i32 = arith.constant 0 : i32
    %c0_i32_0 = arith.constant 0 : i32
    %c0_i32_1 = arith.constant 0 : i32
    return %c0_i32, %c0_i32_0 : i32, i32
  }
  func.func @transform_5(%arg0: i32) -> (i32, i32) {
    %c0_i32 = arith.constant 0 : i32
    %c0_i32_0 = arith.constant 0 : i32
    %c0_i32_1 = arith.constant 0 : i32
    return %c0_i32, %c0_i32_0 : i32, i32
  }
  func.func @transform_6(%arg0: i32) -> (i32, i32) {
    %c0_i32 = arith.constant 0 : i32
    %c0_i32_0 = arith.constant 0 : i32
    %c0_i32_1 = arith.constant 0 : i32
    return %c0_i32, %c0_i32_0 : i32, i32
  }
  func.func @transform_7(%arg0: i32) -> (i32, i32) {
    %c0_i32 = arith.constant 0 : i32
    %c0_i32_0 = arith.constant 0 : i32
    %c0_i32_1 = arith.constant 0 : i32
    return %c0_i32, %c0_i32_0 : i32, i32
  }
  func.func @transform_8(%arg0: i32) -> (i32, i32) {
    %c0_i32 = arith.constant 0 : i32
    %c0_i32_0 = arith.constant 0 : i32
    %c0_i32_1 = arith.constant 0 : i32
    return %c0_i32, %c0_i32_0 : i32, i32
  }
}

</mosaic_0001>

<bundles_post_ra>
// kernel: tpu_custom_call.1
= control target key start
LH: loop header
LB: loop body
LE: loop exit
PB: predicated region body
PF: predicated region fallthrough
CT: control target
= control target key end

     0   :  { %14 = vsyncpa [#allocation3], 0  ;;  %s22198_s0 = inlined_call_operand.vmem [shape: bf16[2,3072], index: 0, kind: input, shape index: {}]   ;;  %s22199_s1 = inlined_call_operand.vmem [shape: bf16[3072,512], index: 1, kind: input, shape index: {}]   ;;  %s22200_s2 = inlined_call_operand.vmem [shape: f32[512,1104], index: 2, kind: input, shape index: {}]   ;;  %s22201_s3 = inlined_call_operand.vmem [shape: f32[2,1104], index: 3, kind: input, shape index: {}]   ;;  %s22202_s4 = inlined_call_operand.hbm [shape: f32[1104,512], index: 4, kind: input, shape index: {}]   ;;  %s22203_s5 = inlined_call_operand.hbm [shape: bf16[512,3072], index: 5, kind: input, shape index: {}]   ;;  %s22204_s6 = inlined_call_operand.hbm [shape: f32[2,3072], index: 6, kind: output, shape index: {0}]   ;;  %s22205_s7 = inlined_call_operand.vmem [shape: f32[2,1], index: 7, kind: output, shape index: {1}]   ;;  %s22206_s8 = inlined_call_operand.hbm [shape: f32[1,1], index: 8, kind: output, shape index: {2}]  }
   0x1   :  { %15 = vsyncpa [#allocation6], 0 }
   0x2   :  { %16 = vsyncpa [#allocation4], 0 }
   0x3   :  { %17 = vsyncpa [#allocation9], 0  ;;  %s17382_s27 = smov [#allocation2]  }
   0x4   :  { %s31_s28 = sshll.u32 %s17382_s27, 4  ;;  %s32_s28 = int_to_ptr.vmem [resolvable:$true] %s31_s28 }
   0x5   :  { %s17302_s29 = scalar_lea.vmem %s32_s28, 70656  ;;  %p17307_p1 = scmp.lt.s32.totalorder %s32_s28, %s32_s28 }
   0x6   :  { %p17303_p0 = scmp.ne.s32.totalorder %s32_s28, %s17302_s29  ;;  %p17308_p2 = scmp.lt.s32.totalorder %s17302_s29, %s17302_s29 }
   0x8   :  { %p17309_p3 = por %p17308_p2, %p17307_p1 }
   0xa   :  { %p17310_p4 = pnand %p17309_p3, %p17303_p0 }
   0xc   :  { %17313 = shalt.err (!%p17310_p4)
}
   0xd   :  { %s17383_s30 = smov 512   ;;  %s17384_s9 = smov 32  }
   0xe   :  { %37 = dma.hbm_to_vmem [thread:$0]  %s22202_s4, 70656, %s32_s28, [#allocation3], %s17383_s30, %s17383_s30, %s17384_s9  }
   0xf   :  { %s17385_s12 = smov [#allocation5]  }
  0x10   :  { %s43_s13 = sshll.u32 %s17385_s12, 4  ;;  %s44_s13 = int_to_ptr.vmem [resolvable:$true] %s43_s13 }
  0x11   :  { %s17322_s14 = scalar_lea.vmem %s44_s13, 98304  ;;  %p17327_p6 = scmp.lt.s32.totalorder %s44_s13, %s44_s13 }
  0x12   :  { %p17323_p5 = scmp.ne.s32.totalorder %s44_s13, %s17322_s14  ;;  %p17328_p7 = scmp.lt.s32.totalorder %s17322_s14, %s17322_s14 }
  0x14   :  { %p17329_p8 = por %p17328_p7, %p17327_p6 }
  0x16   :  { %p17330_p9 = pnand %p17329_p8, %p17323_p5 }
  0x18   :  { %17333 = shalt.err (!%p17330_p9)
}
  0x19   :  { %s17386_s15 = smov 1536   ;;  %s17387_s16 = smov 96  }
  0x1a   :  { %49 = dma.hbm_to_vmem [thread:$0]  %s22203_s5, 98304, %s44_s13, [#allocation6], %s17386_s15, %s17386_s15, %s17387_s16  }
  0x1b   :  { %17374 = dma.done.wait [#allocation3], 70656  }
  0x1c   :  { %17375 = vsyncadd [#allocation3], 4294896640 }
  0x1d   :  { %17376 = dma.done.wait [#allocation6], 98304  }
  0x1e   :  { %17377 = vsyncadd [#allocation6], 4294868992  ;;  %v16109_v0 = vld [vmem:[%s22199_s1 + $0xe4] ss:$16 sps:$4 sm:$0xff]   ;;  %v16113_v2 = vld [vmem:[%s22199_s1 + $0xe0] ss:$16 sps:$4 sm:$0xff]   ;;  %v834_v38 = vlaneseq }
  0x1f   :  { %v16111_v1 = vld [vmem:[%s22199_s1 + $0x2e4] ss:$16 sps:$4 sm:$0xff]   ;;  %4841 = vmatprep.subr.bf16.mxu0 %v16109_v0  ;;  %v16114_v3 = vld [vmem:[%s22199_s1 + $0x2e0] ss:$16 sps:$4 sm:$0xff]   ;;  %v17388_v36 = vmov 1966171168  }
  0x20   :  { %4882 = vmatprep.subr.bf16.mxu1 %v16111_v1  ;;  %v16115_v4 = vld [vmem:[%s22199_s1 + $0xc4] ss:$16 sps:$4 sm:$0xff]   ;;  %4842 = vmatpush1.bf16.msra.mxu0 %v16113_v2  ;;  %v16119_v6 = vld [vmem:[%s22199_s1 + $0xc0] ss:$16 sps:$4 sm:$0xff]   ;;  %v832_v37 = vunpack.c.l.s4 %v17388_v36  ;;  %v17562_v43 = vshrl.u32 %v834_v38, 7  ;;  %vm5825_vm0 = vcmask 1041408  }
  0x21   :  { %4883 = vmatpush1.bf16.msra.mxu1 %v16114_v3  ;;  %v16117_v5 = vld [vmem:[%s22199_s1 + $0x2c4] ss:$16 sps:$4 sm:$0xff]   ;;  %4843 = vmatprep.subr.bf16.mxu0 %v16115_v4  ;;  %v16120_v7 = vld [vmem:[%s22199_s1 + $0x2c0] ss:$16 sps:$4 sm:$0xff]   ;;  %vm7177_vm3 = vcmask 648192   ;;  %s17390_s17 = smov 119  }
  0x22   :  { %4884 = vmatprep.subr.bf16.mxu1 %v16117_v5  ;;  %v16121_v8 = vld [vmem:[%s22199_s1 + $0xa4] ss:$16 sps:$4 sm:$0xff]   ;;  %v16125_v10 = vld [vmem:[%s22199_s1 + $0xa0] ss:$16 sps:$4 sm:$0xff]   ;;  %v833_v42 = vunpack.c.0.s8 %v832_v37  ;;  %vm7340_vm6 = vcmask 1041480   ;;  %vm7353_vm7 = vcmask 590848  }
  0x23   :  { %v16123_v9 = vld [vmem:[%s22199_s1 + $0x2a4] ss:$16 sps:$4 sm:$0xff]   ;;  %v16126_v11 = vld [vmem:[%s22199_s1 + $0x2a0] ss:$16 sps:$4 sm:$0xff]   ;;  %vm8003_vm8 = vcmask 654336   ;;  %vm7300_vm9 = vcmask 973824  }
  0x24   :  { %4844 = vmatpush1.bf16.msra.mxu0 %v16119_v6  ;;  %v16127_v12 = vld [vmem:[%s22199_s1 + $0x84] ss:$16 sps:$4 sm:$0xff]   ;;  %v16131_v14 = vld [vmem:[%s22199_s1 + $0x80] ss:$16 sps:$4 sm:$0xff]   ;;  %v17580_v49 = vsub.s32 %v833_v42, %v17562_v43  ;;  %vm7333_vm10 = vcmask 517120   ;;  %vm7366_vm11 = vcmask 1024  }
  0x25   :  { %4885 = vmatpush1.bf16.msra.mxu1 %v16120_v7  ;;  %4845 = vmatprep.subr.bf16.mxu0 %v16121_v8  ;;  %v16129_v13 = vld [vmem:[%s22199_s1 + $0x284] ss:$16 sps:$4 sm:$0xff]   ;;  %v16132_v15 = vld [vmem:[%s22199_s1 + $0x280] ss:$16 sps:$4 sm:$0xff]   ;;  %vm7384_vm12 = vcmask 0   ;;  %s17392_s20 = smov [#allocation8]  }
  0x26   :  { %4886 = vmatprep.subr.bf16.mxu1 %v16123_v9  ;;  %v16133_v16 = vld [vmem:[%s22199_s1 + $0x64] ss:$16 sps:$4 sm:$0xff]   ;;  %v16137_v18 = vld [vmem:[%s22199_s1 + $0x60] ss:$16 sps:$4 sm:$0xff]   ;;  %s14469_s21 = sshll.u32 %s17392_s20, 4  ;;  %s14470_s21 = int_to_ptr.vmem [resolvable:$true] %s14469_s21 }
  0x27   :  { %v16135_v17 = vld [vmem:[%s22199_s1 + $0x264] ss:$16 sps:$4 sm:$0xff]   ;;  %v16138_v19 = vld [vmem:[%s22199_s1 + $0x260] ss:$16 sps:$4 sm:$0xff]   ;;  %s17334_s22 = scalar_lea.vmem %s14470_s21, 16  ;;  %s17338_s23 = scalar_lea.vmem %s14470_s21, 32 }
  0x28   :  { %4846 = vmatpush1.bf16.msra.mxu0 %v16125_v10  ;;  %v16139_v20 = vld [vmem:[%s22199_s1 + $0x44] ss:$16 sps:$4 sm:$0xff]   ;;  %v16143_v22 = vld [vmem:[%s22199_s1 + $0x40] ss:$16 sps:$4 sm:$0xff]   ;;  %p17335_p10 = scmp.ne.s32.totalorder %s14470_s21, %s17334_s22  ;;  %p17339_p11 = scmp.lt.s32.totalorder %s14470_s21, %s14470_s21 }
  0x29   :  { %4887 = vmatpush1.bf16.msra.mxu1 %v16126_v11  ;;  %4847 = vmatprep.subr.bf16.mxu0 %v16127_v12  ;;  %v16141_v21 = vld [vmem:[%s22199_s1 + $0x244] ss:$16 sps:$4 sm:$0xff]   ;;  %v16144_v23 = vld [vmem:[%s22199_s1 + $0x240] ss:$16 sps:$4 sm:$0xff]   ;;  %p17340_p12 = scmp.lt.s32.totalorder %s17338_s23, %s17334_s22 }
  0x2a   :  { %4888 = vmatprep.subr.bf16.mxu1 %v16129_v13  ;;  %v16145_v24 = vld [vmem:[%s22199_s1 + $0x24] ss:$16 sps:$4 sm:$0xff]   ;;  %v16149_v26 = vld [vmem:[%s22199_s1 + $0x20] ss:$16 sps:$4 sm:$0xff]  }
  0x2b   :  { %v16147_v25 = vld [vmem:[%s22199_s1 + $0x224] ss:$16 sps:$4 sm:$0xff]   ;;  %v16150_v27 = vld [vmem:[%s22199_s1 + $0x220] ss:$16 sps:$4 sm:$0xff]   ;;  %p17341_p13 = por %p17340_p12, %p17339_p11 }
  0x2c   :  { %4848 = vmatpush1.bf16.msra.mxu0 %v16131_v14  ;;  %v16151_v28 = vld [vmem:[%s22199_s1 + $0x4] ss:$16 sps:$4 sm:$0xff]   ;;  %v16155_v30 = vld [vmem:[%s22199_s1] ss:$16 sps:$4 sm:$0xff]  }
  0x2d   :  { %4889 = vmatpush1.bf16.msra.mxu1 %v16132_v15  ;;  %4849 = vmatprep.subr.bf16.mxu0 %v16133_v16  ;;  %v16153_v29 = vld [vmem:[%s22199_s1 + $0x204] ss:$16 sps:$4 sm:$0xff]   ;;  %v16156_v31 = vld [vmem:[%s22199_s1 + $0x200] ss:$16 sps:$4 sm:$0xff]   ;;  %p17342_p0 = pnand %p17341_p13, %p17335_p10 }
  0x2e   :  { %4890 = vmatprep.subr.bf16.mxu1 %v16135_v17  ;;  %v16157_v32 = vld [vmem:[%s22199_s1 + $0x1e4] ss:$16 sps:$4 sm:$0xff]   ;;  %v16161_v34 = vld [vmem:[%s22199_s1 + $0x1e0] ss:$16 sps:$4 sm:$0xff]  }
  0x2f   :  { %v16159_v33 = vld [vmem:[%s22199_s1 + $0x3e4] ss:$16 sps:$4 sm:$0xff]   ;;  %v16162_v35 = vld [vmem:[%s22199_s1 + $0x3e0] ss:$16 sps:$4 sm:$0xff]  }
  0x30   :  { %4850 = vmatpush1.bf16.msra.mxu0 %v16137_v18  ;;  %v16163_v39 = vld [vmem:[%s22199_s1 + $0x1c4] ss:$16 sps:$4 sm:$0xff]   ;;  %v16167_v41 = vld [vmem:[%s22199_s1 + $0x1c0] ss:$16 sps:$4 sm:$0xff]  }
  0x31   :  { %4891 = vmatpush1.bf16.msra.mxu1 %v16138_v19  ;;  %4851 = vmatprep.subr.bf16.mxu0 %v16139_v20  ;;  %v16165_v40 = vld [vmem:[%s22199_s1 + $0x3c4] ss:$16 sps:$4 sm:$0xff]   ;;  %v16168_v44 = vld [vmem:[%s22199_s1 + $0x3c0] ss:$16 sps:$4 sm:$0xff]  }
  0x32   :  { %4892 = vmatprep.subr.bf16.mxu1 %v16141_v21  ;;  %v16169_v45 = vld [vmem:[%s22199_s1 + $0x1a4] ss:$16 sps:$4 sm:$0xff]   ;;  %v16173_v47 = vld [vmem:[%s22199_s1 + $0x1a0] ss:$16 sps:$4 sm:$0xff]  }
  0x33   :  { %v16171_v46 = vld [vmem:[%s22199_s1 + $0x3a4] ss:$16 sps:$4 sm:$0xff]   ;;  %v16174_v48 = vld [vmem:[%s22199_s1 + $0x3a0] ss:$16 sps:$4 sm:$0xff]  }
  0x34   :  { %4852 = vmatpush1.bf16.msra.mxu0 %v16143_v22  ;;  %v16175_v50 = vld [vmem:[%s22199_s1 + $0x184] ss:$16 sps:$4 sm:$0xff]   ;;  %v16179_v53 = vld [vmem:[%s22199_s1 + $0x180] ss:$16 sps:$4 sm:$0xff]  }
  0x35   :  { %4893 = vmatpush1.bf16.msra.mxu1 %v16144_v23  ;;  %4853 = vmatprep.subr.bf16.mxu0 %v16145_v24  ;;  %v16177_v51 = vld [vmem:[%s22199_s1 + $0x384] ss:$16 sps:$4 sm:$0xff]   ;;  %v16180_v55 = vld [vmem:[%s22199_s1 + $0x380] ss:$16 sps:$4 sm:$0xff]  }
  0x36   :  { %4894 = vmatprep.subr.bf16.mxu1 %v16147_v25  ;;  %v56_v52 = vld [vmem:[%s22198_s0] sm:$0xff] }
  0x37   :  { %v837_v54 = vrot.slane %v56_v52, %v17580_v49  ;;  %v16181_v56 = vld [vmem:[%s22199_s1 + $0x164] ss:$16 sps:$4 sm:$0xff]   ;;  %v16185_v59 = vld [vmem:[%s22199_s1 + $0x160] ss:$16 sps:$4 sm:$0xff]   ;;  %v830_v1 = vcombine.high %v56_v52, %v56_v52 }
  0x38   :  { %4854 = vmatpush1.bf16.msra.mxu0 %v16149_v26  ;;  %v16183_v57 = vld [vmem:[%s22199_s1 + $0x364] ss:$16 sps:$4 sm:$0xff]   ;;  %v16186_v61 = vld [vmem:[%s22199_s1 + $0x360] ss:$16 sps:$4 sm:$0xff]  }
  0x39   :  { %4895 = vmatpush1.bf16.msra.mxu1 %v16150_v27  ;;  %4855 = vmatprep.subr.bf16.mxu0 %v16151_v28  ;;  %v845_v58 = vcombine.high %v837_v54, %v837_v54  ;;  %v16187_v62 = vld [vmem:[%s22199_s1 + $0x144] ss:$16 sps:$4 sm:$0xff]   ;;  %v16191_v2 = vld [vmem:[%s22199_s1 + $0x140] ss:$16 sps:$4 sm:$0xff]   ;;  %v17638_v6 = vrot.slane %v830_v1, %v17580_v49  ;;  %v17658_v13 = vrot.slane %v837_v54, %v17580_v49 }
  0x3a   :  { %4896 = vmatprep.subr.bf16.mxu1 %v16153_v29  ;;  %v16189_v63 = vld [vmem:[%s22199_s1 + $0x344] ss:$16 sps:$4 sm:$0xff]   ;;  %v16192_v3 = vld [vmem:[%s22199_s1 + $0x340] ss:$16 sps:$4 sm:$0xff]  }
  0x3b   :  { %v17608_v60 = vrot.slane %v845_v58, %v17580_v49  ;;  %v16193_v4 = vld [vmem:[%s22199_s1 + $0x124] ss:$16 sps:$4 sm:$0xff]   ;;  %v16197_v7 = vld [vmem:[%s22199_s1 + $0x120] ss:$16 sps:$4 sm:$0xff]   ;;  %v846_v11 = vcombine.high %v17638_v6, %v17638_v6  ;;  %v17674_v18 = vcombine.high %v17658_v13, %v17658_v13 }
  0x3c   :  { %4856 = vmatpush1.bf16.msra.mxu0 %v16155_v30  ;;  %v16195_v5 = vld [vmem:[%s22199_s1 + $0x324] ss:$16 sps:$4 sm:$0xff]   ;;  %v16198_v8 = vld [vmem:[%s22199_s1 + $0x320] ss:$16 sps:$4 sm:$0xff]  }
  0x3d   :  { %4897 = vmatpush1.bf16.msra.mxu1 %v16156_v31  ;;  %4857 = vmatprep.subr.bf16.mxu0 %v16157_v32  ;;  %v17621_v0 = vcombine.high %v17608_v60, %v17608_v60  ;;  %v16199_v9 = vld [vmem:[%s22199_s1 + $0x104] ss:$16 sps:$4 sm:$0xff]   ;;  %v16203_v12 = vld [vmem:[%s22199_s1 + $0x100] ss:$16 sps:$4 sm:$0xff]   ;;  %v17670_v17 = vrot.slane %v846_v11, %v17580_v49 }
  0x3e   :  { %4898 = vmatprep.subr.bf16.mxu1 %v16159_v33  ;;  %4873 = vmatprep.mubr.bf16.mxu0 %v17608_v60  ;;  %v16201_v10 = vld [vmem:[%s22199_s1 + $0x304] ss:$16 sps:$4 sm:$0xff]   ;;  %v16204_v14 = vld [vmem:[%s22199_s1 + $0x300] ss:$16 sps:$4 sm:$0xff]  }
  0x3f   :  { %4914 = vmatprep.mubr.bf16.mxu1 %v17621_v0  ;;  %v16207_v15 = vld [vmem:[%s22199_s1 + $0x4e4] ss:$16 sps:$4 sm:$0xff]   ;;  %v16205_v19 = vld [vmem:[%s22199_s1 + $0x4e0] ss:$16 sps:$4 sm:$0xff]   ;;  %v17690_v23 = vcombine.high %v17670_v17, %v17670_v17 }
  0x40   :  { %4858 = vmatpush2.bf16.msra.mxu0 %v16161_v34  ;;  %v16210_v16 = vld [vmem:[%s22199_s1 + $0x6e4] ss:$16 sps:$4 sm:$0xff]   ;;  %v16208_v20 = vld [vmem:[%s22199_s1 + $0x6e0] ss:$16 sps:$4 sm:$0xff]  }
  0x41   :  { %4899 = vmatpush2.bf16.msra.mxu1 %v16162_v35  ;;  %4859 = vmatprep.subr.bf16.mxu0 %v16163_v39  ;;  %v16213_v21 = vld [vmem:[%s22199_s1 + $0x4c4] ss:$16 sps:$4 sm:$0xff]   ;;  %v16211_v24 = vld [vmem:[%s22199_s1 + $0x4c0] ss:$16 sps:$4 sm:$0xff]  }
  0x42   :  { %4900 = vmatprep.subr.bf16.mxu1 %v16165_v40  ;;  %v16216_v22 = vld [vmem:[%s22199_s1 + $0x6c4] ss:$16 sps:$4 sm:$0xff]   ;;  %v16214_v25 = vld [vmem:[%s22199_s1 + $0x6c0] ss:$16 sps:$4 sm:$0xff]  }
  0x43   :  { %v16219_v26 = vld [vmem:[%s22199_s1 + $0x4a4] ss:$16 sps:$4 sm:$0xff]   ;;  %v16217_v28 = vld [vmem:[%s22199_s1 + $0x4a0] ss:$16 sps:$4 sm:$0xff]  }
  0x44   :  { %4860 = vmatpush2.bf16.msra.mxu0 %v16167_v41  ;;  %v16222_v27 = vld [vmem:[%s22199_s1 + $0x6a4] ss:$16 sps:$4 sm:$0xff]   ;;  %v16220_v29 = vld [vmem:[%s22199_s1 + $0x6a0] ss:$16 sps:$4 sm:$0xff]  }
  0x45   :  { %4901 = vmatpush2.bf16.msra.mxu1 %v16168_v44  ;;  %4861 = vmatprep.subr.bf16.mxu0 %v16169_v45  ;;  %v16225_v30 = vld [vmem:[%s22199_s1 + $0x484] ss:$16 sps:$4 sm:$0xff]   ;;  %v16223_v32 = vld [vmem:[%s22199_s1 + $0x480] ss:$16 sps:$4 sm:$0xff]  }
  0x46   :  { %4902 = vmatprep.subr.bf16.mxu1 %v16171_v46  ;;  %v16228_v31 = vld [vmem:[%s22199_s1 + $0x684] ss:$16 sps:$4 sm:$0xff]   ;;  %v16226_v33 = vld [vmem:[%s22199_s1 + $0x680] ss:$16 sps:$4 sm:$0xff]  }
  0x47   :  { %v16231_v34 = vld [vmem:[%s22199_s1 + $0x464] ss:$16 sps:$4 sm:$0xff]   ;;  %v16229_v36 = vld [vmem:[%s22199_s1 + $0x460] ss:$16 sps:$4 sm:$0xff]  }
  0x48   :  { %4862 = vmatpush2.bf16.msra.mxu0 %v16173_v47  ;;  %v16234_v35 = vld [vmem:[%s22199_s1 + $0x664] ss:$16 sps:$4 sm:$0xff]   ;;  %v16232_v37 = vld [vmem:[%s22199_s1 + $0x660] ss:$16 sps:$4 sm:$0xff]  }
  0x49   :  { %4903 = vmatpush2.bf16.msra.mxu1 %v16174_v48  ;;  %4863 = vmatprep.subr.bf16.mxu0 %v16175_v50  ;;  %v16237_v38 = vld [vmem:[%s22199_s1 + $0x444] ss:$16 sps:$4 sm:$0xff]   ;;  %v16235_v40 = vld [vmem:[%s22199_s1 + $0x440] ss:$16 sps:$4 sm:$0xff]  }
  0x4a   :  { %4904 = vmatprep.subr.bf16.mxu1 %v16177_v51  ;;  %v16240_v39 = vld [vmem:[%s22199_s1 + $0x644] ss:$16 sps:$4 sm:$0xff]   ;;  %v16238_v41 = vld [vmem:[%s22199_s1 + $0x640] ss:$16 sps:$4 sm:$0xff]  }
  0x4b   :  { %v16243_v42 = vld [vmem:[%s22199_s1 + $0x424] ss:$16 sps:$4 sm:$0xff]   ;;  %v16241_v45 = vld [vmem:[%s22199_s1 + $0x420] ss:$16 sps:$4 sm:$0xff]  }
  0x4c   :  { %4864 = vmatpush2.bf16.msra.mxu0 %v16179_v53  ;;  %v16246_v44 = vld [vmem:[%s22199_s1 + $0x624] ss:$16 sps:$4 sm:$0xff]   ;;  %v16244_v46 = vld [vmem:[%s22199_s1 + $0x620] ss:$16 sps:$4 sm:$0xff]  }
  0x4d   :  { %4905 = vmatpush2.bf16.msra.mxu1 %v16180_v55  ;;  %4865 = vmatprep.subr.bf16.mxu0 %v16181_v56  ;;  %v16249_v47 = vld [vmem:[%s22199_s1 + $0x404] ss:$16 sps:$4 sm:$0xff]   ;;  %v16247_v50 = vld [vmem:[%s22199_s1 + $0x400] ss:$16 sps:$4 sm:$0xff]  }
  0x4e   :  { %4906 = vmatprep.subr.bf16.mxu1 %v16183_v57  ;;  %v16252_v48 = vld [vmem:[%s22199_s1 + $0x604] ss:$16 sps:$4 sm:$0xff]   ;;  %v16250_v51 = vld [vmem:[%s22199_s1 + $0x600] ss:$16 sps:$4 sm:$0xff]  }
  0x4f   :  { %v16255_v52 = vld [vmem:[%s22199_s1 + $0x5e4] ss:$16 sps:$4 sm:$0xff]   ;;  %v16253_v54 = vld [vmem:[%s22199_s1 + $0x5e0] ss:$16 sps:$4 sm:$0xff]  }
  0x50   :  { %4866 = vmatpush2.bf16.msra.mxu0 %v16185_v59  ;;  %v16258_v53 = vld [vmem:[%s22199_s1 + $0x7e4] ss:$16 sps:$4 sm:$0xff]   ;;  %v16256_v55 = vld [vmem:[%s22199_s1 + $0x7e0] ss:$16 sps:$4 sm:$0xff]  }
  0x51   :  { %4907 = vmatpush2.bf16.msra.mxu1 %v16186_v61  ;;  %4867 = vmatprep.subr.bf16.mxu0 %v16187_v62  ;;  %v16261_v56 = vld [vmem:[%s22199_s1 + $0x5c4] ss:$16 sps:$4 sm:$0xff]   ;;  %v16259_v58 = vld [vmem:[%s22199_s1 + $0x5c0] ss:$16 sps:$4 sm:$0xff]  }
  0x52   :  { %4908 = vmatprep.subr.bf16.mxu1 %v16189_v63  ;;  %v16264_v57 = vld [vmem:[%s22199_s1 + $0x7c4] ss:$16 sps:$4 sm:$0xff]   ;;  %v16262_v59 = vld [vmem:[%s22199_s1 + $0x7c0] ss:$16 sps:$4 sm:$0xff]  }
  0x53   :  { %v16267_v61 = vld [vmem:[%s22199_s1 + $0x5a4] ss:$16 sps:$4 sm:$0xff]   ;;  %v16265_v63 = vld [vmem:[%s22199_s1 + $0x5a0] ss:$16 sps:$4 sm:$0xff]  }
  0x54   :  { %4868 = vmatpush2.bf16.msra.mxu0 %v16191_v2  ;;  %v16270_v62 = vld [vmem:[%s22199_s1 + $0x7a4] ss:$16 sps:$4 sm:$0xff]   ;;  %v16268_v1 = vld [vmem:[%s22199_s1 + $0x7a0] ss:$16 sps:$4 sm:$0xff]  }
  0x55   :  { %4909 = vmatpush2.bf16.msra.mxu1 %v16192_v3  ;;  %4869 = vmatprep.subr.bf16.mxu0 %v16193_v4  ;;  %v16273_v2 = vld [vmem:[%s22199_s1 + $0x584] ss:$16 sps:$4 sm:$0xff]   ;;  %v16271_v4 = vld [vmem:[%s22199_s1 + $0x580] ss:$16 sps:$4 sm:$0xff]  }
  0x56   :  { %4910 = vmatprep.subr.bf16.mxu1 %v16195_v5  ;;  %v16276_v3 = vld [vmem:[%s22199_s1 + $0x784] ss:$16 sps:$4 sm:$0xff]   ;;  %v16274_v5 = vld [vmem:[%s22199_s1 + $0x780] ss:$16 sps:$4 sm:$0xff]  }
  0x57   :  { %v16285_v11 = vld [vmem:[%s22199_s1 + $0x544] ss:$16 sps:$4 sm:$0xff]  }
  0x58   :  { %4870 = vmatpush2.bf16.msra.mxu0 %v16197_v7  ;;  %v16279_v7 = vld [vmem:[%s22199_s1 + $0x564] ss:$16 sps:$4 sm:$0xff]  }
  0x59   :  { %4911 = vmatpush2.bf16.msra.mxu1 %v16198_v8  ;;  %4871 = vmatprep.subr.bf16.mxu0 %v16199_v9  ;;  %v16282_v8 = vld [vmem:[%s22199_s1 + $0x764] ss:$16 sps:$4 sm:$0xff]   ;;  %v16277_v9 = vld [vmem:[%s22199_s1 + $0x560] ss:$16 sps:$4 sm:$0xff]  }
  0x5a   :  { %4912 = vmatprep.subr.bf16.mxu1 %v16201_v10  ;;  %v16280_v10 = vld [vmem:[%s22199_s1 + $0x760] ss:$16 sps:$4 sm:$0xff]  }
  0x5c   :  { %4872 = vmatpush2.bf16.msra.mxu0 %v16203_v12  ;;  %v16288_v12 = vld [vmem:[%s22199_s1 + $0x744] ss:$16 sps:$4 sm:$0xff]  }
  0x5d   :  { %4913 = vmatpush2.bf16.msra.mxu1 %v16204_v14  ;;  %4923 = vmatprep.subr.bf16.mxu0 %v16207_v15  ;;  %v16283_v14 = vld [vmem:[%s22199_s1 + $0x540] ss:$16 sps:$4 sm:$0xff]  }
  0x5e   :  { %4964 = vmatprep.subr.bf16.mxu1 %v16210_v16  ;;  %v16286_v15 = vld [vmem:[%s22199_s1 + $0x740] ss:$16 sps:$4 sm:$0xff]   ;;  %v16291_v16 = vld [vmem:[%s22199_s1 + $0x524] ss:$16 sps:$4 sm:$0xff]  }
  0x5f   :  { %4874 = vmatmul.mubr.bf16.vlgmr.msra.gmra.mxu0 %v17658_v13 }
  0x60   :  { %4915 = vmatmul.mubr.bf16.vlgmr.msra.gmra.mxu1 %v17674_v18  ;;  %4924 = vmatpush1.bf16.msra.mxu0 %v16205_v19  ;;  %v16294_v19 = vld [vmem:[%s22199_s1 + $0x724] ss:$16 sps:$4 sm:$0xff]  }
  0x61   :  { %4965 = vmatpush1.bf16.msra.mxu1 %v16208_v20  ;;  %4925 = vmatprep.subr.bf16.mxu0 %v16213_v21  ;;  %v16289_v20 = vld [vmem:[%s22199_s1 + $0x520] ss:$16 sps:$4 sm:$0xff]  }
  0x62   :  { %4966 = vmatprep.subr.bf16.mxu1 %v16216_v22  ;;  %4955 = vmatprep.mubr.bf16.mxu0 %v17670_v17  ;;  %v16292_v21 = vld [vmem:[%s22199_s1 + $0x720] ss:$16 sps:$4 sm:$0xff]   ;;  %v16297_v22 = vld [vmem:[%s22199_s1 + $0x504] ss:$16 sps:$4 sm:$0xff]  }
  0x63   :  { %4996 = vmatprep.mubr.bf16.mxu1 %v17690_v23 }
  0x64   :  { %4926 = vmatpush1.bf16.msra.mxu0 %v16211_v24  ;;  %v16300_v24 = vld [vmem:[%s22199_s1 + $0x704] ss:$16 sps:$4 sm:$0xff]  }
  0x65   :  { %4967 = vmatpush1.bf16.msra.mxu1 %v16214_v25  ;;  %4927 = vmatprep.subr.bf16.mxu0 %v16219_v26  ;;  %v16295_v25 = vld [vmem:[%s22199_s1 + $0x500] ss:$16 sps:$4 sm:$0xff]   ;;  %v17869_v26 = vrot.slane %v17638_v6, %v17580_v49 }
  0x66   :  { %4968 = vmatprep.subr.bf16.mxu1 %v16222_v27  ;;  %v16298_v27 = vld [vmem:[%s22199_s1 + $0x700] ss:$16 sps:$4 sm:$0xff]  }
  0x67   :  { %v17882_v6 = vcombine.high %v17869_v26, %v17869_v26 }
  0x68   :  { %4928 = vmatpush1.bf16.msra.mxu0 %v16217_v28  ;;  %v16304_v28 = vld [vmem:[%s22199_s1 + $0x8e4] ss:$16 sps:$4 sm:$0xff]  }
  0x69   :  { %4969 = vmatpush1.bf16.msra.mxu1 %v16220_v29  ;;  %4929 = vmatprep.subr.bf16.mxu0 %v16225_v30  ;;  %v16307_v29 = vld [vmem:[%s22199_s1 + $0xae4] ss:$16 sps:$4 sm:$0xff]   ;;  %v16302_v30 = vld [vmem:[%s22199_s1 + $0x8e0] ss:$16 sps:$4 sm:$0xff]  }
  0x6a   :  { %4970 = vmatprep.subr.bf16.mxu1 %v16228_v31  ;;  %v16305_v31 = vld [vmem:[%s22199_s1 + $0xae0] ss:$16 sps:$4 sm:$0xff]  }
  0x6c   :  { %4930 = vmatpush1.bf16.msra.mxu0 %v16223_v32  ;;  %v17893_v32 = vld [vmem:[%s22198_s0 + $0x8] sm:$0xff] }
  0x6d   :  { %4971 = vmatpush1.bf16.msra.mxu1 %v16226_v33  ;;  %4931 = vmatprep.subr.bf16.mxu0 %v16231_v34  ;;  %v16310_v33 = vld [vmem:[%s22199_s1 + $0x8c4] ss:$16 sps:$4 sm:$0xff]  }
  0x6e   :  { %4972 = vmatprep.subr.bf16.mxu1 %v16234_v35  ;;  %v16313_v34 = vld [vmem:[%s22199_s1 + $0xac4] ss:$16 sps:$4 sm:$0xff]   ;;  %v17903_v35 = vrot.slane %v17893_v32, %v17580_v49 }
  0x70   :  { %4932 = vmatpush1.bf16.msra.mxu0 %v16229_v36  ;;  %v894_v36 = vcombine.high %v17903_v35, %v17903_v35 }
  0x71   :  { %4973 = vmatpush1.bf16.msra.mxu1 %v16232_v37  ;;  %4933 = vmatprep.subr.bf16.mxu0 %v16237_v38  ;;  %v16308_v37 = vld [vmem:[%s22199_s1 + $0x8c0] ss:$16 sps:$4 sm:$0xff]  }
  0x72   :  { %4974 = vmatprep.subr.bf16.mxu1 %v16240_v39  ;;  %v16311_v38 = vld [vmem:[%s22199_s1 + $0xac0] ss:$16 sps:$4 sm:$0xff]   ;;  %v16316_v39 = vld [vmem:[%s22199_s1 + $0x8a4] ss:$16 sps:$4 sm:$0xff]  }
  0x74   :  { %4934 = vmatpush1.bf16.msra.mxu0 %v16235_v40  ;;  %v16319_v40 = vld [vmem:[%s22199_s1 + $0xaa4] ss:$16 sps:$4 sm:$0xff]  }
  0x75   :  { %4975 = vmatpush1.bf16.msra.mxu1 %v16238_v41  ;;  %4935 = vmatprep.subr.bf16.mxu0 %v16243_v42  ;;  %v17922_v41 = vrot.slane %v894_v36, %v17580_v49  ;;  %v16380_v36 = vld [vmem:[%s22199_s1 + $0x940] ss:$16 sps:$4 sm:$0xff]  }
  0x76   :  { %4976 = vmatprep.subr.bf16.mxu1 %v16246_v44  ;;  %v16314_v44 = vld [vmem:[%s22199_s1 + $0x8a0] ss:$16 sps:$4 sm:$0xff]  }
  0x77   :  { %v17927_v42 = vcombine.high %v17922_v41, %v17922_v41 }
  0x78   :  { %4936 = vmatpush1.bf16.msra.mxu0 %v16241_v45  ;;  %v16317_v45 = vld [vmem:[%s22199_s1 + $0xaa0] ss:$16 sps:$4 sm:$0xff]  }
  0x79   :  { %4977 = vmatpush1.bf16.msra.mxu1 %v16244_v46  ;;  %4937 = vmatprep.subr.bf16.mxu0 %v16249_v47  ;;  %v16322_v46 = vld [vmem:[%s22199_s1 + $0x884] ss:$16 sps:$4 sm:$0xff]  }
  0x7a   :  { %4978 = vmatprep.subr.bf16.mxu1 %v16252_v48  ;;  %v16325_v47 = vld [vmem:[%s22199_s1 + $0xa84] ss:$16 sps:$4 sm:$0xff]   ;;  %v16320_v48 = vld [vmem:[%s22199_s1 + $0x880] ss:$16 sps:$4 sm:$0xff]  }
  0x7c   :  { %4938 = vmatpush1.bf16.msra.mxu0 %v16247_v50  ;;  %v16323_v50 = vld [vmem:[%s22199_s1 + $0xa80] ss:$16 sps:$4 sm:$0xff]  }
  0x7d   :  { %4979 = vmatpush1.bf16.msra.mxu1 %v16250_v51  ;;  %4939 = vmatprep.subr.bf16.mxu0 %v16255_v52  ;;  %v16328_v51 = vld [vmem:[%s22199_s1 + $0x864] ss:$16 sps:$4 sm:$0xff]  }
  0x7e   :  { %4980 = vmatprep.subr.bf16.mxu1 %v16258_v53  ;;  %v16331_v52 = vld [vmem:[%s22199_s1 + $0xa64] ss:$16 sps:$4 sm:$0xff]   ;;  %v16326_v53 = vld [vmem:[%s22199_s1 + $0x860] ss:$16 sps:$4 sm:$0xff]  }
  0x80   :  { %4940 = vmatpush2.bf16.msra.mxu0 %v16253_v54  ;;  %v16329_v54 = vld [vmem:[%s22199_s1 + $0xa60] ss:$16 sps:$4 sm:$0xff]  }
  0x81   :  { %4981 = vmatpush2.bf16.msra.mxu1 %v16256_v55  ;;  %4941 = vmatprep.subr.bf16.mxu0 %v16261_v56  ;;  %v16334_v55 = vld [vmem:[%s22199_s1 + $0x844] ss:$16 sps:$4 sm:$0xff]  }
  0x82   :  { %4982 = vmatprep.subr.bf16.mxu1 %v16264_v57  ;;  %v16337_v56 = vld [vmem:[%s22199_s1 + $0xa44] ss:$16 sps:$4 sm:$0xff]   ;;  %v16332_v57 = vld [vmem:[%s22199_s1 + $0x840] ss:$16 sps:$4 sm:$0xff]  }
  0x84   :  { %4942 = vmatpush2.bf16.msra.mxu0 %v16259_v58  ;;  %v16335_v58 = vld [vmem:[%s22199_s1 + $0xa40] ss:$16 sps:$4 sm:$0xff]  }
  0x85   :  { %4983 = vmatpush2.bf16.msra.mxu1 %v16262_v59  ;;  %4943 = vmatprep.subr.bf16.mxu0 %v16267_v61  ;;  %v16340_v59 = vld [vmem:[%s22199_s1 + $0x824] ss:$16 sps:$4 sm:$0xff]  }
  0x86   :  { %4984 = vmatprep.subr.bf16.mxu1 %v16270_v62  ;;  %v16343_v61 = vld [vmem:[%s22199_s1 + $0xa24] ss:$16 sps:$4 sm:$0xff]   ;;  %v16338_v62 = vld [vmem:[%s22199_s1 + $0x820] ss:$16 sps:$4 sm:$0xff]  }
  0x88   :  { %4944 = vmatpush2.bf16.msra.mxu0 %v16265_v63  ;;  %v16341_v63 = vld [vmem:[%s22199_s1 + $0xa20] ss:$16 sps:$4 sm:$0xff]  }
  0x89   :  { %4985 = vmatpush2.bf16.msra.mxu1 %v16268_v1  ;;  %4945 = vmatprep.subr.bf16.mxu0 %v16273_v2  ;;  %v16346_v1 = vld [vmem:[%s22199_s1 + $0x804] ss:$16 sps:$4 sm:$0xff]  }
  0x8a   :  { %4986 = vmatprep.subr.bf16.mxu1 %v16276_v3  ;;  %v16349_v2 = vld [vmem:[%s22199_s1 + $0xa04] ss:$16 sps:$4 sm:$0xff]   ;;  %v16344_v3 = vld [vmem:[%s22199_s1 + $0x800] ss:$16 sps:$4 sm:$0xff]  }
  0x8c   :  { %4946 = vmatpush2.bf16.msra.mxu0 %v16271_v4  ;;  %v16347_v4 = vld [vmem:[%s22199_s1 + $0xa00] ss:$16 sps:$4 sm:$0xff]  }
  0x8d   :  { %4987 = vmatpush2.bf16.msra.mxu1 %v16274_v5  ;;  %4947 = vmatprep.subr.bf16.mxu0 %v16279_v7  ;;  %v16352_v5 = vld [vmem:[%s22199_s1 + $0x9e4] ss:$16 sps:$4 sm:$0xff]  }
  0x8e   :  { %4988 = vmatprep.subr.bf16.mxu1 %v16282_v8  ;;  %v16355_v7 = vld [vmem:[%s22199_s1 + $0xbe4] ss:$16 sps:$4 sm:$0xff]   ;;  %v16350_v8 = vld [vmem:[%s22199_s1 + $0x9e0] ss:$16 sps:$4 sm:$0xff]  }
  0x90   :  { %4948 = vmatpush2.bf16.msra.mxu0 %v16277_v9  ;;  %v16353_v9 = vld [vmem:[%s22199_s1 + $0xbe0] ss:$16 sps:$4 sm:$0xff]  }
  0x91   :  { %4989 = vmatpush2.bf16.msra.mxu1 %v16280_v10  ;;  %4949 = vmatprep.subr.bf16.mxu0 %v16285_v11  ;;  %v16358_v10 = vld [vmem:[%s22199_s1 + $0x9c4] ss:$16 sps:$4 sm:$0xff]  }
  0x92   :  { %4990 = vmatprep.subr.bf16.mxu1 %v16288_v12  ;;  %v16361_v11 = vld [vmem:[%s22199_s1 + $0xbc4] ss:$16 sps:$4 sm:$0xff]   ;;  %v16356_v12 = vld [vmem:[%s22199_s1 + $0x9c0] ss:$16 sps:$4 sm:$0xff]  }
  0x94   :  { %4950 = vmatpush2.bf16.msra.mxu0 %v16283_v14  ;;  %v16359_v14 = vld [vmem:[%s22199_s1 + $0xbc0] ss:$16 sps:$4 sm:$0xff]  }
  0x95   :  { %4991 = vmatpush2.bf16.msra.mxu1 %v16286_v15  ;;  %4951 = vmatprep.subr.bf16.mxu0 %v16291_v16  ;;  %v16364_v15 = vld [vmem:[%s22199_s1 + $0x9a4] ss:$16 sps:$4 sm:$0xff]  }
  0x96   :  { %4992 = vmatprep.subr.bf16.mxu1 %v16294_v19  ;;  %v16367_v16 = vld [vmem:[%s22199_s1 + $0xba4] ss:$16 sps:$4 sm:$0xff]   ;;  %v16362_v19 = vld [vmem:[%s22199_s1 + $0x9a0] ss:$16 sps:$4 sm:$0xff]  }
  0x98   :  { %4952 = vmatpush2.bf16.msra.mxu0 %v16289_v20  ;;  %v16365_v20 = vld [vmem:[%s22199_s1 + $0xba0] ss:$16 sps:$4 sm:$0xff]  }
  0x99   :  { %4993 = vmatpush2.bf16.msra.mxu1 %v16292_v21  ;;  %4953 = vmatprep.subr.bf16.mxu0 %v16297_v22  ;;  %v16370_v21 = vld [vmem:[%s22199_s1 + $0x984] ss:$16 sps:$4 sm:$0xff]  }
  0x9a   :  { %4994 = vmatprep.subr.bf16.mxu1 %v16300_v24  ;;  %v16373_v22 = vld [vmem:[%s22199_s1 + $0xb84] ss:$16 sps:$4 sm:$0xff]   ;;  %v16368_v24 = vld [vmem:[%s22199_s1 + $0x980] ss:$16 sps:$4 sm:$0xff]  }
  0x9c   :  { %4954 = vmatpush2.bf16.msra.mxu0 %v16295_v25  ;;  %v16371_v25 = vld [vmem:[%s22199_s1 + $0xb80] ss:$16 sps:$4 sm:$0xff]  }
  0x9d   :  { %4995 = vmatpush2.bf16.msra.mxu1 %v16298_v27  ;;  %5005 = vmatprep.subr.bf16.mxu0 %v16304_v28  ;;  %v16376_v27 = vld [vmem:[%s22199_s1 + $0x964] ss:$16 sps:$4 sm:$0xff]  }
  0x9e   :  { %5046 = vmatprep.subr.bf16.mxu1 %v16307_v29  ;;  %v16379_v28 = vld [vmem:[%s22199_s1 + $0xb64] ss:$16 sps:$4 sm:$0xff]   ;;  %v16374_v29 = vld [vmem:[%s22199_s1 + $0x960] ss:$16 sps:$4 sm:$0xff]  }
  0x9f   :  { %4956 = vmatmul.mubr.bf16.vlgmr.msra.gmra.mxu0 %v17869_v26 }
  0xa0   :  { %4997 = vmatmul.mubr.bf16.vlgmr.msra.gmra.mxu1 %v17882_v6  ;;  %5006 = vmatpush1.bf16.msra.mxu0 %v16302_v30  ;;  %v16377_v30 = vld [vmem:[%s22199_s1 + $0xb60] ss:$16 sps:$4 sm:$0xff]  }
  0xa1   :  { %5047 = vmatpush1.bf16.msra.mxu1 %v16305_v31  ;;  %5007 = vmatprep.subr.bf16.mxu0 %v16310_v33  ;;  %v16382_v31 = vld [vmem:[%s22199_s1 + $0x944] ss:$16 sps:$4 sm:$0xff]  }
  0xa2   :  { %5048 = vmatprep.subr.bf16.mxu1 %v16313_v34  ;;  %5037 = vmatprep.mubr.bf16.mxu0 %v17922_v41  ;;  %v16385_v33 = vld [vmem:[%s22199_s1 + $0xb44] ss:$16 sps:$4 sm:$0xff]   ;;  %v879_v34 = vcombine.high %v17893_v32, %v17893_v32 }
  0xa3   :  { %5078 = vmatprep.mubr.bf16.mxu1 %v17927_v42  ;;  %v16391_v32 = vld [vmem:[%s22199_s1 + $0xb24] ss:$16 sps:$4 sm:$0xff]  }
  0xa4   :  { %5008 = vmatpush1.bf16.msra.mxu0 %v16308_v37  ;;  %v16383_v37 = vld [vmem:[%s22199_s1 + $0xb40] ss:$16 sps:$4 sm:$0xff]  }
  0xa5   :  { %5049 = vmatpush1.bf16.msra.mxu1 %v16311_v38  ;;  %5009 = vmatprep.subr.bf16.mxu0 %v16316_v39  ;;  %v16388_v38 = vld [vmem:[%s22199_s1 + $0x924] ss:$16 sps:$4 sm:$0xff]   ;;  %v18077_v39 = vrot.slane %v879_v34, %v17580_v49  ;;  %v16449_v34 = vld [vmem:[%s22199_s1 + $0xfe0] ss:$16 sps:$4 sm:$0xff]  }
  0xa6   :  { %5050 = vmatprep.subr.bf16.mxu1 %v16319_v40  ;;  %v16386_v40 = vld [vmem:[%s22199_s1 + $0x920] ss:$16 sps:$4 sm:$0xff]  }
  0xa8   :  { %5010 = vmatpush1.bf16.msra.mxu0 %v16314_v44  ;;  %v16389_v44 = vld [vmem:[%s22199_s1 + $0xb20] ss:$16 sps:$4 sm:$0xff]  }
  0xa9   :  { %5051 = vmatpush1.bf16.msra.mxu1 %v16317_v45  ;;  %5011 = vmatprep.subr.bf16.mxu0 %v16322_v46  ;;  %v16394_v45 = vld [vmem:[%s22199_s1 + $0x904] ss:$16 sps:$4 sm:$0xff]  }
  0xaa   :  { %5052 = vmatprep.subr.bf16.mxu1 %v16325_v47  ;;  %v16397_v46 = vld [vmem:[%s22199_s1 + $0xb04] ss:$16 sps:$4 sm:$0xff]   ;;  %v895_v47 = vcombine.high %v18077_v39, %v18077_v39 }
  0xac   :  { %5012 = vmatpush1.bf16.msra.mxu0 %v16320_v48  ;;  %v18095_v48 = vrot.slane %v17903_v35, %v17580_v49  ;;  %v16403_v35 = vld [vmem:[%s22199_s1 + $0xee4] ss:$16 sps:$4 sm:$0xff]  }
  0xad   :  { %5053 = vmatpush1.bf16.msra.mxu1 %v16323_v50  ;;  %5013 = vmatprep.subr.bf16.mxu0 %v16328_v51  ;;  %v16392_v50 = vld [vmem:[%s22199_s1 + $0x900] ss:$16 sps:$4 sm:$0xff]  }
  0xae   :  { %5054 = vmatprep.subr.bf16.mxu1 %v16331_v52  ;;  %v16395_v51 = vld [vmem:[%s22199_s1 + $0xb00] ss:$16 sps:$4 sm:$0xff]   ;;  %v16400_v52 = vld [vmem:[%s22199_s1 + $0xce4] ss:$16 sps:$4 sm:$0xff]  }
  0xb0   :  { %5014 = vmatpush1.bf16.msra.mxu0 %v16326_v53  ;;  %v18110_v53 = vrot.slane %v895_v47, %v17580_v49  ;;  %v16466_v47 = vld [vmem:[%s22199_s1 + $0xd84] ss:$16 sps:$4 sm:$0xff]  }
  0xb1   :  { %5055 = vmatpush1.bf16.msra.mxu1 %v16329_v54  ;;  %5015 = vmatprep.subr.bf16.mxu0 %v16334_v55  ;;  %v18114_v54 = vcombine.high %v18095_v48, %v18095_v48  ;;  %v16398_v55 = vld [vmem:[%s22199_s1 + $0xce0] ss:$16 sps:$4 sm:$0xff]  }
  0xb2   :  { %5056 = vmatprep.subr.bf16.mxu1 %v16337_v56  ;;  %v16401_v56 = vld [vmem:[%s22199_s1 + $0xee0] ss:$16 sps:$4 sm:$0xff]  }
  0xb4   :  { %5016 = vmatpush1.bf16.msra.mxu0 %v16332_v57  ;;  %v16406_v57 = vld [vmem:[%s22199_s1 + $0xcc4] ss:$16 sps:$4 sm:$0xff]  }
  0xb5   :  { %5057 = vmatpush1.bf16.msra.mxu1 %v16335_v58  ;;  %5017 = vmatprep.subr.bf16.mxu0 %v16340_v59  ;;  %v16409_v58 = vld [vmem:[%s22199_s1 + $0xec4] ss:$16 sps:$4 sm:$0xff]   ;;  %v18130_v59 = vcombine.high %v18110_v53, %v18110_v53 }
  0xb6   :  { %5058 = vmatprep.subr.bf16.mxu1 %v16343_v61  ;;  %v16404_v61 = vld [vmem:[%s22199_s1 + $0xcc0] ss:$16 sps:$4 sm:$0xff]  }
  0xb8   :  { %5018 = vmatpush1.bf16.msra.mxu0 %v16338_v62  ;;  %v16407_v62 = vld [vmem:[%s22199_s1 + $0xec0] ss:$16 sps:$4 sm:$0xff]  }
  0xb9   :  { %5059 = vmatpush1.bf16.msra.mxu1 %v16341_v63  ;;  %5019 = vmatprep.subr.bf16.mxu0 %v16346_v1  ;;  %v16412_v63 = vld [vmem:[%s22199_s1 + $0xca4] ss:$16 sps:$4 sm:$0xff]  }
  0xba   :  { %5060 = vmatprep.subr.bf16.mxu1 %v16349_v2  ;;  %v16415_v1 = vld [vmem:[%s22199_s1 + $0xea4] ss:$16 sps:$4 sm:$0xff]   ;;  %v16410_v2 = vld [vmem:[%s22199_s1 + $0xca0] ss:$16 sps:$4 sm:$0xff]  }
  0xbc   :  { %5020 = vmatpush1.bf16.msra.mxu0 %v16344_v3  ;;  %v16413_v3 = vld [vmem:[%s22199_s1 + $0xea0] ss:$16 sps:$4 sm:$0xff]  }
  0xbd   :  { %5061 = vmatpush1.bf16.msra.mxu1 %v16347_v4  ;;  %5021 = vmatprep.subr.bf16.mxu0 %v16352_v5  ;;  %v16418_v4 = vld [vmem:[%s22199_s1 + $0xc84] ss:$16 sps:$4 sm:$0xff]  }
  0xbe   :  { %5062 = vmatprep.subr.bf16.mxu1 %v16355_v7  ;;  %v16421_v5 = vld [vmem:[%s22199_s1 + $0xe84] ss:$16 sps:$4 sm:$0xff]   ;;  %v16416_v7 = vld [vmem:[%s22199_s1 + $0xc80] ss:$16 sps:$4 sm:$0xff]  }
  0xc0   :  { %5022 = vmatpush2.bf16.msra.mxu0 %v16350_v8  ;;  %v16419_v8 = vld [vmem:[%s22199_s1 + $0xe80] ss:$16 sps:$4 sm:$0xff]  }
  0xc1   :  { %5063 = vmatpush2.bf16.msra.mxu1 %v16353_v9  ;;  %5023 = vmatprep.subr.bf16.mxu0 %v16358_v10  ;;  %v16424_v9 = vld [vmem:[%s22199_s1 + $0xc64] ss:$16 sps:$4 sm:$0xff]  }
  0xc2   :  { %5064 = vmatprep.subr.bf16.mxu1 %v16361_v11  ;;  %v16427_v10 = vld [vmem:[%s22199_s1 + $0xe64] ss:$16 sps:$4 sm:$0xff]   ;;  %v16422_v11 = vld [vmem:[%s22199_s1 + $0xc60] ss:$16 sps:$4 sm:$0xff]  }
  0xc4   :  { %5024 = vmatpush2.bf16.msra.mxu0 %v16356_v12  ;;  %v16425_v12 = vld [vmem:[%s22199_s1 + $0xe60] ss:$16 sps:$4 sm:$0xff]  }
  0xc5   :  { %5065 = vmatpush2.bf16.msra.mxu1 %v16359_v14  ;;  %5025 = vmatprep.subr.bf16.mxu0 %v16364_v15  ;;  %v16430_v14 = vld [vmem:[%s22199_s1 + $0xc44] ss:$16 sps:$4 sm:$0xff]  }
  0xc6   :  { %5066 = vmatprep.subr.bf16.mxu1 %v16367_v16  ;;  %v16433_v15 = vld [vmem:[%s22199_s1 + $0xe44] ss:$16 sps:$4 sm:$0xff]   ;;  %v16428_v16 = vld [vmem:[%s22199_s1 + $0xc40] ss:$16 sps:$4 sm:$0xff]  }
  0xc8   :  { %5026 = vmatpush2.bf16.msra.mxu0 %v16362_v19  ;;  %v16431_v19 = vld [vmem:[%s22199_s1 + $0xe40] ss:$16 sps:$4 sm:$0xff]  }
  0xc9   :  { %5067 = vmatpush2.bf16.msra.mxu1 %v16365_v20  ;;  %5027 = vmatprep.subr.bf16.mxu0 %v16370_v21  ;;  %v16436_v20 = vld [vmem:[%s22199_s1 + $0xc24] ss:$16 sps:$4 sm:$0xff]  }
  0xca   :  { %5068 = vmatprep.subr.bf16.mxu1 %v16373_v22  ;;  %v16439_v21 = vld [vmem:[%s22199_s1 + $0xe24] ss:$16 sps:$4 sm:$0xff]   ;;  %v16434_v22 = vld [vmem:[%s22199_s1 + $0xc20] ss:$16 sps:$4 sm:$0xff]  }
  0xcc   :  { %5028 = vmatpush2.bf16.msra.mxu0 %v16368_v24  ;;  %v16437_v24 = vld [vmem:[%s22199_s1 + $0xe20] ss:$16 sps:$4 sm:$0xff]  }
  0xcd   :  { %5069 = vmatpush2.bf16.msra.mxu1 %v16371_v25  ;;  %5029 = vmatprep.subr.bf16.mxu0 %v16376_v27  ;;  %v16442_v25 = vld [vmem:[%s22199_s1 + $0xc04] ss:$16 sps:$4 sm:$0xff]  }
  0xce   :  { %5070 = vmatprep.subr.bf16.mxu1 %v16379_v28  ;;  %v16445_v27 = vld [vmem:[%s22199_s1 + $0xe04] ss:$16 sps:$4 sm:$0xff]   ;;  %v16440_v28 = vld [vmem:[%s22199_s1 + $0xc00] ss:$16 sps:$4 sm:$0xff]  }
  0xd0   :  { %5030 = vmatpush2.bf16.msra.mxu0 %v16374_v29  ;;  %v16443_v29 = vld [vmem:[%s22199_s1 + $0xe00] ss:$16 sps:$4 sm:$0xff]  }
  0xd1   :  { %5071 = vmatpush2.bf16.msra.mxu1 %v16377_v30  ;;  %5031 = vmatprep.subr.bf16.mxu0 %v16382_v31  ;;  %v16448_v30 = vld [vmem:[%s22199_s1 + $0xde4] ss:$16 sps:$4 sm:$0xff]  }
  0xd2   :  { %5072 = vmatprep.subr.bf16.mxu1 %v16385_v33  ;;  %v16451_v31 = vld [vmem:[%s22199_s1 + $0xfe4] ss:$16 sps:$4 sm:$0xff]   ;;  %v16446_v33 = vld [vmem:[%s22199_s1 + $0xde0] ss:$16 sps:$4 sm:$0xff]  }
  0xd4   :  { %5032 = vmatpush2.bf16.msra.mxu0 %v16380_v36  ;;  %v16454_v36 = vld [vmem:[%s22199_s1 + $0xdc4] ss:$16 sps:$4 sm:$0xff]  }
  0xd5   :  { %5073 = vmatpush2.bf16.msra.mxu1 %v16383_v37  ;;  %5033 = vmatprep.subr.bf16.mxu0 %v16388_v38  ;;  %v16457_v37 = vld [vmem:[%s22199_s1 + $0xfc4] ss:$16 sps:$4 sm:$0xff]   ;;  %v16452_v38 = vld [vmem:[%s22199_s1 + $0xdc0] ss:$16 sps:$4 sm:$0xff]  }
  0xd6   :  { %5074 = vmatprep.subr.bf16.mxu1 %v16391_v32  ;;  %v16455_v32 = vld [vmem:[%s22199_s1 + $0xfc0] ss:$16 sps:$4 sm:$0xff]  }
  0xd8   :  { %5034 = vmatpush2.bf16.msra.mxu0 %v16386_v40  ;;  %v16460_v40 = vld [vmem:[%s22199_s1 + $0xda4] ss:$16 sps:$4 sm:$0xff]  }
  0xd9   :  { %5075 = vmatpush2.bf16.msra.mxu1 %v16389_v44  ;;  %5035 = vmatprep.subr.bf16.mxu0 %v16394_v45  ;;  %v16463_v44 = vld [vmem:[%s22199_s1 + $0xfa4] ss:$16 sps:$4 sm:$0xff]   ;;  %v16458_v45 = vld [vmem:[%s22199_s1 + $0xda0] ss:$16 sps:$4 sm:$0xff]  }
  0xda   :  { %5076 = vmatprep.subr.bf16.mxu1 %v16397_v46  ;;  %v16461_v46 = vld [vmem:[%s22199_s1 + $0xfa0] ss:$16 sps:$4 sm:$0xff]  }
  0xdc   :  { %5036 = vmatpush2.bf16.msra.mxu0 %v16392_v50  ;;  %v16469_v50 = vld [vmem:[%s22199_s1 + $0xf84] ss:$16 sps:$4 sm:$0xff]  }
  0xdd   :  { %5077 = vmatpush2.bf16.msra.mxu1 %v16395_v51  ;;  %5087 = vmatprep.subr.bf16.mxu0 %v16400_v52  ;;  %v16464_v51 = vld [vmem:[%s22199_s1 + $0xd80] ss:$16 sps:$4 sm:$0xff]  }
  0xde   :  { %5128 = vmatprep.subr.bf16.mxu1 %v16403_v35  ;;  %v16467_v52 = vld [vmem:[%s22199_s1 + $0xf80] ss:$16 sps:$4 sm:$0xff]   ;;  %v16472_v35 = vld [vmem:[%s22199_s1 + $0xd64] ss:$16 sps:$4 sm:$0xff]  }
  0xdf   :  { %5038 = vmatmul.mubr.bf16.vlgmr.msra.gmra.mxu0 %v18095_v48 }
  0xe0   :  { %5079 = vmatmul.mubr.bf16.vlgmr.msra.gmra.mxu1 %v18114_v54  ;;  %5088 = vmatpush1.bf16.msra.mxu0 %v16398_v55  ;;  %v16475_v55 = vld [vmem:[%s22199_s1 + $0xf64] ss:$16 sps:$4 sm:$0xff]  }
  0xe1   :  { %5129 = vmatpush1.bf16.msra.mxu1 %v16401_v56  ;;  %5089 = vmatprep.subr.bf16.mxu0 %v16406_v57  ;;  %v16470_v56 = vld [vmem:[%s22199_s1 + $0xd60] ss:$16 sps:$4 sm:$0xff]  }
  0xe2   :  { %5130 = vmatprep.subr.bf16.mxu1 %v16409_v58  ;;  %5119 = vmatprep.mubr.bf16.mxu0 %v18110_v53  ;;  %v16473_v57 = vld [vmem:[%s22199_s1 + $0xf60] ss:$16 sps:$4 sm:$0xff]   ;;  %v16478_v58 = vld [vmem:[%s22199_s1 + $0xd44] ss:$16 sps:$4 sm:$0xff]  }
  0xe3   :  { %5160 = vmatprep.mubr.bf16.mxu1 %v18130_v59 }
  0xe4   :  { %5090 = vmatpush1.bf16.msra.mxu0 %v16404_v61  ;;  %v16481_v61 = vld [vmem:[%s22199_s1 + $0xf44] ss:$16 sps:$4 sm:$0xff]  }
  0xe5   :  { %5131 = vmatpush1.bf16.msra.mxu1 %v16407_v62  ;;  %5091 = vmatprep.subr.bf16.mxu0 %v16412_v63  ;;  %v16476_v62 = vld [vmem:[%s22199_s1 + $0xd40] ss:$16 sps:$4 sm:$0xff]  }
  0xe6   :  { %5132 = vmatprep.subr.bf16.mxu1 %v16415_v1  ;;  %v18286_v63 = vld [vmem:[%s22198_s0 + $0x10] sm:$0xff] }
  0xe7   :  { %v16479_v1 = vld [vmem:[%s22199_s1 + $0xf40] ss:$16 sps:$4 sm:$0xff]  }
  0xe8   :  { %5092 = vmatpush1.bf16.msra.mxu0 %v16410_v2  ;;  %v16484_v2 = vld [vmem:[%s22199_s1 + $0xd24] ss:$16 sps:$4 sm:$0xff]  }
  0xe9   :  { %5133 = vmatpush1.bf16.msra.mxu1 %v16413_v3  ;;  %5093 = vmatprep.subr.bf16.mxu0 %v16418_v4  ;;  %v16487_v3 = vld [vmem:[%s22199_s1 + $0xf24] ss:$16 sps:$4 sm:$0xff]   ;;  %v18299_v4 = vrot.slane %v18286_v63, %v17580_v49 }
  0xea   :  { %5134 = vmatprep.subr.bf16.mxu1 %v16421_v5  ;;  %v16482_v5 = vld [vmem:[%s22199_s1 + $0xd20] ss:$16 sps:$4 sm:$0xff]  }
  0xec   :  { %5094 = vmatpush1.bf16.msra.mxu0 %v16416_v7  ;;  %v16485_v7 = vld [vmem:[%s22199_s1 + $0xf20] ss:$16 sps:$4 sm:$0xff]  }
  0xed   :  { %5135 = vmatpush1.bf16.msra.mxu1 %v16419_v8  ;;  %5095 = vmatprep.subr.bf16.mxu0 %v16424_v9  ;;  %v16490_v8 = vld [vmem:[%s22199_s1 + $0xd04] ss:$16 sps:$4 sm:$0xff]  }
  0xee   :  { %5136 = vmatprep.subr.bf16.mxu1 %v16427_v10  ;;  %v16493_v9 = vld [vmem:[%s22199_s1 + $0xf04] ss:$16 sps:$4 sm:$0xff]   ;;  %v943_v10 = vcombine.high %v18299_v4, %v18299_v4 }
  0xf0   :  { %5096 = vmatpush1.bf16.msra.mxu0 %v16422_v11  ;;  %v16488_v11 = vld [vmem:[%s22199_s1 + $0xd00] ss:$16 sps:$4 sm:$0xff]  }
  0xf1   :  { %5137 = vmatpush1.bf16.msra.mxu1 %v16425_v12  ;;  %5097 = vmatprep.subr.bf16.mxu0 %v16430_v14  ;;  %v18320_v12 = vrot.slane %v18077_v39, %v17580_v49  ;;  %v16491_v14 = vld [vmem:[%s22199_s1 + $0xf00] ss:$16 sps:$4 sm:$0xff]  }
  0xf2   :  { %5138 = vmatprep.subr.bf16.mxu1 %v16433_v15  ;;  %v16497_v15 = vld [vmem:[%s22199_s1 + $0x10e4] ss:$16 sps:$4 sm:$0xff]  }
  0xf3   :  { %v18336_v39 = vcombine.high %v18320_v12, %v18320_v12 }
  0xf4   :  { %5098 = vmatpush1.bf16.msra.mxu0 %v16428_v16  ;;  %v16500_v16 = vld [vmem:[%s22199_s1 + $0x12e4] ss:$16 sps:$4 sm:$0xff]  }
  0xf5   :  { %5139 = vmatpush1.bf16.msra.mxu1 %v16431_v19  ;;  %5099 = vmatprep.subr.bf16.mxu0 %v16436_v20  ;;  %v18332_v19 = vrot.slane %v943_v10, %v17580_v49  ;;  %v16495_v20 = vld [vmem:[%s22199_s1 + $0x10e0] ss:$16 sps:$4 sm:$0xff]   ;;  %v16542_v10 = vld [vmem:[%s22199_s1 + $0x1204] ss:$16 sps:$4 sm:$0xff]  }
  0xf6   :  { %5140 = vmatprep.subr.bf16.mxu1 %v16439_v21  ;;  %v16498_v21 = vld [vmem:[%s22199_s1 + $0x12e0] ss:$16 sps:$4 sm:$0xff]  }
  0xf8   :  { %5100 = vmatpush1.bf16.msra.mxu0 %v16434_v22  ;;  %v16503_v22 = vld [vmem:[%s22199_s1 + $0x10c4] ss:$16 sps:$4 sm:$0xff]  }
  0xf9   :  { %5141 = vmatpush1.bf16.msra.mxu1 %v16437_v24  ;;  %5101 = vmatprep.subr.bf16.mxu0 %v16442_v25  ;;  %v16506_v24 = vld [vmem:[%s22199_s1 + $0x12c4] ss:$16 sps:$4 sm:$0xff]   ;;  %v18352_v25 = vcombine.high %v18332_v19, %v18332_v19 }
  0xfa   :  { %5142 = vmatprep.subr.bf16.mxu1 %v16445_v27 }
  0xfc   :  { %5102 = vmatpush1.bf16.msra.mxu0 %v16440_v28 }
  0xfd   :  { %5143 = vmatpush1.bf16.msra.mxu1 %v16443_v29  ;;  %5103 = vmatprep.subr.bf16.mxu0 %v16448_v30  ;;  %v16501_v29 = vld [vmem:[%s22199_s1 + $0x10c0] ss:$16 sps:$4 sm:$0xff]  }
  0xfe   :  { %5144 = vmatprep.subr.bf16.mxu1 %v16451_v31  ;;  %v16504_v30 = vld [vmem:[%s22199_s1 + $0x12c0] ss:$16 sps:$4 sm:$0xff]  }
 0x100   :  { %5104 = vmatpush2.bf16.msra.mxu0 %v16446_v33 }
 0x101   :  { %5145 = vmatpush2.bf16.msra.mxu1 %v16449_v34  ;;  %5105 = vmatprep.subr.bf16.mxu0 %v16454_v36  ;;  %v16509_v36 = vld [vmem:[%s22199_s1 + $0x10a4] ss:$16 sps:$4 sm:$0xff]  }
 0x102   :  { %5146 = vmatprep.subr.bf16.mxu1 %v16457_v37  ;;  %v16512_v37 = vld [vmem:[%s22199_s1 + $0x12a4] ss:$16 sps:$4 sm:$0xff]  }
 0x104   :  { %5106 = vmatpush2.bf16.msra.mxu0 %v16452_v38 }
 0x105   :  { %5147 = vmatpush2.bf16.msra.mxu1 %v16455_v32  ;;  %5107 = vmatprep.subr.bf16.mxu0 %v16460_v40  ;;  %v16507_v32 = vld [vmem:[%s22199_s1 + $0x10a0] ss:$16 sps:$4 sm:$0xff]  }
 0x106   :  { %5148 = vmatprep.subr.bf16.mxu1 %v16463_v44  ;;  %v16510_v40 = vld [vmem:[%s22199_s1 + $0x12a0] ss:$16 sps:$4 sm:$0xff]  }
 0x108   :  { %5108 = vmatpush2.bf16.msra.mxu0 %v16458_v45 }
 0x109   :  { %5149 = vmatpush2.bf16.msra.mxu1 %v16461_v46  ;;  %5109 = vmatprep.subr.bf16.mxu0 %v16466_v47 }
 0x10a   :  { %5150 = vmatprep.subr.bf16.mxu1 %v16469_v50  ;;  %v16515_v50 = vld [vmem:[%s22199_s1 + $0x1084] ss:$16 sps:$4 sm:$0xff]  }
 0x10c   :  { %5110 = vmatpush2.bf16.msra.mxu0 %v16464_v51  ;;  %v16518_v51 = vld [vmem:[%s22199_s1 + $0x1284] ss:$16 sps:$4 sm:$0xff]  }
 0x10d   :  { %5151 = vmatpush2.bf16.msra.mxu1 %v16467_v52  ;;  %5111 = vmatprep.subr.bf16.mxu0 %v16472_v35  ;;  %v16513_v52 = vld [vmem:[%s22199_s1 + $0x1080] ss:$16 sps:$4 sm:$0xff]  }
 0x10e   :  { %5152 = vmatprep.subr.bf16.mxu1 %v16475_v55  ;;  %v16516_v35 = vld [vmem:[%s22199_s1 + $0x1280] ss:$16 sps:$4 sm:$0xff]   ;;  %v16521_v55 = vld [vmem:[%s22199_s1 + $0x1064] ss:$16 sps:$4 sm:$0xff]  }
 0x110   :  { %5112 = vmatpush2.bf16.msra.mxu0 %v16470_v56  ;;  %v16524_v56 = vld [vmem:[%s22199_s1 + $0x1264] ss:$16 sps:$4 sm:$0xff]  }
 0x111   :  { %5153 = vmatpush2.bf16.msra.mxu1 %v16473_v57  ;;  %5113 = vmatprep.subr.bf16.mxu0 %v16478_v58  ;;  %v16519_v57 = vld [vmem:[%s22199_s1 + $0x1060] ss:$16 sps:$4 sm:$0xff]  }
 0x112   :  { %5154 = vmatprep.subr.bf16.mxu1 %v16481_v61  ;;  %v16522_v58 = vld [vmem:[%s22199_s1 + $0x1260] ss:$16 sps:$4 sm:$0xff]   ;;  %v16527_v61 = vld [vmem:[%s22199_s1 + $0x1044] ss:$16 sps:$4 sm:$0xff]  }
 0x114   :  { %5114 = vmatpush2.bf16.msra.mxu0 %v16476_v62  ;;  %v16530_v62 = vld [vmem:[%s22199_s1 + $0x1244] ss:$16 sps:$4 sm:$0xff]  }
 0x115   :  { %5155 = vmatpush2.bf16.msra.mxu1 %v16479_v1  ;;  %5115 = vmatprep.subr.bf16.mxu0 %v16484_v2  ;;  %v16525_v1 = vld [vmem:[%s22199_s1 + $0x1040] ss:$16 sps:$4 sm:$0xff]  }
 0x116   :  { %5156 = vmatprep.subr.bf16.mxu1 %v16487_v3  ;;  %v16528_v2 = vld [vmem:[%s22199_s1 + $0x1240] ss:$16 sps:$4 sm:$0xff]   ;;  %v16533_v3 = vld [vmem:[%s22199_s1 + $0x1024] ss:$16 sps:$4 sm:$0xff]  }
 0x118   :  { %5116 = vmatpush2.bf16.msra.mxu0 %v16482_v5  ;;  %v16536_v5 = vld [vmem:[%s22199_s1 + $0x1224] ss:$16 sps:$4 sm:$0xff]  }
 0x119   :  { %5157 = vmatpush2.bf16.msra.mxu1 %v16485_v7  ;;  %5117 = vmatprep.subr.bf16.mxu0 %v16490_v8  ;;  %v16531_v7 = vld [vmem:[%s22199_s1 + $0x1020] ss:$16 sps:$4 sm:$0xff]  }
 0x11a   :  { %5158 = vmatprep.subr.bf16.mxu1 %v16493_v9  ;;  %v16534_v8 = vld [vmem:[%s22199_s1 + $0x1220] ss:$16 sps:$4 sm:$0xff]   ;;  %v16539_v9 = vld [vmem:[%s22199_s1 + $0x1004] ss:$16 sps:$4 sm:$0xff]  }
 0x11c   :  { %5118 = vmatpush2.bf16.msra.mxu0 %v16488_v11  ;;  %v16537_v11 = vld [vmem:[%s22199_s1 + $0x1000] ss:$16 sps:$4 sm:$0xff]  }
 0x11d   :  { %5159 = vmatpush2.bf16.msra.mxu1 %v16491_v14  ;;  %5169 = vmatprep.subr.bf16.mxu0 %v16497_v15  ;;  %v16540_v14 = vld [vmem:[%s22199_s1 + $0x1200] ss:$16 sps:$4 sm:$0xff]   ;;  %v16545_v15 = vld [vmem:[%s22199_s1 + $0x11e4] ss:$16 sps:$4 sm:$0xff]  }
 0x11e   :  { %5210 = vmatprep.subr.bf16.mxu1 %v16500_v16  ;;  %v16548_v16 = vld [vmem:[%s22199_s1 + $0x13e4] ss:$16 sps:$4 sm:$0xff]  }
 0x11f   :  { %v4875_v27 = vpop.f32.mrf.mxu0  ;;  %5120 = vmatmul.mubr.bf16.vlgmr.msra.gmra.mxu0 %v18320_v12 }
 0x120   :  { %v4916_v28 = vpop.f32.mrf.mxu1  ;;  %5161 = vmatmul.mubr.bf16.vlgmr.msra.gmra.mxu1 %v18336_v39  ;;  %5170 = vmatpush1.bf16.msra.mxu0 %v16495_v20  ;;  %v16543_v20 = vld [vmem:[%s22199_s1 + $0x11e0] ss:$16 sps:$4 sm:$0xff]  }
 0x121   :  { %v18362_v31 = vadd.f32 %v4916_v28, %v4875_v27  ;;  %5211 = vmatpush1.bf16.msra.mxu1 %v16498_v21  ;;  %v4877_v33 = vpop.f32.mrf.mxu0  ;;  %5171 = vmatprep.subr.bf16.mxu0 %v16503_v22  ;;  %v16546_v21 = vld [vmem:[%s22199_s1 + $0x13e0] ss:$16 sps:$4 sm:$0xff]   ;;  %v16551_v22 = vld [vmem:[%s22199_s1 + $0x11c4] ss:$16 sps:$4 sm:$0xff]  }
 0x122   :  { %v4918_v34 = vpop.f32.mrf.mxu1  ;;  %5212 = vmatprep.subr.bf16.mxu1 %v16506_v24  ;;  %5201 = vmatprep.mubr.bf16.mxu0 %v18332_v19  ;;  %v16554_v24 = vld [vmem:[%s22199_s1 + $0x13c4] ss:$16 sps:$4 sm:$0xff]   ;;  %v16549_v27 = vld [vmem:[%s22199_s1 + $0x11c0] ss:$16 sps:$4 sm:$0xff]  }
 0x123   :  { %v18370_v38 = vadd.f32 %v4918_v34, %v4877_v33  ;;  %5242 = vmatprep.mubr.bf16.mxu1 %v18352_v25  ;;  %v4879_v44 = vpop.f32.mrf.mxu0  ;;  %v16552_v28 = vld [vmem:[%s22199_s1 + $0x13c0] ss:$16 sps:$4 sm:$0xff]  }
 0x124   :  { %v4920_v45 = vpop.f32.mrf.mxu1  ;;  %5172 = vmatpush1.bf16.msra.mxu0 %v16501_v29  ;;  %v16557_v29 = vld [vmem:[%s22199_s1 + $0x11a4] ss:$16 sps:$4 sm:$0xff]   ;;  %v16555_v33 = vld [vmem:[%s22199_s1 + $0x11a0] ss:$16 sps:$4 sm:$0xff]  }
 0x125   :  { %5213 = vmatpush1.bf16.msra.mxu1 %v16504_v30  ;;  %v4880_v46 = vpop.f32.mrf.mxu0  ;;  %5173 = vmatprep.subr.bf16.mxu0 %v16509_v36  ;;  %v16560_v30 = vld [vmem:[%s22199_s1 + $0x13a4] ss:$16 sps:$4 sm:$0xff]   ;;  %v16558_v34 = vld [vmem:[%s22199_s1 + $0x13a0] ss:$16 sps:$4 sm:$0xff]  }
 0x126   :  { %v4921_v47 = vpop.f32.mrf.mxu1  ;;  %5214 = vmatprep.subr.bf16.mxu1 %v16512_v37  ;;  %v16563_v36 = vld [vmem:[%s22199_s1 + $0x1184] ss:$16 sps:$4 sm:$0xff]   ;;  %v16567_v46 = vld [vmem:[%s22199_s1 + $0x1160] ss:$16 sps:$4 sm:$0xff]  }
 0x127   :  { %v16566_v37 = vld [vmem:[%s22199_s1 + $0x1384] ss:$16 sps:$4 sm:$0xff]   ;;  %v16570_v47 = vld [vmem:[%s22199_s1 + $0x1360] ss:$16 sps:$4 sm:$0xff]  }
 0x128   :  { %5174 = vmatpush1.bf16.msra.mxu0 %v16507_v32  ;;  %v16561_v32 = vld [vmem:[%s22199_s1 + $0x1180] ss:$16 sps:$4 sm:$0xff]   ;;  %v16569_v44 = vld [vmem:[%s22199_s1 + $0x1164] ss:$16 sps:$4 sm:$0xff]  }
 0x129   :  { %5215 = vmatpush1.bf16.msra.mxu1 %v16510_v40  ;;  %5175 = vmatprep.subr.bf16.mxu0 %v16515_v50  ;;  %v16564_v40 = vld [vmem:[%s22199_s1 + $0x1380] ss:$16 sps:$4 sm:$0xff]   ;;  %v16572_v45 = vld [vmem:[%s22199_s1 + $0x1364] ss:$16 sps:$4 sm:$0xff]  }
 0x12a   :  { %5216 = vmatprep.subr.bf16.mxu1 %v16518_v51  ;;  %v16575_v50 = vld [vmem:[%s22199_s1 + $0x1144] ss:$16 sps:$4 sm:$0xff]  }
 0x12b   :  { %v16578_v51 = vld [vmem:[%s22199_s1 + $0x1344] ss:$16 sps:$4 sm:$0xff]  }
 0x12c   :  { %5176 = vmatpush1.bf16.msra.mxu0 %v16513_v52  ;;  %v928_v52 = vcombine.high %v18286_v63, %v18286_v63  ;;  %v16584_v63 = vld [vmem:[%s22199_s1 + $0x1324] ss:$16 sps:$4 sm:$0xff]  }
 0x12d   :  { %5217 = vmatpush1.bf16.msra.mxu1 %v16516_v35  ;;  %5177 = vmatprep.subr.bf16.mxu0 %v16521_v55  ;;  %v16573_v35 = vld [vmem:[%s22199_s1 + $0x1140] ss:$16 sps:$4 sm:$0xff]  }
 0x12e   :  { %5218 = vmatprep.subr.bf16.mxu1 %v16524_v56  ;;  %v16576_v55 = vld [vmem:[%s22199_s1 + $0x1340] ss:$16 sps:$4 sm:$0xff]   ;;  %v16581_v56 = vld [vmem:[%s22199_s1 + $0x1124] ss:$16 sps:$4 sm:$0xff]  }
 0x130   :  { %5178 = vmatpush1.bf16.msra.mxu0 %v16519_v57  ;;  %v18521_v57 = vrot.slane %v928_v52, %v17580_v49  ;;  %v16612_v52 = vld [vmem:[%s22199_s1 + $0x1680] ss:$16 sps:$4 sm:$0xff]  }
 0x131   :  { %5219 = vmatpush1.bf16.msra.mxu1 %v16522_v58  ;;  %5179 = vmatprep.subr.bf16.mxu0 %v16527_v61  ;;  %v16579_v58 = vld [vmem:[%s22199_s1 + $0x1120] ss:$16 sps:$4 sm:$0xff]  }
 0x132   :  { %5220 = vmatprep.subr.bf16.mxu1 %v16530_v62  ;;  %v16582_v61 = vld [vmem:[%s22199_s1 + $0x1320] ss:$16 sps:$4 sm:$0xff]   ;;  %v16587_v62 = vld [vmem:[%s22199_s1 + $0x1104] ss:$16 sps:$4 sm:$0xff]  }
 0x134   :  { %5180 = vmatpush1.bf16.msra.mxu0 %v16525_v1  ;;  %v16590_v1 = vld [vmem:[%s22199_s1 + $0x1304] ss:$16 sps:$4 sm:$0xff]  }
 0x135   :  { %5221 = vmatpush1.bf16.msra.mxu1 %v16528_v2  ;;  %5181 = vmatprep.subr.bf16.mxu0 %v16533_v3  ;;  %v944_v2 = vcombine.high %v18521_v57, %v18521_v57  ;;  %v18539_v3 = vrot.slane %v18299_v4, %v17580_v49  ;;  %v16596_v4 = vld [vmem:[%s22199_s1 + $0x16e4] ss:$16 sps:$4 sm:$0xff]  }
 0x136   :  { %5222 = vmatprep.subr.bf16.mxu1 %v16536_v5  ;;  %v16585_v5 = vld [vmem:[%s22199_s1 + $0x1100] ss:$16 sps:$4 sm:$0xff]  }
 0x138   :  { %5182 = vmatpush1.bf16.msra.mxu0 %v16531_v7  ;;  %v16588_v7 = vld [vmem:[%s22199_s1 + $0x1300] ss:$16 sps:$4 sm:$0xff]  }
 0x139   :  { %5223 = vmatpush1.bf16.msra.mxu1 %v16534_v8  ;;  %5183 = vmatprep.subr.bf16.mxu0 %v16539_v9  ;;  %v16593_v8 = vld [vmem:[%s22199_s1 + $0x14e4] ss:$16 sps:$4 sm:$0xff]   ;;  %v16591_v9 = vld [vmem:[%s22199_s1 + $0x14e0] ss:$16 sps:$4 sm:$0xff]  }
 0x13a   :  { %5224 = vmatprep.subr.bf16.mxu1 %v16542_v10  ;;  %v16594_v10 = vld [vmem:[%s22199_s1 + $0x16e0] ss:$16 sps:$4 sm:$0xff]  }
 0x13c   :  { %5184 = vmatpush1.bf16.msra.mxu0 %v16537_v11  ;;  %v18560_v11 = vrot.slane %v944_v2, %v17580_v49  ;;  %v16629_v2 = vld [vmem:[%s22199_s1 + $0x1424] ss:$16 sps:$4 sm:$0xff]  }
 0x13d   :  { %5225 = vmatpush1.bf16.msra.mxu1 %v16540_v14  ;;  %5185 = vmatprep.subr.bf16.mxu0 %v16545_v15  ;;  %v18564_v14 = vcombine.high %v18539_v3, %v18539_v3  ;;  %v16599_v15 = vld [vmem:[%s22199_s1 + $0x14c4] ss:$16 sps:$4 sm:$0xff]  }
 0x13e   :  { %5226 = vmatprep.subr.bf16.mxu1 %v16548_v16  ;;  %v16602_v16 = vld [vmem:[%s22199_s1 + $0x16c4] ss:$16 sps:$4 sm:$0xff]  }
 0x140   :  { %5186 = vmatpush2.bf16.msra.mxu0 %v16543_v20  ;;  %v16597_v20 = vld [vmem:[%s22199_s1 + $0x14c0] ss:$16 sps:$4 sm:$0xff]  }
 0x141   :  { %5227 = vmatpush2.bf16.msra.mxu1 %v16546_v21  ;;  %5187 = vmatprep.subr.bf16.mxu0 %v16551_v22  ;;  %v16600_v21 = vld [vmem:[%s22199_s1 + $0x16c0] ss:$16 sps:$4 sm:$0xff]   ;;  %v18580_v22 = vcombine.high %v18560_v11, %v18560_v11 }
 0x142   :  { %5228 = vmatprep.subr.bf16.mxu1 %v16554_v24 }
 0x144   :  { %5188 = vmatpush2.bf16.msra.mxu0 %v16549_v27 }
 0x145   :  { %5229 = vmatpush2.bf16.msra.mxu1 %v16552_v28  ;;  %5189 = vmatprep.subr.bf16.mxu0 %v16557_v29 }
 0x146   :  { %5230 = vmatprep.subr.bf16.mxu1 %v16560_v30 }
 0x148   :  { %5190 = vmatpush2.bf16.msra.mxu0 %v16555_v33  ;;  %v16605_v33 = vld [vmem:[%s22199_s1 + $0x14a4] ss:$16 sps:$4 sm:$0xff]  }
 0x149   :  { %5231 = vmatpush2.bf16.msra.mxu1 %v16558_v34  ;;  %5191 = vmatprep.subr.bf16.mxu0 %v16563_v36  ;;  %v16608_v34 = vld [vmem:[%s22199_s1 + $0x16a4] ss:$16 sps:$4 sm:$0xff]  }
 0x14a   :  { %5232 = vmatprep.subr.bf16.mxu1 %v16566_v37 }
 0x14c   :  { %5192 = vmatpush2.bf16.msra.mxu0 %v16561_v32  ;;  %v16606_v32 = vld [vmem:[%s22199_s1 + $0x16a0] ss:$16 sps:$4 sm:$0xff]  }
 0x14d   :  { %5233 = vmatpush2.bf16.msra.mxu1 %v16564_v40  ;;  %5193 = vmatprep.subr.bf16.mxu0 %v16569_v44 }
 0x14e   :  { %5234 = vmatprep.subr.bf16.mxu1 %v16572_v45 }
 0x150   :  { %5194 = vmatpush2.bf16.msra.mxu0 %v16567_v46 }
 0x151   :  { %5235 = vmatpush2.bf16.msra.mxu1 %v16570_v47  ;;  %5195 = vmatprep.subr.bf16.mxu0 %v16575_v50  ;;  %v16611_v47 = vld [vmem:[%s22199_s1 + $0x1484] ss:$16 sps:$4 sm:$0xff]  }
 0x152   :  { %5236 = vmatprep.subr.bf16.mxu1 %v16578_v51  ;;  %v16614_v50 = vld [vmem:[%s22199_s1 + $0x1684] ss:$16 sps:$4 sm:$0xff]   ;;  %v16609_v51 = vld [vmem:[%s22199_s1 + $0x1480] ss:$16 sps:$4 sm:$0xff]  }
 0x154   :  { %5196 = vmatpush2.bf16.msra.mxu0 %v16573_v35  ;;  %v16617_v35 = vld [vmem:[%s22199_s1 + $0x1464] ss:$16 sps:$4 sm:$0xff]  }
 0x155   :  { %5237 = vmatpush2.bf16.msra.mxu1 %v16576_v55  ;;  %5197 = vmatprep.subr.bf16.mxu0 %v16581_v56  ;;  %v16620_v55 = vld [vmem:[%s22199_s1 + $0x1664] ss:$16 sps:$4 sm:$0xff]   ;;  %v16615_v56 = vld [vmem:[%s22199_s1 + $0x1460] ss:$16 sps:$4 sm:$0xff]  }
 0x156   :  { %5238 = vmatprep.subr.bf16.mxu1 %v16584_v63  ;;  %v16618_v63 = vld [vmem:[%s22199_s1 + $0x1660] ss:$16 sps:$4 sm:$0xff]  }
 0x158   :  { %5198 = vmatpush2.bf16.msra.mxu0 %v16579_v58  ;;  %v16623_v58 = vld [vmem:[%s22199_s1 + $0x1444] ss:$16 sps:$4 sm:$0xff]  }
 0x159   :  { %5239 = vmatpush2.bf16.msra.mxu1 %v16582_v61  ;;  %5199 = vmatprep.subr.bf16.mxu0 %v16587_v62  ;;  %v16626_v61 = vld [vmem:[%s22199_s1 + $0x1644] ss:$16 sps:$4 sm:$0xff]   ;;  %v16621_v62 = vld [vmem:[%s22199_s1 + $0x1440] ss:$16 sps:$4 sm:$0xff]  }
 0x15a   :  { %5240 = vmatprep.subr.bf16.mxu1 %v16590_v1  ;;  %v16624_v1 = vld [vmem:[%s22199_s1 + $0x1640] ss:$16 sps:$4 sm:$0xff]  }
 0x15c   :  { %5200 = vmatpush2.bf16.msra.mxu0 %v16585_v5  ;;  %v16632_v5 = vld [vmem:[%s22199_s1 + $0x1624] ss:$16 sps:$4 sm:$0xff]  }
 0x15d   :  { %5241 = vmatpush2.bf16.msra.mxu1 %v16588_v7  ;;  %5251 = vmatprep.subr.bf16.mxu0 %v16593_v8  ;;  %v16627_v7 = vld [vmem:[%s22199_s1 + $0x1420] ss:$16 sps:$4 sm:$0xff]  }
 0x15e   :  { %5292 = vmatprep.subr.bf16.mxu1 %v16596_v4  ;;  %v16630_v8 = vld [vmem:[%s22199_s1 + $0x1620] ss:$16 sps:$4 sm:$0xff]   ;;  %v16635_v4 = vld [vmem:[%s22199_s1 + $0x1404] ss:$16 sps:$4 sm:$0xff]  }
 0x15f   :  { %v4957_v24 = vpop.f32.mrf.mxu0  ;;  %5202 = vmatmul.mubr.bf16.vlgmr.msra.gmra.mxu0 %v18539_v3 }
 0x160   :  { %v4998_v27 = vpop.f32.mrf.mxu1  ;;  %5243 = vmatmul.mubr.bf16.vlgmr.msra.gmra.mxu1 %v18564_v14  ;;  %v4958_v28 = vadd.f32 %v4957_v24, %v18362_v31  ;;  %5252 = vmatpush1.bf16.msra.mxu0 %v16591_v9  ;;  %v16603_v31 = vld [vmem:[%s22199_s1 + $0x14a0] ss:$16 sps:$4 sm:$0xff]   ;;  %v16638_v9 = vld [vmem:[%s22199_s1 + $0x1604] ss:$16 sps:$4 sm:$0xff]  }
 0x161   :  { %5293 = vmatpush1.bf16.msra.mxu1 %v16594_v10  ;;  %v4959_v29 = vpop.f32.mrf.mxu0  ;;  %5253 = vmatprep.subr.bf16.mxu0 %v16599_v15  ;;  %v16633_v10 = vld [vmem:[%s22199_s1 + $0x1400] ss:$16 sps:$4 sm:$0xff]  }
 0x162   :  { %v5000_v30 = vpop.f32.mrf.mxu1  ;;  %5294 = vmatprep.subr.bf16.mxu1 %v16602_v16  ;;  %v18591_v36 = vadd.f32 %v4998_v27, %v4958_v28  ;;  %v4960_v37 = vadd.f32 %v4959_v29, %v18370_v38  ;;  %5283 = vmatprep.mubr.bf16.mxu0 %v18560_v11  ;;  %v16636_v15 = vld [vmem:[%s22199_s1 + $0x1600] ss:$16 sps:$4 sm:$0xff]   ;;  %v16641_v16 = vld [vmem:[%s22199_s1 + $0x15e4] ss:$16 sps:$4 sm:$0xff]  }
 0x163   :  { %5324 = vmatprep.mubr.bf16.mxu1 %v18580_v22  ;;  %v4961_v40 = vpop.f32.mrf.mxu0  ;;  %v16642_v24 = vld [vmem:[%s22199_s1 + $0x17e0] ss:$16 sps:$4 sm:$0xff]   ;;  %v16647_v27 = vld [vmem:[%s22199_s1 + $0x15c4] ss:$16 sps:$4 sm:$0xff]  }
 0x164   :  { %v5002_v44 = vpop.f32.mrf.mxu1  ;;  %v18602_v45 = vadd.f32 %v5000_v30, %v4960_v37  ;;  %5254 = vmatpush1.bf16.msra.mxu0 %v16597_v20  ;;  %v16644_v20 = vld [vmem:[%s22199_s1 + $0x17e4] ss:$16 sps:$4 sm:$0xff]   ;;  %v16645_v29 = vld [vmem:[%s22199_s1 + $0x15c0] ss:$16 sps:$4 sm:$0xff]  }
 0x165   :  { %5295 = vmatpush1.bf16.msra.mxu1 %v16600_v21  ;;  %v4962_v46 = vpop.f32.mrf.mxu0  ;;  %5255 = vmatprep.subr.bf16.mxu0 %v16605_v33  ;;  %v16639_v21 = vld [vmem:[%s22199_s1 + $0x15e0] ss:$16 sps:$4 sm:$0xff]   ;;  %v16650_v28 = vld [vmem:[%s22199_s1 + $0x17c4] ss:$16 sps:$4 sm:$0xff]  }
 0x166   :  { %v5003_v38 = vpop.f32.mrf.mxu1  ;;  %5296 = vmatprep.subr.bf16.mxu1 %v16608_v34  ;;  %v16648_v30 = vld [vmem:[%s22199_s1 + $0x17c0] ss:$16 sps:$4 sm:$0xff]   ;;  %v16653_v33 = vld [vmem:[%s22199_s1 + $0x15a4] ss:$16 sps:$4 sm:$0xff]  }
 0x167   :  { %v16656_v34 = vld [vmem:[%s22199_s1 + $0x17a4] ss:$16 sps:$4 sm:$0xff]   ;;  %v16651_v37 = vld [vmem:[%s22199_s1 + $0x15a0] ss:$16 sps:$4 sm:$0xff]  }
 0x168   :  { %5256 = vmatpush1.bf16.msra.mxu0 %v16603_v31  ;;  %v16654_v31 = vld [vmem:[%s22199_s1 + $0x17a0] ss:$16 sps:$4 sm:$0xff]   ;;  %v16662_v40 = vld [vmem:[%s22199_s1 + $0x1784] ss:$16 sps:$4 sm:$0xff]  }
 0x169   :  { %5297 = vmatpush1.bf16.msra.mxu1 %v16606_v32  ;;  %5257 = vmatprep.subr.bf16.mxu0 %v16611_v47  ;;  %v16659_v32 = vld [vmem:[%s22199_s1 + $0x1584] ss:$16 sps:$4 sm:$0xff]   ;;  %v16657_v44 = vld [vmem:[%s22199_s1 + $0x1580] ss:$16 sps:$4 sm:$0xff]  }
 0x16a   :  { %5298 = vmatprep.subr.bf16.mxu1 %v16614_v50  ;;  %v16660_v46 = vld [vmem:[%s22199_s1 + $0x1780] ss:$16 sps:$4 sm:$0xff]   ;;  %v16665_v38 = vld [vmem:[%s22199_s1 + $0x1564] ss:$16 sps:$4 sm:$0xff]  }
 0x16b   :  { %v16668_v47 = vld [vmem:[%s22199_s1 + $0x1764] ss:$16 sps:$4 sm:$0xff]   ;;  %v16663_v50 = vld [vmem:[%s22199_s1 + $0x1560] ss:$16 sps:$4 sm:$0xff]  }
 0x16c   :  { %5258 = vmatpush1.bf16.msra.mxu0 %v16609_v51  ;;  %v16666_v51 = vld [vmem:[%s22199_s1 + $0x1760] ss:$16 sps:$4 sm:$0xff]  }
 0x16d   :  { %5299 = vmatpush1.bf16.msra.mxu1 %v16612_v52  ;;  %5259 = vmatprep.subr.bf16.mxu0 %v16617_v35  ;;  %v16671_v52 = vld [vmem:[%s22199_s1 + $0x1544] ss:$16 sps:$4 sm:$0xff]  }
 0x16e   :  { %5300 = vmatprep.subr.bf16.mxu1 %v16620_v55  ;;  %v16674_v35 = vld [vmem:[%s22199_s1 + $0x1744] ss:$16 sps:$4 sm:$0xff]   ;;  %v16669_v55 = vld [vmem:[%s22199_s1 + $0x1540] ss:$16 sps:$4 sm:$0xff]  }
 0x170   :  { %5260 = vmatpush1.bf16.msra.mxu0 %v16615_v56  ;;  %v16672_v56 = vld [vmem:[%s22199_s1 + $0x1740] ss:$16 sps:$4 sm:$0xff]  }
 0x171   :  { %5301 = vmatpush1.bf16.msra.mxu1 %v16618_v63  ;;  %5261 = vmatprep.subr.bf16.mxu0 %v16623_v58  ;;  %v16677_v63 = vld [vmem:[%s22199_s1 + $0x1524] ss:$16 sps:$4 sm:$0xff]  }
 0x172   :  { %5302 = vmatprep.subr.bf16.mxu1 %v16626_v61  ;;  %v16680_v58 = vld [vmem:[%s22199_s1 + $0x1724] ss:$16 sps:$4 sm:$0xff]   ;;  %v16675_v61 = vld [vmem:[%s22199_s1 + $0x1520] ss:$16 sps:$4 sm:$0xff]  }
 0x174   :  { %5262 = vmatpush1.bf16.msra.mxu0 %v16621_v62  ;;  %v16678_v62 = vld [vmem:[%s22199_s1 + $0x1720] ss:$16 sps:$4 sm:$0xff]  }
 0x175   :  { %5303 = vmatpush1.bf16.msra.mxu1 %v16624_v1  ;;  %5263 = vmatprep.subr.bf16.mxu0 %v16629_v2  ;;  %v16683_v1 = vld [vmem:[%s22199_s1 + $0x1504] ss:$16 sps:$4 sm:$0xff]  }
 0x176   :  { %5304 = vmatprep.subr.bf16.mxu1 %v16632_v5  ;;  %v16686_v2 = vld [vmem:[%s22199_s1 + $0x1704] ss:$16 sps:$4 sm:$0xff]   ;;  %v18756_v5 = vrot.slane %v18521_v57, %v17580_v49  ;;  %v16693_v49 = vld [vmem:[%s22199_s1 + $0x2ec] ss:$16 sps:$4 sm:$0xff]   ;;  %v16688_v57 = vld [vmem:[%s22199_s1 + $0xe8] ss:$16 sps:$4 sm:$0xff]  }
 0x178   :  { %5264 = vmatpush1.bf16.msra.mxu0 %v16627_v7  ;;  %v16681_v7 = vld [vmem:[%s22199_s1 + $0x1500] ss:$16 sps:$4 sm:$0xff]  }
 0x179   :  { %5305 = vmatpush1.bf16.msra.mxu1 %v16630_v8  ;;  %5265 = vmatprep.subr.bf16.mxu0 %v16635_v4  ;;  %v16684_v8 = vld [vmem:[%s22199_s1 + $0x1700] ss:$16 sps:$4 sm:$0xff]   ;;  %v16690_v4 = vld [vmem:[%s22199_s1 + $0xec] ss:$16 sps:$4 sm:$0xff]  }
 0x17a   :  { %5306 = vmatprep.subr.bf16.mxu1 %v16638_v9  ;;  %v16691_v9 = vld [vmem:[%s22199_s1 + $0x2e8] ss:$16 sps:$4 sm:$0xff]  }
 0x17c   :  { %5266 = vmatpush1.bf16.msra.mxu0 %v16633_v10  ;;  %v18778_v10 = vcombine.high %v18756_v5, %v18756_v5 }
 0x17d   :  { %5307 = vmatpush1.bf16.msra.mxu1 %v16636_v15  ;;  %5267 = vmatprep.subr.bf16.mxu0 %v16641_v16  ;;  %v16696_v15 = vld [vmem:[%s22199_s1 + $0xcc] ss:$16 sps:$4 sm:$0xff]  }
 0x17e   :  { %5308 = vmatprep.subr.bf16.mxu1 %v16644_v20  ;;  %v16699_v16 = vld [vmem:[%s22199_s1 + $0x2cc] ss:$16 sps:$4 sm:$0xff]   ;;  %v16694_v20 = vld [vmem:[%s22199_s1 + $0xc8] ss:$16 sps:$4 sm:$0xff]  }
 0x180   :  { %5268 = vmatpush2.bf16.msra.mxu0 %v16639_v21  ;;  %v16697_v21 = vld [vmem:[%s22199_s1 + $0x2c8] ss:$16 sps:$4 sm:$0xff]  }
 0x181   :  { %5309 = vmatpush2.bf16.msra.mxu1 %v16642_v24  ;;  %5269 = vmatprep.subr.bf16.mxu0 %v16647_v27 }
 0x182   :  { %5310 = vmatprep.subr.bf16.mxu1 %v16650_v28 }
 0x184   :  { %5270 = vmatpush2.bf16.msra.mxu0 %v16645_v29 }
 0x185   :  { %5311 = vmatpush2.bf16.msra.mxu1 %v16648_v30  ;;  %5271 = vmatprep.subr.bf16.mxu0 %v16653_v33  ;;  %v16702_v33 = vld [vmem:[%s22199_s1 + $0xac] ss:$16 sps:$4 sm:$0xff]  }
 0x186   :  { %5312 = vmatprep.subr.bf16.mxu1 %v16656_v34  ;;  %v16705_v34 = vld [vmem:[%s22199_s1 + $0x2ac] ss:$16 sps:$4 sm:$0xff]  }
 0x188   :  { %5272 = vmatpush2.bf16.msra.mxu0 %v16651_v37 }
 0x189   :  { %5313 = vmatpush2.bf16.msra.mxu1 %v16654_v31  ;;  %5273 = vmatprep.subr.bf16.mxu0 %v16659_v32  ;;  %v16703_v32 = vld [vmem:[%s22199_s1 + $0x2a8] ss:$16 sps:$4 sm:$0xff]  }
 0x18a   :  { %5314 = vmatprep.subr.bf16.mxu1 %v16662_v40 }
 0x18c   :  { %5274 = vmatpush2.bf16.msra.mxu0 %v16657_v44 }
 0x18d   :  { %5315 = vmatpush2.bf16.msra.mxu1 %v16660_v46  ;;  %5275 = vmatprep.subr.bf16.mxu0 %v16665_v38 }
 0x18e   :  { %5316 = vmatprep.subr.bf16.mxu1 %v16668_v47  ;;  %v16708_v47 = vld [vmem:[%s22199_s1 + $0x8c] ss:$16 sps:$4 sm:$0xff]  }
 0x190   :  { %5276 = vmatpush2.bf16.msra.mxu0 %v16663_v50  ;;  %v16709_v50 = vld [vmem:[%s22199_s1 + $0x288] ss:$16 sps:$4 sm:$0xff]  }
 0x191   :  { %5317 = vmatpush2.bf16.msra.mxu1 %v16666_v51  ;;  %5277 = vmatprep.subr.bf16.mxu0 %v16671_v52  ;;  %v16714_v51 = vld [vmem:[%s22199_s1 + $0x6c] ss:$16 sps:$4 sm:$0xff]  }
 0x192   :  { %5318 = vmatprep.subr.bf16.mxu1 %v16674_v35  ;;  %v16717_v52 = vld [vmem:[%s22199_s1 + $0x26c] ss:$16 sps:$4 sm:$0xff]   ;;  %v16712_v35 = vld [vmem:[%s22199_s1 + $0x68] ss:$16 sps:$4 sm:$0xff]  }
 0x194   :  { %5278 = vmatpush2.bf16.msra.mxu0 %v16669_v55  ;;  %v16715_v55 = vld [vmem:[%s22199_s1 + $0x268] ss:$16 sps:$4 sm:$0xff]  }
 0x195   :  { %5319 = vmatpush2.bf16.msra.mxu1 %v16672_v56  ;;  %5279 = vmatprep.subr.bf16.mxu0 %v16677_v63  ;;  %v16720_v56 = vld [vmem:[%s22199_s1 + $0x4c] ss:$16 sps:$4 sm:$0xff]  }
 0x196   :  { %5320 = vmatprep.subr.bf16.mxu1 %v16680_v58  ;;  %v16723_v63 = vld [vmem:[%s22199_s1 + $0x24c] ss:$16 sps:$4 sm:$0xff]   ;;  %v16718_v58 = vld [vmem:[%s22199_s1 + $0x48] ss:$16 sps:$4 sm:$0xff]  }
 0x198   :  { %5280 = vmatpush2.bf16.msra.mxu0 %v16675_v61  ;;  %v16721_v61 = vld [vmem:[%s22199_s1 + $0x248] ss:$16 sps:$4 sm:$0xff]  }
 0x199   :  { %5321 = vmatpush2.bf16.msra.mxu1 %v16678_v62  ;;  %5281 = vmatprep.subr.bf16.mxu0 %v16683_v1  ;;  %v16726_v62 = vld [vmem:[%s22199_s1 + $0x2c] ss:$16 sps:$4 sm:$0xff]  }
 0x19a   :  { %5322 = vmatprep.subr.bf16.mxu1 %v16686_v2  ;;  %v16729_v1 = vld [vmem:[%s22199_s1 + $0x22c] ss:$16 sps:$4 sm:$0xff]   ;;  %v16724_v2 = vld [vmem:[%s22199_s1 + $0x28] ss:$16 sps:$4 sm:$0xff]  }
 0x19c   :  { %5282 = vmatpush2.bf16.msra.mxu0 %v16681_v7  ;;  %v16727_v7 = vld [vmem:[%s22199_s1 + $0x228] ss:$16 sps:$4 sm:$0xff]  }
 0x19d   :  { %5323 = vmatpush2.bf16.msra.mxu1 %v16684_v8  ;;  %5333 = vmatprep.subr.bf16.mxu0 %v16690_v4  ;;  %v16732_v8 = vld [vmem:[%s22199_s1 + $0xc] ss:$16 sps:$4 sm:$0xff]  }
 0x19e   :  { %5374 = vmatprep.subr.bf16.mxu1 %v16693_v49  ;;  %v16735_v4 = vld [vmem:[%s22199_s1 + $0x20c] ss:$16 sps:$4 sm:$0xff]   ;;  %v16730_v49 = vld [vmem:[%s22199_s1 + $0x8] ss:$16 sps:$4 sm:$0xff]  }
 0x19f   :  { %v5039_v24 = vpop.f32.mrf.mxu0  ;;  %5284 = vmatmul.mubr.bf16.vlgmr.msra.gmra.mxu0 %v18756_v5 }
 0x1a0   :  { %v5080_v27 = vpop.f32.mrf.mxu1  ;;  %5325 = vmatmul.mubr.bf16.vlgmr.msra.gmra.mxu1 %v18778_v10  ;;  %v5040_v28 = vadd.f32 %v5039_v24, %v18591_v36  ;;  %5334 = vmatpush1.bf16.msra.mxu0 %v16688_v57  ;;  %v16700_v36 = vld [vmem:[%s22199_s1 + $0xa8] ss:$16 sps:$4 sm:$0xff]   ;;  %v16747_v24 = vld [vmem:[%s22199_s1 + $0x3cc] ss:$16 sps:$4 sm:$0xff]  }
 0x1a1   :  { %5375 = vmatpush1.bf16.msra.mxu1 %v16691_v9  ;;  %v5041_v29 = vpop.f32.mrf.mxu0  ;;  %5335 = vmatprep.subr.bf16.mxu0 %v16696_v15  ;;  %v16733_v57 = vld [vmem:[%s22199_s1 + $0x208] ss:$16 sps:$4 sm:$0xff]   ;;  %v16738_v9 = vld [vmem:[%s22199_s1 + $0x1ec] ss:$16 sps:$4 sm:$0xff]  }
 0x1a2   :  { %v5082_v30 = vpop.f32.mrf.mxu1  ;;  %5376 = vmatprep.subr.bf16.mxu1 %v16699_v16  ;;  %v18801_v37 = vadd.f32 %v5080_v27, %v5040_v28  ;;  %v5042_v31 = vadd.f32 %v5041_v29, %v18602_v45  ;;  %5365 = vmatprep.mubr.bf16.mxu0 %v17608_v60  ;;  %v16711_v60 = vld [vmem:[%s22199_s1 + $0x28c] ss:$16 sps:$4 sm:$0xff]   ;;  %v16736_v16 = vld [vmem:[%s22199_s1 + $0x1e8] ss:$16 sps:$4 sm:$0xff]  }
 0x1a3   :  { %5406 = vmatprep.mubr.bf16.mxu1 %v17621_v0  ;;  %v5043_v40 = vpop.f32.mrf.mxu0  ;;  %v16706_v0 = vld [vmem:[%s22199_s1 + $0x88] ss:$16 sps:$4 sm:$0xff]   ;;  %v16741_v15 = vld [vmem:[%s22199_s1 + $0x3ec] ss:$16 sps:$4 sm:$0xff]  }
 0x1a4   :  { %v5084_v44 = vpop.f32.mrf.mxu1  ;;  %v18812_v46 = vadd.f32 %v5082_v30, %v5042_v31  ;;  %5336 = vmatpush1.bf16.msra.mxu0 %v16694_v20  ;;  %v16739_v20 = vld [vmem:[%s22199_s1 + $0x3e8] ss:$16 sps:$4 sm:$0xff]   ;;  %v16750_v29 = vld [vmem:[%s22199_s1 + $0x1ac] ss:$16 sps:$4 sm:$0xff]  }
 0x1a5   :  { %5377 = vmatpush1.bf16.msra.mxu1 %v16697_v21  ;;  %v5044_v38 = vpop.f32.mrf.mxu0  ;;  %5337 = vmatprep.subr.bf16.mxu0 %v16702_v33  ;;  %v16744_v21 = vld [vmem:[%s22199_s1 + $0x1cc] ss:$16 sps:$4 sm:$0xff]   ;;  %v16742_v27 = vld [vmem:[%s22199_s1 + $0x1c8] ss:$16 sps:$4 sm:$0xff]  }
 0x1a6   :  { %v5085_v45 = vpop.f32.mrf.mxu1  ;;  %5378 = vmatprep.subr.bf16.mxu1 %v16705_v34  ;;  %v16745_v28 = vld [vmem:[%s22199_s1 + $0x3c8] ss:$16 sps:$4 sm:$0xff]   ;;  %v16753_v30 = vld [vmem:[%s22199_s1 + $0x3ac] ss:$16 sps:$4 sm:$0xff]  }
 0x1a7   :  { %v16748_v33 = vld [vmem:[%s22199_s1 + $0x1a8] ss:$16 sps:$4 sm:$0xff]   ;;  %v16756_v31 = vld [vmem:[%s22199_s1 + $0x18c] ss:$16 sps:$4 sm:$0xff]  }
 0x1a8   :  { %5338 = vmatpush1.bf16.msra.mxu0 %v16700_v36  ;;  %v16751_v34 = vld [vmem:[%s22199_s1 + $0x3a8] ss:$16 sps:$4 sm:$0xff]   ;;  %v16759_v36 = vld [vmem:[%s22199_s1 + $0x38c] ss:$16 sps:$4 sm:$0xff]  }
 0x1a9   :  { %5379 = vmatpush1.bf16.msra.mxu1 %v16703_v32  ;;  %5339 = vmatprep.subr.bf16.mxu0 %v16708_v47  ;;  %v16754_v32 = vld [vmem:[%s22199_s1 + $0x188] ss:$16 sps:$4 sm:$0xff]   ;;  %v16762_v44 = vld [vmem:[%s22199_s1 + $0x16c] ss:$16 sps:$4 sm:$0xff]  }
 0x1aa   :  { %5380 = vmatprep.subr.bf16.mxu1 %v16711_v60  ;;  %v16757_v40 = vld [vmem:[%s22199_s1 + $0x388] ss:$16 sps:$4 sm:$0xff]   ;;  %v16765_v38 = vld [vmem:[%s22199_s1 + $0x36c] ss:$16 sps:$4 sm:$0xff]  }
 0x1ab   :  { %v16760_v45 = vld [vmem:[%s22199_s1 + $0x168] ss:$16 sps:$4 sm:$0xff]   ;;  %v16768_v60 = vld [vmem:[%s22199_s1 + $0x14c] ss:$16 sps:$4 sm:$0xff]  }
 0x1ac   :  { %5340 = vmatpush1.bf16.msra.mxu0 %v16706_v0  ;;  %v16763_v47 = vld [vmem:[%s22199_s1 + $0x368] ss:$16 sps:$4 sm:$0xff]   ;;  %v16771_v0 = vld [vmem:[%s22199_s1 + $0x34c] ss:$16 sps:$4 sm:$0xff]  }
 0x1ad   :  { %5381 = vmatpush1.bf16.msra.mxu1 %v16709_v50  ;;  %5341 = vmatprep.subr.bf16.mxu0 %v16714_v51  ;;  %v16766_v50 = vld [vmem:[%s22199_s1 + $0x148] ss:$16 sps:$4 sm:$0xff]  }
 0x1ae   :  { %5382 = vmatprep.subr.bf16.mxu1 %v16717_v52  ;;  %v16769_v51 = vld [vmem:[%s22199_s1 + $0x348] ss:$16 sps:$4 sm:$0xff]   ;;  %v16774_v52 = vld [vmem:[%s22199_s1 + $0x12c] ss:$16 sps:$4 sm:$0xff]  }
 0x1b0   :  { %5342 = vmatpush1.bf16.msra.mxu0 %v16712_v35  ;;  %v16777_v35 = vld [vmem:[%s22199_s1 + $0x32c] ss:$16 sps:$4 sm:$0xff]  }
 0x1b1   :  { %5383 = vmatpush1.bf16.msra.mxu1 %v16715_v55  ;;  %5343 = vmatprep.subr.bf16.mxu0 %v16720_v56  ;;  %v16772_v55 = vld [vmem:[%s22199_s1 + $0x128] ss:$16 sps:$4 sm:$0xff]  }
 0x1b2   :  { %5384 = vmatprep.subr.bf16.mxu1 %v16723_v63  ;;  %v16775_v56 = vld [vmem:[%s22199_s1 + $0x328] ss:$16 sps:$4 sm:$0xff]   ;;  %v16780_v63 = vld [vmem:[%s22199_s1 + $0x10c] ss:$16 sps:$4 sm:$0xff]  }
 0x1b4   :  { %5344 = vmatpush1.bf16.msra.mxu0 %v16718_v58  ;;  %v16783_v58 = vld [vmem:[%s22199_s1 + $0x30c] ss:$16 sps:$4 sm:$0xff]  }
 0x1b5   :  { %5385 = vmatpush1.bf16.msra.mxu1 %v16721_v61  ;;  %5345 = vmatprep.subr.bf16.mxu0 %v16726_v62  ;;  %v16778_v61 = vld [vmem:[%s22199_s1 + $0x108] ss:$16 sps:$4 sm:$0xff]  }
 0x1b6   :  { %5386 = vmatprep.subr.bf16.mxu1 %v16729_v1  ;;  %v16781_v62 = vld [vmem:[%s22199_s1 + $0x308] ss:$16 sps:$4 sm:$0xff]   ;;  %v16786_v1 = vld [vmem:[%s22199_s1 + $0x4ec] ss:$16 sps:$4 sm:$0xff]  }
 0x1b8   :  { %5346 = vmatpush1.bf16.msra.mxu0 %v16724_v2  ;;  %v16789_v2 = vld [vmem:[%s22199_s1 + $0x6ec] ss:$16 sps:$4 sm:$0xff]  }
 0x1b9   :  { %5387 = vmatpush1.bf16.msra.mxu1 %v16727_v7  ;;  %5347 = vmatprep.subr.bf16.mxu0 %v16732_v8  ;;  %v16784_v7 = vld [vmem:[%s22199_s1 + $0x4e8] ss:$16 sps:$4 sm:$0xff]  }
 0x1ba   :  { %5388 = vmatprep.subr.bf16.mxu1 %v16735_v4  ;;  %v16787_v8 = vld [vmem:[%s22199_s1 + $0x6e8] ss:$16 sps:$4 sm:$0xff]   ;;  %v16792_v4 = vld [vmem:[%s22199_s1 + $0x4cc] ss:$16 sps:$4 sm:$0xff]  }
 0x1bc   :  { %5348 = vmatpush1.bf16.msra.mxu0 %v16730_v49  ;;  %v16795_v49 = vld [vmem:[%s22199_s1 + $0x6cc] ss:$16 sps:$4 sm:$0xff]  }
 0x1bd   :  { %5389 = vmatpush1.bf16.msra.mxu1 %v16733_v57  ;;  %5349 = vmatprep.subr.bf16.mxu0 %v16738_v9 }
 0x1be   :  { %5390 = vmatprep.subr.bf16.mxu1 %v16741_v15 }
 0x1c0   :  { %5350 = vmatpush2.bf16.msra.mxu0 %v16736_v16  ;;  %v16790_v16 = vld [vmem:[%s22199_s1 + $0x4c8] ss:$16 sps:$4 sm:$0xff]  }
 0x1c1   :  { %5391 = vmatpush2.bf16.msra.mxu1 %v16739_v20  ;;  %5351 = vmatprep.subr.bf16.mxu0 %v16744_v21  ;;  %v16793_v20 = vld [vmem:[%s22199_s1 + $0x6c8] ss:$16 sps:$4 sm:$0xff]  }
 0x1c2   :  { %5392 = vmatprep.subr.bf16.mxu1 %v16747_v24 }
 0x1c4   :  { %5352 = vmatpush2.bf16.msra.mxu0 %v16742_v27 }
 0x1c5   :  { %5393 = vmatpush2.bf16.msra.mxu1 %v16745_v28  ;;  %5353 = vmatprep.subr.bf16.mxu0 %v16750_v29 }
 0x1c6   :  { %5394 = vmatprep.subr.bf16.mxu1 %v16753_v30 }
 0x1c8   :  { %5354 = vmatpush2.bf16.msra.mxu0 %v16748_v33  ;;  %v16796_v33 = vld [vmem:[%s22199_s1 + $0x4a8] ss:$16 sps:$4 sm:$0xff]  }
 0x1c9   :  { %5395 = vmatpush2.bf16.msra.mxu1 %v16751_v34  ;;  %5355 = vmatprep.subr.bf16.mxu0 %v16756_v31  ;;  %v16799_v34 = vld [vmem:[%s22199_s1 + $0x6a8] ss:$16 sps:$4 sm:$0xff]  }
 0x1ca   :  { %5396 = vmatprep.subr.bf16.mxu1 %v16759_v36  ;;  %v16802_v36 = vld [vmem:[%s22199_s1 + $0x488] ss:$16 sps:$4 sm:$0xff]  }
 0x1cc   :  { %5356 = vmatpush2.bf16.msra.mxu0 %v16754_v32  ;;  %v16805_v32 = vld [vmem:[%s22199_s1 + $0x688] ss:$16 sps:$4 sm:$0xff]  }
 0x1cd   :  { %5397 = vmatpush2.bf16.msra.mxu1 %v16757_v40  ;;  %5357 = vmatprep.subr.bf16.mxu0 %v16762_v44  ;;  %v16810_v40 = vld [vmem:[%s22199_s1 + $0x46c] ss:$16 sps:$4 sm:$0xff]  }
 0x1ce   :  { %5398 = vmatprep.subr.bf16.mxu1 %v16765_v38  ;;  %v16813_v44 = vld [vmem:[%s22199_s1 + $0x66c] ss:$16 sps:$4 sm:$0xff]   ;;  %v16808_v38 = vld [vmem:[%s22199_s1 + $0x468] ss:$16 sps:$4 sm:$0xff]  }
 0x1d0   :  { %5358 = vmatpush2.bf16.msra.mxu0 %v16760_v45  ;;  %v16811_v45 = vld [vmem:[%s22199_s1 + $0x668] ss:$16 sps:$4 sm:$0xff]  }
 0x1d1   :  { %5399 = vmatpush2.bf16.msra.mxu1 %v16763_v47  ;;  %5359 = vmatprep.subr.bf16.mxu0 %v16768_v60  ;;  %v16816_v47 = vld [vmem:[%s22199_s1 + $0x44c] ss:$16 sps:$4 sm:$0xff]  }
 0x1d2   :  { %5400 = vmatprep.subr.bf16.mxu1 %v16771_v0  ;;  %v16819_v60 = vld [vmem:[%s22199_s1 + $0x64c] ss:$16 sps:$4 sm:$0xff]   ;;  %v16814_v0 = vld [vmem:[%s22199_s1 + $0x448] ss:$16 sps:$4 sm:$0xff]  }
 0x1d4   :  { %5360 = vmatpush2.bf16.msra.mxu0 %v16766_v50  ;;  %v16817_v50 = vld [vmem:[%s22199_s1 + $0x648] ss:$16 sps:$4 sm:$0xff]  }
 0x1d5   :  { %5401 = vmatpush2.bf16.msra.mxu1 %v16769_v51  ;;  %5361 = vmatprep.subr.bf16.mxu0 %v16774_v52  ;;  %v16822_v51 = vld [vmem:[%s22199_s1 + $0x42c] ss:$16 sps:$4 sm:$0xff]  }
 0x1d6   :  { %5402 = vmatprep.subr.bf16.mxu1 %v16777_v35  ;;  %v16825_v52 = vld [vmem:[%s22199_s1 + $0x62c] ss:$16 sps:$4 sm:$0xff]   ;;  %v16820_v35 = vld [vmem:[%s22199_s1 + $0x428] ss:$16 sps:$4 sm:$0xff]  }
 0x1d8   :  { %5362 = vmatpush2.bf16.msra.mxu0 %v16772_v55  ;;  %v16823_v55 = vld [vmem:[%s22199_s1 + $0x628] ss:$16 sps:$4 sm:$0xff]  }
 0x1d9   :  { %5403 = vmatpush2.bf16.msra.mxu1 %v16775_v56  ;;  %5363 = vmatprep.subr.bf16.mxu0 %v16780_v63  ;;  %v16828_v56 = vld [vmem:[%s22199_s1 + $0x40c] ss:$16 sps:$4 sm:$0xff]  }
 0x1da   :  { %5404 = vmatprep.subr.bf16.mxu1 %v16783_v58  ;;  %v16831_v63 = vld [vmem:[%s22199_s1 + $0x60c] ss:$16 sps:$4 sm:$0xff]   ;;  %v16826_v58 = vld [vmem:[%s22199_s1 + $0x408] ss:$16 sps:$4 sm:$0xff]  }
 0x1dc   :  { %5364 = vmatpush2.bf16.msra.mxu0 %v16778_v61  ;;  %v16829_v61 = vld [vmem:[%s22199_s1 + $0x608] ss:$16 sps:$4 sm:$0xff]  }
 0x1dd   :  { %5405 = vmatpush2.bf16.msra.mxu1 %v16781_v62  ;;  %5415 = vmatprep.subr.bf16.mxu0 %v16786_v1  ;;  %v16834_v62 = vld [vmem:[%s22199_s1 + $0x5ec] ss:$16 sps:$4 sm:$0xff]  }
 0x1de   :  { %5456 = vmatprep.subr.bf16.mxu1 %v16789_v2  ;;  %v16837_v1 = vld [vmem:[%s22199_s1 + $0x7ec] ss:$16 sps:$4 sm:$0xff]   ;;  %v16832_v2 = vld [vmem:[%s22199_s1 + $0x5e8] ss:$16 sps:$4 sm:$0xff]  }
 0x1df   :  { %v5121_v57 = vpop.f32.mrf.mxu0  ;;  %5366 = vmatmul.mubr.bf16.vlgmr.msra.gmra.mxu0 %v17658_v13  ;;  %v16798_v13 = vld [vmem:[%s22199_s1 + $0x4ac] ss:$16 sps:$4 sm:$0xff]  }
 0x1e0   :  { %v5162_v9 = vpop.f32.mrf.mxu1  ;;  %5407 = vmatmul.mubr.bf16.vlgmr.msra.gmra.mxu1 %v17674_v18  ;;  %v5122_v15 = vadd.f32 %v5121_v57, %v18801_v37  ;;  %5416 = vmatpush1.bf16.msra.mxu0 %v16784_v7  ;;  %v16801_v18 = vld [vmem:[%s22199_s1 + $0x6ac] ss:$16 sps:$4 sm:$0xff]   ;;  %v16835_v7 = vld [vmem:[%s22199_s1 + $0x7e8] ss:$16 sps:$4 sm:$0xff]  }
 0x1e1   :  { %5457 = vmatpush1.bf16.msra.mxu1 %v16787_v8  ;;  %v5123_v21 = vpop.f32.mrf.mxu0  ;;  %5417 = vmatprep.subr.bf16.mxu0 %v16792_v4  ;;  %v16840_v8 = vld [vmem:[%s22199_s1 + $0x5cc] ss:$16 sps:$4 sm:$0xff]   ;;  %v16841_v57 = vld [vmem:[%s22199_s1 + $0x7c8] ss:$16 sps:$4 sm:$0xff]  }
 0x1e2   :  { %v5164_v24 = vpop.f32.mrf.mxu1  ;;  %5458 = vmatprep.subr.bf16.mxu1 %v16795_v49  ;;  %v19003_v37 = vadd.f32 %v5162_v9, %v5122_v15  ;;  %v5124_v27 = vadd.f32 %v5123_v21, %v18812_v46  ;;  %5447 = vmatprep.mubr.bf16.mxu0 %v17670_v17  ;;  %v16804_v17 = vld [vmem:[%s22199_s1 + $0x48c] ss:$16 sps:$4 sm:$0xff]   ;;  %v16838_v49 = vld [vmem:[%s22199_s1 + $0x5c8] ss:$16 sps:$4 sm:$0xff]  }
 0x1e3   :  { %5488 = vmatprep.mubr.bf16.mxu1 %v17690_v23  ;;  %v5125_v28 = vpop.f32.mrf.mxu0  ;;  %v16807_v23 = vld [vmem:[%s22199_s1 + $0x68c] ss:$16 sps:$4 sm:$0xff]  }
 0x1e4   :  { %v5166_v29 = vpop.f32.mrf.mxu1  ;;  %v19008_v30 = vadd.f32 %v5164_v24, %v5124_v27  ;;  %5418 = vmatpush1.bf16.msra.mxu0 %v16790_v16  ;;  %v16843_v4 = vld [vmem:[%s22199_s1 + $0x7cc] ss:$16 sps:$4 sm:$0xff]   ;;  %v16844_v16 = vld [vmem:[%s22199_s1 + $0x5a8] ss:$16 sps:$4 sm:$0xff]  }
 0x1e5   :  { %5459 = vmatpush1.bf16.msra.mxu1 %v16793_v20  ;;  %v5126_v31 = vpop.f32.mrf.mxu0  ;;  %5419 = vmatprep.subr.bf16.mxu0 %v16798_v13  ;;  %v16846_v9 = vld [vmem:[%s22199_s1 + $0x5ac] ss:$16 sps:$4 sm:$0xff]   ;;  %v16847_v20 = vld [vmem:[%s22199_s1 + $0x7a8] ss:$16 sps:$4 sm:$0xff]  }
 0x1e6   :  { %v5167_v46 = vpop.f32.mrf.mxu1  ;;  %5460 = vmatprep.subr.bf16.mxu1 %v16801_v18  ;;  %v16849_v15 = vld [vmem:[%s22199_s1 + $0x7ac] ss:$16 sps:$4 sm:$0xff]   ;;  %v16850_v13 = vld [vmem:[%s22199_s1 + $0x588] ss:$16 sps:$4 sm:$0xff]  }
 0x1e7   :  { %v16852_v21 = vld [vmem:[%s22199_s1 + $0x58c] ss:$16 sps:$4 sm:$0xff]   ;;  %v16853_v18 = vld [vmem:[%s22199_s1 + $0x788] ss:$16 sps:$4 sm:$0xff]  }
 0x1e8   :  { %5420 = vmatpush1.bf16.msra.mxu0 %v16796_v33  ;;  %v16855_v24 = vld [vmem:[%s22199_s1 + $0x78c] ss:$16 sps:$4 sm:$0xff]   ;;  %v16856_v29 = vld [vmem:[%s22199_s1 + $0x568] ss:$16 sps:$4 sm:$0xff]  }
 0x1e9   :  { %5461 = vmatpush1.bf16.msra.mxu1 %v16799_v34  ;;  %5421 = vmatprep.subr.bf16.mxu0 %v16804_v17  ;;  %v16858_v27 = vld [vmem:[%s22199_s1 + $0x56c] ss:$16 sps:$4 sm:$0xff]   ;;  %v16859_v33 = vld [vmem:[%s22199_s1 + $0x768] ss:$16 sps:$4 sm:$0xff]  }
 0x1ea   :  { %5462 = vmatprep.subr.bf16.mxu1 %v16807_v23  ;;  %v16861_v28 = vld [vmem:[%s22199_s1 + $0x76c] ss:$16 sps:$4 sm:$0xff]   ;;  %v16862_v46 = vld [vmem:[%s22199_s1 + $0x548] ss:$16 sps:$4 sm:$0xff]  }
 0x1eb   :  { %v16864_v34 = vld [vmem:[%s22199_s1 + $0x54c] ss:$16 sps:$4 sm:$0xff]   ;;  %v16865_v17 = vld [vmem:[%s22199_s1 + $0x748] ss:$16 sps:$4 sm:$0xff]  }
 0x1ec   :  { %5422 = vmatpush1.bf16.msra.mxu0 %v16802_v36  ;;  %v16867_v31 = vld [vmem:[%s22199_s1 + $0x74c] ss:$16 sps:$4 sm:$0xff]  }
 0x1ed   :  { %5463 = vmatpush1.bf16.msra.mxu1 %v16805_v32  ;;  %5423 = vmatprep.subr.bf16.mxu0 %v16810_v40  ;;  %v16870_v23 = vld [vmem:[%s22199_s1 + $0x52c] ss:$16 sps:$4 sm:$0xff]   ;;  %v16868_v32 = vld [vmem:[%s22199_s1 + $0x528] ss:$16 sps:$4 sm:$0xff]  }
 0x1ee   :  { %5464 = vmatprep.subr.bf16.mxu1 %v16813_v44  ;;  %v16873_v36 = vld [vmem:[%s22199_s1 + $0x72c] ss:$16 sps:$4 sm:$0xff]   ;;  %v16871_v40 = vld [vmem:[%s22199_s1 + $0x728] ss:$16 sps:$4 sm:$0xff]  }
 0x1ef   :  { %v16876_v44 = vld [vmem:[%s22199_s1 + $0x50c] ss:$16 sps:$4 sm:$0xff]  }
 0x1f0   :  { %5424 = vmatpush1.bf16.msra.mxu0 %v16808_v38  ;;  %v16879_v38 = vld [vmem:[%s22199_s1 + $0x70c] ss:$16 sps:$4 sm:$0xff]  }
 0x1f1   :  { %5465 = vmatpush1.bf16.msra.mxu1 %v16811_v45  ;;  %5425 = vmatprep.subr.bf16.mxu0 %v16816_v47  ;;  %v16874_v45 = vld [vmem:[%s22199_s1 + $0x508] ss:$16 sps:$4 sm:$0xff]  }
 0x1f2   :  { %5466 = vmatprep.subr.bf16.mxu1 %v16819_v60  ;;  %v16877_v47 = vld [vmem:[%s22199_s1 + $0x708] ss:$16 sps:$4 sm:$0xff]   ;;  %v16882_v60 = vld [vmem:[%s22199_s1 + $0x8ec] ss:$16 sps:$4 sm:$0xff]  }
 0x1f4   :  { %5426 = vmatpush1.bf16.msra.mxu0 %v16814_v0  ;;  %v16885_v0 = vld [vmem:[%s22199_s1 + $0xaec] ss:$16 sps:$4 sm:$0xff]  }
 0x1f5   :  { %5467 = vmatpush1.bf16.msra.mxu1 %v16817_v50  ;;  %5427 = vmatprep.subr.bf16.mxu0 %v16822_v51  ;;  %v16880_v50 = vld [vmem:[%s22199_s1 + $0x8e8] ss:$16 sps:$4 sm:$0xff]  }
 0x1f6   :  { %5468 = vmatprep.subr.bf16.mxu1 %v16825_v52  ;;  %v16883_v51 = vld [vmem:[%s22199_s1 + $0xae8] ss:$16 sps:$4 sm:$0xff]   ;;  %v16888_v52 = vld [vmem:[%s22199_s1 + $0x8cc] ss:$16 sps:$4 sm:$0xff]  }
 0x1f8   :  { %5428 = vmatpush1.bf16.msra.mxu0 %v16820_v35  ;;  %v16891_v35 = vld [vmem:[%s22199_s1 + $0xacc] ss:$16 sps:$4 sm:$0xff]  }
 0x1f9   :  { %5469 = vmatpush1.bf16.msra.mxu1 %v16823_v55  ;;  %5429 = vmatprep.subr.bf16.mxu0 %v16828_v56 }
 0x1fa   :  { %5470 = vmatprep.subr.bf16.mxu1 %v16831_v63 }
 0x1fc   :  { %5430 = vmatpush1.bf16.msra.mxu0 %v16826_v58  ;;  %v16886_v58 = vld [vmem:[%s22199_s1 + $0x8c8] ss:$16 sps:$4 sm:$0xff]  }
 0x1fd   :  { %5471 = vmatpush1.bf16.msra.mxu1 %v16829_v61  ;;  %5431 = vmatprep.subr.bf16.mxu0 %v16834_v62  ;;  %v16889_v61 = vld [vmem:[%s22199_s1 + $0xac8] ss:$16 sps:$4 sm:$0xff]  }
 0x1fe   :  { %5472 = vmatprep.subr.bf16.mxu1 %v16837_v1 }
 0x200   :  { %5432 = vmatpush2.bf16.msra.mxu0 %v16832_v2 }
 0x201   :  { %5473 = vmatpush2.bf16.msra.mxu1 %v16835_v7  ;;  %5433 = vmatprep.subr.bf16.mxu0 %v16840_v8 }
 0x202   :  { %5474 = vmatprep.subr.bf16.mxu1 %v16843_v4 }
 0x204   :  { %5434 = vmatpush2.bf16.msra.mxu0 %v16838_v49  ;;  %v16892_v49 = vld [vmem:[%s22199_s1 + $0x8a8] ss:$16 sps:$4 sm:$0xff]  }
 0x205   :  { %5475 = vmatpush2.bf16.msra.mxu1 %v16841_v57  ;;  %5435 = vmatprep.subr.bf16.mxu0 %v16846_v9  ;;  %v16895_v57 = vld [vmem:[%s22199_s1 + $0xaa8] ss:$16 sps:$4 sm:$0xff]  }
 0x206   :  { %5476 = vmatprep.subr.bf16.mxu1 %v16849_v15  ;;  %v16898_v15 = vld [vmem:[%s22199_s1 + $0x888] ss:$16 sps:$4 sm:$0xff]  }
 0x208   :  { %5436 = vmatpush2.bf16.msra.mxu0 %v16844_v16  ;;  %v16901_v16 = vld [vmem:[%s22199_s1 + $0xa88] ss:$16 sps:$4 sm:$0xff]  }
 0x209   :  { %5477 = vmatpush2.bf16.msra.mxu1 %v16847_v20  ;;  %5437 = vmatprep.subr.bf16.mxu0 %v16852_v21  ;;  %v16906_v20 = vld [vmem:[%s22199_s1 + $0x86c] ss:$16 sps:$4 sm:$0xff]  }
 0x20a   :  { %5478 = vmatprep.subr.bf16.mxu1 %v16855_v24  ;;  %v16909_v21 = vld [vmem:[%s22199_s1 + $0xa6c] ss:$16 sps:$4 sm:$0xff]   ;;  %v16904_v24 = vld [vmem:[%s22199_s1 + $0x868] ss:$16 sps:$4 sm:$0xff]  }
 0x20c   :  { %5438 = vmatpush2.bf16.msra.mxu0 %v16850_v13  ;;  %v16907_v13 = vld [vmem:[%s22199_s1 + $0xa68] ss:$16 sps:$4 sm:$0xff]  }
 0x20d   :  { %5479 = vmatpush2.bf16.msra.mxu1 %v16853_v18  ;;  %5439 = vmatprep.subr.bf16.mxu0 %v16858_v27  ;;  %v16912_v18 = vld [vmem:[%s22199_s1 + $0x84c] ss:$16 sps:$4 sm:$0xff]  }
 0x20e   :  { %5480 = vmatprep.subr.bf16.mxu1 %v16861_v28  ;;  %v16915_v27 = vld [vmem:[%s22199_s1 + $0xa4c] ss:$16 sps:$4 sm:$0xff]   ;;  %v16910_v28 = vld [vmem:[%s22199_s1 + $0x848] ss:$16 sps:$4 sm:$0xff]  }
 0x210   :  { %5440 = vmatpush2.bf16.msra.mxu0 %v16856_v29  ;;  %v16913_v29 = vld [vmem:[%s22199_s1 + $0xa48] ss:$16 sps:$4 sm:$0xff]  }
 0x211   :  { %5481 = vmatpush2.bf16.msra.mxu1 %v16859_v33  ;;  %5441 = vmatprep.subr.bf16.mxu0 %v16864_v34  ;;  %v16918_v33 = vld [vmem:[%s22199_s1 + $0x82c] ss:$16 sps:$4 sm:$0xff]  }
 0x212   :  { %5482 = vmatprep.subr.bf16.mxu1 %v16867_v31  ;;  %v16921_v34 = vld [vmem:[%s22199_s1 + $0xa2c] ss:$16 sps:$4 sm:$0xff]   ;;  %v16916_v31 = vld [vmem:[%s22199_s1 + $0x828] ss:$16 sps:$4 sm:$0xff]  }
 0x214   :  { %5442 = vmatpush2.bf16.msra.mxu0 %v16862_v46  ;;  %v16919_v46 = vld [vmem:[%s22199_s1 + $0xa28] ss:$16 sps:$4 sm:$0xff]  }
 0x215   :  { %5483 = vmatpush2.bf16.msra.mxu1 %v16865_v17  ;;  %5443 = vmatprep.subr.bf16.mxu0 %v16870_v23  ;;  %v16924_v17 = vld [vmem:[%s22199_s1 + $0x80c] ss:$16 sps:$4 sm:$0xff]  }
 0x216   :  { %5484 = vmatprep.subr.bf16.mxu1 %v16873_v36  ;;  %v16927_v23 = vld [vmem:[%s22199_s1 + $0xa0c] ss:$16 sps:$4 sm:$0xff]   ;;  %v16922_v36 = vld [vmem:[%s22199_s1 + $0x808] ss:$16 sps:$4 sm:$0xff]  }
 0x218   :  { %5444 = vmatpush2.bf16.msra.mxu0 %v16868_v32  ;;  %v16925_v32 = vld [vmem:[%s22199_s1 + $0xa08] ss:$16 sps:$4 sm:$0xff]  }
 0x219   :  { %5485 = vmatpush2.bf16.msra.mxu1 %v16871_v40  ;;  %5445 = vmatprep.subr.bf16.mxu0 %v16876_v44  ;;  %v16930_v40 = vld [vmem:[%s22199_s1 + $0x9ec] ss:$16 sps:$4 sm:$0xff]  }
 0x21a   :  { %5486 = vmatprep.subr.bf16.mxu1 %v16879_v38  ;;  %v16933_v44 = vld [vmem:[%s22199_s1 + $0xbec] ss:$16 sps:$4 sm:$0xff]   ;;  %v16928_v38 = vld [vmem:[%s22199_s1 + $0x9e8] ss:$16 sps:$4 sm:$0xff]  }
 0x21c   :  { %5446 = vmatpush2.bf16.msra.mxu0 %v16874_v45  ;;  %v16931_v45 = vld [vmem:[%s22199_s1 + $0xbe8] ss:$16 sps:$4 sm:$0xff]  }
 0x21d   :  { %5487 = vmatpush2.bf16.msra.mxu1 %v16877_v47  ;;  %5497 = vmatprep.subr.bf16.mxu0 %v16882_v60  ;;  %v16936_v47 = vld [vmem:[%s22199_s1 + $0x9cc] ss:$16 sps:$4 sm:$0xff]  }
 0x21e   :  { %5538 = vmatprep.subr.bf16.mxu1 %v16885_v0  ;;  %v16939_v60 = vld [vmem:[%s22199_s1 + $0xbcc] ss:$16 sps:$4 sm:$0xff]   ;;  %v16934_v0 = vld [vmem:[%s22199_s1 + $0x9c8] ss:$16 sps:$4 sm:$0xff]  }
 0x21f   :  { %v5203_v55 = vpop.f32.mrf.mxu0  ;;  %5448 = vmatmul.mubr.bf16.vlgmr.msra.gmra.mxu0 %v17869_v26  ;;  %v16894_v26 = vld [vmem:[%s22199_s1 + $0x8ac] ss:$16 sps:$4 sm:$0xff]  }
 0x220   :  { %v5244_v56 = vpop.f32.mrf.mxu1  ;;  %5489 = vmatmul.mubr.bf16.vlgmr.msra.gmra.mxu1 %v17882_v6  ;;  %v5204_v63 = vadd.f32 %v5203_v55, %v19003_v37  ;;  %5498 = vmatpush1.bf16.msra.mxu0 %v16880_v50  ;;  %v16897_v6 = vld [vmem:[%s22199_s1 + $0xaac] ss:$16 sps:$4 sm:$0xff]   ;;  %v16937_v50 = vld [vmem:[%s22199_s1 + $0xbc8] ss:$16 sps:$4 sm:$0xff]  }
 0x221   :  { %5539 = vmatpush1.bf16.msra.mxu1 %v16883_v51  ;;  %v5205_v62 = vpop.f32.mrf.mxu0  ;;  %5499 = vmatprep.subr.bf16.mxu0 %v16888_v52  ;;  %v16942_v51 = vld [vmem:[%s22199_s1 + $0x9ac] ss:$16 sps:$4 sm:$0xff]   ;;  %v16943_v55 = vld [vmem:[%s22199_s1 + $0xba8] ss:$16 sps:$4 sm:$0xff]  }
 0x222   :  { %v5246_v1 = vpop.f32.mrf.mxu1  ;;  %5540 = vmatprep.subr.bf16.mxu1 %v16891_v35  ;;  %v19205_v37 = vadd.f32 %v5244_v56, %v5204_v63  ;;  %v5206_v2 = vadd.f32 %v5205_v62, %v19008_v30  ;;  %5529 = vmatprep.mubr.bf16.mxu0 %v17922_v41  ;;  %v16900_v41 = vld [vmem:[%s22199_s1 + $0x88c] ss:$16 sps:$4 sm:$0xff]   ;;  %v16940_v35 = vld [vmem:[%s22199_s1 + $0x9a8] ss:$16 sps:$4 sm:$0xff]  }
 0x223   :  { %5570 = vmatprep.mubr.bf16.mxu1 %v17927_v42  ;;  %v5207_v7 = vpop.f32.mrf.mxu0  ;;  %v16903_v42 = vld [vmem:[%s22199_s1 + $0xa8c] ss:$16 sps:$4 sm:$0xff]  }
 0x224   :  { %v5248_v8 = vpop.f32.mrf.mxu1  ;;  %v19210_v4 = vadd.f32 %v5246_v1, %v5206_v2  ;;  %5500 = vmatpush1.bf16.msra.mxu0 %v16886_v58  ;;  %v16945_v52 = vld [vmem:[%s22199_s1 + $0xbac] ss:$16 sps:$4 sm:$0xff]   ;;  %v16946_v58 = vld [vmem:[%s22199_s1 + $0x988] ss:$16 sps:$4 sm:$0xff]  }
 0x225   :  { %5541 = vmatpush1.bf16.msra.mxu1 %v16889_v61  ;;  %v5208_v9 = vpop.f32.mrf.mxu0  ;;  %5501 = vmatprep.subr.bf16.mxu0 %v16894_v26  ;;  %v16948_v56 = vld [vmem:[%s22199_s1 + $0x98c] ss:$16 sps:$4 sm:$0xff]   ;;  %v16949_v61 = vld [vmem:[%s22199_s1 + $0xb88] ss:$16 sps:$4 sm:$0xff]  }
 0x226   :  { %v5249_v30 = vpop.f32.mrf.mxu1  ;;  %5542 = vmatprep.subr.bf16.mxu1 %v16897_v6  ;;  %v16951_v63 = vld [vmem:[%s22199_s1 + $0xb8c] ss:$16 sps:$4 sm:$0xff]   ;;  %v16952_v26 = vld [vmem:[%s22199_s1 + $0x968] ss:$16 sps:$4 sm:$0xff]  }
 0x227   :  { %v16954_v62 = vld [vmem:[%s22199_s1 + $0x96c] ss:$16 sps:$4 sm:$0xff]   ;;  %v16955_v6 = vld [vmem:[%s22199_s1 + $0xb68] ss:$16 sps:$4 sm:$0xff]  }
 0x228   :  { %5502 = vmatpush1.bf16.msra.mxu0 %v16892_v49  ;;  %v16957_v1 = vld [vmem:[%s22199_s1 + $0xb6c] ss:$16 sps:$4 sm:$0xff]   ;;  %v16958_v8 = vld [vmem:[%s22199_s1 + $0x948] ss:$16 sps:$4 sm:$0xff]  }
 0x229   :  { %5543 = vmatpush1.bf16.msra.mxu1 %v16895_v57  ;;  %5503 = vmatprep.subr.bf16.mxu0 %v16900_v41  ;;  %v16960_v2 = vld [vmem:[%s22199_s1 + $0x94c] ss:$16 sps:$4 sm:$0xff]   ;;  %v16961_v49 = vld [vmem:[%s22199_s1 + $0xb48] ss:$16 sps:$4 sm:$0xff]  }
 0x22a   :  { %5544 = vmatprep.subr.bf16.mxu1 %v16903_v42  ;;  %v16963_v7 = vld [vmem:[%s22199_s1 + $0xb4c] ss:$16 sps:$4 sm:$0xff]   ;;  %v16964_v30 = vld [vmem:[%s22199_s1 + $0x928] ss:$16 sps:$4 sm:$0xff]  }
 0x22b   :  { %v16966_v57 = vld [vmem:[%s22199_s1 + $0x92c] ss:$16 sps:$4 sm:$0xff]   ;;  %v16967_v41 = vld [vmem:[%s22199_s1 + $0xb28] ss:$16 sps:$4 sm:$0xff]  }
 0x22c   :  { %5504 = vmatpush1.bf16.msra.mxu0 %v16898_v15  ;;  %v16969_v9 = vld [vmem:[%s22199_s1 + $0xb2c] ss:$16 sps:$4 sm:$0xff]  }
 0x22d   :  { %5545 = vmatpush1.bf16.msra.mxu1 %v16901_v16  ;;  %5505 = vmatprep.subr.bf16.mxu0 %v16906_v20  ;;  %v16972_v42 = vld [vmem:[%s22199_s1 + $0x90c] ss:$16 sps:$4 sm:$0xff]   ;;  %v16970_v16 = vld [vmem:[%s22199_s1 + $0x908] ss:$16 sps:$4 sm:$0xff]  }
 0x22e   :  { %5546 = vmatprep.subr.bf16.mxu1 %v16909_v21  ;;  %v16975_v15 = vld [vmem:[%s22199_s1 + $0xb0c] ss:$16 sps:$4 sm:$0xff]   ;;  %v16973_v20 = vld [vmem:[%s22199_s1 + $0xb08] ss:$16 sps:$4 sm:$0xff]  }
 0x22f   :  { %v16978_v21 = vld [vmem:[%s22199_s1 + $0xcec] ss:$16 sps:$4 sm:$0xff]  }
 0x230   :  { %5506 = vmatpush1.bf16.msra.mxu0 %v16904_v24  ;;  %v16981_v24 = vld [vmem:[%s22199_s1 + $0xeec] ss:$16 sps:$4 sm:$0xff]  }
 0x231   :  { %5547 = vmatpush1.bf16.msra.mxu1 %v16907_v13  ;;  %5507 = vmatprep.subr.bf16.mxu0 %v16912_v18  ;;  %v16976_v13 = vld [vmem:[%s22199_s1 + $0xce8] ss:$16 sps:$4 sm:$0xff]  }
 0x232   :  { %5548 = vmatprep.subr.bf16.mxu1 %v16915_v27  ;;  %v16979_v18 = vld [vmem:[%s22199_s1 + $0xee8] ss:$16 sps:$4 sm:$0xff]   ;;  %v16984_v27 = vld [vmem:[%s22199_s1 + $0xccc] ss:$16 sps:$4 sm:$0xff]  }
 0x234   :  { %5508 = vmatpush1.bf16.msra.mxu0 %v16910_v28  ;;  %v16987_v28 = vld [vmem:[%s22199_s1 + $0xecc] ss:$16 sps:$4 sm:$0xff]  }
 0x235   :  { %5549 = vmatpush1.bf16.msra.mxu1 %v16913_v29  ;;  %5509 = vmatprep.subr.bf16.mxu0 %v16918_v33 }
 0x236   :  { %5550 = vmatprep.subr.bf16.mxu1 %v16921_v34 }
 0x238   :  { %5510 = vmatpush1.bf16.msra.mxu0 %v16916_v31  ;;  %v16982_v31 = vld [vmem:[%s22199_s1 + $0xcc8] ss:$16 sps:$4 sm:$0xff]  }
 0x239   :  { %5551 = vmatpush1.bf16.msra.mxu1 %v16919_v46  ;;  %5511 = vmatprep.subr.bf16.mxu0 %v16924_v17  ;;  %v16985_v46 = vld [vmem:[%s22199_s1 + $0xec8] ss:$16 sps:$4 sm:$0xff]  }
 0x23a   :  { %5552 = vmatprep.subr.bf16.mxu1 %v16927_v23 }
 0x23c   :  { %5512 = vmatpush1.bf16.msra.mxu0 %v16922_v36 }
 0x23d   :  { %5553 = vmatpush1.bf16.msra.mxu1 %v16925_v32  ;;  %5513 = vmatprep.subr.bf16.mxu0 %v16930_v40 }
 0x23e   :  { %5554 = vmatprep.subr.bf16.mxu1 %v16933_v44 }
 0x240   :  { %5514 = vmatpush2.bf16.msra.mxu0 %v16928_v38  ;;  %v16988_v38 = vld [vmem:[%s22199_s1 + $0xca8] ss:$16 sps:$4 sm:$0xff]  }
 0x241   :  { %5555 = vmatpush2.bf16.msra.mxu1 %v16931_v45  ;;  %5515 = vmatprep.subr.bf16.mxu0 %v16936_v47  ;;  %v16991_v45 = vld [vmem:[%s22199_s1 + $0xea8] ss:$16 sps:$4 sm:$0xff]  }
 0x242   :  { %5556 = vmatprep.subr.bf16.mxu1 %v16939_v60  ;;  %v16994_v60 = vld [vmem:[%s22199_s1 + $0xc88] ss:$16 sps:$4 sm:$0xff]  }
 0x244   :  { %5516 = vmatpush2.bf16.msra.mxu0 %v16934_v0  ;;  %v16997_v0 = vld [vmem:[%s22199_s1 + $0xe88] ss:$16 sps:$4 sm:$0xff]  }
 0x245   :  { %5557 = vmatpush2.bf16.msra.mxu1 %v16937_v50  ;;  %5517 = vmatprep.subr.bf16.mxu0 %v16942_v51  ;;  %v17002_v50 = vld [vmem:[%s22199_s1 + $0xc6c] ss:$16 sps:$4 sm:$0xff]  }
 0x246   :  { %5558 = vmatprep.subr.bf16.mxu1 %v16945_v52  ;;  %v17005_v51 = vld [vmem:[%s22199_s1 + $0xe6c] ss:$16 sps:$4 sm:$0xff]   ;;  %v17000_v52 = vld [vmem:[%s22199_s1 + $0xc68] ss:$16 sps:$4 sm:$0xff]  }
 0x248   :  { %5518 = vmatpush2.bf16.msra.mxu0 %v16940_v35  ;;  %v17003_v35 = vld [vmem:[%s22199_s1 + $0xe68] ss:$16 sps:$4 sm:$0xff]  }
 0x249   :  { %5559 = vmatpush2.bf16.msra.mxu1 %v16943_v55  ;;  %5519 = vmatprep.subr.bf16.mxu0 %v16948_v56  ;;  %v17008_v55 = vld [vmem:[%s22199_s1 + $0xc4c] ss:$16 sps:$4 sm:$0xff]  }
 0x24a   :  { %5560 = vmatprep.subr.bf16.mxu1 %v16951_v63  ;;  %v17011_v56 = vld [vmem:[%s22199_s1 + $0xe4c] ss:$16 sps:$4 sm:$0xff]   ;;  %v17006_v63 = vld [vmem:[%s22199_s1 + $0xc48] ss:$16 sps:$4 sm:$0xff]  }
 0x24c   :  { %5520 = vmatpush2.bf16.msra.mxu0 %v16946_v58  ;;  %v17009_v58 = vld [vmem:[%s22199_s1 + $0xe48] ss:$16 sps:$4 sm:$0xff]  }
 0x24d   :  { %5561 = vmatpush2.bf16.msra.mxu1 %v16949_v61  ;;  %5521 = vmatprep.subr.bf16.mxu0 %v16954_v62  ;;  %v17014_v61 = vld [vmem:[%s22199_s1 + $0xc2c] ss:$16 sps:$4 sm:$0xff]  }
 0x24e   :  { %5562 = vmatprep.subr.bf16.mxu1 %v16957_v1  ;;  %v17017_v62 = vld [vmem:[%s22199_s1 + $0xe2c] ss:$16 sps:$4 sm:$0xff]   ;;  %v17012_v1 = vld [vmem:[%s22199_s1 + $0xc28] ss:$16 sps:$4 sm:$0xff]  }
 0x250   :  { %5522 = vmatpush2.bf16.msra.mxu0 %v16952_v26  ;;  %v17015_v26 = vld [vmem:[%s22199_s1 + $0xe28] ss:$16 sps:$4 sm:$0xff]  }
 0x251   :  { %5563 = vmatpush2.bf16.msra.mxu1 %v16955_v6  ;;  %5523 = vmatprep.subr.bf16.mxu0 %v16960_v2  ;;  %v17020_v6 = vld [vmem:[%s22199_s1 + $0xc0c] ss:$16 sps:$4 sm:$0xff]  }
 0x252   :  { %5564 = vmatprep.subr.bf16.mxu1 %v16963_v7  ;;  %v17023_v2 = vld [vmem:[%s22199_s1 + $0xe0c] ss:$16 sps:$4 sm:$0xff]   ;;  %v17018_v7 = vld [vmem:[%s22199_s1 + $0xc08] ss:$16 sps:$4 sm:$0xff]  }
 0x254   :  { %5524 = vmatpush2.bf16.msra.mxu0 %v16958_v8  ;;  %v17021_v8 = vld [vmem:[%s22199_s1 + $0xe08] ss:$16 sps:$4 sm:$0xff]  }
 0x255   :  { %5565 = vmatpush2.bf16.msra.mxu1 %v16961_v49  ;;  %5525 = vmatprep.subr.bf16.mxu0 %v16966_v57  ;;  %v17026_v49 = vld [vmem:[%s22199_s1 + $0xdec] ss:$16 sps:$4 sm:$0xff]  }
 0x256   :  { %5566 = vmatprep.subr.bf16.mxu1 %v16969_v9  ;;  %v17029_v57 = vld [vmem:[%s22199_s1 + $0xfec] ss:$16 sps:$4 sm:$0xff]   ;;  %v17024_v9 = vld [vmem:[%s22199_s1 + $0xde8] ss:$16 sps:$4 sm:$0xff]  }
 0x258   :  { %5526 = vmatpush2.bf16.msra.mxu0 %v16964_v30  ;;  %v17027_v30 = vld [vmem:[%s22199_s1 + $0xfe8] ss:$16 sps:$4 sm:$0xff]  }
 0x259   :  { %5567 = vmatpush2.bf16.msra.mxu1 %v16967_v41  ;;  %5527 = vmatprep.subr.bf16.mxu0 %v16972_v42  ;;  %v17032_v41 = vld [vmem:[%s22199_s1 + $0xdcc] ss:$16 sps:$4 sm:$0xff]  }
 0x25a   :  { %5568 = vmatprep.subr.bf16.mxu1 %v16975_v15  ;;  %v17035_v42 = vld [vmem:[%s22199_s1 + $0xfcc] ss:$16 sps:$4 sm:$0xff]   ;;  %v17030_v15 = vld [vmem:[%s22199_s1 + $0xdc8] ss:$16 sps:$4 sm:$0xff]  }
 0x25c   :  { %5528 = vmatpush2.bf16.msra.mxu0 %v16970_v16  ;;  %v17033_v16 = vld [vmem:[%s22199_s1 + $0xfc8] ss:$16 sps:$4 sm:$0xff]  }
 0x25d   :  { %5569 = vmatpush2.bf16.msra.mxu1 %v16973_v20  ;;  %5579 = vmatprep.subr.bf16.mxu0 %v16978_v21  ;;  %v17038_v20 = vld [vmem:[%s22199_s1 + $0xdac] ss:$16 sps:$4 sm:$0xff]  }
 0x25e   :  { %5620 = vmatprep.subr.bf16.mxu1 %v16981_v24  ;;  %v17041_v21 = vld [vmem:[%s22199_s1 + $0xfac] ss:$16 sps:$4 sm:$0xff]   ;;  %v17036_v24 = vld [vmem:[%s22199_s1 + $0xda8] ss:$16 sps:$4 sm:$0xff]  }
 0x25f   :  { %v5285_v29 = vpop.f32.mrf.mxu0  ;;  %5530 = vmatmul.mubr.bf16.vlgmr.msra.gmra.mxu0 %v18095_v48  ;;  %v16990_v48 = vld [vmem:[%s22199_s1 + $0xcac] ss:$16 sps:$4 sm:$0xff]  }
 0x260   :  { %v5326_v33 = vpop.f32.mrf.mxu1  ;;  %5571 = vmatmul.mubr.bf16.vlgmr.msra.gmra.mxu1 %v18114_v54  ;;  %v5286_v34 = vadd.f32 %v5285_v29, %v19205_v37  ;;  %5580 = vmatpush1.bf16.msra.mxu0 %v16976_v13  ;;  %v16993_v54 = vld [vmem:[%s22199_s1 + $0xeac] ss:$16 sps:$4 sm:$0xff]   ;;  %v17039_v13 = vld [vmem:[%s22199_s1 + $0xfa8] ss:$16 sps:$4 sm:$0xff]  }
 0x261   :  { %5621 = vmatpush1.bf16.msra.mxu1 %v16979_v18  ;;  %v5287_v17 = vpop.f32.mrf.mxu0  ;;  %5581 = vmatprep.subr.bf16.mxu0 %v16984_v27  ;;  %v17044_v18 = vld [vmem:[%s22199_s1 + $0xd8c] ss:$16 sps:$4 sm:$0xff]   ;;  %v17045_v29 = vld [vmem:[%s22199_s1 + $0xf88] ss:$16 sps:$4 sm:$0xff]  }
 0x262   :  { %v5328_v23 = vpop.f32.mrf.mxu1  ;;  %5622 = vmatprep.subr.bf16.mxu1 %v16987_v28  ;;  %v19407_v37 = vadd.f32 %v5326_v33, %v5286_v34  ;;  %v5288_v36 = vadd.f32 %v5287_v17, %v19210_v4  ;;  %5611 = vmatprep.mubr.bf16.mxu0 %v18110_v53  ;;  %v16996_v53 = vld [vmem:[%s22199_s1 + $0xc8c] ss:$16 sps:$4 sm:$0xff]   ;;  %v17042_v28 = vld [vmem:[%s22199_s1 + $0xd88] ss:$16 sps:$4 sm:$0xff]  }
 0x263   :  { %5652 = vmatprep.mubr.bf16.mxu1 %v18130_v59  ;;  %v5289_v32 = vpop.f32.mrf.mxu0  ;;  %v16999_v59 = vld [vmem:[%s22199_s1 + $0xe8c] ss:$16 sps:$4 sm:$0xff]  }
 0x264   :  { %v5330_v40 = vpop.f32.mrf.mxu1  ;;  %v19412_v44 = vadd.f32 %v5328_v23, %v5288_v36  ;;  %5582 = vmatpush1.bf16.msra.mxu0 %v16982_v31  ;;  %v17047_v27 = vld [vmem:[%s22199_s1 + $0xf8c] ss:$16 sps:$4 sm:$0xff]   ;;  %v17048_v31 = vld [vmem:[%s22199_s1 + $0xd68] ss:$16 sps:$4 sm:$0xff]  }
 0x265   :  { %5623 = vmatpush1.bf16.msra.mxu1 %v16985_v46  ;;  %v5290_v47 = vpop.f32.mrf.mxu0  ;;  %5583 = vmatprep.subr.bf16.mxu0 %v16990_v48  ;;  %v17050_v33 = vld [vmem:[%s22199_s1 + $0xd6c] ss:$16 sps:$4 sm:$0xff]   ;;  %v17051_v46 = vld [vmem:[%s22199_s1 + $0xf68] ss:$16 sps:$4 sm:$0xff]  }
 0x266   :  { %v5331_v4 = vpop.f32.mrf.mxu1  ;;  %5624 = vmatprep.subr.bf16.mxu1 %v16993_v54  ;;  %v17053_v34 = vld [vmem:[%s22199_s1 + $0xf6c] ss:$16 sps:$4 sm:$0xff]   ;;  %v17054_v48 = vld [vmem:[%s22199_s1 + $0xd48] ss:$16 sps:$4 sm:$0xff]  }
 0x267   :  { %v17056_v17 = vld [vmem:[%s22199_s1 + $0xd4c] ss:$16 sps:$4 sm:$0xff]   ;;  %v17057_v54 = vld [vmem:[%s22199_s1 + $0xf48] ss:$16 sps:$4 sm:$0xff]  }
 0x268   :  { %5584 = vmatpush1.bf16.msra.mxu0 %v16988_v38  ;;  %v17059_v23 = vld [vmem:[%s22199_s1 + $0xf4c] ss:$16 sps:$4 sm:$0xff]   ;;  %v17060_v40 = vld [vmem:[%s22199_s1 + $0xd28] ss:$16 sps:$4 sm:$0xff]  }
 0x269   :  { %5625 = vmatpush1.bf16.msra.mxu1 %v16991_v45  ;;  %5585 = vmatprep.subr.bf16.mxu0 %v16996_v53  ;;  %v17062_v36 = vld [vmem:[%s22199_s1 + $0xd2c] ss:$16 sps:$4 sm:$0xff]   ;;  %v17063_v38 = vld [vmem:[%s22199_s1 + $0xf28] ss:$16 sps:$4 sm:$0xff]  }
 0x26a   :  { %5626 = vmatprep.subr.bf16.mxu1 %v16999_v59  ;;  %v17065_v32 = vld [vmem:[%s22199_s1 + $0xf2c] ss:$16 sps:$4 sm:$0xff]   ;;  %v17066_v4 = vld [vmem:[%s22199_s1 + $0xd08] ss:$16 sps:$4 sm:$0xff]  }
 0x26b   :  { %v17068_v45 = vld [vmem:[%s22199_s1 + $0xd0c] ss:$16 sps:$4 sm:$0xff]   ;;  %v17069_v53 = vld [vmem:[%s22199_s1 + $0xf08] ss:$16 sps:$4 sm:$0xff]  }
 0x26c   :  { %5586 = vmatpush1.bf16.msra.mxu0 %v16994_v60  ;;  %v17071_v47 = vld [vmem:[%s22199_s1 + $0xf0c] ss:$16 sps:$4 sm:$0xff]  }
 0x26d   :  { %5627 = vmatpush1.bf16.msra.mxu1 %v16997_v0  ;;  %5587 = vmatprep.subr.bf16.mxu0 %v17002_v50  ;;  %v17074_v59 = vld [vmem:[%s22199_s1 + $0x10ec] ss:$16 sps:$4 sm:$0xff]   ;;  %v17072_v0 = vld [vmem:[%s22199_s1 + $0x10e8] ss:$16 sps:$4 sm:$0xff]  }
 0x26e   :  { %5628 = vmatprep.subr.bf16.mxu1 %v17005_v51  ;;  %v17077_v60 = vld [vmem:[%s22199_s1 + $0x12ec] ss:$16 sps:$4 sm:$0xff]   ;;  %v17075_v50 = vld [vmem:[%s22199_s1 + $0x12e8] ss:$16 sps:$4 sm:$0xff]  }
 0x26f   :  { %v17080_v51 = vld [vmem:[%s22199_s1 + $0x10cc] ss:$16 sps:$4 sm:$0xff]  }
 0x270   :  { %5588 = vmatpush1.bf16.msra.mxu0 %v17000_v52  ;;  %v17083_v52 = vld [vmem:[%s22199_s1 + $0x12cc] ss:$16 sps:$4 sm:$0xff]  }
 0x271   :  { %5629 = vmatpush1.bf16.msra.mxu1 %v17003_v35  ;;  %5589 = vmatprep.subr.bf16.mxu0 %v17008_v55 }
 0x272   :  { %5630 = vmatprep.subr.bf16.mxu1 %v17011_v56 }
 0x274   :  { %5590 = vmatpush1.bf16.msra.mxu0 %v17006_v63  ;;  %v17078_v63 = vld [vmem:[%s22199_s1 + $0x10c8] ss:$16 sps:$4 sm:$0xff]  }
 0x275   :  { %5631 = vmatpush1.bf16.msra.mxu1 %v17009_v58  ;;  %5591 = vmatprep.subr.bf16.mxu0 %v17014_v61  ;;  %v17081_v58 = vld [vmem:[%s22199_s1 + $0x12c8] ss:$16 sps:$4 sm:$0xff]  }
 0x276   :  { %5632 = vmatprep.subr.bf16.mxu1 %v17017_v62 }
 0x278   :  { %5592 = vmatpush1.bf16.msra.mxu0 %v17012_v1 }
 0x279   :  { %5633 = vmatpush1.bf16.msra.mxu1 %v17015_v26  ;;  %5593 = vmatprep.subr.bf16.mxu0 %v17020_v6 }
 0x27a   :  { %5634 = vmatprep.subr.bf16.mxu1 %v17023_v2  ;;  %v17084_v2 = vld [vmem:[%s22199_s1 + $0x10a8] ss:$16 sps:$4 sm:$0xff]  }
 0x27c   :  { %5594 = vmatpush1.bf16.msra.mxu0 %v17018_v7  ;;  %v17087_v7 = vld [vmem:[%s22199_s1 + $0x12a8] ss:$16 sps:$4 sm:$0xff]  }
 0x27d   :  { %5635 = vmatpush1.bf16.msra.mxu1 %v17021_v8  ;;  %5595 = vmatprep.subr.bf16.mxu0 %v17026_v49 }
 0x27e   :  { %5636 = vmatprep.subr.bf16.mxu1 %v17029_v57  ;;  %v17090_v57 = vld [vmem:[%s22199_s1 + $0x1088] ss:$16 sps:$4 sm:$0xff]  }
 0x280   :  { %5596 = vmatpush2.bf16.msra.mxu0 %v17024_v9  ;;  %v17093_v9 = vld [vmem:[%s22199_s1 + $0x1288] ss:$16 sps:$4 sm:$0xff]  }
 0x281   :  { %5637 = vmatpush2.bf16.msra.mxu1 %v17027_v30  ;;  %5597 = vmatprep.subr.bf16.mxu0 %v17032_v41  ;;  %v17098_v30 = vld [vmem:[%s22199_s1 + $0x106c] ss:$16 sps:$4 sm:$0xff]  }
 0x282   :  { %5638 = vmatprep.subr.bf16.mxu1 %v17035_v42  ;;  %v17101_v41 = vld [vmem:[%s22199_s1 + $0x126c] ss:$16 sps:$4 sm:$0xff]   ;;  %v17096_v42 = vld [vmem:[%s22199_s1 + $0x1068] ss:$16 sps:$4 sm:$0xff]  }
 0x284   :  { %5598 = vmatpush2.bf16.msra.mxu0 %v17030_v15  ;;  %v17099_v15 = vld [vmem:[%s22199_s1 + $0x1268] ss:$16 sps:$4 sm:$0xff]  }
 0x285   :  { %5639 = vmatpush2.bf16.msra.mxu1 %v17033_v16  ;;  %5599 = vmatprep.subr.bf16.mxu0 %v17038_v20  ;;  %v17104_v16 = vld [vmem:[%s22199_s1 + $0x104c] ss:$16 sps:$4 sm:$0xff]  }
 0x286   :  { %5640 = vmatprep.subr.bf16.mxu1 %v17041_v21  ;;  %v17107_v20 = vld [vmem:[%s22199_s1 + $0x124c] ss:$16 sps:$4 sm:$0xff]   ;;  %v17102_v21 = vld [vmem:[%s22199_s1 + $0x1048] ss:$16 sps:$4 sm:$0xff]  }
 0x288   :  { %5600 = vmatpush2.bf16.msra.mxu0 %v17036_v24  ;;  %v17105_v24 = vld [vmem:[%s22199_s1 + $0x1248] ss:$16 sps:$4 sm:$0xff]  }
 0x289   :  { %5641 = vmatpush2.bf16.msra.mxu1 %v17039_v13  ;;  %5601 = vmatprep.subr.bf16.mxu0 %v17044_v18  ;;  %v17110_v13 = vld [vmem:[%s22199_s1 + $0x102c] ss:$16 sps:$4 sm:$0xff]  }
 0x28a   :  { %5642 = vmatprep.subr.bf16.mxu1 %v17047_v27  ;;  %v17113_v18 = vld [vmem:[%s22199_s1 + $0x122c] ss:$16 sps:$4 sm:$0xff]   ;;  %v17108_v27 = vld [vmem:[%s22199_s1 + $0x1028] ss:$16 sps:$4 sm:$0xff]  }
 0x28c   :  { %5602 = vmatpush2.bf16.msra.mxu0 %v17042_v28  ;;  %v17111_v28 = vld [vmem:[%s22199_s1 + $0x1228] ss:$16 sps:$4 sm:$0xff]  }
 0x28d   :  { %5643 = vmatpush2.bf16.msra.mxu1 %v17045_v29  ;;  %5603 = vmatprep.subr.bf16.mxu0 %v17050_v33  ;;  %v17116_v29 = vld [vmem:[%s22199_s1 + $0x100c] ss:$16 sps:$4 sm:$0xff]  }
 0x28e   :  { %5644 = vmatprep.subr.bf16.mxu1 %v17053_v34  ;;  %v17119_v33 = vld [vmem:[%s22199_s1 + $0x120c] ss:$16 sps:$4 sm:$0xff]   ;;  %v17114_v34 = vld [vmem:[%s22199_s1 + $0x1008] ss:$16 sps:$4 sm:$0xff]  }
 0x290   :  { %5604 = vmatpush2.bf16.msra.mxu0 %v17048_v31  ;;  %v17117_v31 = vld [vmem:[%s22199_s1 + $0x1208] ss:$16 sps:$4 sm:$0xff]  }
 0x291   :  { %5645 = vmatpush2.bf16.msra.mxu1 %v17051_v46  ;;  %5605 = vmatprep.subr.bf16.mxu0 %v17056_v17  ;;  %v17122_v46 = vld [vmem:[%s22199_s1 + $0x11ec] ss:$16 sps:$4 sm:$0xff]  }
 0x292   :  { %5646 = vmatprep.subr.bf16.mxu1 %v17059_v23  ;;  %v17125_v17 = vld [vmem:[%s22199_s1 + $0x13ec] ss:$16 sps:$4 sm:$0xff]   ;;  %v17120_v23 = vld [vmem:[%s22199_s1 + $0x11e8] ss:$16 sps:$4 sm:$0xff]  }
 0x294   :  { %5606 = vmatpush2.bf16.msra.mxu0 %v17054_v48  ;;  %v17123_v48 = vld [vmem:[%s22199_s1 + $0x13e8] ss:$16 sps:$4 sm:$0xff]  }
 0x295   :  { %5647 = vmatpush2.bf16.msra.mxu1 %v17057_v54  ;;  %5607 = vmatprep.subr.bf16.mxu0 %v17062_v36  ;;  %v17128_v54 = vld [vmem:[%s22199_s1 + $0x11cc] ss:$16 sps:$4 sm:$0xff]  }
 0x296   :  { %5648 = vmatprep.subr.bf16.mxu1 %v17065_v32  ;;  %v17131_v36 = vld [vmem:[%s22199_s1 + $0x13cc] ss:$16 sps:$4 sm:$0xff]   ;;  %v17126_v32 = vld [vmem:[%s22199_s1 + $0x11c8] ss:$16 sps:$4 sm:$0xff]  }
 0x298   :  { %5608 = vmatpush2.bf16.msra.mxu0 %v17060_v40  ;;  %v17129_v40 = vld [vmem:[%s22199_s1 + $0x13c8] ss:$16 sps:$4 sm:$0xff]  }
 0x299   :  { %5649 = vmatpush2.bf16.msra.mxu1 %v17063_v38  ;;  %5609 = vmatprep.subr.bf16.mxu0 %v17068_v45  ;;  %v17134_v38 = vld [vmem:[%s22199_s1 + $0x11ac] ss:$16 sps:$4 sm:$0xff]  }
 0x29a   :  { %5650 = vmatprep.subr.bf16.mxu1 %v17071_v47  ;;  %v17137_v45 = vld [vmem:[%s22199_s1 + $0x13ac] ss:$16 sps:$4 sm:$0xff]   ;;  %v17132_v47 = vld [vmem:[%s22199_s1 + $0x11a8] ss:$16 sps:$4 sm:$0xff]  }
 0x29c   :  { %5610 = vmatpush2.bf16.msra.mxu0 %v17066_v4  ;;  %v17135_v4 = vld [vmem:[%s22199_s1 + $0x13a8] ss:$16 sps:$4 sm:$0xff]  }
 0x29d   :  { %5651 = vmatpush2.bf16.msra.mxu1 %v17069_v53  ;;  %5661 = vmatprep.subr.bf16.mxu0 %v17074_v59  ;;  %v17140_v53 = vld [vmem:[%s22199_s1 + $0x118c] ss:$16 sps:$4 sm:$0xff]  }
 0x29e   :  { %5702 = vmatprep.subr.bf16.mxu1 %v17077_v60  ;;  %v17143_v59 = vld [vmem:[%s22199_s1 + $0x138c] ss:$16 sps:$4 sm:$0xff]   ;;  %v17138_v60 = vld [vmem:[%s22199_s1 + $0x1188] ss:$16 sps:$4 sm:$0xff]  }
 0x29f   :  { %v5367_v35 = vpop.f32.mrf.mxu0  ;;  %5612 = vmatmul.mubr.bf16.vlgmr.msra.gmra.mxu0 %v18320_v12  ;;  %v17086_v12 = vld [vmem:[%s22199_s1 + $0x10ac] ss:$16 sps:$4 sm:$0xff]  }
 0x2a0   :  { %v5408_v55 = vpop.f32.mrf.mxu1  ;;  %5653 = vmatmul.mubr.bf16.vlgmr.msra.gmra.mxu1 %v18336_v39  ;;  %5662 = vmatpush1.bf16.msra.mxu0 %v17072_v0  ;;  %v17089_v39 = vld [vmem:[%s22199_s1 + $0x12ac] ss:$16 sps:$4 sm:$0xff]   ;;  %v17141_v0 = vld [vmem:[%s22199_s1 + $0x1388] ss:$16 sps:$4 sm:$0xff]  }
 0x2a1   :  { %v19596_v56 = vadd.f32 %v5408_v55, %v5367_v35  ;;  %5703 = vmatpush1.bf16.msra.mxu1 %v17075_v50  ;;  %v5369_v61 = vpop.f32.mrf.mxu0  ;;  %5663 = vmatprep.subr.bf16.mxu0 %v17080_v51  ;;  %v17146_v50 = vld [vmem:[%s22199_s1 + $0x116c] ss:$16 sps:$4 sm:$0xff]   ;;  %v17147_v35 = vld [vmem:[%s22199_s1 + $0x1368] ss:$16 sps:$4 sm:$0xff]  }
 0x2a2   :  { %v5410_v62 = vpop.f32.mrf.mxu1  ;;  %5704 = vmatprep.subr.bf16.mxu1 %v17083_v52  ;;  %5693 = vmatprep.mubr.bf16.mxu0 %v18332_v19  ;;  %v17092_v19 = vld [vmem:[%s22199_s1 + $0x108c] ss:$16 sps:$4 sm:$0xff]   ;;  %v17144_v52 = vld [vmem:[%s22199_s1 + $0x1168] ss:$16 sps:$4 sm:$0xff]  }
 0x2a3   :  { %v19610_v1 = vadd.f32 %v5410_v62, %v5369_v61  ;;  %5734 = vmatprep.mubr.bf16.mxu1 %v18352_v25  ;;  %v5371_v26 = vpop.f32.mrf.mxu0  ;;  %v17095_v25 = vld [vmem:[%s22199_s1 + $0x128c] ss:$16 sps:$4 sm:$0xff]   ;;  %v17153_v61 = vld [vmem:[%s22199_s1 + $0x1348] ss:$16 sps:$4 sm:$0xff]  }
 0x2a4   :  { %v5412_v6 = vpop.f32.mrf.mxu1  ;;  %5664 = vmatpush1.bf16.msra.mxu0 %v17078_v63  ;;  %v17149_v51 = vld [vmem:[%s22199_s1 + $0x136c] ss:$16 sps:$4 sm:$0xff]   ;;  %v17159_v26 = vld [vmem:[%s22199_s1 + $0x1328] ss:$16 sps:$4 sm:$0xff]  }
 0x2a5   :  { %5705 = vmatpush1.bf16.msra.mxu1 %v17081_v58  ;;  %v5372_v8 = vpop.f32.mrf.mxu0  ;;  %5665 = vmatprep.subr.bf16.mxu0 %v17086_v12  ;;  %v17152_v55 = vld [vmem:[%s22199_s1 + $0x114c] ss:$16 sps:$4 sm:$0xff]   ;;  %v17150_v58 = vld [vmem:[%s22199_s1 + $0x1148] ss:$16 sps:$4 sm:$0xff]  }
 0x2a6   :  { %v5413_v49 = vpop.f32.mrf.mxu1  ;;  %5706 = vmatprep.subr.bf16.mxu1 %v17089_v39  ;;  %v17155_v63 = vld [vmem:[%s22199_s1 + $0x134c] ss:$16 sps:$4 sm:$0xff]   ;;  %v17156_v39 = vld [vmem:[%s22199_s1 + $0x1128] ss:$16 sps:$4 sm:$0xff]  }
 0x2a7   :  { %v17158_v62 = vld [vmem:[%s22199_s1 + $0x112c] ss:$16 sps:$4 sm:$0xff]   ;;  %v17165_v8 = vld [vmem:[%s22199_s1 + $0x1308] ss:$16 sps:$4 sm:$0xff]  }
 0x2a8   :  { %5666 = vmatpush1.bf16.msra.mxu0 %v17084_v2  ;;  %v17161_v12 = vld [vmem:[%s22199_s1 + $0x132c] ss:$16 sps:$4 sm:$0xff]  }
 0x2a9   :  { %5707 = vmatpush1.bf16.msra.mxu1 %v17087_v7  ;;  %5667 = vmatprep.subr.bf16.mxu0 %v17092_v19  ;;  %v17164_v6 = vld [vmem:[%s22199_s1 + $0x110c] ss:$16 sps:$4 sm:$0xff]   ;;  %v17162_v7 = vld [vmem:[%s22199_s1 + $0x1108] ss:$16 sps:$4 sm:$0xff]  }
 0x2aa   :  { %5708 = vmatprep.subr.bf16.mxu1 %v17095_v25  ;;  %v17167_v2 = vld [vmem:[%s22199_s1 + $0x130c] ss:$16 sps:$4 sm:$0xff]   ;;  %v17168_v25 = vld [vmem:[%s22199_s1 + $0x14e8] ss:$16 sps:$4 sm:$0xff]  }
 0x2ab   :  { %v17170_v49 = vld [vmem:[%s22199_s1 + $0x14ec] ss:$16 sps:$4 sm:$0xff]  }
 0x2ac   :  { %5668 = vmatpush1.bf16.msra.mxu0 %v17090_v57  ;;  %v17173_v19 = vld [vmem:[%s22199_s1 + $0x16ec] ss:$16 sps:$4 sm:$0xff]   ;;  %v17171_v57 = vld [vmem:[%s22199_s1 + $0x16e8] ss:$16 sps:$4 sm:$0xff]  }
 0x2ad   :  { %5709 = vmatpush1.bf16.msra.mxu1 %v17093_v9  ;;  %5669 = vmatprep.subr.bf16.mxu0 %v17098_v30  ;;  %v17176_v9 = vld [vmem:[%s22199_s1 + $0x14cc] ss:$16 sps:$4 sm:$0xff]  }
 0x2ae   :  { %5710 = vmatprep.subr.bf16.mxu1 %v17101_v41  ;;  %v17179_v30 = vld [vmem:[%s22199_s1 + $0x16cc] ss:$16 sps:$4 sm:$0xff]  }
 0x2b0   :  { %5670 = vmatpush1.bf16.msra.mxu0 %v17096_v42 }
 0x2b1   :  { %5711 = vmatpush1.bf16.msra.mxu1 %v17099_v15  ;;  %5671 = vmatprep.subr.bf16.mxu0 %v17104_v16  ;;  %v17174_v16 = vld [vmem:[%s22199_s1 + $0x14c8] ss:$16 sps:$4 sm:$0xff]  }
 0x2b2   :  { %5712 = vmatprep.subr.bf16.mxu1 %v17107_v20  ;;  %v17177_v20 = vld [vmem:[%s22199_s1 + $0x16c8] ss:$16 sps:$4 sm:$0xff]  }
 0x2b4   :  { %5672 = vmatpush1.bf16.msra.mxu0 %v17102_v21 }
 0x2b5   :  { %5713 = vmatpush1.bf16.msra.mxu1 %v17105_v24  ;;  %5673 = vmatprep.subr.bf16.mxu0 %v17110_v13 }
 0x2b6   :  { %5714 = vmatprep.subr.bf16.mxu1 %v17113_v18 }
 0x2b8   :  { %5674 = vmatpush1.bf16.msra.mxu0 %v17108_v27 }
 0x2b9   :  { %5715 = vmatpush1.bf16.msra.mxu1 %v17111_v28  ;;  %5675 = vmatprep.subr.bf16.mxu0 %v17116_v29  ;;  %v17180_v29 = vld [vmem:[%s22199_s1 + $0x14a8] ss:$16 sps:$4 sm:$0xff]  }
 0x2ba   :  { %5716 = vmatprep.subr.bf16.mxu1 %v17119_v33  ;;  %v17183_v33 = vld [vmem:[%s22199_s1 + $0x16a8] ss:$16 sps:$4 sm:$0xff]  }
 0x2bc   :  { %5676 = vmatpush1.bf16.msra.mxu0 %v17114_v34 }
 0x2bd   :  { %5717 = vmatpush1.bf16.msra.mxu1 %v17117_v31  ;;  %5677 = vmatprep.subr.bf16.mxu0 %v17122_v46  ;;  %v17186_v31 = vld [vmem:[%s22199_s1 + $0x1488] ss:$16 sps:$4 sm:$0xff]  }
 0x2be   :  { %5718 = vmatprep.subr.bf16.mxu1 %v17125_v17  ;;  %v17189_v46 = vld [vmem:[%s22199_s1 + $0x1688] ss:$16 sps:$4 sm:$0xff]   ;;  %v17194_v17 = vld [vmem:[%s22199_s1 + $0x146c] ss:$16 sps:$4 sm:$0xff]  }
 0x2c0   :  { %5678 = vmatpush2.bf16.msra.mxu0 %v17120_v23  ;;  %v17197_v23 = vld [vmem:[%s22199_s1 + $0x166c] ss:$16 sps:$4 sm:$0xff]  }
 0x2c1   :  { %5719 = vmatpush2.bf16.msra.mxu1 %v17123_v48  ;;  %5679 = vmatprep.subr.bf16.mxu0 %v17128_v54  ;;  %v17192_v48 = vld [vmem:[%s22199_s1 + $0x1468] ss:$16 sps:$4 sm:$0xff]  }
 0x2c2   :  { %5720 = vmatprep.subr.bf16.mxu1 %v17131_v36  ;;  %v17195_v54 = vld [vmem:[%s22199_s1 + $0x1668] ss:$16 sps:$4 sm:$0xff]   ;;  %v17200_v36 = vld [vmem:[%s22199_s1 + $0x144c] ss:$16 sps:$4 sm:$0xff]  }
 0x2c4   :  { %5680 = vmatpush2.bf16.msra.mxu0 %v17126_v32  ;;  %v17203_v32 = vld [vmem:[%s22199_s1 + $0x164c] ss:$16 sps:$4 sm:$0xff]  }
 0x2c5   :  { %5721 = vmatpush2.bf16.msra.mxu1 %v17129_v40  ;;  %5681 = vmatprep.subr.bf16.mxu0 %v17134_v38  ;;  %v17198_v40 = vld [vmem:[%s22199_s1 + $0x1448] ss:$16 sps:$4 sm:$0xff]  }
 0x2c6   :  { %5722 = vmatprep.subr.bf16.mxu1 %v17137_v45  ;;  %v17201_v38 = vld [vmem:[%s22199_s1 + $0x1648] ss:$16 sps:$4 sm:$0xff]   ;;  %v17206_v45 = vld [vmem:[%s22199_s1 + $0x142c] ss:$16 sps:$4 sm:$0xff]  }
 0x2c8   :  { %5682 = vmatpush2.bf16.msra.mxu0 %v17132_v47  ;;  %v17209_v47 = vld [vmem:[%s22199_s1 + $0x162c] ss:$16 sps:$4 sm:$0xff]  }
 0x2c9   :  { %5723 = vmatpush2.bf16.msra.mxu1 %v17135_v4  ;;  %5683 = vmatprep.subr.bf16.mxu0 %v17140_v53  ;;  %v17204_v4 = vld [vmem:[%s22199_s1 + $0x1428] ss:$16 sps:$4 sm:$0xff]  }
 0x2ca   :  { %5724 = vmatprep.subr.bf16.mxu1 %v17143_v59  ;;  %v17207_v53 = vld [vmem:[%s22199_s1 + $0x1628] ss:$16 sps:$4 sm:$0xff]   ;;  %v17212_v59 = vld [vmem:[%s22199_s1 + $0x140c] ss:$16 sps:$4 sm:$0xff]  }
 0x2cc   :  { %5684 = vmatpush2.bf16.msra.mxu0 %v17138_v60  ;;  %v17215_v60 = vld [vmem:[%s22199_s1 + $0x160c] ss:$16 sps:$4 sm:$0xff]  }
 0x2cd   :  { %5725 = vmatpush2.bf16.msra.mxu1 %v17141_v0  ;;  %5685 = vmatprep.subr.bf16.mxu0 %v17146_v50  ;;  %v17210_v0 = vld [vmem:[%s22199_s1 + $0x1408] ss:$16 sps:$4 sm:$0xff]  }
 0x2ce   :  { %5726 = vmatprep.subr.bf16.mxu1 %v17149_v51  ;;  %v17213_v50 = vld [vmem:[%s22199_s1 + $0x1608] ss:$16 sps:$4 sm:$0xff]   ;;  %v17218_v51 = vld [vmem:[%s22199_s1 + $0x15ec] ss:$16 sps:$4 sm:$0xff]  }
 0x2d0   :  { %5686 = vmatpush2.bf16.msra.mxu0 %v17144_v52  ;;  %v17221_v52 = vld [vmem:[%s22199_s1 + $0x17ec] ss:$16 sps:$4 sm:$0xff]  }
 0x2d1   :  { %5727 = vmatpush2.bf16.msra.mxu1 %v17147_v35  ;;  %5687 = vmatprep.subr.bf16.mxu0 %v17152_v55  ;;  %v17216_v35 = vld [vmem:[%s22199_s1 + $0x15e8] ss:$16 sps:$4 sm:$0xff]  }
 0x2d2   :  { %5728 = vmatprep.subr.bf16.mxu1 %v17155_v63  ;;  %v17219_v55 = vld [vmem:[%s22199_s1 + $0x17e8] ss:$16 sps:$4 sm:$0xff]   ;;  %v17224_v63 = vld [vmem:[%s22199_s1 + $0x15cc] ss:$16 sps:$4 sm:$0xff]  }
 0x2d4   :  { %5688 = vmatpush2.bf16.msra.mxu0 %v17150_v58  ;;  %v17227_v58 = vld [vmem:[%s22199_s1 + $0x17cc] ss:$16 sps:$4 sm:$0xff]  }
 0x2d5   :  { %5729 = vmatpush2.bf16.msra.mxu1 %v17153_v61  ;;  %5689 = vmatprep.subr.bf16.mxu0 %v17158_v62  ;;  %v17222_v61 = vld [vmem:[%s22199_s1 + $0x15c8] ss:$16 sps:$4 sm:$0xff]  }
 0x2d6   :  { %5730 = vmatprep.subr.bf16.mxu1 %v17161_v12  ;;  %v17225_v62 = vld [vmem:[%s22199_s1 + $0x17c8] ss:$16 sps:$4 sm:$0xff]   ;;  %v17230_v12 = vld [vmem:[%s22199_s1 + $0x15ac] ss:$16 sps:$4 sm:$0xff]  }
 0x2d8   :  { %5690 = vmatpush2.bf16.msra.mxu0 %v17156_v39  ;;  %v17233_v39 = vld [vmem:[%s22199_s1 + $0x17ac] ss:$16 sps:$4 sm:$0xff]  }
 0x2d9   :  { %5731 = vmatpush2.bf16.msra.mxu1 %v17159_v26  ;;  %5691 = vmatprep.subr.bf16.mxu0 %v17164_v6  ;;  %v17228_v26 = vld [vmem:[%s22199_s1 + $0x15a8] ss:$16 sps:$4 sm:$0xff]  }
 0x2da   :  { %5732 = vmatprep.subr.bf16.mxu1 %v17167_v2  ;;  %v17231_v6 = vld [vmem:[%s22199_s1 + $0x17a8] ss:$16 sps:$4 sm:$0xff]   ;;  %v17236_v2 = vld [vmem:[%s22199_s1 + $0x158c] ss:$16 sps:$4 sm:$0xff]  }
 0x2dc   :  { %5692 = vmatpush2.bf16.msra.mxu0 %v17162_v7  ;;  %v17239_v7 = vld [vmem:[%s22199_s1 + $0x178c] ss:$16 sps:$4 sm:$0xff]  }
 0x2dd   :  { %5733 = vmatpush2.bf16.msra.mxu1 %v17165_v8  ;;  %5743 = vmatprep.subr.bf16.mxu0 %v17170_v49  ;;  %v17234_v8 = vld [vmem:[%s22199_s1 + $0x1588] ss:$16 sps:$4 sm:$0xff]  }
 0x2de   :  { %5784 = vmatprep.subr.bf16.mxu1 %v17173_v19  ;;  %v17237_v49 = vld [vmem:[%s22199_s1 + $0x1788] ss:$16 sps:$4 sm:$0xff]   ;;  %v17242_v19 = vld [vmem:[%s22199_s1 + $0x156c] ss:$16 sps:$4 sm:$0xff]  }
 0x2df   :  { %v5449_v41 = vpop.f32.mrf.mxu0  ;;  %5694 = vmatmul.mubr.bf16.vlgmr.msra.gmra.mxu0 %v18539_v3  ;;  %v17182_v3 = vld [vmem:[%s22199_s1 + $0x14ac] ss:$16 sps:$4 sm:$0xff]  }
 0x2e0   :  { %v5490_v42 = vpop.f32.mrf.mxu1  ;;  %5735 = vmatmul.mubr.bf16.vlgmr.msra.gmra.mxu1 %v18564_v14  ;;  %v5450_v15 = vadd.f32 %v5449_v41, %v19596_v56  ;;  %5744 = vmatpush1.bf16.msra.mxu0 %v17168_v25  ;;  %v17185_v14 = vld [vmem:[%s22199_s1 + $0x16ac] ss:$16 sps:$4 sm:$0xff]  }
 0x2e1   :  { %5785 = vmatpush1.bf16.msra.mxu1 %v17171_v57  ;;  %v5451_v21 = vpop.f32.mrf.mxu0  ;;  %5745 = vmatprep.subr.bf16.mxu0 %v17176_v9  ;;  %v17245_v25 = vld [vmem:[%s22199_s1 + $0x176c] ss:$16 sps:$4 sm:$0xff]   ;;  %v17240_v57 = vld [vmem:[%s22199_s1 + $0x1568] ss:$16 sps:$4 sm:$0xff]  }
 0x2e2   :  { %v5492_v24 = vpop.f32.mrf.mxu1  ;;  %5786 = vmatprep.subr.bf16.mxu1 %v17179_v30  ;;  %v19809_v56 = vadd.f32 %v5490_v42, %v5450_v15  ;;  %v5452_v13 = vadd.f32 %v5451_v21, %v19610_v1  ;;  %5775 = vmatprep.mubr.bf16.mxu0 %v18560_v11  ;;  %v17188_v11 = vld [vmem:[%s22199_s1 + $0x148c] ss:$16 sps:$4 sm:$0xff]   ;;  %v17243_v9 = vld [vmem:[%s22199_s1 + $0x1768] ss:$16 sps:$4 sm:$0xff]  }
 0x2e3   :  { %5816 = vmatprep.mubr.bf16.mxu1 %v18580_v22  ;;  %v5453_v18 = vpop.f32.mrf.mxu0  ;;  %v17191_v22 = vld [vmem:[%s22199_s1 + $0x168c] ss:$16 sps:$4 sm:$0xff]   ;;  %v17246_v42 = vld [vmem:[%s22199_s1 + $0x1548] ss:$16 sps:$4 sm:$0xff]  }
 0x2e4   :  { %v5494_v27 = vpop.f32.mrf.mxu1  ;;  %v19814_v28 = vadd.f32 %v5492_v24, %v5452_v13  ;;  %5746 = vmatpush1.bf16.msra.mxu0 %v17174_v16  ;;  %v17248_v30 = vld [vmem:[%s22199_s1 + $0x154c] ss:$16 sps:$4 sm:$0xff]   ;;  %v17249_v15 = vld [vmem:[%s22199_s1 + $0x1748] ss:$16 sps:$4 sm:$0xff]  }
 0x2e5   :  { %5787 = vmatpush1.bf16.msra.mxu1 %v17177_v20  ;;  %v5454_v34 = vpop.f32.mrf.mxu0  ;;  %5747 = vmatprep.subr.bf16.mxu0 %v17182_v3  ;;  %v17251_v41 = vld [vmem:[%s22199_s1 + $0x174c] ss:$16 sps:$4 sm:$0xff]   ;;  %v17252_v21 = vld [vmem:[%s22199_s1 + $0x1528] ss:$16 sps:$4 sm:$0xff]  }
 0x2e6   :  { %v5495_v1 = vpop.f32.mrf.mxu1  ;;  %5788 = vmatprep.subr.bf16.mxu1 %v17185_v14  ;;  %v17254_v16 = vld [vmem:[%s22199_s1 + $0x152c] ss:$16 sps:$4 sm:$0xff]   ;;  %v17255_v24 = vld [vmem:[%s22199_s1 + $0x1728] ss:$16 sps:$4 sm:$0xff]  }
 0x2e7   :  { %v17257_v20 = vld [vmem:[%s22199_s1 + $0x172c] ss:$16 sps:$4 sm:$0xff]   ;;  %v17258_v13 = vld [vmem:[%s22199_s1 + $0x1508] ss:$16 sps:$4 sm:$0xff]  }
 0x2e8   :  { %5748 = vmatpush1.bf16.msra.mxu0 %v17180_v29  ;;  %v17260_v3 = vld [vmem:[%s22199_s1 + $0x150c] ss:$16 sps:$4 sm:$0xff]   ;;  %v17261_v18 = vld [vmem:[%s22199_s1 + $0x1708] ss:$16 sps:$4 sm:$0xff]  }
 0x2e9   :  { %5789 = vmatpush1.bf16.msra.mxu1 %v17183_v33  ;;  %5749 = vmatprep.subr.bf16.mxu0 %v17188_v11  ;;  %v17263_v14 = vld [vmem:[%s22199_s1 + $0x170c] ss:$16 sps:$4 sm:$0xff]  }
 0x2ea   :  { %5790 = vmatprep.subr.bf16.mxu1 %v17191_v22 }
 0x2ec   :  { %5750 = vmatpush1.bf16.msra.mxu0 %v17186_v31 }
 0x2ed   :  { %5791 = vmatpush1.bf16.msra.mxu1 %v17189_v46  ;;  %5751 = vmatprep.subr.bf16.mxu0 %v17194_v17 }
 0x2ee   :  { %5792 = vmatprep.subr.bf16.mxu1 %v17197_v23 }
 0x2f0   :  { %5752 = vmatpush1.bf16.msra.mxu0 %v17192_v48 }
 0x2f1   :  { %5793 = vmatpush1.bf16.msra.mxu1 %v17195_v54  ;;  %5753 = vmatprep.subr.bf16.mxu0 %v17200_v36 }
 0x2f2   :  { %5794 = vmatprep.subr.bf16.mxu1 %v17203_v32 }
 0x2f4   :  { %5754 = vmatpush1.bf16.msra.mxu0 %v17198_v40 }
 0x2f5   :  { %5795 = vmatpush1.bf16.msra.mxu1 %v17201_v38  ;;  %5755 = vmatprep.subr.bf16.mxu0 %v17206_v45 }
 0x2f6   :  { %5796 = vmatprep.subr.bf16.mxu1 %v17209_v47 }
 0x2f8   :  { %5756 = vmatpush1.bf16.msra.mxu0 %v17204_v4 }
 0x2f9   :  { %5797 = vmatpush1.bf16.msra.mxu1 %v17207_v53  ;;  %5757 = vmatprep.subr.bf16.mxu0 %v17212_v59 }
 0x2fa   :  { %5798 = vmatprep.subr.bf16.mxu1 %v17215_v60 }
 0x2fc   :  { %5758 = vmatpush1.bf16.msra.mxu0 %v17210_v0 }
 0x2fd   :  { %5799 = vmatpush1.bf16.msra.mxu1 %v17213_v50  ;;  %5759 = vmatprep.subr.bf16.mxu0 %v17218_v51 }
 0x2fe   :  { %5800 = vmatprep.subr.bf16.mxu1 %v17221_v52 }
 0x300   :  { %5760 = vmatpush2.bf16.msra.mxu0 %v17216_v35 }
 0x301   :  { %5801 = vmatpush2.bf16.msra.mxu1 %v17219_v55  ;;  %5761 = vmatprep.subr.bf16.mxu0 %v17224_v63 }
 0x302   :  { %5802 = vmatprep.subr.bf16.mxu1 %v17227_v58 }
 0x304   :  { %5762 = vmatpush2.bf16.msra.mxu0 %v17222_v61 }
 0x305   :  { %5803 = vmatpush2.bf16.msra.mxu1 %v17225_v62  ;;  %5763 = vmatprep.subr.bf16.mxu0 %v17230_v12  ;;  %v5827_v12 = vsel %vm5825_vm0, %v19412_v44, 0.0 }
 0x306   :  { %5804 = vmatprep.subr.bf16.mxu1 %v17233_v39 }
 0x308   :  { %5764 = vmatpush2.bf16.msra.mxu0 %v17228_v26 }
 0x309   :  { %5805 = vmatpush2.bf16.msra.mxu1 %v17231_v6  ;;  %5765 = vmatprep.subr.bf16.mxu0 %v17236_v2 }
 0x30a   :  { %5806 = vmatprep.subr.bf16.mxu1 %v17239_v7  ;;  %v5826_v7 = vsel %vm5825_vm0, %v19407_v37, 0.0 }
 0x30c   :  { %5766 = vmatpush2.bf16.msra.mxu0 %v17234_v8 }
 0x30d   :  { %5807 = vmatpush2.bf16.msra.mxu1 %v17237_v49  ;;  %5767 = vmatprep.subr.bf16.mxu0 %v17242_v19  ;;  %v5828_v19 = vadd.f32 %v5827_v12, %v5826_v7  ;;  %v6202_v12 = vld [vmem:[%s22200_s2 + $0xa68] sm:$0xff]  ;;  %v5897_v7 = vld [vmem:[%s22200_s2 + $0xe0] sm:$0xff] }
 0x30e   :  { %5808 = vmatprep.subr.bf16.mxu1 %v17245_v25 }
 0x310   :  { %5768 = vmatpush2.bf16.msra.mxu0 %v17240_v57 }
 0x311   :  { %5809 = vmatpush2.bf16.msra.mxu1 %v17243_v9  ;;  %5769 = vmatprep.subr.bf16.mxu0 %v17248_v30 }
 0x312   :  { %5810 = vmatprep.subr.bf16.mxu1 %v17251_v41 }
 0x314   :  { %5770 = vmatpush2.bf16.msra.mxu0 %v17246_v42 }
 0x315   :  { %5811 = vmatpush2.bf16.msra.mxu1 %v17249_v15  ;;  %5771 = vmatprep.subr.bf16.mxu0 %v17254_v16 }
 0x316   :  { %5812 = vmatprep.subr.bf16.mxu1 %v17257_v20 }
 0x318   :  { %5772 = vmatpush2.bf16.msra.mxu0 %v17252_v21  ;;  %v6005_v21 = vld [vmem:[%s22200_s2 + $0x440] sm:$0xff] }
 0x319   :  { %5813 = vmatpush2.bf16.msra.mxu1 %v17255_v24  ;;  %5773 = vmatprep.subr.bf16.mxu0 %v17260_v3  ;;  %v6293_v24 = vld [vmem:[%s22200_s2 + $0xd40] sm:$0xff]  ;;  %v6004_v3 = vld [vmem:[%s22200_s2 + $0x438] sm:$0xff] }
 0x31a   :  { %5814 = vmatprep.subr.bf16.mxu1 %v17263_v14  ;;  %v6292_v14 = vld [vmem:[%s22200_s2 + $0xd38] sm:$0xff] }
 0x31c   :  { %5774 = vmatpush2.bf16.msra.mxu0 %v17258_v13  ;;  %v5996_v13 = vld [vmem:[%s22200_s2 + $0x3f8] sm:$0xff] }
 0x31d   :  { %5815 = vmatpush2.bf16.msra.mxu1 %v17261_v18  ;;  %6445 = vmatprep.subr.mxu0 %v6005_v21  ;;  %v6284_v18 = vld [vmem:[%s22200_s2 + $0xcf8] sm:$0xff] }
 0x31e   :  { %6516 = vmatprep.subr.mxu1 %v6293_v24 }
 0x31f   :  { %v5531_v27 = vpop.f32.mrf.mxu0  ;;  %5776 = vmatmul.mubr.bf16.vlgmr.msra.gmra.mxu0 %v18756_v5 }
 0x320   :  { %v5572_v29 = vpop.f32.mrf.mxu1  ;;  %5817 = vmatmul.mubr.bf16.vlgmr.msra.gmra.mxu1 %v18778_v10  ;;  %v5532_v33 = vadd.f32 %v5531_v27, %v19809_v56  ;;  %6446 = vmatpush1.msra.mxu0 %v6004_v3  ;;  %v5995_v27 = vld [vmem:[%s22200_s2 + $0x3f0] sm:$0xff] }
 0x321   :  { %v5533_v34 = vpop.f32.mrf.mxu0  ;;  %6517 = vmatpush1.msra.mxu1 %v6292_v14  ;;  %6447 = vmatprep.subr.mxu0 %v5996_v13 }
 0x322   :  { %v5574_v1 = vpop.f32.mrf.mxu1  ;;  %v5573_v11 = vadd.f32 %v5572_v29, %v5532_v33  ;;  %v5534_v22 = vadd.f32 %v5533_v34, %v19814_v28  ;;  %v6283_v29 = vld [vmem:[%s22200_s2 + $0xcf0] sm:$0xff]  ;;  %6518 = vmatprep.subr.mxu1 %v6284_v18  ;;  %6448 = vmatpush1.msra.mxu0 %v5995_v27  ;;  %v5888_v27 = vld [vmem:[%s22200_s2 + $0x98] sm:$0xff] }
 0x323   :  { %v5535_v31 = vpop.f32.mrf.mxu0  ;;  %v5987_v33 = vld [vmem:[%s22200_s2 + $0x3b0] sm:$0xff]  ;;  %6519 = vmatpush1.msra.mxu1 %v6283_v29  ;;  %v6176_v29 = vld [vmem:[%s22200_s2 + $0x998] sm:$0xff] }
 0x324   :  { %v5576_v46 = vpop.f32.mrf.mxu1  ;;  %v5575_v17 = vadd.f32 %v5574_v1, %v5534_v22  ;;  %v6275_v34 = vld [vmem:[%s22200_s2 + $0xcb0] sm:$0xff]  ;;  %v5986_v1 = vld [vmem:[%s22200_s2 + $0x3a8] sm:$0xff]  ;;  %6449 = vmatprep.subr.mxu0 %v5987_v33 }
 0x325   :  { %v5536_v23 = vpop.f32.mrf.mxu0  ;;  %v5978_v22 = vld [vmem:[%s22200_s2 + $0x368] sm:$0xff]  ;;  %6520 = vmatprep.subr.mxu1 %v6275_v34  ;;  %v5977_v46 = vld [vmem:[%s22200_s2 + $0x360] sm:$0xff]  ;;  %6450 = vmatpush1.msra.mxu0 %v5986_v1  ;;  %v5887_v33 = vld [vmem:[%s22200_s2 + $0x90] sm:$0xff] }
 0x326   :  { %v5577_v48 = vpop.f32.mrf.mxu1  ;;  %v6266_v31 = vld [vmem:[%s22200_s2 + $0xc68] sm:$0xff]  ;;  %v5969_v23 = vld [vmem:[%s22200_s2 + $0x320] sm:$0xff]  ;;  %6451 = vmatprep.subr.mxu0 %v5978_v22  ;;  %v6175_v34 = vld [vmem:[%s22200_s2 + $0x990] sm:$0xff] }
 0x327   :  { %v6257_v48 = vld [vmem:[%s22200_s2 + $0xc20] sm:$0xff]  ;;  %6452 = vmatpush1.msra.mxu0 %v5977_v46  ;;  %v5879_v1 = vld [vmem:[%s22200_s2 + $0x50] sm:$0xff]  ;;  %v5878_v22 = vld [vmem:[%s22200_s2 + $0x48] sm:$0xff] }
 0x328   :  { %6453 = vmatprep.subr.mxu0 %v5969_v23  ;;  %v5870_v46 = vld [vmem:[%s22200_s2 + $0x8] sm:$0xff]  ;;  %v5869_v23 = vld [vmem:[%s22200_s2] sm:$0xff] }
 0x35f   :  { %v5613_v54 = vpop.f32.mrf.mxu0 }
 0x360   :  { %v5654_v36 = vpop.f32.mrf.mxu1  ;;  %v5614_v32 = vadd.f32 %v5613_v54, %v5573_v11  ;;  %v6274_v11 = vld [vmem:[%s22200_s2 + $0xca8] sm:$0xff]  ;;  %v5968_v54 = vld [vmem:[%s22200_s2 + $0x318] sm:$0xff] }
 0x361   :  { %v5615_v40 = vpop.f32.mrf.mxu0  ;;  %6521 = vmatpush1.msra.mxu1 %v6274_v11  ;;  %6454 = vmatpush1.msra.mxu0 %v5968_v54  ;;  %v6167_v11 = vld [vmem:[%s22200_s2 + $0x950] sm:$0xff]  ;;  %v6149_v54 = vld [vmem:[%s22200_s2 + $0x8c0] sm:$0xff] }
 0x362   :  { %v5656_v38 = vpop.f32.mrf.mxu1  ;;  %v5655_v5 = vadd.f32 %v5654_v36, %v5614_v32  ;;  %v5616_v45 = vadd.f32 %v5615_v40, %v5575_v17  ;;  %v6265_v17 = vld [vmem:[%s22200_s2 + $0xc60] sm:$0xff]  ;;  %6522 = vmatprep.subr.mxu1 %v6266_v31  ;;  %v6256_v36 = vld [vmem:[%s22200_s2 + $0xc18] sm:$0xff]  ;;  %v6166_v31 = vld [vmem:[%s22200_s2 + $0x948] sm:$0xff] }
 0x363   :  { %v5617_v10 = vpop.f32.mrf.mxu0  ;;  %6523 = vmatpush1.msra.mxu1 %v6265_v17  ;;  %v5960_v32 = vld [vmem:[%s22200_s2 + $0x2d8] sm:$0xff]  ;;  %v6158_v17 = vld [vmem:[%s22200_s2 + $0x908] sm:$0xff] }
 0x364   :  { %v5658_v47 = vpop.f32.mrf.mxu1  ;;  %v5657_v56 = vadd.f32 %v5656_v38, %v5616_v45  ;;  %v6248_v40 = vld [vmem:[%s22200_s2 + $0xbd8] sm:$0xff]  ;;  %6524 = vmatprep.subr.mxu1 %v6257_v48  ;;  %v5959_v38 = vld [vmem:[%s22200_s2 + $0x2d0] sm:$0xff]  ;;  %6455 = vmatprep.subr.mxu0 %v5960_v32  ;;  %v6157_v48 = vld [vmem:[%s22200_s2 + $0x900] sm:$0xff] }
 0x365   :  { %v5618_v4 = vpop.f32.mrf.mxu0  ;;  %6525 = vmatpush1.msra.mxu1 %v6256_v36  ;;  %v5951_v45 = vld [vmem:[%s22200_s2 + $0x290] sm:$0xff]  ;;  %v5950_v47 = vld [vmem:[%s22200_s2 + $0x288] sm:$0xff]  ;;  %6456 = vmatpush1.msra.mxu0 %v5959_v38  ;;  %v6437_v36 = vld [vmem:[%s22200_s2 + $0x11c0] sm:$0xff] }
 0x366   :  { %v5659_v53 = vpop.f32.mrf.mxu1  ;;  %v6239_v10 = vld [vmem:[%s22200_s2 + $0xb90] sm:$0xff]  ;;  %6526 = vmatprep.subr.mxu1 %v6248_v40  ;;  %v5942_v4 = vld [vmem:[%s22200_s2 + $0x248] sm:$0xff]  ;;  %6457 = vmatprep.subr.mxu0 %v5951_v45  ;;  %v6148_v32 = vld [vmem:[%s22200_s2 + $0x8b8] sm:$0xff] }
 0x367   :  { %v6230_v53 = vld [vmem:[%s22200_s2 + $0xb48] sm:$0xff]  ;;  %6458 = vmatpush1.msra.mxu0 %v5950_v47  ;;  %v6436_v40 = vld [vmem:[%s22200_s2 + $0x11b8] sm:$0xff]  ;;  %v6139_v45 = vld [vmem:[%s22200_s2 + $0x870] sm:$0xff] }
 0x368   :  { %6459 = vmatprep.subr.mxu0 %v5942_v4  ;;  %v6140_v38 = vld [vmem:[%s22200_s2 + $0x878] sm:$0xff]  ;;  %v6131_v47 = vld [vmem:[%s22200_s2 + $0x830] sm:$0xff]  ;;  %v6130_v4 = vld [vmem:[%s22200_s2 + $0x828] sm:$0xff] }
 0x39f   :  { %v5695_v59 = vpop.f32.mrf.mxu0 }
 0x3a0   :  { %v5736_v60 = vpop.f32.mrf.mxu1  ;;  %v5696_v55 = vadd.f32 %v5695_v59, %v5655_v5  ;;  %v6247_v5 = vld [vmem:[%s22200_s2 + $0xbd0] sm:$0xff]  ;;  %v5941_v59 = vld [vmem:[%s22200_s2 + $0x240] sm:$0xff] }
 0x3a1   :  { %v5697_v28 = vpop.f32.mrf.mxu0  ;;  %6527 = vmatpush1.msra.mxu1 %v6247_v5  ;;  %6460 = vmatpush1.msra.mxu0 %v5941_v59  ;;  %v6428_v5 = vld [vmem:[%s22200_s2 + $0x1178] sm:$0xff]  ;;  %v6122_v59 = vld [vmem:[%s22200_s2 + $0x7e8] sm:$0xff] }
 0x3a2   :  { %v5738_v0 = vpop.f32.mrf.mxu1  ;;  %v5698_v63 = vadd.f32 %v5697_v28, %v5657_v56  ;;  %v5737_v58 = vadd.f32 %v5736_v60, %v5696_v55  ;;  %v6238_v56 = vld [vmem:[%s22200_s2 + $0xb88] sm:$0xff]  ;;  %6528 = vmatprep.subr.mxu1 %v6239_v10  ;;  %v6229_v60 = vld [vmem:[%s22200_s2 + $0xb40] sm:$0xff]  ;;  %v5923_v55 = vld [vmem:[%s22200_s2 + $0x1b0] sm:$0xff] }
 0x3a3   :  { %v5699_v50 = vpop.f32.mrf.mxu0  ;;  %6529 = vmatpush1.msra.mxu1 %v6238_v56  ;;  %v5933_v28 = vld [vmem:[%s22200_s2 + $0x200] sm:$0xff]  ;;  %v6427_v10 = vld [vmem:[%s22200_s2 + $0x1170] sm:$0xff] }
 0x3a4   :  { %v5740_v51 = vpop.f32.mrf.mxu1  ;;  %v5739_v39 = vadd.f32 %v5738_v0, %v5698_v63  ;;  %v6221_v0 = vld [vmem:[%s22200_s2 + $0xb00] sm:$0xff]  ;;  %6530 = vmatprep.subr.mxu1 %v6230_v53  ;;  %v5932_v50 = vld [vmem:[%s22200_s2 + $0x1f8] sm:$0xff]  ;;  %6461 = vmatprep.subr.mxu0 %v5933_v28  ;;  %v6211_v63 = vld [vmem:[%s22200_s2 + $0xab0] sm:$0xff] }
 0x3a5   :  { %v5700_v52 = vpop.f32.mrf.mxu0  ;;  %v6220_v51 = vld [vmem:[%s22200_s2 + $0xaf8] sm:$0xff]  ;;  %6531 = vmatpush1.msra.mxu1 %v6229_v60  ;;  %6462 = vmatpush1.msra.mxu0 %v5932_v50  ;;  %v6419_v56 = vld [vmem:[%s22200_s2 + $0x1130] sm:$0xff]  ;;  %v6418_v53 = vld [vmem:[%s22200_s2 + $0x1128] sm:$0xff] }
 0x3a6   :  { %v5741_v35 = vpop.f32.mrf.mxu1  ;;  %v5924_v52 = vld [vmem:[%s22200_s2 + $0x1b8] sm:$0xff]  ;;  %6532 = vmatprep.subr.mxu1 %v6221_v0  ;;  %v6410_v60 = vld [vmem:[%s22200_s2 + $0x10e8] sm:$0xff]  ;;  %v6121_v28 = vld [vmem:[%s22200_s2 + $0x7e0] sm:$0xff] }
 0x3a7   :  { %v6212_v35 = vld [vmem:[%s22200_s2 + $0xab8] sm:$0xff]  ;;  %6533 = vmatpush1.msra.mxu1 %v6220_v51  ;;  %6463 = vmatprep.subr.mxu0 %v5924_v52  ;;  %v6409_v0 = vld [vmem:[%s22200_s2 + $0x10e0] sm:$0xff] }
 0x3a8   :  { %6534 = vmatprep.subr.mxu1 %v6212_v35  ;;  %6464 = vmatpush1.msra.mxu0 %v5923_v55  ;;  %v6113_v50 = vld [vmem:[%s22200_s2 + $0x7a0] sm:$0xff]  ;;  %v6112_v52 = vld [vmem:[%s22200_s2 + $0x798] sm:$0xff] }
 0x3a9   :  { %6535 = vmatpush1.msra.mxu1 %v6211_v63  ;;  %v6401_v51 = vld [vmem:[%s22200_s2 + $0x10a0] sm:$0xff]  ;;  %v6400_v35 = vld [vmem:[%s22200_s2 + $0x1098] sm:$0xff] }
 0x3aa   :  { %v6104_v55 = vld [vmem:[%s22200_s2 + $0x758] sm:$0xff] }
 0x3ab   :  { %v6392_v63 = vld [vmem:[%s22200_s2 + $0x1058] sm:$0xff] }
 0x3df   :  { %v5777_v61 = vpop.f32.mrf.mxu0 }
 0x3e0   :  { %v5818_v62 = vpop.f32.mrf.mxu1  ;;  %v5778_v26 = vadd.f32 %v5777_v61, %v5737_v58  ;;  %v5915_v58 = vld [vmem:[%s22200_s2 + $0x170] sm:$0xff] }
 0x3e1   :  { %v5779_v6 = vpop.f32.mrf.mxu0  ;;  %v6203_v61 = vld [vmem:[%s22200_s2 + $0xa70] sm:$0xff]  ;;  %6465 = vmatprep.subr.mxu0 %v5915_v58 }
 0x3e2   :  { %v5820_v2 = vpop.f32.mrf.mxu1  ;;  %v19986_v8 = vadd.f32 %v5818_v62, %v5778_v26  ;;  %v5780_v49 = vadd.f32 %v5779_v6, %v5739_v39  ;;  %v5914_v62 = vld [vmem:[%s22200_s2 + $0x168] sm:$0xff]  ;;  %6536 = vmatprep.subr.mxu1 %v6203_v61  ;;  %v5905_v6 = vld [vmem:[%s22200_s2 + $0x120] sm:$0xff]  ;;  %v6103_v58 = vld [vmem:[%s22200_s2 + $0x750] sm:$0xff] }
 0x3e3   :  { %v5781_v25 = vpop.f32.mrf.mxu0  ;;  %v5906_v39 = vld [vmem:[%s22200_s2 + $0x128] sm:$0xff]  ;;  %6466 = vmatpush1.msra.mxu0 %v5914_v62  ;;  %6537 = vmatpush1.msra.mxu1 %v6202_v12  ;;  %v6391_v61 = vld [vmem:[%s22200_s2 + $0x1050] sm:$0xff] }
 0x3e4   :  { %v5822_v57 = vpop.f32.mrf.mxu1  ;;  %v5829_v9 = vsel %vm5825_vm0, %v19986_v8, 0.0  ;;  %v19990_v30 = vadd.f32 %v5820_v2, %v5780_v49  ;;  %v6194_v26 = vld [vmem:[%s22200_s2 + $0xa28] sm:$0xff]  ;;  %v6193_v2 = vld [vmem:[%s22200_s2 + $0xa20] sm:$0xff]  ;;  %6467 = vmatprep.subr.mxu0 %v5906_v39  ;;  %v6184_v25 = vld [vmem:[%s22200_s2 + $0x9d8] sm:$0xff] }
 0x3e5   :  { %v5782_v41 = vpop.f32.mrf.mxu0  ;;  %v5830_v15 = vadd.f32 %v5829_v9, %v5828_v19  ;;  %v6185_v49 = vld [vmem:[%s22200_s2 + $0x9e0] sm:$0xff]  ;;  %6538 = vmatprep.subr.mxu1 %v6194_v26  ;;  %v5896_v19 = vld [vmem:[%s22200_s2 + $0xd8] sm:$0xff]  ;;  %6468 = vmatpush1.msra.mxu0 %v5905_v6  ;;  %v6095_v62 = vld [vmem:[%s22200_s2 + $0x710] sm:$0xff] }
 0x3e6   :  { %v5823_v42 = vpop.f32.mrf.mxu1  ;;  %v5831_v16 = vsel %vm5825_vm0, %v19990_v30, 0.0  ;;  %6539 = vmatpush1.msra.mxu1 %v6193_v2  ;;  %6469 = vmatprep.subr.mxu0 %v5897_v7  ;;  %v6383_v12 = vld [vmem:[%s22200_s2 + $0x1010] sm:$0xff]  ;;  %v6094_v39 = vld [vmem:[%s22200_s2 + $0x708] sm:$0xff]  ;;  %v6085_v7 = vld [vmem:[%s22200_s2 + $0x6c0] sm:$0xff] }
 0x3e7   :  { %v5832_v20 = vadd.f32 %v5831_v16, %v5830_v15  ;;  %6540 = vmatprep.subr.mxu1 %v6185_v49  ;;  %6470 = vmatpush1.msra.mxu0 %v5896_v19  ;;  %v6382_v26 = vld [vmem:[%s22200_s2 + $0x1008] sm:$0xff]  ;;  %v6373_v49 = vld [vmem:[%s22200_s2 + $0xfc0] sm:$0xff] }
 0x3e8   :  { %6541 = vmatpush1.msra.mxu1 %v6184_v25  ;;  %6471 = vmatprep.subr.mxu0 %v5888_v27  ;;  %v6086_v6 = vld [vmem:[%s22200_s2 + $0x6c8] sm:$0xff]  ;;  %v6077_v19 = vld [vmem:[%s22200_s2 + $0x680] sm:$0xff] }
 0x3e9   :  { %5833 = vadd.xlane.f32.xlu0 %v5832_v20  ;;  %6542 = vmatprep.subr.mxu1 %v6176_v29  ;;  %v6374_v2 = vld [vmem:[%s22200_s2 + $0xfc8] sm:$0xff]  ;;  %v6365_v25 = vld [vmem:[%s22200_s2 + $0xf80] sm:$0xff] }
 0x3ea   :  { %6472 = vmatpush1.msra.mxu0 %v5887_v33  ;;  %6543 = vmatpush1.msra.mxu1 %v6175_v34  ;;  %v6337_v27 = vld [vmem:[%s22200_s2 + $0xea0] sm:$0xff]  ;;  %v6040_v34 = vld [vmem:[%s22200_s2 + $0x558] sm:$0xff] }
 0x3eb   :  { %6473 = vmatprep.subr.mxu0 %v5879_v1  ;;  %6544 = vmatprep.subr.mxu1 %v6167_v11  ;;  %v6041_v29 = vld [vmem:[%s22200_s2 + $0x560] sm:$0xff]  ;;  %v6328_v1 = vld [vmem:[%s22200_s2 + $0xe58] sm:$0xff] }
 0x3ec   :  { %6474 = vmatpush1.msra.mxu0 %v5878_v22  ;;  %6545 = vmatpush1.msra.mxu1 %v6166_v31  ;;  %v6329_v33 = vld [vmem:[%s22200_s2 + $0xe60] sm:$0xff]  ;;  %v6032_v11 = vld [vmem:[%s22200_s2 + $0x518] sm:$0xff]  ;;  %v6031_v31 = vld [vmem:[%s22200_s2 + $0x510] sm:$0xff] }
 0x3ed   :  { %6475 = vmatprep.subr.mxu0 %v5870_v46  ;;  %6546 = vmatprep.subr.mxu1 %v6158_v17  ;;  %v6320_v22 = vld [vmem:[%s22200_s2 + $0xe18] sm:$0xff]  ;;  %v6319_v46 = vld [vmem:[%s22200_s2 + $0xe10] sm:$0xff] }
 0x3ee   :  { %6476 = vmatpush1.msra.mxu0 %v5869_v23  ;;  %6547 = vmatpush1.msra.mxu1 %v6157_v48  ;;  %v6023_v17 = vld [vmem:[%s22200_s2 + $0x4d0] sm:$0xff]  ;;  %v6022_v48 = vld [vmem:[%s22200_s2 + $0x4c8] sm:$0xff] }
 0x3ef   :  { %6477 = vmatprep.subr.mxu0 %v6149_v54  ;;  %6548 = vmatprep.subr.mxu1 %v6437_v36  ;;  %v6311_v23 = vld [vmem:[%s22200_s2 + $0xdd0] sm:$0xff]  ;;  %v6310_v54 = vld [vmem:[%s22200_s2 + $0xdc8] sm:$0xff] }
 0x3f0   :  { %6478 = vmatpush2.msra.mxu0 %v6148_v32  ;;  %6549 = vmatpush2.msra.mxu1 %v6436_v40  ;;  %v6014_v36 = vld [vmem:[%s22200_s2 + $0x488] sm:$0xff]  ;;  %v6013_v40 = vld [vmem:[%s22200_s2 + $0x480] sm:$0xff] }
 0x3f1   :  { %6479 = vmatprep.subr.mxu0 %v6140_v38  ;;  %6550 = vmatprep.subr.mxu1 %v6428_v5  ;;  %v6302_v32 = vld [vmem:[%s22200_s2 + $0xd88] sm:$0xff]  ;;  %v6301_v38 = vld [vmem:[%s22200_s2 + $0xd80] sm:$0xff]  ;;  %v6007_v5 = vld [vmem:[%s22200_s2 + $0x450] sm:$0xff] }
 0x3f2   :  { %6480 = vmatpush2.msra.mxu0 %v6139_v45  ;;  %6551 = vmatpush2.msra.mxu1 %v6427_v10  ;;  %v6295_v45 = vld [vmem:[%s22200_s2 + $0xd50] sm:$0xff] }
 0x3f3   :  { %6481 = vmatprep.subr.mxu0 %v6131_v47  ;;  %6552 = vmatprep.subr.mxu1 %v6419_v56 }
 0x3f4   :  { %6482 = vmatpush2.msra.mxu0 %v6130_v4  ;;  %6553 = vmatpush2.msra.mxu1 %v6418_v53 }
 0x3f5   :  { %6483 = vmatprep.subr.mxu0 %v6122_v59  ;;  %6554 = vmatprep.subr.mxu1 %v6410_v60 }
 0x3f6   :  { %6484 = vmatpush2.msra.mxu0 %v6121_v28  ;;  %6555 = vmatpush2.msra.mxu1 %v6409_v0 }
 0x3f7   :  { %6485 = vmatprep.subr.mxu0 %v6113_v50  ;;  %6556 = vmatprep.subr.mxu1 %v6401_v51 }
 0x3f8   :  { %6486 = vmatpush2.msra.mxu0 %v6112_v52  ;;  %6557 = vmatpush2.msra.mxu1 %v6400_v35 }
 0x3f9   :  { %6487 = vmatprep.subr.mxu0 %v6104_v55  ;;  %6558 = vmatprep.subr.mxu1 %v6392_v63  ;;  %v6006_v55 = vld [vmem:[%s22200_s2 + $0x448] sm:$0xff] }
 0x3fa   :  { %6488 = vmatpush2.msra.mxu0 %v6103_v58  ;;  %6559 = vmatpush2.msra.mxu1 %v6391_v61  ;;  %v6294_v63 = vld [vmem:[%s22200_s2 + $0xd48] sm:$0xff]  ;;  %v5989_v58 = vld [vmem:[%s22200_s2 + $0x3c0] sm:$0xff] }
 0x3fb   :  { %6489 = vmatprep.subr.mxu0 %v6095_v62  ;;  %6560 = vmatprep.subr.mxu1 %v6383_v12  ;;  %v6277_v61 = vld [vmem:[%s22200_s2 + $0xcc0] sm:$0xff]  ;;  %v5988_v62 = vld [vmem:[%s22200_s2 + $0x3b8] sm:$0xff] }
 0x3fc   :  { %6490 = vmatpush2.msra.mxu0 %v6094_v39  ;;  %6561 = vmatpush2.msra.mxu1 %v6382_v26  ;;  %v6276_v12 = vld [vmem:[%s22200_s2 + $0xcb8] sm:$0xff] }
 0x3fd   :  { %6491 = vmatprep.subr.mxu0 %v6086_v6  ;;  %6562 = vmatprep.subr.mxu1 %v6374_v2  ;;  %v5980_v39 = vld [vmem:[%s22200_s2 + $0x378] sm:$0xff]  ;;  %v5979_v6 = vld [vmem:[%s22200_s2 + $0x370] sm:$0xff] }
 0x3fe   :  { %6492 = vmatpush2.msra.mxu0 %v6085_v7  ;;  %6563 = vmatpush2.msra.mxu1 %v6373_v49  ;;  %v6268_v26 = vld [vmem:[%s22200_s2 + $0xc78] sm:$0xff]  ;;  %v6267_v2 = vld [vmem:[%s22200_s2 + $0xc70] sm:$0xff] }
 0x3ff   :  { %6493 = vmatprep.subr.mxu0 %v6077_v19  ;;  %6564 = vmatprep.subr.mxu1 %v6365_v25  ;;  %v5971_v7 = vld [vmem:[%s22200_s2 + $0x330] sm:$0xff]  ;;  %v5970_v19 = vld [vmem:[%s22200_s2 + $0x328] sm:$0xff] }
 0x400   :  { %v6259_v49 = vld [vmem:[%s22200_s2 + $0xc30] sm:$0xff]  ;;  %v6258_v25 = vld [vmem:[%s22200_s2 + $0xc28] sm:$0xff] }
 0x472   :  { %v5834_v57 = vpop.xlane.xlu0 %5833 }
 0x473   :  { %v5836_v9 = vmul.f32 0.001953125, %v5834_v57  ;;  %v6076_v57 = vld [vmem:[%s22200_s2 + $0x678] sm:$0xff] }
 0x474   :  { %6494 = vmatpush2.msra.mxu0 %v6076_v57  ;;  %v5962_v57 = vld [vmem:[%s22200_s2 + $0x2e8] sm:$0xff] }
 0x475   :  { %v20151_v41 = vsub.f32 %v19407_v37, %v5836_v9  ;;  %v20154_v42 = vsub.f32 %v19412_v44, %v5836_v9  ;;  %v20157_v15 = vsub.f32 %v19986_v8, %v5836_v9  ;;  %v20160_v16 = vsub.f32 %v19990_v30, %v5836_v9  ;;  %v6364_v9 = vld [vmem:[%s22200_s2 + $0xf78] sm:$0xff] }
 0x476   :  { %6565 = vmatpush2.msra.mxu1 %v6364_v9  ;;  %v6250_v9 = vld [vmem:[%s22200_s2 + $0xbe8] sm:$0xff] }
 0x477   :  { %v5841_v20 = vmul.f32 %v20151_v41, %v20151_v41  ;;  %v5842_v21 = vmul.f32 %v20154_v42, %v20154_v42  ;;  %v5843_v24 = vmul.f32 %v20157_v15, %v20157_v15  ;;  %v5844_v37 = vmul.f32 %v20160_v16, %v20160_v16 }
 0x479   :  { %v5845_v44 = vsel %vm5825_vm0, %v5841_v20, 0.0  ;;  %v5846_v8 = vsel %vm5825_vm0, %v5842_v21, 0.0  ;;  %v5848_v30 = vsel %vm5825_vm0, %v5843_v24, 0.0  ;;  %v5850_v13 = vsel %vm5825_vm0, %v5844_v37, 0.0  ;;  %v6068_v20 = vld [vmem:[%s22200_s2 + $0x638] sm:$0xff]  ;;  %v6067_v24 = vld [vmem:[%s22200_s2 + $0x630] sm:$0xff] }
 0x47a   :  { %v5847_v3 = vadd.f32 %v5846_v8, %v5845_v44  ;;  %v6356_v21 = vld [vmem:[%s22200_s2 + $0xf38] sm:$0xff]  ;;  %v6355_v37 = vld [vmem:[%s22200_s2 + $0xf30] sm:$0xff]  ;;  %6495 = vmatprep.subr.mxu0 %v6068_v20  ;;  %v5961_v20 = vld [vmem:[%s22200_s2 + $0x2e0] sm:$0xff] }
 0x47b   :  { %6566 = vmatprep.subr.mxu1 %v6356_v21  ;;  %v6059_v44 = vld [vmem:[%s22200_s2 + $0x5f0] sm:$0xff]  ;;  %6496 = vmatpush2.msra.mxu0 %v6067_v24  ;;  %v6249_v21 = vld [vmem:[%s22200_s2 + $0xbe0] sm:$0xff] }
 0x47c   :  { %v5849_v14 = vadd.f32 %v5848_v30, %v5847_v3  ;;  %v6347_v8 = vld [vmem:[%s22200_s2 + $0xef0] sm:$0xff]  ;;  %v6058_v3 = vld [vmem:[%s22200_s2 + $0x5e8] sm:$0xff]  ;;  %6567 = vmatpush2.msra.mxu1 %v6355_v37  ;;  %6497 = vmatprep.subr.mxu0 %v6059_v44  ;;  %v5953_v24 = vld [vmem:[%s22200_s2 + $0x2a0] sm:$0xff] }
 0x47d   :  { %v6346_v30 = vld [vmem:[%s22200_s2 + $0xee8] sm:$0xff]  ;;  %6568 = vmatprep.subr.mxu1 %v6347_v8  ;;  %6498 = vmatpush2.msra.mxu0 %v6058_v3  ;;  %v6241_v37 = vld [vmem:[%s22200_s2 + $0xba0] sm:$0xff]  ;;  %v5952_v44 = vld [vmem:[%s22200_s2 + $0x298] sm:$0xff] }
 0x47e   :  { %v5851_v18 = vadd.f32 %v5850_v13, %v5849_v14  ;;  %v6050_v14 = vld [vmem:[%s22200_s2 + $0x5a8] sm:$0xff]  ;;  %6569 = vmatpush2.msra.mxu1 %v6346_v30  ;;  %v6240_v8 = vld [vmem:[%s22200_s2 + $0xb98] sm:$0xff] }
 0x47f   :  { %v6338_v13 = vld [vmem:[%s22200_s2 + $0xea8] sm:$0xff]  ;;  %6499 = vmatprep.subr.mxu0 %v6050_v14  ;;  %v5944_v3 = vld [vmem:[%s22200_s2 + $0x258] sm:$0xff]  ;;  %v5943_v14 = vld [vmem:[%s22200_s2 + $0x250] sm:$0xff] }
 0x480   :  { %5852 = vadd.xlane.f32.xlu0 %v5851_v18  ;;  %v6049_v18 = vld [vmem:[%s22200_s2 + $0x5a0] sm:$0xff]  ;;  %6570 = vmatprep.subr.mxu1 %v6338_v13  ;;  %v6232_v30 = vld [vmem:[%s22200_s2 + $0xb58] sm:$0xff]  ;;  %v6231_v13 = vld [vmem:[%s22200_s2 + $0xb50] sm:$0xff] }
 0x481   :  { %6500 = vmatpush2.msra.mxu0 %v6049_v18  ;;  %6571 = vmatpush2.msra.mxu1 %v6337_v27  ;;  %v5935_v18 = vld [vmem:[%s22200_s2 + $0x210] sm:$0xff] }
 0x482   :  { %6501 = vmatprep.subr.mxu0 %v6041_v29  ;;  %6572 = vmatprep.subr.mxu1 %v6329_v33  ;;  %v6223_v27 = vld [vmem:[%s22200_s2 + $0xb10] sm:$0xff]  ;;  %v5934_v29 = vld [vmem:[%s22200_s2 + $0x208] sm:$0xff] }
 0x483   :  { %6502 = vmatpush2.msra.mxu0 %v6040_v34  ;;  %6573 = vmatpush2.msra.mxu1 %v6328_v1  ;;  %v6222_v33 = vld [vmem:[%s22200_s2 + $0xb08] sm:$0xff] }
 0x484   :  { %6503 = vmatprep.subr.mxu0 %v6032_v11  ;;  %6574 = vmatprep.subr.mxu1 %v6320_v22  ;;  %v5926_v34 = vld [vmem:[%s22200_s2 + $0x1c8] sm:$0xff]  ;;  %v5925_v11 = vld [vmem:[%s22200_s2 + $0x1c0] sm:$0xff] }
 0x485   :  { %6504 = vmatpush2.msra.mxu0 %v6031_v31  ;;  %6575 = vmatpush2.msra.mxu1 %v6319_v46  ;;  %v6214_v1 = vld [vmem:[%s22200_s2 + $0xac8] sm:$0xff]  ;;  %v6213_v22 = vld [vmem:[%s22200_s2 + $0xac0] sm:$0xff] }
 0x486   :  { %6505 = vmatprep.subr.mxu0 %v6023_v17  ;;  %6576 = vmatprep.subr.mxu1 %v6311_v23  ;;  %v5917_v31 = vld [vmem:[%s22200_s2 + $0x180] sm:$0xff]  ;;  %v5916_v17 = vld [vmem:[%s22200_s2 + $0x178] sm:$0xff] }
 0x487   :  { %6506 = vmatpush2.msra.mxu0 %v6022_v48  ;;  %6577 = vmatpush2.msra.mxu1 %v6310_v54  ;;  %v6205_v46 = vld [vmem:[%s22200_s2 + $0xa80] sm:$0xff]  ;;  %v6204_v23 = vld [vmem:[%s22200_s2 + $0xa78] sm:$0xff] }
 0x488   :  { %6507 = vmatprep.subr.mxu0 %v6014_v36  ;;  %6578 = vmatprep.subr.mxu1 %v6302_v32  ;;  %v5908_v48 = vld [vmem:[%s22200_s2 + $0x138] sm:$0xff]  ;;  %v5907_v36 = vld [vmem:[%s22200_s2 + $0x130] sm:$0xff] }
 0x489   :  { %6508 = vmatpush2.msra.mxu0 %v6013_v40  ;;  %6579 = vmatpush2.msra.mxu1 %v6301_v38  ;;  %v6196_v54 = vld [vmem:[%s22200_s2 + $0xa38] sm:$0xff]  ;;  %v6195_v32 = vld [vmem:[%s22200_s2 + $0xa30] sm:$0xff] }
 0x48a   :  { %6587 = vmatprep.subr.mxu0 %v6007_v5  ;;  %6658 = vmatprep.subr.mxu1 %v6295_v45  ;;  %v5899_v40 = vld [vmem:[%s22200_s2 + $0xf0] sm:$0xff]  ;;  %v5898_v5 = vld [vmem:[%s22200_s2 + $0xe8] sm:$0xff] }
 0x48b   :  { %v6187_v38 = vld [vmem:[%s22200_s2 + $0x9f0] sm:$0xff]  ;;  %v6186_v45 = vld [vmem:[%s22200_s2 + $0x9e8] sm:$0xff] }
 0x509   :  { %v5853_v10 = vpop.xlane.xlu0 %5852 }
 0x50a   :  { %v5855_v47 = vmul.f32 0.0019569471, %v5853_v10  ;;  %v5890_v10 = vld [vmem:[%s22200_s2 + $0xa8] sm:$0xff] }
 0x50c   :  { %17266 = vrsqrt.f32 %v5855_v47  ;;  %vm5858_vm1 = vcmp.eq.f32.partialorder %v5855_v47, inf  ;;  %v5861_v53 = vand.u32 2147483648, %v5855_v47  ;;  %vm5860_vm2 = vcmp.eq.f32.partialorder %v5855_v47, 0.0 }
 0x519   :  { %v17267_v56 = vpop.eup %17266 }
 0x51a   :  { %v5857_v4 = vmul.f32 %v17267_v56, %v5855_v47  ;;  %v5889_v56 = vld [vmem:[%s22200_s2 + $0xa0] sm:$0xff] }
 0x51c   :  { %v5859_v59 = vsel %vm5858_vm1, %v5855_v47, %v5857_v4  ;;  %v6178_v47 = vld [vmem:[%s22200_s2 + $0x9a8] sm:$0xff]  ;;  %v6177_v4 = vld [vmem:[%s22200_s2 + $0x9a0] sm:$0xff] }
 0x51d   :  { %v5862_v60 = vsel %vm5860_vm2, %v5861_v53, %v5859_v59  ;;  %v5881_v53 = vld [vmem:[%s22200_s2 + $0x60] sm:$0xff] }
 0x51e   :  { %v5863_v28 = vadd.f32 1e-08, %v5862_v60  ;;  %v6169_v59 = vld [vmem:[%s22200_s2 + $0x960] sm:$0xff]  ;;  %v5880_v60 = vld [vmem:[%s22200_s2 + $0x58] sm:$0xff] }
 0x520   :  { %17268 = vrcp.f32 %v5863_v28  ;;  %v6168_v28 = vld [vmem:[%s22200_s2 + $0x958] sm:$0xff] }
 0x52d   :  { %v17269_v0 = vpop.eup %17268 }
 0x52e   :  { %v20409_v50 = vmul.f32 %v17269_v0, %v20154_v42  ;;  %v20412_v51 = vmul.f32 %v17269_v0, %v20160_v16  ;;  %v20415_v52 = vmul.f32 %v17269_v0, %v20151_v41  ;;  %v20418_v35 = vmul.f32 %v17269_v0, %v20157_v15  ;;  %v5998_v41 = vld [vmem:[%s22200_s2 + $0x408] sm:$0xff]  ;;  %v5997_v15 = vld [vmem:[%s22200_s2 + $0x400] sm:$0xff]  ;;  %v5872_v0 = vld [vmem:[%s22200_s2 + $0x18] sm:$0xff] }
 0x52f   :  { %v6286_v42 = vld [vmem:[%s22200_s2 + $0xd08] sm:$0xff]  ;;  %v6285_v16 = vld [vmem:[%s22200_s2 + $0xd00] sm:$0xff] }
 0x530   :  { %6509 = vmatprep.mubr.f32.mxu0 %v20409_v50  ;;  %6580 = vmatprep.mubr.f32.mxu1 %v20412_v51 }
 0x531   :  { %6510 = vmatmul.mubr.f32.vlgmr.msra.gmra.mxu0 %v20415_v52  ;;  %6581 = vmatmul.mubr.f32.vlgmr.msra.gmra.mxu1 %v20418_v35 }
 0x532   :  { %6588 = vmatpush1.msra.mxu0 %v6006_v55  ;;  %6659 = vmatpush1.msra.mxu1 %v6294_v63  ;;  %v6160_v55 = vld [vmem:[%s22200_s2 + $0x918] sm:$0xff]  ;;  %v5871_v63 = vld [vmem:[%s22200_s2 + $0x10] sm:$0xff] }
 0x533   :  { %6589 = vmatprep.subr.mxu0 %v5998_v41  ;;  %6651 = vmatprep.mubr.f32.mxu0 %v20409_v50  ;;  %v6159_v41 = vld [vmem:[%s22200_s2 + $0x910] sm:$0xff] }
 0x534   :  { %6660 = vmatprep.subr.mxu1 %v6286_v42  ;;  %6722 = vmatprep.mubr.f32.mxu1 %v20412_v51  ;;  %v6151_v42 = vld [vmem:[%s22200_s2 + $0x8d0] sm:$0xff] }
 0x535   :  { %6590 = vmatpush1.msra.mxu0 %v5997_v15  ;;  %6661 = vmatpush1.msra.mxu1 %v6285_v16  ;;  %v6439_v15 = vld [vmem:[%s22200_s2 + $0x11d0] sm:$0xff]  ;;  %v6150_v16 = vld [vmem:[%s22200_s2 + $0x8c8] sm:$0xff] }
 0x536   :  { %6591 = vmatprep.subr.mxu0 %v5989_v58  ;;  %6662 = vmatprep.subr.mxu1 %v6277_v61  ;;  %v6438_v58 = vld [vmem:[%s22200_s2 + $0x11c8] sm:$0xff] }
 0x537   :  { %6592 = vmatpush1.msra.mxu0 %v5988_v62  ;;  %6663 = vmatpush1.msra.mxu1 %v6276_v12  ;;  %v6142_v61 = vld [vmem:[%s22200_s2 + $0x888] sm:$0xff]  ;;  %v6141_v12 = vld [vmem:[%s22200_s2 + $0x880] sm:$0xff] }
 0x538   :  { %6593 = vmatprep.subr.mxu0 %v5980_v39  ;;  %6664 = vmatprep.subr.mxu1 %v6268_v26  ;;  %v6430_v62 = vld [vmem:[%s22200_s2 + $0x1188] sm:$0xff]  ;;  %v6429_v39 = vld [vmem:[%s22200_s2 + $0x1180] sm:$0xff] }
 0x539   :  { %6594 = vmatpush1.msra.mxu0 %v5979_v6  ;;  %6665 = vmatpush1.msra.mxu1 %v6267_v2  ;;  %v6133_v26 = vld [vmem:[%s22200_s2 + $0x840] sm:$0xff]  ;;  %v6132_v2 = vld [vmem:[%s22200_s2 + $0x838] sm:$0xff] }
 0x53a   :  { %6595 = vmatprep.subr.mxu0 %v5971_v7  ;;  %6666 = vmatprep.subr.mxu1 %v6259_v49  ;;  %v6421_v6 = vld [vmem:[%s22200_s2 + $0x1140] sm:$0xff]  ;;  %v6420_v7 = vld [vmem:[%s22200_s2 + $0x1138] sm:$0xff] }
 0x53b   :  { %6596 = vmatpush1.msra.mxu0 %v5970_v19  ;;  %6667 = vmatpush1.msra.mxu1 %v6258_v25  ;;  %v6124_v49 = vld [vmem:[%s22200_s2 + $0x7f8] sm:$0xff]  ;;  %v6123_v25 = vld [vmem:[%s22200_s2 + $0x7f0] sm:$0xff] }
 0x53c   :  { %6597 = vmatprep.subr.mxu0 %v5962_v57  ;;  %6668 = vmatprep.subr.mxu1 %v6250_v9  ;;  %v6412_v19 = vld [vmem:[%s22200_s2 + $0x10f8] sm:$0xff]  ;;  %v6411_v57 = vld [vmem:[%s22200_s2 + $0x10f0] sm:$0xff] }
 0x53d   :  { %6598 = vmatpush1.msra.mxu0 %v5961_v20  ;;  %6669 = vmatpush1.msra.mxu1 %v6249_v21  ;;  %v6115_v9 = vld [vmem:[%s22200_s2 + $0x7b0] sm:$0xff]  ;;  %v6114_v21 = vld [vmem:[%s22200_s2 + $0x7a8] sm:$0xff] }
 0x53e   :  { %6599 = vmatprep.subr.mxu0 %v5953_v24  ;;  %6670 = vmatprep.subr.mxu1 %v6241_v37  ;;  %v6403_v20 = vld [vmem:[%s22200_s2 + $0x10b0] sm:$0xff]  ;;  %v6402_v24 = vld [vmem:[%s22200_s2 + $0x10a8] sm:$0xff] }
 0x53f   :  { %6600 = vmatpush1.msra.mxu0 %v5952_v44  ;;  %6671 = vmatpush1.msra.mxu1 %v6240_v8  ;;  %v6106_v37 = vld [vmem:[%s22200_s2 + $0x768] sm:$0xff]  ;;  %v6105_v8 = vld [vmem:[%s22200_s2 + $0x760] sm:$0xff] }
 0x540   :  { %6601 = vmatprep.subr.mxu0 %v5944_v3  ;;  %6672 = vmatprep.subr.mxu1 %v6232_v30  ;;  %v6394_v44 = vld [vmem:[%s22200_s2 + $0x1068] sm:$0xff]  ;;  %v6393_v3 = vld [vmem:[%s22200_s2 + $0x1060] sm:$0xff] }
 0x541   :  { %6602 = vmatpush1.msra.mxu0 %v5943_v14  ;;  %6673 = vmatpush1.msra.mxu1 %v6231_v13  ;;  %v6097_v30 = vld [vmem:[%s22200_s2 + $0x720] sm:$0xff]  ;;  %v6096_v13 = vld [vmem:[%s22200_s2 + $0x718] sm:$0xff] }
 0x542   :  { %6603 = vmatprep.subr.mxu0 %v5935_v18  ;;  %6674 = vmatprep.subr.mxu1 %v6223_v27  ;;  %v6385_v14 = vld [vmem:[%s22200_s2 + $0x1020] sm:$0xff]  ;;  %v6384_v18 = vld [vmem:[%s22200_s2 + $0x1018] sm:$0xff] }
 0x543   :  { %6604 = vmatpush1.msra.mxu0 %v5934_v29  ;;  %6675 = vmatpush1.msra.mxu1 %v6222_v33  ;;  %v6088_v27 = vld [vmem:[%s22200_s2 + $0x6d8] sm:$0xff]  ;;  %v6087_v33 = vld [vmem:[%s22200_s2 + $0x6d0] sm:$0xff] }
 0x544   :  { %6605 = vmatprep.subr.mxu0 %v5926_v34  ;;  %6676 = vmatprep.subr.mxu1 %v6214_v1  ;;  %v6376_v29 = vld [vmem:[%s22200_s2 + $0xfd8] sm:$0xff]  ;;  %v6375_v34 = vld [vmem:[%s22200_s2 + $0xfd0] sm:$0xff] }
 0x545   :  { %6606 = vmatpush1.msra.mxu0 %v5925_v11  ;;  %6677 = vmatpush1.msra.mxu1 %v6213_v22  ;;  %v6079_v1 = vld [vmem:[%s22200_s2 + $0x690] sm:$0xff]  ;;  %v6078_v22 = vld [vmem:[%s22200_s2 + $0x688] sm:$0xff] }
 0x546   :  { %6607 = vmatprep.subr.mxu0 %v5917_v31  ;;  %6678 = vmatprep.subr.mxu1 %v6205_v46  ;;  %v6367_v11 = vld [vmem:[%s22200_s2 + $0xf90] sm:$0xff]  ;;  %v6366_v31 = vld [vmem:[%s22200_s2 + $0xf88] sm:$0xff] }
 0x547   :  { %6608 = vmatpush1.msra.mxu0 %v5916_v17  ;;  %6679 = vmatpush1.msra.mxu1 %v6204_v23  ;;  %v6070_v46 = vld [vmem:[%s22200_s2 + $0x648] sm:$0xff]  ;;  %v6069_v23 = vld [vmem:[%s22200_s2 + $0x640] sm:$0xff] }
 0x548   :  { %6609 = vmatprep.subr.mxu0 %v5908_v48  ;;  %6680 = vmatprep.subr.mxu1 %v6196_v54  ;;  %v6358_v17 = vld [vmem:[%s22200_s2 + $0xf48] sm:$0xff]  ;;  %v6357_v48 = vld [vmem:[%s22200_s2 + $0xf40] sm:$0xff] }
 0x549   :  { %6610 = vmatpush1.msra.mxu0 %v5907_v36  ;;  %6681 = vmatpush1.msra.mxu1 %v6195_v32  ;;  %v6061_v54 = vld [vmem:[%s22200_s2 + $0x600] sm:$0xff]  ;;  %v6060_v32 = vld [vmem:[%s22200_s2 + $0x5f8] sm:$0xff] }
 0x54a   :  { %6611 = vmatprep.subr.mxu0 %v5899_v40  ;;  %6682 = vmatprep.subr.mxu1 %v6187_v38  ;;  %v6349_v36 = vld [vmem:[%s22200_s2 + $0xf00] sm:$0xff]  ;;  %v6348_v40 = vld [vmem:[%s22200_s2 + $0xef8] sm:$0xff] }
 0x54b   :  { %6612 = vmatpush1.msra.mxu0 %v5898_v5  ;;  %6683 = vmatpush1.msra.mxu1 %v6186_v45  ;;  %v6052_v38 = vld [vmem:[%s22200_s2 + $0x5b8] sm:$0xff]  ;;  %v6051_v45 = vld [vmem:[%s22200_s2 + $0x5b0] sm:$0xff] }
 0x54c   :  { %6613 = vmatprep.subr.mxu0 %v5890_v10  ;;  %6684 = vmatprep.subr.mxu1 %v6178_v47  ;;  %v6340_v5 = vld [vmem:[%s22200_s2 + $0xeb8] sm:$0xff]  ;;  %v6339_v10 = vld [vmem:[%s22200_s2 + $0xeb0] sm:$0xff] }
 0x54d   :  { %6614 = vmatpush1.msra.mxu0 %v5889_v56  ;;  %6685 = vmatpush1.msra.mxu1 %v6177_v4  ;;  %v6043_v47 = vld [vmem:[%s22200_s2 + $0x570] sm:$0xff]  ;;  %v6042_v4 = vld [vmem:[%s22200_s2 + $0x568] sm:$0xff] }
 0x54e   :  { %6615 = vmatprep.subr.mxu0 %v5881_v53  ;;  %6686 = vmatprep.subr.mxu1 %v6169_v59  ;;  %v6331_v56 = vld [vmem:[%s22200_s2 + $0xe70] sm:$0xff]  ;;  %v6330_v53 = vld [vmem:[%s22200_s2 + $0xe68] sm:$0xff] }
 0x54f   :  { %6616 = vmatpush1.msra.mxu0 %v5880_v60  ;;  %6687 = vmatpush1.msra.mxu1 %v6168_v28  ;;  %v6034_v59 = vld [vmem:[%s22200_s2 + $0x528] sm:$0xff]  ;;  %v6033_v28 = vld [vmem:[%s22200_s2 + $0x520] sm:$0xff] }
 0x550   :  { %6617 = vmatprep.subr.mxu0 %v5872_v0  ;;  %6688 = vmatprep.subr.mxu1 %v6160_v55  ;;  %v6322_v60 = vld [vmem:[%s22200_s2 + $0xe28] sm:$0xff]  ;;  %v6321_v0 = vld [vmem:[%s22200_s2 + $0xe20] sm:$0xff] }
 0x551   :  { %6618 = vmatpush1.msra.mxu0 %v5871_v63  ;;  %6689 = vmatpush1.msra.mxu1 %v6159_v41  ;;  %v6025_v55 = vld [vmem:[%s22200_s2 + $0x4e0] sm:$0xff]  ;;  %v6024_v41 = vld [vmem:[%s22200_s2 + $0x4d8] sm:$0xff] }
 0x552   :  { %6619 = vmatprep.subr.mxu0 %v6151_v42  ;;  %6690 = vmatprep.subr.mxu1 %v6439_v15  ;;  %v6313_v63 = vld [vmem:[%s22200_s2 + $0xde0] sm:$0xff]  ;;  %v6312_v42 = vld [vmem:[%s22200_s2 + $0xdd8] sm:$0xff] }
 0x553   :  { %6620 = vmatpush2.msra.mxu0 %v6150_v16  ;;  %6691 = vmatpush2.msra.mxu1 %v6438_v58  ;;  %v6016_v15 = vld [vmem:[%s22200_s2 + $0x498] sm:$0xff]  ;;  %v6015_v58 = vld [vmem:[%s22200_s2 + $0x490] sm:$0xff] }
 0x554   :  { %6621 = vmatprep.subr.mxu0 %v6142_v61  ;;  %6692 = vmatprep.subr.mxu1 %v6430_v62  ;;  %v6304_v16 = vld [vmem:[%s22200_s2 + $0xd98] sm:$0xff]  ;;  %v6303_v61 = vld [vmem:[%s22200_s2 + $0xd90] sm:$0xff]  ;;  %v6009_v62 = vld [vmem:[%s22200_s2 + $0x460] sm:$0xff] }
 0x555   :  { %6622 = vmatpush2.msra.mxu0 %v6141_v12  ;;  %6693 = vmatpush2.msra.mxu1 %v6429_v39  ;;  %v6297_v12 = vld [vmem:[%s22200_s2 + $0xd60] sm:$0xff]  ;;  %v6008_v39 = vld [vmem:[%s22200_s2 + $0x458] sm:$0xff] }
 0x556   :  { %6623 = vmatprep.subr.mxu0 %v6133_v26  ;;  %6694 = vmatprep.subr.mxu1 %v6421_v6  ;;  %v6296_v26 = vld [vmem:[%s22200_s2 + $0xd58] sm:$0xff] }
 0x557   :  { %6624 = vmatpush2.msra.mxu0 %v6132_v2  ;;  %6695 = vmatpush2.msra.mxu1 %v6420_v7  ;;  %v6000_v6 = vld [vmem:[%s22200_s2 + $0x418] sm:$0xff]  ;;  %v5999_v7 = vld [vmem:[%s22200_s2 + $0x410] sm:$0xff] }
 0x558   :  { %6625 = vmatprep.subr.mxu0 %v6124_v49  ;;  %6696 = vmatprep.subr.mxu1 %v6412_v19  ;;  %v6288_v2 = vld [vmem:[%s22200_s2 + $0xd18] sm:$0xff]  ;;  %v6287_v49 = vld [vmem:[%s22200_s2 + $0xd10] sm:$0xff] }
 0x559   :  { %6626 = vmatpush2.msra.mxu0 %v6123_v25  ;;  %6697 = vmatpush2.msra.mxu1 %v6411_v57  ;;  %v5991_v19 = vld [vmem:[%s22200_s2 + $0x3d0] sm:$0xff]  ;;  %v5990_v57 = vld [vmem:[%s22200_s2 + $0x3c8] sm:$0xff] }
 0x55a   :  { %6627 = vmatprep.subr.mxu0 %v6115_v9  ;;  %6698 = vmatprep.subr.mxu1 %v6403_v20  ;;  %v6279_v25 = vld [vmem:[%s22200_s2 + $0xcd0] sm:$0xff]  ;;  %v6278_v9 = vld [vmem:[%s22200_s2 + $0xcc8] sm:$0xff] }
 0x55b   :  { %6628 = vmatpush2.msra.mxu0 %v6114_v21  ;;  %6699 = vmatpush2.msra.mxu1 %v6402_v24  ;;  %v5982_v20 = vld [vmem:[%s22200_s2 + $0x388] sm:$0xff]  ;;  %v5981_v24 = vld [vmem:[%s22200_s2 + $0x380] sm:$0xff] }
 0x55c   :  { %6629 = vmatprep.subr.mxu0 %v6106_v37  ;;  %6700 = vmatprep.subr.mxu1 %v6394_v44  ;;  %v6270_v21 = vld [vmem:[%s22200_s2 + $0xc88] sm:$0xff]  ;;  %v6269_v37 = vld [vmem:[%s22200_s2 + $0xc80] sm:$0xff] }
 0x55d   :  { %6630 = vmatpush2.msra.mxu0 %v6105_v8  ;;  %6701 = vmatpush2.msra.mxu1 %v6393_v3  ;;  %v5973_v44 = vld [vmem:[%s22200_s2 + $0x340] sm:$0xff]  ;;  %v5972_v3 = vld [vmem:[%s22200_s2 + $0x338] sm:$0xff] }
 0x55e   :  { %6631 = vmatprep.subr.mxu0 %v6097_v30  ;;  %6702 = vmatprep.subr.mxu1 %v6385_v14  ;;  %v6261_v8 = vld [vmem:[%s22200_s2 + $0xc40] sm:$0xff]  ;;  %v6260_v30 = vld [vmem:[%s22200_s2 + $0xc38] sm:$0xff] }
 0x55f   :  { %6632 = vmatpush2.msra.mxu0 %v6096_v13  ;;  %6703 = vmatpush2.msra.mxu1 %v6384_v18  ;;  %v5964_v14 = vld [vmem:[%s22200_s2 + $0x2f8] sm:$0xff]  ;;  %v5963_v18 = vld [vmem:[%s22200_s2 + $0x2f0] sm:$0xff] }
 0x560   :  { %6633 = vmatprep.subr.mxu0 %v6088_v27  ;;  %6704 = vmatprep.subr.mxu1 %v6376_v29  ;;  %v6252_v13 = vld [vmem:[%s22200_s2 + $0xbf8] sm:$0xff]  ;;  %v6251_v27 = vld [vmem:[%s22200_s2 + $0xbf0] sm:$0xff] }
 0x561   :  { %6634 = vmatpush2.msra.mxu0 %v6087_v33  ;;  %6705 = vmatpush2.msra.mxu1 %v6375_v34  ;;  %v5955_v29 = vld [vmem:[%s22200_s2 + $0x2b0] sm:$0xff]  ;;  %v5954_v34 = vld [vmem:[%s22200_s2 + $0x2a8] sm:$0xff] }
 0x562   :  { %6635 = vmatprep.subr.mxu0 %v6079_v1  ;;  %6706 = vmatprep.subr.mxu1 %v6367_v11  ;;  %v6243_v33 = vld [vmem:[%s22200_s2 + $0xbb0] sm:$0xff]  ;;  %v6242_v1 = vld [vmem:[%s22200_s2 + $0xba8] sm:$0xff] }
 0x563   :  { %6636 = vmatpush2.msra.mxu0 %v6078_v22  ;;  %6707 = vmatpush2.msra.mxu1 %v6366_v31  ;;  %v5946_v11 = vld [vmem:[%s22200_s2 + $0x268] sm:$0xff]  ;;  %v5945_v31 = vld [vmem:[%s22200_s2 + $0x260] sm:$0xff] }
 0x564   :  { %6637 = vmatprep.subr.mxu0 %v6070_v46  ;;  %6708 = vmatprep.subr.mxu1 %v6358_v17  ;;  %v6234_v22 = vld [vmem:[%s22200_s2 + $0xb68] sm:$0xff]  ;;  %v6233_v46 = vld [vmem:[%s22200_s2 + $0xb60] sm:$0xff] }
 0x565   :  { %6638 = vmatpush2.msra.mxu0 %v6069_v23  ;;  %6709 = vmatpush2.msra.mxu1 %v6357_v48  ;;  %v5937_v17 = vld [vmem:[%s22200_s2 + $0x220] sm:$0xff]  ;;  %v5936_v48 = vld [vmem:[%s22200_s2 + $0x218] sm:$0xff] }
 0x566   :  { %6639 = vmatprep.subr.mxu0 %v6061_v54  ;;  %6710 = vmatprep.subr.mxu1 %v6349_v36  ;;  %v6225_v23 = vld [vmem:[%s22200_s2 + $0xb20] sm:$0xff]  ;;  %v6224_v54 = vld [vmem:[%s22200_s2 + $0xb18] sm:$0xff] }
 0x567   :  { %6640 = vmatpush2.msra.mxu0 %v6060_v32  ;;  %6711 = vmatpush2.msra.mxu1 %v6348_v40  ;;  %v5928_v36 = vld [vmem:[%s22200_s2 + $0x1d8] sm:$0xff]  ;;  %v5927_v40 = vld [vmem:[%s22200_s2 + $0x1d0] sm:$0xff] }
 0x568   :  { %6641 = vmatprep.subr.mxu0 %v6052_v38  ;;  %6712 = vmatprep.subr.mxu1 %v6340_v5  ;;  %v6216_v32 = vld [vmem:[%s22200_s2 + $0xad8] sm:$0xff]  ;;  %v6215_v38 = vld [vmem:[%s22200_s2 + $0xad0] sm:$0xff] }
 0x569   :  { %6642 = vmatpush2.msra.mxu0 %v6051_v45  ;;  %6713 = vmatpush2.msra.mxu1 %v6339_v10  ;;  %v5919_v5 = vld [vmem:[%s22200_s2 + $0x190] sm:$0xff]  ;;  %v5918_v10 = vld [vmem:[%s22200_s2 + $0x188] sm:$0xff] }
 0x56a   :  { %6643 = vmatprep.subr.mxu0 %v6043_v47  ;;  %6714 = vmatprep.subr.mxu1 %v6331_v56  ;;  %v6207_v45 = vld [vmem:[%s22200_s2 + $0xa90] sm:$0xff]  ;;  %v6206_v47 = vld [vmem:[%s22200_s2 + $0xa88] sm:$0xff] }
 0x56b   :  { %6644 = vmatpush2.msra.mxu0 %v6042_v4  ;;  %6715 = vmatpush2.msra.mxu1 %v6330_v53  ;;  %v5910_v56 = vld [vmem:[%s22200_s2 + $0x148] sm:$0xff]  ;;  %v5909_v53 = vld [vmem:[%s22200_s2 + $0x140] sm:$0xff] }
 0x56c   :  { %6645 = vmatprep.subr.mxu0 %v6034_v59  ;;  %6716 = vmatprep.subr.mxu1 %v6322_v60  ;;  %v6198_v4 = vld [vmem:[%s22200_s2 + $0xa48] sm:$0xff]  ;;  %v6197_v59 = vld [vmem:[%s22200_s2 + $0xa40] sm:$0xff] }
 0x56d   :  { %6646 = vmatpush2.msra.mxu0 %v6033_v28  ;;  %6717 = vmatpush2.msra.mxu1 %v6321_v0  ;;  %v5901_v60 = vld [vmem:[%s22200_s2 + $0x100] sm:$0xff]  ;;  %v5900_v0 = vld [vmem:[%s22200_s2 + $0xf8] sm:$0xff] }
 0x56e   :  { %6647 = vmatprep.subr.mxu0 %v6025_v55  ;;  %6718 = vmatprep.subr.mxu1 %v6313_v63  ;;  %v6189_v28 = vld [vmem:[%s22200_s2 + $0xa00] sm:$0xff]  ;;  %v6188_v55 = vld [vmem:[%s22200_s2 + $0x9f8] sm:$0xff] }
 0x56f   :  { %6648 = vmatpush2.msra.mxu0 %v6024_v41  ;;  %6719 = vmatpush2.msra.mxu1 %v6312_v42  ;;  %v5892_v63 = vld [vmem:[%s22200_s2 + $0xb8] sm:$0xff]  ;;  %v5891_v42 = vld [vmem:[%s22200_s2 + $0xb0] sm:$0xff] }
 0x570   :  { %6649 = vmatprep.subr.mxu0 %v6016_v15  ;;  %6720 = vmatprep.subr.mxu1 %v6304_v16  ;;  %v6180_v41 = vld [vmem:[%s22200_s2 + $0x9b8] sm:$0xff]  ;;  %v6179_v15 = vld [vmem:[%s22200_s2 + $0x9b0] sm:$0xff] }
 0x571   :  { %6650 = vmatpush2.msra.mxu0 %v6015_v58  ;;  %6721 = vmatpush2.msra.mxu1 %v6303_v61  ;;  %v5883_v16 = vld [vmem:[%s22200_s2 + $0x70] sm:$0xff]  ;;  %v5882_v61 = vld [vmem:[%s22200_s2 + $0x68] sm:$0xff] }
 0x572   :  { %6652 = vmatmul.mubr.f32.vlgmr.msra.gmra.mxu0 %v20415_v52  ;;  %6723 = vmatmul.mubr.f32.vlgmr.msra.gmra.mxu1 %v20418_v35  ;;  %v6171_v58 = vld [vmem:[%s22200_s2 + $0x970] sm:$0xff] }
 0x573   :  { %6729 = vmatprep.subr.mxu0 %v6009_v62  ;;  %6800 = vmatprep.subr.mxu1 %v6297_v12  ;;  %v6170_v62 = vld [vmem:[%s22200_s2 + $0x968] sm:$0xff] }
 0x574   :  { %6730 = vmatpush1.msra.mxu0 %v6008_v39  ;;  %6793 = vmatprep.mubr.f32.mxu0 %v20409_v50  ;;  %v5874_v12 = vld [vmem:[%s22200_s2 + $0x28] sm:$0xff] }
 0x575   :  { %6801 = vmatpush1.msra.mxu1 %v6296_v26  ;;  %6864 = vmatprep.mubr.f32.mxu1 %v20412_v51  ;;  %v6162_v39 = vld [vmem:[%s22200_s2 + $0x928] sm:$0xff]  ;;  %v5873_v26 = vld [vmem:[%s22200_s2 + $0x20] sm:$0xff] }
 0x576   :  { %6731 = vmatprep.subr.mxu0 %v6000_v6  ;;  %6802 = vmatprep.subr.mxu1 %v6288_v2  ;;  %v6161_v6 = vld [vmem:[%s22200_s2 + $0x920] sm:$0xff] }
 0x577   :  { %6732 = vmatpush1.msra.mxu0 %v5999_v7  ;;  %6803 = vmatpush1.msra.mxu1 %v6287_v49  ;;  %v6153_v2 = vld [vmem:[%s22200_s2 + $0x8e0] sm:$0xff]  ;;  %v6152_v49 = vld [vmem:[%s22200_s2 + $0x8d8] sm:$0xff] }
 0x578   :  { %6733 = vmatprep.subr.mxu0 %v5991_v19  ;;  %6804 = vmatprep.subr.mxu1 %v6279_v25  ;;  %v6441_v7 = vld [vmem:[%s22200_s2 + $0x11e0] sm:$0xff]  ;;  %v6440_v19 = vld [vmem:[%s22200_s2 + $0x11d8] sm:$0xff] }
 0x579   :  { %6734 = vmatpush1.msra.mxu0 %v5990_v57  ;;  %6805 = vmatpush1.msra.mxu1 %v6278_v9  ;;  %v6144_v25 = vld [vmem:[%s22200_s2 + $0x898] sm:$0xff]  ;;  %v6143_v9 = vld [vmem:[%s22200_s2 + $0x890] sm:$0xff] }
 0x57a   :  { %6735 = vmatprep.subr.mxu0 %v5982_v20  ;;  %6806 = vmatprep.subr.mxu1 %v6270_v21  ;;  %v6432_v57 = vld [vmem:[%s22200_s2 + $0x1198] sm:$0xff]  ;;  %v6431_v20 = vld [vmem:[%s22200_s2 + $0x1190] sm:$0xff] }
 0x57b   :  { %6736 = vmatpush1.msra.mxu0 %v5981_v24  ;;  %6807 = vmatpush1.msra.mxu1 %v6269_v37  ;;  %v6135_v21 = vld [vmem:[%s22200_s2 + $0x850] sm:$0xff]  ;;  %v6134_v37 = vld [vmem:[%s22200_s2 + $0x848] sm:$0xff] }
 0x57c   :  { %6737 = vmatprep.subr.mxu0 %v5973_v44  ;;  %6808 = vmatprep.subr.mxu1 %v6261_v8  ;;  %v6423_v24 = vld [vmem:[%s22200_s2 + $0x1150] sm:$0xff]  ;;  %v6422_v44 = vld [vmem:[%s22200_s2 + $0x1148] sm:$0xff] }
 0x57d   :  { %6738 = vmatpush1.msra.mxu0 %v5972_v3  ;;  %6809 = vmatpush1.msra.mxu1 %v6260_v30  ;;  %v6126_v8 = vld [vmem:[%s22200_s2 + $0x808] sm:$0xff]  ;;  %v6125_v30 = vld [vmem:[%s22200_s2 + $0x800] sm:$0xff] }
 0x57e   :  { %6739 = vmatprep.subr.mxu0 %v5964_v14  ;;  %6810 = vmatprep.subr.mxu1 %v6252_v13  ;;  %v6414_v3 = vld [vmem:[%s22200_s2 + $0x1108] sm:$0xff]  ;;  %v6413_v14 = vld [vmem:[%s22200_s2 + $0x1100] sm:$0xff] }
 0x57f   :  { %6740 = vmatpush1.msra.mxu0 %v5963_v18  ;;  %6811 = vmatpush1.msra.mxu1 %v6251_v27  ;;  %v6117_v13 = vld [vmem:[%s22200_s2 + $0x7c0] sm:$0xff]  ;;  %v6116_v27 = vld [vmem:[%s22200_s2 + $0x7b8] sm:$0xff] }
 0x580   :  { %6741 = vmatprep.subr.mxu0 %v5955_v29  ;;  %6812 = vmatprep.subr.mxu1 %v6243_v33  ;;  %v6405_v18 = vld [vmem:[%s22200_s2 + $0x10c0] sm:$0xff]  ;;  %v6404_v29 = vld [vmem:[%s22200_s2 + $0x10b8] sm:$0xff] }
 0x581   :  { %6742 = vmatpush1.msra.mxu0 %v5954_v34  ;;  %6813 = vmatpush1.msra.mxu1 %v6242_v1  ;;  %v6108_v33 = vld [vmem:[%s22200_s2 + $0x778] sm:$0xff]  ;;  %v6107_v1 = vld [vmem:[%s22200_s2 + $0x770] sm:$0xff] }
 0x582   :  { %6743 = vmatprep.subr.mxu0 %v5946_v11  ;;  %6814 = vmatprep.subr.mxu1 %v6234_v22  ;;  %v6396_v34 = vld [vmem:[%s22200_s2 + $0x1078] sm:$0xff]  ;;  %v6395_v11 = vld [vmem:[%s22200_s2 + $0x1070] sm:$0xff] }
 0x583   :  { %6744 = vmatpush1.msra.mxu0 %v5945_v31  ;;  %6815 = vmatpush1.msra.mxu1 %v6233_v46  ;;  %v6099_v22 = vld [vmem:[%s22200_s2 + $0x730] sm:$0xff]  ;;  %v6098_v46 = vld [vmem:[%s22200_s2 + $0x728] sm:$0xff] }
 0x584   :  { %6745 = vmatprep.subr.mxu0 %v5937_v17  ;;  %6816 = vmatprep.subr.mxu1 %v6225_v23  ;;  %v6387_v31 = vld [vmem:[%s22200_s2 + $0x1030] sm:$0xff]  ;;  %v6386_v17 = vld [vmem:[%s22200_s2 + $0x1028] sm:$0xff] }
 0x585   :  { %6746 = vmatpush1.msra.mxu0 %v5936_v48  ;;  %6817 = vmatpush1.msra.mxu1 %v6224_v54  ;;  %v6090_v23 = vld [vmem:[%s22200_s2 + $0x6e8] sm:$0xff]  ;;  %v6089_v54 = vld [vmem:[%s22200_s2 + $0x6e0] sm:$0xff] }
 0x586   :  { %6747 = vmatprep.subr.mxu0 %v5928_v36  ;;  %6818 = vmatprep.subr.mxu1 %v6216_v32  ;;  %v6378_v48 = vld [vmem:[%s22200_s2 + $0xfe8] sm:$0xff]  ;;  %v6377_v36 = vld [vmem:[%s22200_s2 + $0xfe0] sm:$0xff] }
 0x587   :  { %6748 = vmatpush1.msra.mxu0 %v5927_v40  ;;  %6819 = vmatpush1.msra.mxu1 %v6215_v38  ;;  %v6081_v32 = vld [vmem:[%s22200_s2 + $0x6a0] sm:$0xff]  ;;  %v6080_v38 = vld [vmem:[%s22200_s2 + $0x698] sm:$0xff] }
 0x588   :  { %6749 = vmatprep.subr.mxu0 %v5919_v5  ;;  %6820 = vmatprep.subr.mxu1 %v6207_v45  ;;  %v6369_v40 = vld [vmem:[%s22200_s2 + $0xfa0] sm:$0xff]  ;;  %v6368_v5 = vld [vmem:[%s22200_s2 + $0xf98] sm:$0xff] }
 0x589   :  { %6750 = vmatpush1.msra.mxu0 %v5918_v10  ;;  %6821 = vmatpush1.msra.mxu1 %v6206_v47  ;;  %v6072_v45 = vld [vmem:[%s22200_s2 + $0x658] sm:$0xff]  ;;  %v6071_v47 = vld [vmem:[%s22200_s2 + $0x650] sm:$0xff] }
 0x58a   :  { %6751 = vmatprep.subr.mxu0 %v5910_v56  ;;  %6822 = vmatprep.subr.mxu1 %v6198_v4  ;;  %v6360_v10 = vld [vmem:[%s22200_s2 + $0xf58] sm:$0xff]  ;;  %v6359_v56 = vld [vmem:[%s22200_s2 + $0xf50] sm:$0xff] }
 0x58b   :  { %6752 = vmatpush1.msra.mxu0 %v5909_v53  ;;  %6823 = vmatpush1.msra.mxu1 %v6197_v59  ;;  %v6063_v4 = vld [vmem:[%s22200_s2 + $0x610] sm:$0xff]  ;;  %v6062_v59 = vld [vmem:[%s22200_s2 + $0x608] sm:$0xff] }
 0x58c   :  { %6753 = vmatprep.subr.mxu0 %v5901_v60  ;;  %6824 = vmatprep.subr.mxu1 %v6189_v28  ;;  %v6351_v53 = vld [vmem:[%s22200_s2 + $0xf10] sm:$0xff]  ;;  %v6350_v60 = vld [vmem:[%s22200_s2 + $0xf08] sm:$0xff] }
 0x58d   :  { %6754 = vmatpush1.msra.mxu0 %v5900_v0  ;;  %6825 = vmatpush1.msra.mxu1 %v6188_v55  ;;  %v6054_v28 = vld [vmem:[%s22200_s2 + $0x5c8] sm:$0xff]  ;;  %v6053_v55 = vld [vmem:[%s22200_s2 + $0x5c0] sm:$0xff] }
 0x58e   :  { %6755 = vmatprep.subr.mxu0 %v5892_v63  ;;  %6826 = vmatprep.subr.mxu1 %v6180_v41  ;;  %v6342_v0 = vld [vmem:[%s22200_s2 + $0xec8] sm:$0xff]  ;;  %v6341_v63 = vld [vmem:[%s22200_s2 + $0xec0] sm:$0xff] }
 0x58f   :  { %6756 = vmatpush1.msra.mxu0 %v5891_v42  ;;  %6827 = vmatpush1.msra.mxu1 %v6179_v15  ;;  %v6045_v41 = vld [vmem:[%s22200_s2 + $0x580] sm:$0xff]  ;;  %v6044_v15 = vld [vmem:[%s22200_s2 + $0x578] sm:$0xff] }
 0x590   :  { %6757 = vmatprep.subr.mxu0 %v5883_v16  ;;  %6828 = vmatprep.subr.mxu1 %v6171_v58  ;;  %v6333_v42 = vld [vmem:[%s22200_s2 + $0xe80] sm:$0xff]  ;;  %v6332_v16 = vld [vmem:[%s22200_s2 + $0xe78] sm:$0xff] }
 0x591   :  { %6758 = vmatpush1.msra.mxu0 %v5882_v61  ;;  %6829 = vmatpush1.msra.mxu1 %v6170_v62  ;;  %v6036_v58 = vld [vmem:[%s22200_s2 + $0x538] sm:$0xff]  ;;  %v6035_v62 = vld [vmem:[%s22200_s2 + $0x530] sm:$0xff] }
 0x592   :  { %6759 = vmatprep.subr.mxu0 %v5874_v12  ;;  %6830 = vmatprep.subr.mxu1 %v6162_v39  ;;  %v6324_v61 = vld [vmem:[%s22200_s2 + $0xe38] sm:$0xff]  ;;  %v6323_v12 = vld [vmem:[%s22200_s2 + $0xe30] sm:$0xff] }
 0x593   :  { %6760 = vmatpush1.msra.mxu0 %v5873_v26  ;;  %6831 = vmatpush1.msra.mxu1 %v6161_v6  ;;  %v6027_v39 = vld [vmem:[%s22200_s2 + $0x4f0] sm:$0xff]  ;;  %v6026_v6 = vld [vmem:[%s22200_s2 + $0x4e8] sm:$0xff] }
 0x594   :  { %6761 = vmatprep.subr.mxu0 %v6153_v2  ;;  %6832 = vmatprep.subr.mxu1 %v6441_v7  ;;  %v6315_v26 = vld [vmem:[%s22200_s2 + $0xdf0] sm:$0xff]  ;;  %v6314_v2 = vld [vmem:[%s22200_s2 + $0xde8] sm:$0xff] }
 0x595   :  { %6762 = vmatpush2.msra.mxu0 %v6152_v49  ;;  %6833 = vmatpush2.msra.mxu1 %v6440_v19  ;;  %v6018_v7 = vld [vmem:[%s22200_s2 + $0x4a8] sm:$0xff]  ;;  %v6017_v19 = vld [vmem:[%s22200_s2 + $0x4a0] sm:$0xff] }
 0x596   :  { %6763 = vmatprep.subr.mxu0 %v6144_v25  ;;  %6834 = vmatprep.subr.mxu1 %v6432_v57  ;;  %v6306_v49 = vld [vmem:[%s22200_s2 + $0xda8] sm:$0xff]  ;;  %v6305_v25 = vld [vmem:[%s22200_s2 + $0xda0] sm:$0xff]  ;;  %v6011_v57 = vld [vmem:[%s22200_s2 + $0x470] sm:$0xff] }
 0x597   :  { %6764 = vmatpush2.msra.mxu0 %v6143_v9  ;;  %6835 = vmatpush2.msra.mxu1 %v6431_v20  ;;  %v6299_v9 = vld [vmem:[%s22200_s2 + $0xd70] sm:$0xff]  ;;  %v6010_v20 = vld [vmem:[%s22200_s2 + $0x468] sm:$0xff] }
 0x598   :  { %6765 = vmatprep.subr.mxu0 %v6135_v21  ;;  %6836 = vmatprep.subr.mxu1 %v6423_v24  ;;  %v6298_v21 = vld [vmem:[%s22200_s2 + $0xd68] sm:$0xff] }
 0x599   :  { %6766 = vmatpush2.msra.mxu0 %v6134_v37  ;;  %6837 = vmatpush2.msra.mxu1 %v6422_v44  ;;  %v6002_v24 = vld [vmem:[%s22200_s2 + $0x428] sm:$0xff]  ;;  %v6001_v44 = vld [vmem:[%s22200_s2 + $0x420] sm:$0xff] }
 0x59a   :  { %6767 = vmatprep.subr.mxu0 %v6126_v8  ;;  %6838 = vmatprep.subr.mxu1 %v6414_v3  ;;  %v6290_v37 = vld [vmem:[%s22200_s2 + $0xd28] sm:$0xff]  ;;  %v6289_v8 = vld [vmem:[%s22200_s2 + $0xd20] sm:$0xff] }
 0x59b   :  { %6768 = vmatpush2.msra.mxu0 %v6125_v30  ;;  %6839 = vmatpush2.msra.mxu1 %v6413_v14  ;;  %v5993_v3 = vld [vmem:[%s22200_s2 + $0x3e0] sm:$0xff]  ;;  %v5992_v14 = vld [vmem:[%s22200_s2 + $0x3d8] sm:$0xff] }
 0x59c   :  { %6769 = vmatprep.subr.mxu0 %v6117_v13  ;;  %6840 = vmatprep.subr.mxu1 %v6405_v18  ;;  %v6281_v30 = vld [vmem:[%s22200_s2 + $0xce0] sm:$0xff]  ;;  %v6280_v13 = vld [vmem:[%s22200_s2 + $0xcd8] sm:$0xff] }
 0x59d   :  { %6770 = vmatpush2.msra.mxu0 %v6116_v27  ;;  %6841 = vmatpush2.msra.mxu1 %v6404_v29  ;;  %v5984_v18 = vld [vmem:[%s22200_s2 + $0x398] sm:$0xff]  ;;  %v5983_v29 = vld [vmem:[%s22200_s2 + $0x390] sm:$0xff] }
 0x59e   :  { %6771 = vmatprep.subr.mxu0 %v6108_v33  ;;  %6842 = vmatprep.subr.mxu1 %v6396_v34  ;;  %v6272_v27 = vld [vmem:[%s22200_s2 + $0xc98] sm:$0xff]  ;;  %v6271_v33 = vld [vmem:[%s22200_s2 + $0xc90] sm:$0xff] }
 0x59f   :  { %6772 = vmatpush2.msra.mxu0 %v6107_v1  ;;  %6843 = vmatpush2.msra.mxu1 %v6395_v11  ;;  %v5975_v34 = vld [vmem:[%s22200_s2 + $0x350] sm:$0xff]  ;;  %v5974_v11 = vld [vmem:[%s22200_s2 + $0x348] sm:$0xff] }
 0x5a0   :  { %6773 = vmatprep.subr.mxu0 %v6099_v22  ;;  %6844 = vmatprep.subr.mxu1 %v6387_v31  ;;  %v6263_v1 = vld [vmem:[%s22200_s2 + $0xc50] sm:$0xff]  ;;  %v6262_v22 = vld [vmem:[%s22200_s2 + $0xc48] sm:$0xff] }
 0x5a1   :  { %6774 = vmatpush2.msra.mxu0 %v6098_v46  ;;  %6845 = vmatpush2.msra.mxu1 %v6386_v17  ;;  %v5966_v31 = vld [vmem:[%s22200_s2 + $0x308] sm:$0xff]  ;;  %v5965_v17 = vld [vmem:[%s22200_s2 + $0x300] sm:$0xff] }
 0x5a2   :  { %6775 = vmatprep.subr.mxu0 %v6090_v23  ;;  %6846 = vmatprep.subr.mxu1 %v6378_v48  ;;  %v6254_v46 = vld [vmem:[%s22200_s2 + $0xc08] sm:$0xff]  ;;  %v6253_v23 = vld [vmem:[%s22200_s2 + $0xc00] sm:$0xff] }
 0x5a3   :  { %6776 = vmatpush2.msra.mxu0 %v6089_v54  ;;  %6847 = vmatpush2.msra.mxu1 %v6377_v36  ;;  %v5957_v48 = vld [vmem:[%s22200_s2 + $0x2c0] sm:$0xff]  ;;  %v5956_v36 = vld [vmem:[%s22200_s2 + $0x2b8] sm:$0xff] }
 0x5a4   :  { %6777 = vmatprep.subr.mxu0 %v6081_v32  ;;  %6848 = vmatprep.subr.mxu1 %v6369_v40  ;;  %v6245_v54 = vld [vmem:[%s22200_s2 + $0xbc0] sm:$0xff]  ;;  %v6244_v32 = vld [vmem:[%s22200_s2 + $0xbb8] sm:$0xff] }
 0x5a5   :  { %6778 = vmatpush2.msra.mxu0 %v6080_v38  ;;  %6849 = vmatpush2.msra.mxu1 %v6368_v5  ;;  %v5948_v40 = vld [vmem:[%s22200_s2 + $0x278] sm:$0xff]  ;;  %v5947_v5 = vld [vmem:[%s22200_s2 + $0x270] sm:$0xff] }
 0x5a6   :  { %6779 = vmatprep.subr.mxu0 %v6072_v45  ;;  %6850 = vmatprep.subr.mxu1 %v6360_v10  ;;  %v6236_v38 = vld [vmem:[%s22200_s2 + $0xb78] sm:$0xff]  ;;  %v6235_v45 = vld [vmem:[%s22200_s2 + $0xb70] sm:$0xff] }
 0x5a7   :  { %6780 = vmatpush2.msra.mxu0 %v6071_v47  ;;  %6851 = vmatpush2.msra.mxu1 %v6359_v56  ;;  %v5939_v10 = vld [vmem:[%s22200_s2 + $0x230] sm:$0xff]  ;;  %v5938_v56 = vld [vmem:[%s22200_s2 + $0x228] sm:$0xff] }
 0x5a8   :  { %6781 = vmatprep.subr.mxu0 %v6063_v4  ;;  %6852 = vmatprep.subr.mxu1 %v6351_v53  ;;  %v6227_v47 = vld [vmem:[%s22200_s2 + $0xb30] sm:$0xff]  ;;  %v6226_v4 = vld [vmem:[%s22200_s2 + $0xb28] sm:$0xff] }
 0x5a9   :  { %6782 = vmatpush2.msra.mxu0 %v6062_v59  ;;  %6853 = vmatpush2.msra.mxu1 %v6350_v60  ;;  %v5930_v53 = vld [vmem:[%s22200_s2 + $0x1e8] sm:$0xff]  ;;  %v5929_v60 = vld [vmem:[%s22200_s2 + $0x1e0] sm:$0xff] }
 0x5aa   :  { %6783 = vmatprep.subr.mxu0 %v6054_v28  ;;  %6854 = vmatprep.subr.mxu1 %v6342_v0  ;;  %v6218_v59 = vld [vmem:[%s22200_s2 + $0xae8] sm:$0xff]  ;;  %v6217_v28 = vld [vmem:[%s22200_s2 + $0xae0] sm:$0xff] }
 0x5ab   :  { %6784 = vmatpush2.msra.mxu0 %v6053_v55  ;;  %6855 = vmatpush2.msra.mxu1 %v6341_v63  ;;  %v5921_v0 = vld [vmem:[%s22200_s2 + $0x1a0] sm:$0xff]  ;;  %v5920_v63 = vld [vmem:[%s22200_s2 + $0x198] sm:$0xff] }
 0x5ac   :  { %6785 = vmatprep.subr.mxu0 %v6045_v41  ;;  %6856 = vmatprep.subr.mxu1 %v6333_v42  ;;  %v6209_v55 = vld [vmem:[%s22200_s2 + $0xaa0] sm:$0xff]  ;;  %v6208_v41 = vld [vmem:[%s22200_s2 + $0xa98] sm:$0xff] }
 0x5ad   :  { %6786 = vmatpush2.msra.mxu0 %v6044_v15  ;;  %6857 = vmatpush2.msra.mxu1 %v6332_v16  ;;  %v5912_v42 = vld [vmem:[%s22200_s2 + $0x158] sm:$0xff]  ;;  %v5911_v16 = vld [vmem:[%s22200_s2 + $0x150] sm:$0xff] }
 0x5ae   :  { %6787 = vmatprep.subr.mxu0 %v6036_v58  ;;  %6858 = vmatprep.subr.mxu1 %v6324_v61  ;;  %v6200_v15 = vld [vmem:[%s22200_s2 + $0xa58] sm:$0xff]  ;;  %v6199_v58 = vld [vmem:[%s22200_s2 + $0xa50] sm:$0xff] }
 0x5af   :  { %6788 = vmatpush2.msra.mxu0 %v6035_v62  ;;  %6859 = vmatpush2.msra.mxu1 %v6323_v12  ;;  %v5903_v61 = vld [vmem:[%s22200_s2 + $0x110] sm:$0xff]  ;;  %v5902_v12 = vld [vmem:[%s22200_s2 + $0x108] sm:$0xff] }
 0x5b0   :  { %6789 = vmatprep.subr.mxu0 %v6027_v39  ;;  %6860 = vmatprep.subr.mxu1 %v6315_v26  ;;  %v6191_v62 = vld [vmem:[%s22200_s2 + $0xa10] sm:$0xff]  ;;  %v6190_v39 = vld [vmem:[%s22200_s2 + $0xa08] sm:$0xff] }
 0x5b1   :  { %6790 = vmatpush2.msra.mxu0 %v6026_v6  ;;  %6861 = vmatpush2.msra.mxu1 %v6314_v2  ;;  %v5894_v26 = vld [vmem:[%s22200_s2 + $0xc8] sm:$0xff]  ;;  %v5893_v2 = vld [vmem:[%s22200_s2 + $0xc0] sm:$0xff] }
 0x5b2   :  { %6791 = vmatprep.subr.mxu0 %v6018_v7  ;;  %6862 = vmatprep.subr.mxu1 %v6306_v49  ;;  %v6182_v6 = vld [vmem:[%s22200_s2 + $0x9c8] sm:$0xff]  ;;  %v6181_v7 = vld [vmem:[%s22200_s2 + $0x9c0] sm:$0xff] }
 0x5b3   :  { %6792 = vmatpush2.msra.mxu0 %v6017_v19  ;;  %6863 = vmatpush2.msra.mxu1 %v6305_v25  ;;  %v5885_v49 = vld [vmem:[%s22200_s2 + $0x80] sm:$0xff]  ;;  %v5884_v25 = vld [vmem:[%s22200_s2 + $0x78] sm:$0xff] }
 0x5b4   :  { %6794 = vmatmul.mubr.f32.vlgmr.msra.gmra.mxu0 %v20415_v52  ;;  %6865 = vmatmul.mubr.f32.vlgmr.msra.gmra.mxu1 %v20418_v35  ;;  %v6173_v19 = vld [vmem:[%s22200_s2 + $0x980] sm:$0xff] }
 0x5b5   :  { %6871 = vmatprep.subr.mxu0 %v6011_v57  ;;  %6942 = vmatprep.subr.mxu1 %v6299_v9  ;;  %v6172_v57 = vld [vmem:[%s22200_s2 + $0x978] sm:$0xff] }
 0x5b6   :  { %6872 = vmatpush1.msra.mxu0 %v6010_v20  ;;  %6935 = vmatprep.mubr.f32.mxu0 %v20409_v50  ;;  %v5876_v9 = vld [vmem:[%s22200_s2 + $0x38] sm:$0xff] }
 0x5b7   :  { %6943 = vmatpush1.msra.mxu1 %v6298_v21  ;;  %7006 = vmatprep.mubr.f32.mxu1 %v20412_v51  ;;  %v6164_v20 = vld [vmem:[%s22200_s2 + $0x938] sm:$0xff]  ;;  %v5875_v21 = vld [vmem:[%s22200_s2 + $0x30] sm:$0xff] }
 0x5b8   :  { %6873 = vmatprep.subr.mxu0 %v6002_v24  ;;  %6944 = vmatprep.subr.mxu1 %v6290_v37  ;;  %v6163_v24 = vld [vmem:[%s22200_s2 + $0x930] sm:$0xff] }
 0x5b9   :  { %6874 = vmatpush1.msra.mxu0 %v6001_v44  ;;  %6945 = vmatpush1.msra.mxu1 %v6289_v8  ;;  %v6155_v37 = vld [vmem:[%s22200_s2 + $0x8f0] sm:$0xff]  ;;  %v6154_v8 = vld [vmem:[%s22200_s2 + $0x8e8] sm:$0xff] }
 0x5ba   :  { %6875 = vmatprep.subr.mxu0 %v5993_v3  ;;  %6946 = vmatprep.subr.mxu1 %v6281_v30  ;;  %v6443_v44 = vld [vmem:[%s22200_s2 + $0x11f0] sm:$0xff]  ;;  %v6442_v3 = vld [vmem:[%s22200_s2 + $0x11e8] sm:$0xff] }
 0x5bb   :  { %6876 = vmatpush1.msra.mxu0 %v5992_v14  ;;  %6947 = vmatpush1.msra.mxu1 %v6280_v13  ;;  %v6146_v30 = vld [vmem:[%s22200_s2 + $0x8a8] sm:$0xff]  ;;  %v6145_v13 = vld [vmem:[%s22200_s2 + $0x8a0] sm:$0xff] }
 0x5bc   :  { %6877 = vmatprep.subr.mxu0 %v5984_v18  ;;  %6948 = vmatprep.subr.mxu1 %v6272_v27  ;;  %v6434_v14 = vld [vmem:[%s22200_s2 + $0x11a8] sm:$0xff]  ;;  %v6433_v18 = vld [vmem:[%s22200_s2 + $0x11a0] sm:$0xff] }
 0x5bd   :  { %6878 = vmatpush1.msra.mxu0 %v5983_v29  ;;  %6949 = vmatpush1.msra.mxu1 %v6271_v33  ;;  %v6137_v27 = vld [vmem:[%s22200_s2 + $0x860] sm:$0xff]  ;;  %v6136_v33 = vld [vmem:[%s22200_s2 + $0x858] sm:$0xff] }
 0x5be   :  { %6879 = vmatprep.subr.mxu0 %v5975_v34  ;;  %6950 = vmatprep.subr.mxu1 %v6263_v1  ;;  %v6425_v29 = vld [vmem:[%s22200_s2 + $0x1160] sm:$0xff]  ;;  %v6424_v34 = vld [vmem:[%s22200_s2 + $0x1158] sm:$0xff] }
 0x5bf   :  { %6880 = vmatpush1.msra.mxu0 %v5974_v11  ;;  %6951 = vmatpush1.msra.mxu1 %v6262_v22  ;;  %v6128_v1 = vld [vmem:[%s22200_s2 + $0x818] sm:$0xff]  ;;  %v6127_v22 = vld [vmem:[%s22200_s2 + $0x810] sm:$0xff] }
 0x5c0   :  { %6881 = vmatprep.subr.mxu0 %v5966_v31  ;;  %6952 = vmatprep.subr.mxu1 %v6254_v46  ;;  %v6416_v11 = vld [vmem:[%s22200_s2 + $0x1118] sm:$0xff]  ;;  %v6415_v31 = vld [vmem:[%s22200_s2 + $0x1110] sm:$0xff] }
 0x5c1   :  { %6882 = vmatpush1.msra.mxu0 %v5965_v17  ;;  %6953 = vmatpush1.msra.mxu1 %v6253_v23  ;;  %v6119_v46 = vld [vmem:[%s22200_s2 + $0x7d0] sm:$0xff]  ;;  %v6118_v23 = vld [vmem:[%s22200_s2 + $0x7c8] sm:$0xff] }
 0x5c2   :  { %6883 = vmatprep.subr.mxu0 %v5957_v48  ;;  %6954 = vmatprep.subr.mxu1 %v6245_v54  ;;  %v6407_v17 = vld [vmem:[%s22200_s2 + $0x10d0] sm:$0xff]  ;;  %v6406_v48 = vld [vmem:[%s22200_s2 + $0x10c8] sm:$0xff] }
 0x5c3   :  { %6884 = vmatpush1.msra.mxu0 %v5956_v36  ;;  %6955 = vmatpush1.msra.mxu1 %v6244_v32  ;;  %v6110_v54 = vld [vmem:[%s22200_s2 + $0x788] sm:$0xff]  ;;  %v6109_v32 = vld [vmem:[%s22200_s2 + $0x780] sm:$0xff] }
 0x5c4   :  { %6885 = vmatprep.subr.mxu0 %v5948_v40  ;;  %6956 = vmatprep.subr.mxu1 %v6236_v38  ;;  %v6398_v36 = vld [vmem:[%s22200_s2 + $0x1088] sm:$0xff]  ;;  %v6397_v40 = vld [vmem:[%s22200_s2 + $0x1080] sm:$0xff] }
 0x5c5   :  { %6886 = vmatpush1.msra.mxu0 %v5947_v5  ;;  %6957 = vmatpush1.msra.mxu1 %v6235_v45  ;;  %v6101_v38 = vld [vmem:[%s22200_s2 + $0x740] sm:$0xff]  ;;  %v6100_v45 = vld [vmem:[%s22200_s2 + $0x738] sm:$0xff] }
 0x5c6   :  { %6887 = vmatprep.subr.mxu0 %v5939_v10  ;;  %6958 = vmatprep.subr.mxu1 %v6227_v47  ;;  %v6389_v5 = vld [vmem:[%s22200_s2 + $0x1040] sm:$0xff]  ;;  %v6388_v10 = vld [vmem:[%s22200_s2 + $0x1038] sm:$0xff] }
 0x5c7   :  { %6888 = vmatpush1.msra.mxu0 %v5938_v56  ;;  %6959 = vmatpush1.msra.mxu1 %v6226_v4  ;;  %v6092_v47 = vld [vmem:[%s22200_s2 + $0x6f8] sm:$0xff]  ;;  %v6091_v4 = vld [vmem:[%s22200_s2 + $0x6f0] sm:$0xff] }
 0x5c8   :  { %6889 = vmatprep.subr.mxu0 %v5930_v53  ;;  %6960 = vmatprep.subr.mxu1 %v6218_v59  ;;  %v6380_v56 = vld [vmem:[%s22200_s2 + $0xff8] sm:$0xff]  ;;  %v6379_v53 = vld [vmem:[%s22200_s2 + $0xff0] sm:$0xff] }
 0x5c9   :  { %6890 = vmatpush1.msra.mxu0 %v5929_v60  ;;  %6961 = vmatpush1.msra.mxu1 %v6217_v28  ;;  %v6083_v59 = vld [vmem:[%s22200_s2 + $0x6b0] sm:$0xff]  ;;  %v6082_v28 = vld [vmem:[%s22200_s2 + $0x6a8] sm:$0xff] }
 0x5ca   :  { %6891 = vmatprep.subr.mxu0 %v5921_v0  ;;  %6962 = vmatprep.subr.mxu1 %v6209_v55  ;;  %v6371_v60 = vld [vmem:[%s22200_s2 + $0xfb0] sm:$0xff]  ;;  %v6370_v0 = vld [vmem:[%s22200_s2 + $0xfa8] sm:$0xff] }
 0x5cb   :  { %6892 = vmatpush1.msra.mxu0 %v5920_v63  ;;  %6963 = vmatpush1.msra.mxu1 %v6208_v41  ;;  %v6074_v55 = vld [vmem:[%s22200_s2 + $0x668] sm:$0xff]  ;;  %v6073_v41 = vld [vmem:[%s22200_s2 + $0x660] sm:$0xff] }
 0x5cc   :  { %6893 = vmatprep.subr.mxu0 %v5912_v42  ;;  %6964 = vmatprep.subr.mxu1 %v6200_v15  ;;  %v6362_v63 = vld [vmem:[%s22200_s2 + $0xf68] sm:$0xff]  ;;  %v6361_v42 = vld [vmem:[%s22200_s2 + $0xf60] sm:$0xff] }
 0x5cd   :  { %6894 = vmatpush1.msra.mxu0 %v5911_v16  ;;  %6965 = vmatpush1.msra.mxu1 %v6199_v58  ;;  %v6065_v15 = vld [vmem:[%s22200_s2 + $0x620] sm:$0xff]  ;;  %v6064_v58 = vld [vmem:[%s22200_s2 + $0x618] sm:$0xff] }
 0x5ce   :  { %6895 = vmatprep.subr.mxu0 %v5903_v61  ;;  %6966 = vmatprep.subr.mxu1 %v6191_v62  ;;  %v6353_v16 = vld [vmem:[%s22200_s2 + $0xf20] sm:$0xff]  ;;  %v6352_v61 = vld [vmem:[%s22200_s2 + $0xf18] sm:$0xff] }
 0x5cf   :  { %6896 = vmatpush1.msra.mxu0 %v5902_v12  ;;  %6967 = vmatpush1.msra.mxu1 %v6190_v39  ;;  %v6056_v62 = vld [vmem:[%s22200_s2 + $0x5d8] sm:$0xff]  ;;  %v6055_v39 = vld [vmem:[%s22200_s2 + $0x5d0] sm:$0xff] }
 0x5d0   :  { %6897 = vmatprep.subr.mxu0 %v5894_v26  ;;  %6968 = vmatprep.subr.mxu1 %v6182_v6  ;;  %v6344_v12 = vld [vmem:[%s22200_s2 + $0xed8] sm:$0xff]  ;;  %v6343_v26 = vld [vmem:[%s22200_s2 + $0xed0] sm:$0xff] }
 0x5d1   :  { %6898 = vmatpush1.msra.mxu0 %v5893_v2  ;;  %6969 = vmatpush1.msra.mxu1 %v6181_v7  ;;  %v6047_v6 = vld [vmem:[%s22200_s2 + $0x590] sm:$0xff]  ;;  %v6046_v7 = vld [vmem:[%s22200_s2 + $0x588] sm:$0xff] }
 0x5d2   :  { %6899 = vmatprep.subr.mxu0 %v5885_v49  ;;  %6970 = vmatprep.subr.mxu1 %v6173_v19  ;;  %v6335_v2 = vld [vmem:[%s22200_s2 + $0xe90] sm:$0xff]  ;;  %v6334_v49 = vld [vmem:[%s22200_s2 + $0xe88] sm:$0xff] }
 0x5d3   :  { %6900 = vmatpush1.msra.mxu0 %v5884_v25  ;;  %6971 = vmatpush1.msra.mxu1 %v6172_v57  ;;  %v6038_v19 = vld [vmem:[%s22200_s2 + $0x548] sm:$0xff]  ;;  %v6037_v57 = vld [vmem:[%s22200_s2 + $0x540] sm:$0xff] }
 0x5d4   :  { %6901 = vmatprep.subr.mxu0 %v5876_v9  ;;  %6972 = vmatprep.subr.mxu1 %v6164_v20  ;;  %v6326_v25 = vld [vmem:[%s22200_s2 + $0xe48] sm:$0xff]  ;;  %v6325_v9 = vld [vmem:[%s22200_s2 + $0xe40] sm:$0xff] }
 0x5d5   :  { %6902 = vmatpush1.msra.mxu0 %v5875_v21  ;;  %6973 = vmatpush1.msra.mxu1 %v6163_v24  ;;  %v6029_v20 = vld [vmem:[%s22200_s2 + $0x500] sm:$0xff]  ;;  %v6028_v24 = vld [vmem:[%s22200_s2 + $0x4f8] sm:$0xff] }
 0x5d6   :  { %6903 = vmatprep.subr.mxu0 %v6155_v37  ;;  %6974 = vmatprep.subr.mxu1 %v6443_v44  ;;  %v6317_v21 = vld [vmem:[%s22200_s2 + $0xe00] sm:$0xff]  ;;  %v6316_v37 = vld [vmem:[%s22200_s2 + $0xdf8] sm:$0xff] }
 0x5d7   :  { %6904 = vmatpush2.msra.mxu0 %v6154_v8  ;;  %6975 = vmatpush2.msra.mxu1 %v6442_v3  ;;  %v6020_v44 = vld [vmem:[%s22200_s2 + $0x4b8] sm:$0xff]  ;;  %v6019_v3 = vld [vmem:[%s22200_s2 + $0x4b0] sm:$0xff] }
 0x5d8   :  { %6905 = vmatprep.subr.mxu0 %v6146_v30  ;;  %6976 = vmatprep.subr.mxu1 %v6434_v14  ;;  %v6308_v8 = vld [vmem:[%s22200_s2 + $0xdb8] sm:$0xff]  ;;  %v6307_v30 = vld [vmem:[%s22200_s2 + $0xdb0] sm:$0xff] }
 0x5d9   :  { %6906 = vmatpush2.msra.mxu0 %v6145_v13  ;;  %6977 = vmatpush2.msra.mxu1 %v6433_v18  ;;  %v6156_v14 = vld [vmem:[%s22200_s2 + $0x8f8] sm:$0xff] }
 0x5da   :  { %6907 = vmatprep.subr.mxu0 %v6137_v27  ;;  %6978 = vmatprep.subr.mxu1 %v6425_v29  ;;  %v6444_v13 = vld [vmem:[%s22200_s2 + $0x11f8] sm:$0xff]  ;;  %v6147_v29 = vld [vmem:[%s22200_s2 + $0x8b0] sm:$0xff] }
 0x5db   :  { %6908 = vmatpush2.msra.mxu0 %v6136_v33  ;;  %6979 = vmatpush2.msra.mxu1 %v6424_v34  ;;  %v6012_v18 = vld [vmem:[%s22200_s2 + $0x478] sm:$0xff]  ;;  %v6435_v33 = vld [vmem:[%s22200_s2 + $0x11b0] sm:$0xff] }
 0x5dc   :  { %6909 = vmatprep.subr.mxu0 %v6128_v1  ;;  %6980 = vmatprep.subr.mxu1 %v6416_v11  ;;  %v6300_v27 = vld [vmem:[%s22200_s2 + $0xd78] sm:$0xff]  ;;  %v6003_v34 = vld [vmem:[%s22200_s2 + $0x430] sm:$0xff]  ;;  %v6138_v11 = vld [vmem:[%s22200_s2 + $0x868] sm:$0xff] }
 0x5dd   :  { %6910 = vmatpush2.msra.mxu0 %v6127_v22  ;;  %6981 = vmatpush2.msra.mxu1 %v6415_v31  ;;  %v6291_v1 = vld [vmem:[%s22200_s2 + $0xd30] sm:$0xff]  ;;  %v6426_v22 = vld [vmem:[%s22200_s2 + $0x1168] sm:$0xff] }
 0x5de   :  { %6911 = vmatprep.subr.mxu0 %v6119_v46  ;;  %6982 = vmatprep.subr.mxu1 %v6407_v17  ;;  %v6282_v31 = vld [vmem:[%s22200_s2 + $0xce8] sm:$0xff]  ;;  %v6417_v46 = vld [vmem:[%s22200_s2 + $0x1120] sm:$0xff] }
 0x5df   :  { %6912 = vmatpush2.msra.mxu0 %v6118_v23  ;;  %6983 = vmatpush2.msra.mxu1 %v6406_v48  ;;  %v5985_v17 = vld [vmem:[%s22200_s2 + $0x3a0] sm:$0xff]  ;;  %v6120_v48 = vld [vmem:[%s22200_s2 + $0x7d8] sm:$0xff] }
 0x5e0   :  { %6913 = vmatprep.subr.mxu0 %v6110_v54  ;;  %6984 = vmatprep.subr.mxu1 %v6398_v36  ;;  %v6273_v23 = vld [vmem:[%s22200_s2 + $0xca0] sm:$0xff]  ;;  %v6408_v54 = vld [vmem:[%s22200_s2 + $0x10d8] sm:$0xff] }
 0x5e1   :  { %6914 = vmatpush2.msra.mxu0 %v6109_v32  ;;  %6985 = vmatpush2.msra.mxu1 %v6397_v40  ;;  %v5976_v36 = vld [vmem:[%s22200_s2 + $0x358] sm:$0xff]  ;;  %v6111_v40 = vld [vmem:[%s22200_s2 + $0x790] sm:$0xff] }
 0x5e2   :  { %6915 = vmatprep.subr.mxu0 %v6101_v38  ;;  %6986 = vmatprep.subr.mxu1 %v6389_v5  ;;  %v6264_v32 = vld [vmem:[%s22200_s2 + $0xc58] sm:$0xff]  ;;  %v6399_v38 = vld [vmem:[%s22200_s2 + $0x1090] sm:$0xff] }
 0x5e3   :  { %6916 = vmatpush2.msra.mxu0 %v6100_v45  ;;  %6987 = vmatpush2.msra.mxu1 %v6388_v10  ;;  %v5967_v5 = vld [vmem:[%s22200_s2 + $0x310] sm:$0xff]  ;;  %v6102_v10 = vld [vmem:[%s22200_s2 + $0x748] sm:$0xff] }
 0x5e4   :  { %6917 = vmatprep.subr.mxu0 %v6092_v47  ;;  %6988 = vmatprep.subr.mxu1 %v6380_v56  ;;  %v6255_v45 = vld [vmem:[%s22200_s2 + $0xc10] sm:$0xff]  ;;  %v6390_v47 = vld [vmem:[%s22200_s2 + $0x1048] sm:$0xff] }
 0x5e5   :  { %6918 = vmatpush2.msra.mxu0 %v6091_v4  ;;  %6989 = vmatpush2.msra.mxu1 %v6379_v53  ;;  %v5958_v56 = vld [vmem:[%s22200_s2 + $0x2c8] sm:$0xff]  ;;  %v6093_v53 = vld [vmem:[%s22200_s2 + $0x700] sm:$0xff] }
 0x5e6   :  { %6919 = vmatprep.subr.mxu0 %v6083_v59  ;;  %6990 = vmatprep.subr.mxu1 %v6371_v60  ;;  %v6246_v4 = vld [vmem:[%s22200_s2 + $0xbc8] sm:$0xff]  ;;  %v6381_v59 = vld [vmem:[%s22200_s2 + $0x1000] sm:$0xff] }
 0x5e7   :  { %6920 = vmatpush2.msra.mxu0 %v6082_v28  ;;  %6991 = vmatpush2.msra.mxu1 %v6370_v0  ;;  %v5949_v60 = vld [vmem:[%s22200_s2 + $0x280] sm:$0xff]  ;;  %v6084_v0 = vld [vmem:[%s22200_s2 + $0x6b8] sm:$0xff] }
 0x5e8   :  { %6921 = vmatprep.subr.mxu0 %v6074_v55  ;;  %6992 = vmatprep.subr.mxu1 %v6362_v63  ;;  %v6237_v28 = vld [vmem:[%s22200_s2 + $0xb80] sm:$0xff]  ;;  %v6372_v55 = vld [vmem:[%s22200_s2 + $0xfb8] sm:$0xff] }
 0x5e9   :  { %6922 = vmatpush2.msra.mxu0 %v6073_v41  ;;  %6993 = vmatpush2.msra.mxu1 %v6361_v42  ;;  %v5940_v63 = vld [vmem:[%s22200_s2 + $0x238] sm:$0xff]  ;;  %v6075_v42 = vld [vmem:[%s22200_s2 + $0x670] sm:$0xff] }
 0x5ea   :  { %6923 = vmatprep.subr.mxu0 %v6065_v15  ;;  %6994 = vmatprep.subr.mxu1 %v6353_v16  ;;  %v6228_v41 = vld [vmem:[%s22200_s2 + $0xb38] sm:$0xff]  ;;  %v6363_v15 = vld [vmem:[%s22200_s2 + $0xf70] sm:$0xff] }
 0x5eb   :  { %6924 = vmatpush2.msra.mxu0 %v6064_v58  ;;  %6995 = vmatpush2.msra.mxu1 %v6352_v61  ;;  %v5931_v16 = vld [vmem:[%s22200_s2 + $0x1f0] sm:$0xff]  ;;  %v6066_v61 = vld [vmem:[%s22200_s2 + $0x628] sm:$0xff] }
 0x5ec   :  { %6925 = vmatprep.subr.mxu0 %v6056_v62  ;;  %6996 = vmatprep.subr.mxu1 %v6344_v12  ;;  %v6219_v58 = vld [vmem:[%s22200_s2 + $0xaf0] sm:$0xff]  ;;  %v6354_v62 = vld [vmem:[%s22200_s2 + $0xf28] sm:$0xff] }
 0x5ed   :  { %6926 = vmatpush2.msra.mxu0 %v6055_v39  ;;  %6997 = vmatpush2.msra.mxu1 %v6343_v26  ;;  %v5922_v12 = vld [vmem:[%s22200_s2 + $0x1a8] sm:$0xff]  ;;  %v6057_v26 = vld [vmem:[%s22200_s2 + $0x5e0] sm:$0xff] }
 0x5ee   :  { %6927 = vmatprep.subr.mxu0 %v6047_v6  ;;  %6998 = vmatprep.subr.mxu1 %v6335_v2  ;;  %v6210_v39 = vld [vmem:[%s22200_s2 + $0xaa8] sm:$0xff]  ;;  %v6345_v6 = vld [vmem:[%s22200_s2 + $0xee0] sm:$0xff] }
 0x5ef   :  { %6928 = vmatpush2.msra.mxu0 %v6046_v7  ;;  %6999 = vmatpush2.msra.mxu1 %v6334_v49  ;;  %v5913_v2 = vld [vmem:[%s22200_s2 + $0x160] sm:$0xff]  ;;  %v6048_v49 = vld [vmem:[%s22200_s2 + $0x598] sm:$0xff] }
 0x5f0   :  { %6929 = vmatprep.subr.mxu0 %v6038_v19  ;;  %7000 = vmatprep.subr.mxu1 %v6326_v25  ;;  %v6201_v7 = vld [vmem:[%s22200_s2 + $0xa60] sm:$0xff]  ;;  %v6336_v19 = vld [vmem:[%s22200_s2 + $0xe98] sm:$0xff] }
 0x5f1   :  { %6930 = vmatpush2.msra.mxu0 %v6037_v57  ;;  %7001 = vmatpush2.msra.mxu1 %v6325_v9  ;;  %v5904_v25 = vld [vmem:[%s22200_s2 + $0x118] sm:$0xff]  ;;  %v6039_v9 = vld [vmem:[%s22200_s2 + $0x550] sm:$0xff] }
 0x5f2   :  { %6931 = vmatprep.subr.mxu0 %v6029_v20  ;;  %7002 = vmatprep.subr.mxu1 %v6317_v21  ;;  %v6192_v57 = vld [vmem:[%s22200_s2 + $0xa18] sm:$0xff]  ;;  %v6327_v20 = vld [vmem:[%s22200_s2 + $0xe50] sm:$0xff] }
 0x5f3   :  { %6932 = vmatpush2.msra.mxu0 %v6028_v24  ;;  %7003 = vmatpush2.msra.mxu1 %v6316_v37  ;;  %v5895_v21 = vld [vmem:[%s22200_s2 + $0xd0] sm:$0xff]  ;;  %v6030_v37 = vld [vmem:[%s22200_s2 + $0x508] sm:$0xff] }
 0x5f4   :  { %6933 = vmatprep.subr.mxu0 %v6020_v44  ;;  %7004 = vmatprep.subr.mxu1 %v6308_v8  ;;  %v6183_v24 = vld [vmem:[%s22200_s2 + $0x9d0] sm:$0xff]  ;;  %v6318_v44 = vld [vmem:[%s22200_s2 + $0xe08] sm:$0xff] }
 0x5f5   :  { %6934 = vmatpush2.msra.mxu0 %v6019_v3  ;;  %7005 = vmatpush2.msra.mxu1 %v6307_v30  ;;  %v5886_v8 = vld [vmem:[%s22200_s2 + $0x88] sm:$0xff]  ;;  %v6021_v30 = vld [vmem:[%s22200_s2 + $0x4c0] sm:$0xff] }
 0x5f6   :  { %6936 = vmatmul.mubr.f32.vlgmr.msra.gmra.mxu0 %v20415_v52  ;;  %7007 = vmatmul.mubr.f32.vlgmr.msra.gmra.mxu1 %v20418_v35  ;;  %v6174_v3 = vld [vmem:[%s22200_s2 + $0x988] sm:$0xff] }
 0x5f7   :  { %16025 = vmatprep.subr.mxu0 %v6156_v14  ;;  %16060 = vmatprep.subr.mxu1 %v6444_v13  ;;  %v6309_v14 = vld [vmem:[%s22200_s2 + $0xdc0] sm:$0xff] }
 0x5f8   :  { %16026 = vmatpush3.msra.mxu0 %v6012_v18  ;;  %7077 = vmatprep.mubr.f32.mxu0 %v20409_v50  ;;  %v5994_v50 = vld [vmem:[%s22200_s2 + $0x3e8] sm:$0xff]  ;;  %v5877_v13 = vld [vmem:[%s22200_s2 + $0x40] sm:$0xff] }
 0x5f9   :  { %16061 = vmatpush3.msra.mxu1 %v6300_v27  ;;  %7147 = vmatprep.mubr.f32.mxu1 %v20412_v51  ;;  %v6129_v51 = vld [vmem:[%s22200_s2 + $0x820] sm:$0xff]  ;;  %v7512_v27 = vld [vmem:[#allocation2 + $0x1e8] sm:$0xff] }
 0x5fa   :  { %16027 = vmatprep.subr.mxu0 %v6147_v29  ;;  %16062 = vmatprep.subr.mxu1 %v6435_v33  ;;  %v6165_v18 = vld [vmem:[%s22200_s2 + $0x940] sm:$0xff]  ;;  %v7640_v29 = vld [vmem:[#allocation2 + $0x5e8] sm:$0xff] }
 0x5fb   :  { %16028 = vmatpush3.msra.mxu0 %v6003_v34  ;;  %16063 = vmatpush3.msra.mxu1 %v6291_v1  ;;  %v7511_v33 = vld [vmem:[#allocation2 + $0x1e0] sm:$0xff]  ;;  %v7508_v1 = vld [vmem:[#allocation2 + $0x1c8] sm:$0xff] }
 0x5fc   :  { %16029 = vmatprep.subr.mxu0 %v6138_v11  ;;  %16064 = vmatprep.subr.mxu1 %v6426_v22  ;;  %v7639_v34 = vld [vmem:[#allocation2 + $0x5e0] sm:$0xff]  ;;  %v7636_v11 = vld [vmem:[#allocation2 + $0x5c8] sm:$0xff] }
 0x5fd   :  { %16030 = vmatpush3.msra.mxu0 %v5994_v50  ;;  %16065 = vmatpush3.msra.mxu1 %v6282_v31  ;;  %v7507_v22 = vld [vmem:[#allocation2 + $0x1c0] sm:$0xff]  ;;  %v7504_v31 = vld [vmem:[#allocation2 + $0x1a8] sm:$0xff] }
 0x5fe   :  { %16031 = vmatprep.subr.mxu0 %v6129_v51  ;;  %16066 = vmatprep.subr.mxu1 %v6417_v46  ;;  %v7635_v50 = vld [vmem:[#allocation2 + $0x5c0] sm:$0xff]  ;;  %v7632_v51 = vld [vmem:[#allocation2 + $0x5a8] sm:$0xff] }
 0x5ff   :  { %16032 = vmatpush3.msra.mxu0 %v5985_v17  ;;  %16067 = vmatpush3.msra.mxu1 %v6273_v23  ;;  %v7503_v46 = vld [vmem:[#allocation2 + $0x1a0] sm:$0xff]  ;;  %v7628_v17 = vld [vmem:[#allocation2 + $0x588] sm:$0xff] }
 0x600   :  { %16033 = vmatprep.subr.mxu0 %v6120_v48  ;;  %16068 = vmatprep.subr.mxu1 %v6408_v54  ;;  %v7499_v23 = vld [vmem:[#allocation2 + $0x180] sm:$0xff]  ;;  %v7496_v54 = vld [vmem:[#allocation2 + $0x168] sm:$0xff] }
 0x601   :  { %16034 = vmatpush3.msra.mxu0 %v5976_v36  ;;  %16069 = vmatpush3.msra.mxu1 %v6264_v32  ;;  %v7627_v48 = vld [vmem:[#allocation2 + $0x580] sm:$0xff]  ;;  %v7624_v36 = vld [vmem:[#allocation2 + $0x568] sm:$0xff] }
 0x602   :  { %16035 = vmatprep.subr.mxu0 %v6111_v40  ;;  %16070 = vmatprep.subr.mxu1 %v6399_v38  ;;  %v7495_v32 = vld [vmem:[#allocation2 + $0x160] sm:$0xff]  ;;  %v7492_v38 = vld [vmem:[#allocation2 + $0x148] sm:$0xff] }
 0x603   :  { %16036 = vmatpush3.msra.mxu0 %v5967_v5  ;;  %16071 = vmatpush3.msra.mxu1 %v6255_v45  ;;  %v7623_v40 = vld [vmem:[#allocation2 + $0x560] sm:$0xff]  ;;  %v7620_v5 = vld [vmem:[#allocation2 + $0x548] sm:$0xff] }
 0x604   :  { %16037 = vmatprep.subr.mxu0 %v6102_v10  ;;  %16072 = vmatprep.subr.mxu1 %v6390_v47  ;;  %v7491_v45 = vld [vmem:[#allocation2 + $0x140] sm:$0xff]  ;;  %v7488_v47 = vld [vmem:[#allocation2 + $0x128] sm:$0xff] }
 0x605   :  { %16038 = vmatpush3.msra.mxu0 %v5958_v56  ;;  %16073 = vmatpush3.msra.mxu1 %v6246_v4  ;;  %v7619_v10 = vld [vmem:[#allocation2 + $0x540] sm:$0xff]  ;;  %v7616_v56 = vld [vmem:[#allocation2 + $0x528] sm:$0xff] }
 0x606   :  { %16039 = vmatprep.subr.mxu0 %v6093_v53  ;;  %16074 = vmatprep.subr.mxu1 %v6381_v59  ;;  %v7487_v4 = vld [vmem:[#allocation2 + $0x120] sm:$0xff]  ;;  %v7484_v59 = vld [vmem:[#allocation2 + $0x108] sm:$0xff] }
 0x607   :  { %16040 = vmatpush3.msra.mxu0 %v5949_v60  ;;  %16075 = vmatpush3.msra.mxu1 %v6237_v28  ;;  %v7615_v53 = vld [vmem:[#allocation2 + $0x520] sm:$0xff]  ;;  %v7612_v60 = vld [vmem:[#allocation2 + $0x508] sm:$0xff] }
 0x608   :  { %16041 = vmatprep.subr.mxu0 %v6084_v0  ;;  %16076 = vmatprep.subr.mxu1 %v6372_v55  ;;  %v7483_v28 = vld [vmem:[#allocation2 + $0x100] sm:$0xff]  ;;  %v7480_v55 = vld [vmem:[#allocation2 + $0xe8] sm:$0xff] }
 0x609   :  { %16042 = vmatpush3.msra.mxu0 %v5940_v63  ;;  %16077 = vmatpush3.msra.mxu1 %v6228_v41  ;;  %v7611_v0 = vld [vmem:[#allocation2 + $0x500] sm:$0xff]  ;;  %v7608_v63 = vld [vmem:[#allocation2 + $0x4e8] sm:$0xff] }
 0x60a   :  { %16043 = vmatprep.subr.mxu0 %v6075_v42  ;;  %16078 = vmatprep.subr.mxu1 %v6363_v15  ;;  %v7479_v41 = vld [vmem:[#allocation2 + $0xe0] sm:$0xff]  ;;  %v7476_v15 = vld [vmem:[#allocation2 + $0xc8] sm:$0xff] }
 0x60b   :  { %16044 = vmatpush3.msra.mxu0 %v5931_v16  ;;  %16079 = vmatpush3.msra.mxu1 %v6219_v58  ;;  %v7607_v42 = vld [vmem:[#allocation2 + $0x4e0] sm:$0xff]  ;;  %v7604_v16 = vld [vmem:[#allocation2 + $0x4c8] sm:$0xff] }
 0x60c   :  { %16045 = vmatprep.subr.mxu0 %v6066_v61  ;;  %16080 = vmatprep.subr.mxu1 %v6354_v62  ;;  %v7475_v58 = vld [vmem:[#allocation2 + $0xc0] sm:$0xff]  ;;  %v7472_v62 = vld [vmem:[#allocation2 + $0xa8] sm:$0xff] }
 0x60d   :  { %16046 = vmatpush3.msra.mxu0 %v5922_v12  ;;  %16081 = vmatpush3.msra.mxu1 %v6210_v39  ;;  %v7603_v61 = vld [vmem:[#allocation2 + $0x4c0] sm:$0xff]  ;;  %v7600_v12 = vld [vmem:[#allocation2 + $0x4a8] sm:$0xff] }
 0x60e   :  { %16047 = vmatprep.subr.mxu0 %v6057_v26  ;;  %16082 = vmatprep.subr.mxu1 %v6345_v6  ;;  %v7471_v39 = vld [vmem:[#allocation2 + $0xa0] sm:$0xff]  ;;  %v7468_v6 = vld [vmem:[#allocation2 + $0x88] sm:$0xff] }
 0x60f   :  { %16048 = vmatpush3.msra.mxu0 %v5913_v2  ;;  %16083 = vmatpush3.msra.mxu1 %v6201_v7  ;;  %v7599_v26 = vld [vmem:[#allocation2 + $0x4a0] sm:$0xff]  ;;  %v7596_v2 = vld [vmem:[#allocation2 + $0x488] sm:$0xff] }
 0x610   :  { %16049 = vmatprep.subr.mxu0 %v6048_v49  ;;  %16084 = vmatprep.subr.mxu1 %v6336_v19  ;;  %v7467_v7 = vld [vmem:[#allocation2 + $0x80] sm:$0xff]  ;;  %v7464_v19 = vld [vmem:[#allocation2 + $0x68] sm:$0xff] }
 0x611   :  { %16050 = vmatpush3.msra.mxu0 %v5904_v25  ;;  %16085 = vmatpush3.msra.mxu1 %v6192_v57  ;;  %v7595_v49 = vld [vmem:[#allocation2 + $0x480] sm:$0xff]  ;;  %v7592_v25 = vld [vmem:[#allocation2 + $0x468] sm:$0xff] }
 0x612   :  { %16051 = vmatprep.subr.mxu0 %v6039_v9  ;;  %16086 = vmatprep.subr.mxu1 %v6327_v20  ;;  %v7463_v57 = vld [vmem:[#allocation2 + $0x60] sm:$0xff]  ;;  %v7460_v20 = vld [vmem:[#allocation2 + $0x48] sm:$0xff] }
 0x613   :  { %16052 = vmatpush3.msra.mxu0 %v5895_v21  ;;  %16087 = vmatpush3.msra.mxu1 %v6183_v24  ;;  %v7591_v9 = vld [vmem:[#allocation2 + $0x460] sm:$0xff]  ;;  %v7588_v21 = vld [vmem:[#allocation2 + $0x448] sm:$0xff] }
 0x614   :  { %16053 = vmatprep.subr.mxu0 %v6030_v37  ;;  %16088 = vmatprep.subr.mxu1 %v6318_v44  ;;  %v7459_v24 = vld [vmem:[#allocation2 + $0x40] sm:$0xff]  ;;  %v7456_v44 = vld [vmem:[#allocation2 + $0x28] sm:$0xff] }
 0x615   :  { %16054 = vmatpush3.msra.mxu0 %v5886_v8  ;;  %16089 = vmatpush3.msra.mxu1 %v6174_v3  ;;  %v7587_v37 = vld [vmem:[#allocation2 + $0x440] sm:$0xff]  ;;  %v7584_v8 = vld [vmem:[#allocation2 + $0x428] sm:$0xff] }
 0x616   :  { %16055 = vmatprep.subr.mxu0 %v6021_v30  ;;  %16090 = vmatprep.subr.mxu1 %v6309_v14  ;;  %v7455_v3 = vld [vmem:[#allocation2 + $0x20] sm:$0xff]  ;;  %v6511_v14 = vpop.f32.mrf.mxu0 }
 0x617   :  { %16056 = vmatpush3.msra.mxu0 %v5877_v13  ;;  %16091 = vmatpush3.msra.mxu1 %v6165_v18  ;;  %v7583_v30 = vld [vmem:[#allocation2 + $0x420] sm:$0xff]  ;;  %v6582_v13 = vpop.f32.mrf.mxu1 }
 0x618   :  { %7078 = vmatmul.mubr.f32.vlgmr.msra.gmra.mxu0 %v20415_v52  ;;  %7148 = vmatmul.mubr.f32.vlgmr.msra.gmra.mxu1 %v20418_v35  ;;  %v7631_v52 = vld [vmem:[#allocation2 + $0x5a0] sm:$0xff]  ;;  %v7500_v35 = vld [vmem:[#allocation2 + $0x188] sm:$0xff]  ;;  %v6513_v18 = vpop.f32.mrf.mxu0 }
 0x619   :  { %8007 = vmatprep.subr.mxu0 %v7512_v27  ;;  %8078 = vmatprep.subr.mxu1 %v7640_v29  ;;  %v6584_v27 = vpop.f32.mrf.mxu1 }
 0x61a   :  { %8008 = vmatpush1.msra.mxu0 %v7511_v33  ;;  %8079 = vmatpush1.msra.mxu1 %v7639_v34  ;;  %v21778_v34 = vadd.f32 %v6584_v27, %v6513_v18  ;;  %v7572_v18 = vld [vmem:[#allocation2 + $0x3c8] sm:$0xff] }
 0x61b   :  { %8009 = vmatprep.subr.mxu0 %v7508_v1  ;;  %8080 = vmatprep.subr.mxu1 %v7636_v11  ;;  %v21780_v1 = vadd.f32 %v6582_v13, %v6511_v14  ;;  %v7575_v14 = vld [vmem:[#allocation2 + $0x3e0] sm:$0xff]  ;;  %v7700_v27 = vld [vmem:[#allocation2 + $0x7c8] sm:$0xff] }
 0x61c   :  { %8010 = vmatpush1.msra.mxu0 %v7507_v22  ;;  %8081 = vmatpush1.msra.mxu1 %v7635_v50  ;;  %v7703_v13 = vld [vmem:[#allocation2 + $0x7e0] sm:$0xff] }
 0x61d   :  { %8011 = vmatprep.subr.mxu0 %v7504_v31  ;;  %8082 = vmatprep.subr.mxu1 %v7632_v51  ;;  %v7154_v31 = vmul.f32 %v21778_v34, %v21778_v34 }
 0x61e   :  { %8012 = vmatpush1.msra.mxu0 %v7503_v46  ;;  %8083 = vmatpush1.msra.mxu1 %v7631_v52  ;;  %v7153_v52 = vmul.f32 %v21780_v1, %v21780_v1 }
 0x61f   :  { %8013 = vmatprep.subr.mxu0 %v7500_v35  ;;  %8084 = vmatprep.subr.mxu1 %v7628_v17 }
 0x620   :  { %8014 = vmatpush1.msra.mxu0 %v7499_v23  ;;  %8085 = vmatpush1.msra.mxu1 %v7627_v48  ;;  %v7163_v23 = vsel %vm5825_vm0, %v7154_v31, 0.0  ;;  %v7567_v31 = vld [vmem:[#allocation2 + $0x3a0] sm:$0xff] }
 0x621   :  { %8015 = vmatprep.subr.mxu0 %v7496_v54  ;;  %8086 = vmatprep.subr.mxu1 %v7624_v36 }
 0x622   :  { %8016 = vmatpush1.msra.mxu0 %v7495_v32  ;;  %8087 = vmatpush1.msra.mxu1 %v7623_v40  ;;  %v7162_v32 = vsel %vm5825_vm0, %v7153_v52, 0.0  ;;  %v7692_v52 = vld [vmem:[#allocation2 + $0x788] sm:$0xff] }
 0x623   :  { %8017 = vmatprep.subr.mxu0 %v7492_v38  ;;  %8088 = vmatprep.subr.mxu1 %v7620_v5  ;;  %v7164_v5 = vadd.f32 %v7163_v23, %v7162_v32  ;;  %v7691_v23 = vld [vmem:[#allocation2 + $0x780] sm:$0xff] }
 0x624   :  { %8018 = vmatpush1.msra.mxu0 %v7491_v45  ;;  %8089 = vmatpush1.msra.mxu1 %v7619_v10  ;;  %v7559_v32 = vld [vmem:[#allocation2 + $0x360] sm:$0xff] }
 0x625   :  { %8019 = vmatprep.subr.mxu0 %v7488_v47  ;;  %8090 = vmatprep.subr.mxu1 %v7616_v56 }
 0x626   :  { %8020 = vmatpush1.msra.mxu0 %v7487_v4  ;;  %8091 = vmatpush1.msra.mxu1 %v7615_v53 }
 0x627   :  { %8021 = vmatprep.subr.mxu0 %v7484_v59  ;;  %8092 = vmatprep.subr.mxu1 %v7612_v60 }
 0x628   :  { %8022 = vmatpush1.msra.mxu0 %v7483_v28  ;;  %8093 = vmatpush1.msra.mxu1 %v7611_v0 }
 0x629   :  { %8023 = vmatprep.subr.mxu0 %v7480_v55  ;;  %8094 = vmatprep.subr.mxu1 %v7608_v63 }
 0x62a   :  { %8024 = vmatpush1.msra.mxu0 %v7479_v41  ;;  %8095 = vmatpush1.msra.mxu1 %v7607_v42 }
 0x62b   :  { %8025 = vmatprep.subr.mxu0 %v7476_v15  ;;  %8096 = vmatprep.subr.mxu1 %v7604_v16 }
 0x62c   :  { %8026 = vmatpush1.msra.mxu0 %v7475_v58  ;;  %8097 = vmatpush1.msra.mxu1 %v7603_v61 }
 0x62d   :  { %8027 = vmatprep.subr.mxu0 %v7472_v62  ;;  %8098 = vmatprep.subr.mxu1 %v7600_v12 }
 0x62e   :  { %8028 = vmatpush1.msra.mxu0 %v7471_v39  ;;  %8099 = vmatpush1.msra.mxu1 %v7599_v26 }
 0x62f   :  { %8029 = vmatprep.subr.mxu0 %v7468_v6  ;;  %8100 = vmatprep.subr.mxu1 %v7596_v2 }
 0x630   :  { %8030 = vmatpush1.msra.mxu0 %v7467_v7  ;;  %8101 = vmatpush1.msra.mxu1 %v7595_v49 }
 0x631   :  { %8031 = vmatprep.subr.mxu0 %v7464_v19  ;;  %8102 = vmatprep.subr.mxu1 %v7592_v25 }
 0x632   :  { %8032 = vmatpush1.msra.mxu0 %v7463_v57  ;;  %8103 = vmatpush1.msra.mxu1 %v7591_v9  ;;  %v6653_v29 = vpop.f32.mrf.mxu0  ;;  %v6724_v33 = vpop.f32.mrf.mxu1 }
 0x633   :  { %8033 = vmatprep.subr.mxu0 %v7460_v20  ;;  %8104 = vmatprep.subr.mxu1 %v7588_v21  ;;  %v21782_v11 = vadd.f32 %v6724_v33, %v6653_v29  ;;  %v7571_v29 = vld [vmem:[#allocation2 + $0x3c0] sm:$0xff] }
 0x634   :  { %8034 = vmatpush1.msra.mxu0 %v7459_v24  ;;  %8105 = vmatpush1.msra.mxu1 %v7587_v37  ;;  %v6655_v22 = vpop.f32.mrf.mxu0  ;;  %v6726_v50 = vpop.f32.mrf.mxu1  ;;  %v7452_v24 = vld [vmem:[#allocation2 + $0x8] sm:$0xff]  ;;  %v7699_v33 = vld [vmem:[#allocation2 + $0x7c0] sm:$0xff] }
 0x635   :  { %8035 = vmatprep.subr.mxu0 %v7456_v44  ;;  %8106 = vmatprep.subr.mxu1 %v7584_v8  ;;  %v7155_v35 = vmul.f32 %v21782_v11, %v21782_v11  ;;  %v21790_v17 = vadd.f32 %v6726_v50, %v6655_v22  ;;  %v7580_v37 = vld [vmem:[#allocation2 + $0x408] sm:$0xff]  ;;  %v7451_v44 = vld [vmem:[#allocation2] sm:$0xff] }
 0x636   :  { %8036 = vmatpush1.msra.mxu0 %v7455_v3  ;;  %8107 = vmatpush1.msra.mxu1 %v7583_v30  ;;  %v7579_v8 = vld [vmem:[#allocation2 + $0x400] sm:$0xff]  ;;  %v7576_v3 = vld [vmem:[#allocation2 + $0x3e8] sm:$0xff] }
 0x637   :  { %v7165_v40 = vsel %vm5825_vm0, %v7155_v35, 0.0  ;;  %v7156_v38 = vmul.f32 %v21790_v17, %v21790_v17  ;;  %8037 = vmatprep.subr.mxu0 %v7452_v24  ;;  %8108 = vmatprep.subr.mxu1 %v7580_v37  ;;  %v7704_v30 = vld [vmem:[#allocation2 + $0x7e8] sm:$0xff]  ;;  %v7563_v35 = vld [vmem:[#allocation2 + $0x380] sm:$0xff] }
 0x638   :  { %v7166_v4 = vadd.f32 %v7165_v40, %v7164_v5  ;;  %8038 = vmatpush1.msra.mxu0 %v7451_v44  ;;  %8109 = vmatpush1.msra.mxu1 %v7579_v8  ;;  %v7568_v22 = vld [vmem:[#allocation2 + $0x3a8] sm:$0xff]  ;;  %v7687_v40 = vld [vmem:[#allocation2 + $0x760] sm:$0xff] }
 0x639   :  { %v7167_v53 = vsel %vm5825_vm0, %v7156_v38, 0.0  ;;  %8039 = vmatprep.subr.mxu0 %v7576_v3  ;;  %8110 = vmatprep.subr.mxu1 %v7704_v30  ;;  %v7696_v50 = vld [vmem:[#allocation2 + $0x7a8] sm:$0xff]  ;;  %v7527_v24 = vld [vmem:[#allocation2 + $0x260] sm:$0xff] }
 0x63a   :  { %v7168_v63 = vadd.f32 %v7167_v53, %v7166_v4  ;;  %8040 = vmatpush2.msra.mxu0 %v7575_v14  ;;  %8111 = vmatpush2.msra.mxu1 %v7703_v13  ;;  %v7556_v38 = vld [vmem:[#allocation2 + $0x348] sm:$0xff]  ;;  %v7551_v53 = vld [vmem:[#allocation2 + $0x320] sm:$0xff] }
 0x63b   :  { %8041 = vmatprep.subr.mxu0 %v7572_v18  ;;  %8112 = vmatprep.subr.mxu1 %v7700_v27  ;;  %v7684_v5 = vld [vmem:[#allocation2 + $0x748] sm:$0xff]  ;;  %v7655_v37 = vld [vmem:[#allocation2 + $0x660] sm:$0xff] }
 0x63c   :  { %8042 = vmatpush2.msra.mxu0 %v7571_v29  ;;  %8113 = vmatpush2.msra.mxu1 %v7699_v33  ;;  %v7680_v4 = vld [vmem:[#allocation2 + $0x728] sm:$0xff]  ;;  %v7523_v3 = vld [vmem:[#allocation2 + $0x240] sm:$0xff] }
 0x63d   :  { %8043 = vmatprep.subr.mxu0 %v7568_v22  ;;  %8114 = vmatprep.subr.mxu1 %v7696_v50  ;;  %v7524_v44 = vld [vmem:[#allocation2 + $0x248] sm:$0xff]  ;;  %v7651_v30 = vld [vmem:[#allocation2 + $0x640] sm:$0xff] }
 0x63e   :  { %8044 = vmatpush2.msra.mxu0 %v7567_v31  ;;  %v7652_v8 = vld [vmem:[#allocation2 + $0x648] sm:$0xff]  ;;  %v7519_v18 = vld [vmem:[#allocation2 + $0x220] sm:$0xff] }
 0x63f   :  { %v7520_v14 = vld [vmem:[#allocation2 + $0x228] sm:$0xff]  ;;  %v7647_v27 = vld [vmem:[#allocation2 + $0x620] sm:$0xff] }
 0x640   :  { %v7648_v13 = vld [vmem:[#allocation2 + $0x628] sm:$0xff]  ;;  %v7515_v22 = vld [vmem:[#allocation2 + $0x200] sm:$0xff] }
 0x641   :  { %v7516_v29 = vld [vmem:[#allocation2 + $0x208] sm:$0xff]  ;;  %v7643_v50 = vld [vmem:[#allocation2 + $0x600] sm:$0xff] }
 0x642   :  { %v7644_v33 = vld [vmem:[#allocation2 + $0x608] sm:$0xff] }
 0x643   :  { %v7768_v31 = vld [vmem:[#allocation2 + $0x9e8] sm:$0xff] }
 0x674   :  { %v6795_v51 = vpop.f32.mrf.mxu0  ;;  %v6866_v46 = vpop.f32.mrf.mxu1 }
 0x675   :  { %v21793_v48 = vadd.f32 %v6866_v46, %v6795_v51  ;;  %v7695_v51 = vld [vmem:[#allocation2 + $0x7a0] sm:$0xff]  ;;  %v7564_v46 = vld [vmem:[#allocation2 + $0x388] sm:$0xff] }
 0x676   :  { %v6797_v54 = vpop.f32.mrf.mxu0  ;;  %v6868_v36 = vpop.f32.mrf.mxu1  ;;  %8115 = vmatpush2.msra.mxu1 %v7695_v51  ;;  %8045 = vmatprep.subr.mxu0 %v7564_v46  ;;  %v7896_v51 = vld [vmem:[#allocation2 + $0xde8] sm:$0xff] }
 0x677   :  { %v7157_v47 = vmul.f32 %v21793_v48, %v21793_v48  ;;  %v21801_v56 = vadd.f32 %v6868_v36, %v6797_v54  ;;  %8116 = vmatprep.subr.mxu1 %v7692_v52  ;;  %8046 = vmatpush2.msra.mxu0 %v7563_v35  ;;  %v7560_v54 = vld [vmem:[#allocation2 + $0x368] sm:$0xff]  ;;  %v7192_v52 = vand.u32 2147483647, %v21780_v1 }
 0x678   :  { %8117 = vmatpush2.msra.mxu1 %v7691_v23  ;;  %v7688_v36 = vld [vmem:[#allocation2 + $0x768] sm:$0xff]  ;;  %8047 = vmatprep.subr.mxu0 %v7560_v54  ;;  %v7193_v23 = vand.u32 2147483647, %v21778_v34  ;;  %v7194_v54 = vand.u32 2147483647, %v21782_v11 }
 0x679   :  { %v7169_v0 = vsel %vm5825_vm0, %v7157_v47, 0.0  ;;  %v7158_v55 = vmul.f32 %v21801_v56, %v21801_v56  ;;  %8118 = vmatprep.subr.mxu1 %v7688_v36  ;;  %8048 = vmatpush2.msra.mxu0 %v7559_v32  ;;  %v7552_v47 = vld [vmem:[#allocation2 + $0x328] sm:$0xff]  ;;  %v7195_v36 = vand.u32 2147483647, %v21790_v17  ;;  %v7219_v32 = vadd.f32 1e-08, %v7192_v52 }
 0x67a   :  { %v7170_v15 = vadd.f32 %v7169_v0, %v7168_v63  ;;  %8119 = vmatpush2.msra.mxu1 %v7687_v40  ;;  %8049 = vmatprep.subr.mxu0 %v7556_v38  ;;  %v7676_v0 = vld [vmem:[#allocation2 + $0x708] sm:$0xff]  ;;  %v7675_v63 = vld [vmem:[#allocation2 + $0x700] sm:$0xff]  ;;  %v7197_v40 = vand.u32 2147483647, %v21801_v56  ;;  %v7220_v38 = vadd.f32 1e-08, %v7193_v23 }
 0x67b   :  { %v7171_v16 = vsel %vm5825_vm0, %v7158_v55, 0.0  ;;  %8120 = vmatprep.subr.mxu1 %v7684_v5  ;;  %v7547_v55 = vld [vmem:[#allocation2 + $0x300] sm:$0xff] }
 0x67c   :  { %v7172_v6 = vadd.f32 %v7171_v16, %v7170_v15  ;;  %v7672_v15 = vld [vmem:[#allocation2 + $0x6e8] sm:$0xff]  ;;  %v7543_v16 = vld [vmem:[#allocation2 + $0x2e0] sm:$0xff] }
 0x6b6   :  { %v6937_v45 = vpop.f32.mrf.mxu0  ;;  %v7008_v10 = vpop.f32.mrf.mxu1 }
 0x6b7   :  { %v21804_v59 = vadd.f32 %v7008_v10, %v6937_v45  ;;  %v7555_v45 = vld [vmem:[#allocation2 + $0x340] sm:$0xff] }
 0x6b8   :  { %v6939_v60 = vpop.f32.mrf.mxu0  ;;  %v7010_v28 = vpop.f32.mrf.mxu1  ;;  %v7683_v10 = vld [vmem:[#allocation2 + $0x740] sm:$0xff]  ;;  %8050 = vmatpush2.msra.mxu0 %v7555_v45  ;;  %v7221_v45 = vadd.f32 1e-08, %v7194_v54 }
 0x6b9   :  { %v7159_v41 = vmul.f32 %v21804_v59, %v21804_v59  ;;  %v21811_v42 = vadd.f32 %v7010_v28, %v6939_v60  ;;  %8121 = vmatpush2.msra.mxu1 %v7683_v10  ;;  %8051 = vmatprep.subr.mxu0 %v7552_v47  ;;  %v7679_v60 = vld [vmem:[#allocation2 + $0x720] sm:$0xff]  ;;  %v7548_v28 = vld [vmem:[#allocation2 + $0x308] sm:$0xff]  ;;  %v7222_v10 = vadd.f32 1e-08, %v7195_v36  ;;  %v7224_v47 = vadd.f32 1e-08, %v7197_v40 }
 0x6ba   :  { %8122 = vmatprep.subr.mxu1 %v7680_v4  ;;  %8052 = vmatpush2.msra.mxu0 %v7551_v53  ;;  %v17389_v53 = vmov 1983009808  }
 0x6bb   :  { %v7160_v62 = vmul.f32 %v21811_v42, %v21811_v42  ;;  %v7173_v12 = vsel %vm5825_vm0, %v7159_v41, 0.0  ;;  %8123 = vmatpush2.msra.mxu1 %v7679_v60  ;;  %8053 = vmatprep.subr.mxu0 %v7548_v28  ;;  %v7544_v41 = vld [vmem:[#allocation2 + $0x2e8] sm:$0xff]  ;;  %v7199_v5 = vand.u32 2147483647, %v21811_v42  ;;  %v7394_v60 = vunpack.c.l.s4 %v17389_v53 }
 0x6bc   :  { %v7174_v49 = vadd.f32 %v7173_v12, %v7172_v6  ;;  %8124 = vmatprep.subr.mxu1 %v7676_v0  ;;  %8054 = vmatpush2.msra.mxu0 %v7547_v55  ;;  %v7539_v12 = vld [vmem:[#allocation2 + $0x2c0] sm:$0xff]  ;;  %v7664_v6 = vld [vmem:[#allocation2 + $0x6a8] sm:$0xff]  ;;  %v7196_v28 = vand.u32 2147483647, %v21793_v48  ;;  %v7198_v0 = vand.u32 2147483647, %v21804_v59 }
 0x6bd   :  { %v7175_v25 = vsel %vm5825_vm0, %v7160_v62, 0.0  ;;  %8125 = vmatpush2.msra.mxu1 %v7675_v63  ;;  %8055 = vmatprep.subr.mxu0 %v7544_v41  ;;  %v7668_v62 = vld [vmem:[#allocation2 + $0x6c8] sm:$0xff]  ;;  %v7226_v4 = vadd.f32 1e-08, %v7199_v5  ;;  %v7395_v63 = vunpack.c.0.s8 %v7394_v60 }
 0x6be   :  { %v7176_v9 = vadd.f32 %v7175_v25, %v7174_v49  ;;  %8126 = vmatprep.subr.mxu1 %v7672_v15  ;;  %8056 = vmatpush2.msra.mxu0 %v7543_v16  ;;  %v7532_v49 = vld [vmem:[#allocation2 + $0x288] sm:$0xff]  ;;  %v7223_v41 = vadd.f32 1e-08, %v7196_v28  ;;  %v7386_v16 = vld [vmem:[%s22201_s3] sm:$0xff] }
 0x6bf   :  { %v7660_v25 = vld [vmem:[#allocation2 + $0x688] sm:$0xff] }
 0x6d8   :  { %v16057_v58 = vpop.f32.mrf.mxu0  ;;  %v16092_v61 = vpop.f32.mrf.mxu1 }
 0x6da   :  { %v16058_v39 = vpop.f32.mrf.mxu0  ;;  %v16093_v26 = vpop.f32.mrf.mxu1 }
 0x6db   :  { %v16059_v2 = vadd.f32 %v16058_v39, %v16057_v58  ;;  %v16094_v7 = vadd.f32 %v16093_v26, %v16092_v61  ;;  %v7671_v58 = vld [vmem:[#allocation2 + $0x6e0] sm:$0xff]  ;;  %v7540_v61 = vld [vmem:[#allocation2 + $0x2c8] sm:$0xff] }
 0x6dc   :  { %8127 = vmatpush2.msra.mxu1 %v7671_v58  ;;  %8057 = vmatprep.subr.mxu0 %v7540_v61  ;;  %v7667_v39 = vld [vmem:[#allocation2 + $0x6c0] sm:$0xff]  ;;  %v7536_v26 = vld [vmem:[#allocation2 + $0x2a8] sm:$0xff]  ;;  %v7225_v58 = vadd.f32 1e-08, %v7198_v0 }
 0x6dd   :  { %v21817_v19 = vadd.f32 %v16094_v7, %v16059_v2  ;;  %8128 = vmatprep.subr.mxu1 %v7668_v62  ;;  %8058 = vmatpush2.msra.mxu0 %v7539_v12  ;;  %v7535_v2 = vld [vmem:[#allocation2 + $0x2a0] sm:$0xff] }
 0x6de   :  { %8129 = vmatpush2.msra.mxu1 %v7667_v39  ;;  %v7663_v7 = vld [vmem:[#allocation2 + $0x6a0] sm:$0xff]  ;;  %8059 = vmatprep.subr.mxu0 %v7536_v26  ;;  %v21837_v26 = vsub.s32 %v7395_v63, %v17562_v43  ;;  %v7387_v43 = vld [vmem:[%s22201_s3 + $0x8] sm:$0xff] }
 0x6df   :  { %v7161_v57 = vmul.f32 %v21817_v19, %v21817_v19  ;;  %8130 = vmatprep.subr.mxu1 %v7664_v6  ;;  %8060 = vmatpush2.msra.mxu0 %v7535_v2  ;;  %v7200_v61 = vand.u32 2147483647, %v21817_v19  ;;  %v7392_v6 = vcombine.high %v7386_v16, %v7386_v16 }
 0x6e0   :  { %8131 = vmatpush2.msra.mxu1 %v7663_v7  ;;  %8061 = vmatprep.subr.mxu0 %v7532_v49 }
 0x6e1   :  { %v7178_v20 = vsel %vm7177_vm3, %v7161_v57, 0.0  ;;  %v7531_v57 = vld [vmem:[#allocation2 + $0x280] sm:$0xff]  ;;  %8132 = vmatprep.subr.mxu1 %v7660_v25  ;;  %v7227_v49 = vadd.f32 1e-08, %v7200_v61 }
 0x6e2   :  { %v7179_v21 = vadd.f32 %v7178_v20, %v7176_v9  ;;  %v7659_v9 = vld [vmem:[#allocation2 + $0x680] sm:$0xff]  ;;  %v7528_v20 = vld [vmem:[#allocation2 + $0x268] sm:$0xff]  ;;  %8062 = vmatpush2.msra.mxu0 %v7531_v57 }
 0x6e3   :  { %8133 = vmatpush2.msra.mxu1 %v7659_v9  ;;  %8063 = vmatprep.subr.mxu0 %v7528_v20 }
 0x6e4   :  { %7180 = vadd.xlane.f32.xlu1 %v7179_v21  ;;  %v7656_v21 = vld [vmem:[#allocation2 + $0x668] sm:$0xff]  ;;  %8064 = vmatpush2.msra.mxu0 %v7527_v24 }
 0x6e5   :  { %8134 = vmatprep.subr.mxu1 %v7656_v21  ;;  %8065 = vmatprep.subr.mxu0 %v7524_v44  ;;  %v7406_v44 = vrot.slane %v7392_v6, %v21837_v26 }
 0x6e6   :  { %8135 = vmatpush2.msra.mxu1 %v7655_v37  ;;  %8066 = vmatpush2.msra.mxu0 %v7523_v3  ;;  %v7399_v37 = vrot.slane %v7386_v16, %v21837_v26 }
 0x6e7   :  { %8136 = vmatprep.subr.mxu1 %v7652_v8  ;;  %8067 = vmatprep.subr.mxu0 %v7520_v14 }
 0x6e8   :  { %8137 = vmatpush2.msra.mxu1 %v7651_v30  ;;  %8068 = vmatpush2.msra.mxu0 %v7519_v18 }
 0x6e9   :  { %8138 = vmatprep.subr.mxu1 %v7648_v13  ;;  %8069 = vmatprep.subr.mxu0 %v7516_v29 }
 0x6ea   :  { %8139 = vmatpush2.msra.mxu1 %v7647_v27  ;;  %8070 = vmatpush2.msra.mxu0 %v7515_v22  ;;  %v21855_v22 = vrot.slane %v7387_v43, %v21837_v26 }
 0x6eb   :  { %8140 = vmatprep.subr.mxu1 %v7644_v33  ;;  %8149 = vmatprep.subr.mxu0 %v7768_v31  ;;  %v7409_v31 = vcombine.high %v7387_v43, %v7387_v43  ;;  %v7891_v43 = vld [vmem:[#allocation2 + $0xdc0] sm:$0xff] }
 0x6ec   :  { %8141 = vmatpush2.msra.mxu1 %v7643_v50 }
 0x6ed   :  { %8220 = vmatprep.subr.mxu1 %v7896_v51  ;;  %v21858_v53 = vrot.slane %v7409_v31, %v21837_v26 }
 0x76d   :  { %v7181_v46 = vpop.xlane.xlu1 %7180 }
 0x76e   :  { %v7183_v35 = vmul.f32 0.0009057971, %v7181_v46 }
 0x770   :  { %17270 = vrsqrt.f32 %v7183_v35  ;;  %vm7186_vm4 = vcmp.eq.f32.partialorder %v7183_v35, inf  ;;  %v7189_v62 = vand.u32 2147483648, %v7183_v35  ;;  %vm7188_vm5 = vcmp.eq.f32.partialorder %v7183_v35, 0.0 }
 0x771   :  { %17272 = vrcp.f32 %v7219_v32 }
 0x772   :  { %17274 = vrcp.f32 %v7220_v38 }
 0x773   :  { %17276 = vrcp.f32 %v7221_v45 }
 0x774   :  { %17278 = vrcp.f32 %v7222_v10 }
 0x775   :  { %17280 = vrcp.f32 %v7224_v47 }
 0x776   :  { %17282 = vrcp.f32 %v7226_v4 }
 0x777   :  { %17284 = vrcp.f32 %v7223_v41 }
 0x778   :  { %17286 = vrcp.f32 %v7225_v58  ;;  %v7424_v58 = vcombine.high %v21855_v22, %v21855_v22 }
 0x779   :  { %17288 = vrcp.f32 %v7227_v49  ;;  %v7895_v49 = vld [vmem:[#allocation2 + $0xde0] sm:$0xff] }
 0x77d   :  { %v17271_v55 = vpop.eup %17270 }
 0x77e   :  { %v7185_v15 = vmul.f32 %v17271_v55, %v7183_v35  ;;  %v17273_v7 = vpop.eup %17272 }
 0x77f   :  { %v17275_v25 = vpop.eup %17274 }
 0x780   :  { %v7187_v12 = vsel %vm7186_vm4, %v7183_v35, %v7185_v15  ;;  %v17277_v24 = vpop.eup %17276 }
 0x781   :  { %v7190_v39 = vsel %vm7188_vm5, %v7189_v62, %v7187_v12  ;;  %v17279_v30 = vpop.eup %17278 }
 0x782   :  { %v21839_v2 = vmul.f32 1.5, %v7190_v39  ;;  %v17281_v29 = vpop.eup %17280 }
 0x783   :  { %v17283_v51 = vpop.eup %17282 }
 0x784   :  { %v7202_v57 = vsub.f32 %v7193_v23, %v21839_v2  ;;  %v7204_v9 = vsub.f32 %v7195_v36, %v21839_v2  ;;  %v7201_v20 = vsub.f32 %v7192_v52, %v21839_v2  ;;  %v7203_v21 = vsub.f32 %v7194_v54, %v21839_v2 }
 0x785   :  { %v7206_v8 = vsub.f32 %v7197_v40, %v21839_v2  ;;  %v7208_v3 = vsub.f32 %v7199_v5, %v21839_v2  ;;  %v7407_v54 = vcombine.high %v7399_v37, %v7399_v37  ;;  %v7408_v36 = vcombine.high %v7406_v44, %v7406_v44 }
 0x786   :  { %v7211_v14 = vmax.f32 %v7202_v57, 0.0  ;;  %v7213_v13 = vmax.f32 %v7204_v9, 0.0  ;;  %v7210_v18 = vmax.f32 %v7201_v20, 0.0  ;;  %v7212_v27 = vmax.f32 %v7203_v21, 0.0  ;;  %v7892_v20 = vld [vmem:[#allocation2 + $0xdc8] sm:$0xff] }
 0x787   :  { %v7215_v33 = vmax.f32 %v7206_v8, 0.0  ;;  %v7217_v50 = vmax.f32 %v7208_v3, 0.0  ;;  %v7205_v60 = vsub.f32 %v7196_v28, %v21839_v2  ;;  %v7207_v57 = vsub.f32 %v7198_v0, %v21839_v2  ;;  %v7763_v0 = vld [vmem:[#allocation2 + $0x9c0] sm:$0xff]  ;;  %v7760_v3 = vld [vmem:[#allocation2 + $0x9a8] sm:$0xff] }
 0x788   :  { %v7238_v46 = vmul.f32 %v17275_v25, %v7211_v14  ;;  %v7240_v52 = vmul.f32 %v17279_v30, %v7213_v13  ;;  %v7237_v35 = vmul.f32 %v17273_v7, %v7210_v18  ;;  %v7239_v23 = vmul.f32 %v17277_v24, %v7212_v27  ;;  %v7767_v7 = vld [vmem:[#allocation2 + $0x9e0] sm:$0xff]  ;;  %v7888_v24 = vld [vmem:[#allocation2 + $0xda8] sm:$0xff] }
 0x789   :  { %v7242_v32 = vmul.f32 %v17281_v29, %v7215_v33  ;;  %v7244_v40 = vmul.f32 %v17283_v51, %v7217_v50  ;;  %v7214_v25 = vmax.f32 %v7205_v60, 0.0  ;;  %v7209_v30 = vsub.f32 %v7200_v61, %v21839_v2  ;;  %v7759_v13 = vld [vmem:[#allocation2 + $0x9a0] sm:$0xff]  ;;  %v7756_v27 = vld [vmem:[#allocation2 + $0x988] sm:$0xff] }
 0x78a   :  { %v7247_v38 = vsub.f32 1.0, %v7238_v46  ;;  %v7249_v5 = vsub.f32 1.0, %v7240_v52  ;;  %v7246_v45 = vsub.f32 1.0, %v7237_v35  ;;  %v7248_v10 = vsub.f32 1.0, %v7239_v23  ;;  %v7887_v18 = vld [vmem:[#allocation2 + $0xda0] sm:$0xff]  ;;  %v7884_v29 = vld [vmem:[#allocation2 + $0xd88] sm:$0xff] }
 0x78b   :  { %v7251_v47 = vsub.f32 1.0, %v7242_v32  ;;  %v7253_v4 = vsub.f32 1.0, %v7244_v40  ;;  %v7755_v33 = vld [vmem:[#allocation2 + $0x980] sm:$0xff]  ;;  %v7880_v2 = vld [vmem:[#allocation2 + $0xd68] sm:$0xff]  ;;  %v7218_v51 = vmax.f32 %v7209_v30, 0.0 }
 0x78c   :  { %v7256_v55 = vmul.f32 %v7247_v38, %v21778_v34  ;;  %v21863_v63 = vmul.f32 %v7249_v5, %v21790_v17  ;;  %v7255_v41 = vmul.f32 %v7246_v45, %v21780_v1  ;;  %v7257_v15 = vmul.f32 %v7248_v10, %v21782_v11  ;;  %v17285_v17 = vpop.eup %17284  ;;  %v7883_v50 = vld [vmem:[#allocation2 + $0xd80] sm:$0xff]  ;;  %v7752_v35 = vld [vmem:[#allocation2 + $0x968] sm:$0xff] }
 0x78d   :  { %v7260_v16 = vmul.f32 %v7251_v47, %v21801_v56  ;;  %v7262_v11 = vmul.f32 %v7253_v4, %v21811_v42  ;;  %v7425_v56 = vcombine.high %v21858_v53, %v21858_v53  ;;  %v17287_v6 = vpop.eup %17286  ;;  %v7764_v42 = vld [vmem:[#allocation2 + $0x9c8] sm:$0xff]  ;;  %v7747_v45 = vld [vmem:[#allocation2 + $0x940] sm:$0xff] }
 0x78e   :  { %v21870_v62 = vadd.f32 %v7407_v54, %v7256_v55  ;;  %v21873_v12 = vadd.f32 %v7408_v36, %v21863_v63  ;;  %v21875_v28 = vmul.f32 %v7256_v55, %v7256_v55  ;;  %v21877_v34 = vmul.f32 %v7255_v41, %v7255_v41  ;;  %v17289_v46 = vpop.eup %17288  ;;  %v7751_v54 = vld [vmem:[#allocation2 + $0x960] sm:$0xff]  ;;  %v7748_v32 = vld [vmem:[#allocation2 + $0x948] sm:$0xff] }
 0x78f   :  { %v21879_v39 = vadd.f32 %v7399_v37, %v7255_v41  ;;  %v21881_v1 = vadd.f32 %v7406_v44, %v7257_v15  ;;  %v21897_v9 = vadd.f32 %v7424_v58, %v7260_v16  ;;  %v21899_v21 = vadd.f32 %v7425_v56, %v7262_v11  ;;  %v7879_v36 = vld [vmem:[#allocation2 + $0xd60] sm:$0xff]  ;;  %v7876_v40 = vld [vmem:[#allocation2 + $0xd48] sm:$0xff] }
 0x790   :  { %8071 = vmatprep.mubr.f32.mxu0 %v21870_v62  ;;  %8142 = vmatprep.mubr.f32.mxu1 %v21873_v12  ;;  %v7241_v37 = vmul.f32 %v17285_v17, %v7214_v25  ;;  %v7216_v44 = vmax.f32 %v7207_v57, 0.0  ;;  %v21903_v8 = vmul.f32 %v7260_v16, %v7260_v16  ;;  %v21908_v14 = vmul.f32 %v7257_v15, %v7257_v15  ;;  %v7875_v10 = vld [vmem:[#allocation2 + $0xd40] sm:$0xff]  ;;  %v7744_v4 = vld [vmem:[#allocation2 + $0x928] sm:$0xff] }
 0x791   :  { %7284 = vrot.lane.b32.xlu0 %v21875_v28, %s17390_s17  ;;  %7282 = vrot.lane.b32.xlu1 %v21877_v34, %s17390_s17  ;;  %v21914_v52 = vmul.f32 %v7262_v11, %v7262_v11  ;;  %v21918_v23 = vmul.f32 %v21863_v63, %v21863_v63  ;;  %v7245_v47 = vmul.f32 %v17289_v46, %v7218_v51  ;;  %v7872_v60 = vld [vmem:[#allocation2 + $0xd28] sm:$0xff]  ;;  %v7743_v55 = vld [vmem:[#allocation2 + $0x920] sm:$0xff] }
 0x792   :  { %8072 = vmatmul.mubr.f32.vlgmr.msra.gmra.mxu0 %v21879_v39  ;;  %8143 = vmatmul.mubr.f32.vlgmr.msra.gmra.mxu1 %v21881_v1  ;;  %v7250_v31 = vsub.f32 1.0, %v7241_v37  ;;  %v7243_v61 = vmul.f32 %v17287_v6, %v7216_v44  ;;  %v7871_v63 = vld [vmem:[#allocation2 + $0xd20] sm:$0xff]  ;;  %v7740_v41 = vld [vmem:[#allocation2 + $0x908] sm:$0xff] }
 0x793   :  { %8150 = vmatpush1.msra.mxu0 %v7767_v7  ;;  %8221 = vmatpush1.msra.mxu1 %v7895_v49  ;;  %v7868_v16 = vld [vmem:[#allocation2 + $0xd08] sm:$0xff]  ;;  %v7739_v58 = vld [vmem:[#allocation2 + $0x900] sm:$0xff]  ;;  %v7254_v17 = vsub.f32 1.0, %v7245_v47 }
 0x794   :  { %8151 = vmatprep.subr.mxu0 %v7764_v42  ;;  %8213 = vmatprep.mubr.f32.mxu0 %v21897_v9  ;;  %v21923_v38 = vmul.f32 %v7250_v31, %v21793_v48  ;;  %v7252_v5 = vsub.f32 1.0, %v7243_v61  ;;  %v7867_v11 = vld [vmem:[#allocation2 + $0xd00] sm:$0xff]  ;;  %v7736_v56 = vld [vmem:[#allocation2 + $0x8e8] sm:$0xff] }
 0x795   :  { %8222 = vmatprep.subr.mxu1 %v7892_v20  ;;  %8284 = vmatprep.mubr.f32.mxu1 %v21899_v21  ;;  %v7864_v6 = vld [vmem:[#allocation2 + $0xce8] sm:$0xff]  ;;  %v7735_v7 = vld [vmem:[#allocation2 + $0x8e0] sm:$0xff]  ;;  %v21941_v42 = vmul.f32 %v7254_v17, %v21817_v19 }
 0x796   :  { %8152 = vmatpush1.msra.mxu0 %v7763_v0  ;;  %8223 = vmatpush1.msra.mxu1 %v7891_v43  ;;  %v21929_v48 = vmul.f32 %v21923_v38, %v21923_v38  ;;  %v21932_v15 = vmul.f32 %v7252_v5, %v21804_v59  ;;  %v7863_v49 = vld [vmem:[#allocation2 + $0xce0] sm:$0xff]  ;;  %v7732_v25 = vld [vmem:[#allocation2 + $0x8c8] sm:$0xff] }
 0x797   :  { %8224 = vmatprep.subr.mxu1 %v7888_v24  ;;  %7292 = vrot.lane.b32.xlu0 %v21903_v8, %s17390_s17  ;;  %v7860_v57 = vld [vmem:[#allocation2 + $0xcc8] sm:$0xff]  ;;  %v7731_v20 = vld [vmem:[#allocation2 + $0x8c0] sm:$0xff]  ;;  %v21947_v44 = vmul.f32 %v21941_v42, %v21941_v42 }
 0x798   :  { %8153 = vmatprep.subr.mxu0 %v7760_v3  ;;  %7286 = vrot.lane.b32.xlu1 %v21908_v14, %s17390_s17  ;;  %v21938_v59 = vmul.f32 %v21932_v15, %v21932_v15  ;;  %v7859_v0 = vld [vmem:[#allocation2 + $0xcc0] sm:$0xff]  ;;  %v7728_v43 = vld [vmem:[#allocation2 + $0x8a8] sm:$0xff] }
 0x799   :  { %8154 = vmatpush1.msra.mxu0 %v7759_v13  ;;  %8225 = vmatpush1.msra.mxu1 %v7887_v18  ;;  %v7856_v24 = vld [vmem:[#allocation2 + $0xca8] sm:$0xff]  ;;  %v7727_v37 = vld [vmem:[#allocation2 + $0x8a0] sm:$0xff] }
 0x79a   :  { %8155 = vmatprep.subr.mxu0 %v7756_v27  ;;  %8226 = vmatprep.subr.mxu1 %v7884_v29  ;;  %v7855_v19 = vld [vmem:[#allocation2 + $0xca0] sm:$0xff]  ;;  %v7724_v3 = vld [vmem:[#allocation2 + $0x888] sm:$0xff] }
 0x79b   :  { %8156 = vmatpush1.msra.mxu0 %v7755_v33  ;;  %8227 = vmatpush1.msra.mxu1 %v7883_v50  ;;  %v7852_v30 = vld [vmem:[#allocation2 + $0xc88] sm:$0xff]  ;;  %v7723_v13 = vld [vmem:[#allocation2 + $0x880] sm:$0xff] }
 0x79c   :  { %8228 = vmatprep.subr.mxu1 %v7880_v2  ;;  %7296 = vrot.lane.b32.xlu0 %v21914_v52, %s17390_s17  ;;  %v7851_v18 = vld [vmem:[#allocation2 + $0xc80] sm:$0xff]  ;;  %v7720_v27 = vld [vmem:[#allocation2 + $0x868] sm:$0xff] }
 0x79d   :  { %8157 = vmatprep.subr.mxu0 %v7752_v35  ;;  %7288 = vrot.lane.b32.xlu1 %v21918_v23, %s17390_s17  ;;  %v7848_v29 = vld [vmem:[#allocation2 + $0xc68] sm:$0xff]  ;;  %v7719_v33 = vld [vmem:[#allocation2 + $0x860] sm:$0xff] }
 0x79e   :  { %8158 = vmatpush1.msra.mxu0 %v7751_v54  ;;  %8229 = vmatpush1.msra.mxu1 %v7879_v36  ;;  %v7847_v50 = vld [vmem:[#allocation2 + $0xc60] sm:$0xff]  ;;  %v7716_v31 = vld [vmem:[#allocation2 + $0x848] sm:$0xff] }
 0x79f   :  { %8159 = vmatprep.subr.mxu0 %v7748_v32  ;;  %8230 = vmatprep.subr.mxu1 %v7876_v40  ;;  %v7844_v61 = vld [vmem:[#allocation2 + $0xc48] sm:$0xff]  ;;  %v7715_v2 = vld [vmem:[#allocation2 + $0x840] sm:$0xff] }
 0x7a0   :  { %8160 = vmatpush1.msra.mxu0 %v7747_v45  ;;  %8231 = vmatpush1.msra.mxu1 %v7875_v10  ;;  %v7843_v51 = vld [vmem:[#allocation2 + $0xc40] sm:$0xff]  ;;  %v7712_v46 = vld [vmem:[#allocation2 + $0x828] sm:$0xff] }
 0x7a1   :  { %8161 = vmatprep.subr.mxu0 %v7744_v4  ;;  %8232 = vmatprep.subr.mxu1 %v7872_v60  ;;  %v7840_v35 = vld [vmem:[#allocation2 + $0xc28] sm:$0xff]  ;;  %v7711_v54 = vld [vmem:[#allocation2 + $0x820] sm:$0xff] }
 0x7a2   :  { %7290 = vrot.lane.b32.xlu1 %v21929_v48, %s17390_s17  ;;  %8162 = vmatpush1.msra.mxu0 %v7743_v55  ;;  %v7839_v36 = vld [vmem:[#allocation2 + $0xc20] sm:$0xff]  ;;  %v7708_v32 = vld [vmem:[#allocation2 + $0x808] sm:$0xff] }
 0x7a3   :  { %8233 = vmatpush1.msra.mxu1 %v7871_v63  ;;  %8163 = vmatprep.subr.mxu0 %v7740_v41  ;;  %v7836_v40 = vld [vmem:[#allocation2 + $0xc08] sm:$0xff]  ;;  %v7707_v5 = vld [vmem:[#allocation2 + $0x800] sm:$0xff] }
 0x7a4   :  { %8234 = vmatprep.subr.mxu1 %v7868_v16  ;;  %8164 = vmatpush1.msra.mxu0 %v7739_v58  ;;  %v7835_v45 = vld [vmem:[#allocation2 + $0xc00] sm:$0xff]  ;;  %v7832_v10 = vld [vmem:[#allocation2 + $0xbe8] sm:$0xff] }
 0x7a5   :  { %8235 = vmatpush1.msra.mxu1 %v7867_v11  ;;  %8165 = vmatprep.subr.mxu0 %v7736_v56  ;;  %v7960_v47 = vld [vmem:[#allocation2 + $0xfe8] sm:$0xff]  ;;  %v7831_v4 = vld [vmem:[#allocation2 + $0xbe0] sm:$0xff] }
 0x7a6   :  { %8236 = vmatprep.subr.mxu1 %v7864_v6  ;;  %7294 = vrot.lane.b32.xlu1 %v21938_v59, %s17390_s17  ;;  %v7959_v60 = vld [vmem:[#allocation2 + $0xfe0] sm:$0xff]  ;;  %v7828_v55 = vld [vmem:[#allocation2 + $0xbc8] sm:$0xff] }
 0x7a7   :  { %8166 = vmatpush1.msra.mxu0 %v7735_v7  ;;  %8237 = vmatpush1.msra.mxu1 %v7863_v49  ;;  %v7956_v63 = vld [vmem:[#allocation2 + $0xfc8] sm:$0xff]  ;;  %v7827_v41 = vld [vmem:[#allocation2 + $0xbc0] sm:$0xff] }
 0x7a8   :  { %8167 = vmatprep.subr.mxu0 %v7732_v25  ;;  %8238 = vmatprep.subr.mxu1 %v7860_v57  ;;  %v7955_v16 = vld [vmem:[#allocation2 + $0xfc0] sm:$0xff]  ;;  %v7824_v58 = vld [vmem:[#allocation2 + $0xba8] sm:$0xff] }
 0x7a9   :  { %8168 = vmatpush1.msra.mxu0 %v7731_v20  ;;  %8239 = vmatpush1.msra.mxu1 %v7859_v0  ;;  %v7952_v17 = vld [vmem:[#allocation2 + $0xfa8] sm:$0xff]  ;;  %v7823_v11 = vld [vmem:[#allocation2 + $0xba0] sm:$0xff] }
 0x7aa   :  { %8169 = vmatprep.subr.mxu0 %v7728_v43  ;;  %8240 = vmatprep.subr.mxu1 %v7856_v24  ;;  %v7951_v56 = vld [vmem:[#allocation2 + $0xfa0] sm:$0xff]  ;;  %v7820_v6 = vld [vmem:[#allocation2 + $0xb88] sm:$0xff] }
 0x7ab   :  { %7298 = vrot.lane.b32.xlu1 %v21947_v44, %s17390_s17  ;;  %8170 = vmatpush1.msra.mxu0 %v7727_v37  ;;  %v7948_v7 = vld [vmem:[#allocation2 + $0xf88] sm:$0xff]  ;;  %v7819_v49 = vld [vmem:[#allocation2 + $0xb80] sm:$0xff]  ;;  %v7341_v37 = vsel %vm7340_vm6, %v21877_v34, -inf }
 0x7ac   :  { %8241 = vmatpush1.msra.mxu1 %v7855_v19  ;;  %8171 = vmatprep.subr.mxu0 %v7724_v3  ;;  %v7947_v25 = vld [vmem:[#allocation2 + $0xf80] sm:$0xff]  ;;  %v7816_v57 = vld [vmem:[#allocation2 + $0xb68] sm:$0xff]  ;;  %v7345_v19 = vsel %vm5825_vm0, %v21929_v48, -inf }
 0x7ad   :  { %8242 = vmatprep.subr.mxu1 %v7852_v30  ;;  %8172 = vmatpush1.msra.mxu0 %v7723_v13  ;;  %v7944_v20 = vld [vmem:[#allocation2 + $0xf68] sm:$0xff]  ;;  %v7815_v0 = vld [vmem:[#allocation2 + $0xb60] sm:$0xff] }
 0x7ae   :  { %8243 = vmatpush1.msra.mxu1 %v7851_v18  ;;  %8173 = vmatprep.subr.mxu0 %v7720_v27  ;;  %v7943_v43 = vld [vmem:[#allocation2 + $0xf60] sm:$0xff]  ;;  %v7812_v24 = vld [vmem:[#allocation2 + $0xb48] sm:$0xff] }
 0x7af   :  { %8244 = vmatprep.subr.mxu1 %v7848_v29  ;;  %8174 = vmatpush1.msra.mxu0 %v7719_v33  ;;  %v7940_v3 = vld [vmem:[#allocation2 + $0xf48] sm:$0xff]  ;;  %v7811_v30 = vld [vmem:[#allocation2 + $0xb40] sm:$0xff]  ;;  %v7346_v33 = vmax.f32 %v7341_v37, %v7345_v19 }
 0x7b0   :  { %8245 = vmatpush1.msra.mxu1 %v7847_v50  ;;  %8175 = vmatprep.subr.mxu0 %v7716_v31  ;;  %v7939_v13 = vld [vmem:[#allocation2 + $0xf40] sm:$0xff]  ;;  %v7808_v18 = vld [vmem:[#allocation2 + $0xb28] sm:$0xff] }
 0x7b1   :  { %8246 = vmatprep.subr.mxu1 %v7844_v61  ;;  %8176 = vmatpush1.msra.mxu0 %v7715_v2  ;;  %v7936_v27 = vld [vmem:[#allocation2 + $0xf28] sm:$0xff]  ;;  %v7807_v29 = vld [vmem:[#allocation2 + $0xb20] sm:$0xff]  ;;  %v7342_v61 = vsel %vm5825_vm0, %v21875_v28, -inf  ;;  %v7347_v2 = vsel %vm5825_vm0, %v21903_v8, -inf  ;;  %v7354_v28 = vsel %vm7353_vm7, %v21947_v44, -inf }
 0x7b2   :  { %8247 = vmatpush1.msra.mxu1 %v7843_v51  ;;  %8177 = vmatprep.subr.mxu0 %v7712_v46  ;;  %v7935_v34 = vld [vmem:[#allocation2 + $0xf20] sm:$0xff]  ;;  %v7804_v50 = vld [vmem:[#allocation2 + $0xb08] sm:$0xff]  ;;  %v7343_v51 = vsel %vm5825_vm0, %v21908_v14, -inf }
 0x7b3   :  { %8248 = vmatprep.subr.mxu1 %v7840_v35  ;;  %8178 = vmatpush1.msra.mxu0 %v7711_v54  ;;  %v7932_v48 = vld [vmem:[#allocation2 + $0xf08] sm:$0xff]  ;;  %v7803_v31 = vld [vmem:[#allocation2 + $0xb00] sm:$0xff]  ;;  %v7351_v54 = vsel %vm5825_vm0, %v21914_v52, -inf }
 0x7b4   :  { %8249 = vmatpush1.msra.mxu1 %v7839_v36  ;;  %8179 = vmatprep.subr.mxu0 %v7708_v32  ;;  %v7931_v46 = vld [vmem:[#allocation2 + $0xf00] sm:$0xff]  ;;  %v7800_v35 = vld [vmem:[#allocation2 + $0xae8] sm:$0xff]  ;;  %v7344_v36 = vsel %vm5825_vm0, %v21918_v23, -inf  ;;  %v7349_v32 = vsel %vm5825_vm0, %v21938_v59, -inf }
 0x7b5   :  { %8250 = vmatprep.subr.mxu1 %v7836_v40  ;;  %8180 = vmatpush1.msra.mxu0 %v7707_v5  ;;  %v7928_v8 = vld [vmem:[#allocation2 + $0xee8] sm:$0xff]  ;;  %v7799_v14 = vld [vmem:[#allocation2 + $0xae0] sm:$0xff]  ;;  %v7352_v44 = vmax.f32 %v7344_v36, %v7351_v54  ;;  %v7502_v36 = vld [vmem:[#allocation2 + $0x198] sm:$0xff] }
 0x7b6   :  { %8251 = vmatpush1.msra.mxu1 %v7835_v45  ;;  %8181 = vmatprep.subr.mxu0 %v7832_v10  ;;  %v7927_v40 = vld [vmem:[#allocation2 + $0xee0] sm:$0xff]  ;;  %v7796_v5 = vld [vmem:[#allocation2 + $0xac8] sm:$0xff]  ;;  %v7355_v45 = vmax.f32 %v7346_v33, %v7354_v28  ;;  %v21970_v33 = vadd.f32 %v21855_v22, %v21923_v38  ;;  %v7509_v38 = vld [vmem:[#allocation2 + $0x1d0] sm:$0xff] }
 0x7b7   :  { %8252 = vmatprep.subr.mxu1 %v7960_v47  ;;  %8182 = vmatpush2.msra.mxu0 %v7831_v4  ;;  %v7924_v52 = vld [vmem:[#allocation2 + $0xec8] sm:$0xff]  ;;  %v7795_v10 = vld [vmem:[#allocation2 + $0xac0] sm:$0xff]  ;;  %v7348_v47 = vmax.f32 %v7342_v61, %v7347_v2  ;;  %v7350_v4 = vmax.f32 %v7343_v51, %v7349_v32  ;;  %v7513_v61 = vld [vmem:[#allocation2 + $0x1f0] sm:$0xff] }
 0x7b8   :  { %8253 = vmatpush2.msra.mxu1 %v7959_v60  ;;  %8183 = vmatprep.subr.mxu0 %v7828_v55  ;;  %v7923_v23 = vld [vmem:[#allocation2 + $0xec0] sm:$0xff]  ;;  %v7792_v59 = vld [vmem:[#allocation2 + $0xaa8] sm:$0xff]  ;;  %v7510_v51 = vld [vmem:[#allocation2 + $0x1d8] sm:$0xff] }
 0x7b9   :  { %8254 = vmatprep.subr.mxu1 %v7956_v63  ;;  %8184 = vmatpush2.msra.mxu0 %v7827_v41  ;;  %v7920_v60 = vld [vmem:[#allocation2 + $0xea8] sm:$0xff]  ;;  %v7791_v55 = vld [vmem:[#allocation2 + $0xaa0] sm:$0xff]  ;;  %v7501_v28 = vld [vmem:[#allocation2 + $0x190] sm:$0xff] }
 0x7ba   :  { %8255 = vmatpush2.msra.mxu1 %v7955_v16  ;;  %8185 = vmatprep.subr.mxu0 %v7824_v58  ;;  %v7919_v63 = vld [vmem:[#allocation2 + $0xea0] sm:$0xff]  ;;  %v7788_v41 = vld [vmem:[#allocation2 + $0xa88] sm:$0xff]  ;;  %v7356_v16 = vmax.f32 %v7355_v45, %v7348_v47  ;;  %v7494_v45 = vld [vmem:[#allocation2 + $0x158] sm:$0xff] }
 0x7bb   :  { %8256 = vmatprep.subr.mxu1 %v7952_v17  ;;  %8186 = vmatpush2.msra.mxu0 %v7823_v11  ;;  %v7916_v58 = vld [vmem:[#allocation2 + $0xe88] sm:$0xff]  ;;  %v7787_v17 = vld [vmem:[#allocation2 + $0xa80] sm:$0xff] }
 0x7bc   :  { %8257 = vmatpush2.msra.mxu1 %v7951_v56  ;;  %8187 = vmatprep.subr.mxu0 %v7820_v6  ;;  %v7915_v11 = vld [vmem:[#allocation2 + $0xe80] sm:$0xff]  ;;  %v7784_v56 = vld [vmem:[#allocation2 + $0xa68] sm:$0xff]  ;;  %v7357_v6 = vmax.f32 %v7350_v4, %v7352_v44  ;;  %v7489_v4 = vld [vmem:[#allocation2 + $0x130] sm:$0xff] }
 0x7bd   :  { %8258 = vmatprep.subr.mxu1 %v7948_v7  ;;  %8188 = vmatpush2.msra.mxu0 %v7819_v49  ;;  %v7912_v7 = vld [vmem:[#allocation2 + $0xe68] sm:$0xff]  ;;  %v7995_v22 = vld [vmem:[#allocation2 + $0x1100] sm:$0xff] }
 0x7be   :  { %8259 = vmatpush2.msra.mxu1 %v7947_v25  ;;  %8189 = vmatprep.subr.mxu0 %v7816_v57  ;;  %v7358_v49 = vmax.f32 %v7356_v16, %v7357_v6  ;;  %v7783_v25 = vld [vmem:[#allocation2 + $0xa60] sm:$0xff]  ;;  %v7776_v37 = vld [vmem:[#allocation2 + $0xa28] sm:$0xff]  ;;  %v7482_v16 = vld [vmem:[#allocation2 + $0xf8] sm:$0xff] }
 0x7bf   :  { %8260 = vmatprep.subr.mxu1 %v7944_v20  ;;  %8190 = vmatpush2.msra.mxu0 %v7815_v0  ;;  %v7911_v57 = vld [vmem:[#allocation2 + $0xe60] sm:$0xff]  ;;  %v7780_v20 = vld [vmem:[#allocation2 + $0xa48] sm:$0xff]  ;;  %v7478_v6 = vld [vmem:[#allocation2 + $0xd8] sm:$0xff] }
 0x7c0   :  { %8261 = vmatpush2.msra.mxu1 %v7943_v43  ;;  %8191 = vmatprep.subr.mxu0 %v7812_v24  ;;  %v7908_v0 = vld [vmem:[#allocation2 + $0xe48] sm:$0xff]  ;;  %v7779_v43 = vld [vmem:[#allocation2 + $0xa40] sm:$0xff] }
 0x7c1   :  { %8262 = vmatprep.subr.mxu1 %v7940_v3  ;;  %8192 = vmatpush2.msra.mxu0 %v7811_v30  ;;  %v7907_v24 = vld [vmem:[#allocation2 + $0xe40] sm:$0xff]  ;;  %v7904_v19 = vld [vmem:[#allocation2 + $0xe28] sm:$0xff] }
 0x7c2   :  { %8263 = vmatpush2.msra.mxu1 %v7939_v13  ;;  %8193 = vmatprep.subr.mxu0 %v7808_v18  ;;  %v7775_v3 = vld [vmem:[#allocation2 + $0xa20] sm:$0xff]  ;;  %v7772_v13 = vld [vmem:[#allocation2 + $0xa08] sm:$0xff] }
 0x7c3   :  { %8264 = vmatprep.subr.mxu1 %v7936_v27  ;;  %8194 = vmatpush2.msra.mxu0 %v7807_v29  ;;  %v7903_v30 = vld [vmem:[#allocation2 + $0xe20] sm:$0xff]  ;;  %v7900_v18 = vld [vmem:[#allocation2 + $0xe08] sm:$0xff] }
 0x7c4   :  { %8265 = vmatpush2.msra.mxu1 %v7935_v34  ;;  %8195 = vmatprep.subr.mxu0 %v7804_v50  ;;  %v7771_v27 = vld [vmem:[#allocation2 + $0xa00] sm:$0xff]  ;;  %v21974_v34 = vadd.f32 %v21858_v53, %v21932_v15  ;;  %v8000_v50 = vld [vmem:[#allocation2 + $0x1128] sm:$0xff]  ;;  %v7506_v15 = vld [vmem:[#allocation2 + $0x1b8] sm:$0xff] }
 0x7c5   :  { %8266 = vmatprep.subr.mxu1 %v7932_v48  ;;  %8196 = vmatpush2.msra.mxu0 %v7803_v31  ;;  %v7899_v29 = vld [vmem:[#allocation2 + $0xe00] sm:$0xff]  ;;  %v7514_v48 = vld [vmem:[#allocation2 + $0x1f8] sm:$0xff]  ;;  %v7996_v2 = vld [vmem:[#allocation2 + $0x1108] sm:$0xff] }
 0x7c6   :  { %8267 = vmatpush2.msra.mxu1 %v7931_v46  ;;  %8197 = vmatprep.subr.mxu0 %v7800_v35  ;;  %v7999_v31 = vld [vmem:[#allocation2 + $0x1120] sm:$0xff]  ;;  %v7992_v53 = vld [vmem:[#allocation2 + $0x10e8] sm:$0xff]  ;;  %v7505_v35 = vld [vmem:[#allocation2 + $0x1b0] sm:$0xff] }
 0x7c7   :  { %8268 = vmatprep.subr.mxu1 %v7928_v8  ;;  %8198 = vmatpush2.msra.mxu0 %v7799_v14  ;;  %v7991_v46 = vld [vmem:[#allocation2 + $0x10e0] sm:$0xff]  ;;  %v7988_v54 = vld [vmem:[#allocation2 + $0x10c8] sm:$0xff]  ;;  %v7498_v14 = vld [vmem:[#allocation2 + $0x178] sm:$0xff] }
 0x7c8   :  { %8269 = vmatpush2.msra.mxu1 %v7927_v40  ;;  %8199 = vmatprep.subr.mxu0 %v7796_v5  ;;  %v7987_v32 = vld [vmem:[#allocation2 + $0x10c0] sm:$0xff]  ;;  %v7984_v8 = vld [vmem:[#allocation2 + $0x10a8] sm:$0xff] }
 0x7c9   :  { %8270 = vmatprep.subr.mxu1 %v7924_v52  ;;  %8200 = vmatpush2.msra.mxu0 %v7795_v10  ;;  %v7983_v40 = vld [vmem:[#allocation2 + $0x10a0] sm:$0xff]  ;;  %v7980_v5 = vld [vmem:[#allocation2 + $0x1088] sm:$0xff]  ;;  %v7493_v10 = vld [vmem:[#allocation2 + $0x150] sm:$0xff] }
 0x7ca   :  { %8271 = vmatpush2.msra.mxu1 %v7923_v23  ;;  %8201 = vmatprep.subr.mxu0 %v7792_v59  ;;  %v7979_v52 = vld [vmem:[#allocation2 + $0x1080] sm:$0xff]  ;;  %v7976_v23 = vld [vmem:[#allocation2 + $0x1068] sm:$0xff]  ;;  %v7490_v59 = vld [vmem:[#allocation2 + $0x138] sm:$0xff] }
 0x7cb   :  { %8272 = vmatprep.subr.mxu1 %v7920_v60  ;;  %8202 = vmatpush2.msra.mxu0 %v7791_v55  ;;  %v7975_v47 = vld [vmem:[#allocation2 + $0x1060] sm:$0xff]  ;;  %v7972_v44 = vld [vmem:[#allocation2 + $0x1048] sm:$0xff]  ;;  %v7486_v60 = vld [vmem:[#allocation2 + $0x118] sm:$0xff] }
 0x7cc   :  { %8273 = vmatpush2.msra.mxu1 %v7919_v63  ;;  %8203 = vmatprep.subr.mxu0 %v7788_v41  ;;  %v7971_v55 = vld [vmem:[#allocation2 + $0x1040] sm:$0xff]  ;;  %v7485_v63 = vld [vmem:[#allocation2 + $0x110] sm:$0xff]  ;;  %v7968_v41 = vld [vmem:[#allocation2 + $0x1028] sm:$0xff] }
 0x7cd   :  { %8274 = vmatprep.subr.mxu1 %v7916_v58  ;;  %8204 = vmatpush2.msra.mxu0 %v7787_v17  ;;  %v7967_v58 = vld [vmem:[#allocation2 + $0x1020] sm:$0xff]  ;;  %v7481_v17 = vld [vmem:[#allocation2 + $0xf0] sm:$0xff] }
 0x7ce   :  { %8275 = vmatpush2.msra.mxu1 %v7915_v11  ;;  %8205 = vmatprep.subr.mxu0 %v7784_v56  ;;  %v7964_v11 = vld [vmem:[#allocation2 + $0x1008] sm:$0xff]  ;;  %v15254_v56 = vld.sshfl [vmem:[%s22201_s3 + $0x10] sm:$0x3 pattern:$0x76325410] }
 0x7cf   :  { %8276 = vmatprep.subr.mxu1 %v7912_v7  ;;  %7359 = vmax.xlane.f32.xlu1 %v7358_v49  ;;  %v7963_v7 = vld [vmem:[#allocation2 + $0x1000] sm:$0xff]  ;;  %v7477_v49 = vld [vmem:[#allocation2 + $0xd0] sm:$0xff] }
 0x7d0   :  { %8206 = vmatpush2.msra.mxu0 %v7783_v25  ;;  %8277 = vmatpush2.msra.mxu1 %v7911_v57  ;;  %v7474_v25 = vld [vmem:[#allocation2 + $0xb8] sm:$0xff]  ;;  %v21983_v57 = vadd.f32 %v15254_v56, %v21941_v42  ;;  %v7637_v42 = vld [vmem:[#allocation2 + $0x5d0] sm:$0xff] }
 0x7d1   :  { %8207 = vmatprep.subr.mxu0 %v7780_v20  ;;  %8278 = vmatprep.subr.mxu1 %v7908_v0  ;;  %v7642_v20 = vld [vmem:[#allocation2 + $0x5f8] sm:$0xff]  ;;  %v7473_v0 = vld [vmem:[#allocation2 + $0xb0] sm:$0xff] }
 0x7d2   :  { %8208 = vmatpush2.msra.mxu0 %v7779_v43  ;;  %8279 = vmatpush2.msra.mxu1 %v7907_v24  ;;  %v17391_v43 = vmov 0.0   ;;  %v7641_v24 = vld [vmem:[#allocation2 + $0x5f0] sm:$0xff] }
 0x7d3   :  { %8209 = vmatprep.subr.mxu0 %v7776_v37  ;;  %8280 = vmatprep.subr.mxu1 %v7904_v19  ;;  %v7470_v37 = vld [vmem:[#allocation2 + $0x98] sm:$0xff]  ;;  %v7593_v56 = vld [vmem:[#allocation2 + $0x470] sm:$0xff] }
 0x7d4   :  { %8210 = vmatpush2.msra.mxu0 %v7775_v3  ;;  %8281 = vmatpush2.msra.mxu1 %v7903_v30  ;;  %v7638_v19 = vld [vmem:[#allocation2 + $0x5d8] sm:$0xff]  ;;  %v7469_v3 = vld [vmem:[#allocation2 + $0x90] sm:$0xff] }
 0x7d5   :  { %8211 = vmatprep.subr.mxu0 %v7772_v13  ;;  %8282 = vmatprep.subr.mxu1 %v7900_v18  ;;  %v7466_v30 = vld [vmem:[#allocation2 + $0x78] sm:$0xff]  ;;  %v7465_v18 = vld [vmem:[#allocation2 + $0x70] sm:$0xff] }
 0x7d6   :  { %8212 = vmatpush2.msra.mxu0 %v7771_v27  ;;  %8283 = vmatpush2.msra.mxu1 %v7899_v29  ;;  %v7634_v13 = vld [vmem:[#allocation2 + $0x5b8] sm:$0xff]  ;;  %v7633_v27 = vld [vmem:[#allocation2 + $0x5b0] sm:$0xff] }
 0x7d7   :  { %8214 = vmatmul.mubr.f32.vlgmr.msra.gmra.mxu0 %v21970_v33  ;;  %8285 = vmatmul.mubr.f32.vlgmr.msra.gmra.mxu1 %v21974_v34  ;;  %v7462_v29 = vld [vmem:[#allocation2 + $0x58] sm:$0xff] }
 0x7d8   :  { %8303 = vmatprep.subr.mxu0 %v8000_v50  ;;  %8362 = vmatprep.subr.mxu1 %v7514_v48  ;;  %v7630_v50 = vld [vmem:[#allocation2 + $0x598] sm:$0xff]  ;;  %v7461_v48 = vld [vmem:[#allocation2 + $0x50] sm:$0xff] }
 0x7d9   :  { %8304 = vmatpush1.msra.mxu0 %v7999_v31  ;;  %8363 = vmatpush1.msra.mxu1 %v7513_v61  ;;  %v7629_v31 = vld [vmem:[#allocation2 + $0x590] sm:$0xff]  ;;  %v7458_v61 = vld [vmem:[#allocation2 + $0x38] sm:$0xff] }
 0x7da   :  { %8426 = vmatprep.mubr.f32.mxu1 %v21870_v62  ;;  %8305 = vmatprep.subr.mxu0 %v7996_v2  ;;  %v7497_v62 = vld [vmem:[#allocation2 + $0x170] sm:$0xff]  ;;  %v7626_v2 = vld [vmem:[#allocation2 + $0x578] sm:$0xff] }
 0x7db   :  { %8364 = vmatprep.subr.mxu1 %v7510_v51  ;;  %8306 = vmatpush1.msra.mxu0 %v7995_v22  ;;  %v7625_v51 = vld [vmem:[#allocation2 + $0x570] sm:$0xff]  ;;  %v7454_v22 = vld [vmem:[#allocation2 + $0x18] sm:$0xff] }
 0x7dc   :  { %8365 = vmatpush1.msra.mxu1 %v7509_v38  ;;  %8307 = vmatprep.subr.mxu0 %v7992_v53  ;;  %v7622_v38 = vld [vmem:[#allocation2 + $0x558] sm:$0xff]  ;;  %v7453_v53 = vld [vmem:[#allocation2 + $0x10] sm:$0xff] }
 0x7dd   :  { %8366 = vmatprep.subr.mxu1 %v7506_v15  ;;  %8308 = vmatpush1.msra.mxu0 %v7991_v46  ;;  %v7621_v15 = vld [vmem:[#allocation2 + $0x550] sm:$0xff]  ;;  %v7578_v46 = vld [vmem:[#allocation2 + $0x3f8] sm:$0xff] }
 0x7de   :  { %8367 = vmatpush1.msra.mxu1 %v7505_v35  ;;  %8309 = vmatprep.subr.mxu0 %v7988_v54  ;;  %v7618_v35 = vld [vmem:[#allocation2 + $0x538] sm:$0xff]  ;;  %v7577_v54 = vld [vmem:[#allocation2 + $0x3f0] sm:$0xff] }
 0x7df   :  { %8368 = vmatprep.subr.mxu1 %v7502_v36  ;;  %8310 = vmatpush1.msra.mxu0 %v7987_v32  ;;  %v7617_v36 = vld [vmem:[#allocation2 + $0x530] sm:$0xff]  ;;  %v7574_v32 = vld [vmem:[#allocation2 + $0x3d8] sm:$0xff] }
 0x7e0   :  { %8369 = vmatpush1.msra.mxu1 %v7501_v28  ;;  %8311 = vmatprep.subr.mxu0 %v7984_v8  ;;  %v7614_v28 = vld [vmem:[#allocation2 + $0x518] sm:$0xff]  ;;  %v7573_v8 = vld [vmem:[#allocation2 + $0x3d0] sm:$0xff] }
 0x7e1   :  { %8370 = vmatprep.subr.mxu1 %v7498_v14  ;;  %8312 = vmatpush1.msra.mxu0 %v7983_v40  ;;  %v7613_v14 = vld [vmem:[#allocation2 + $0x510] sm:$0xff]  ;;  %v7570_v40 = vld [vmem:[#allocation2 + $0x3b8] sm:$0xff] }
 0x7e2   :  { %8371 = vmatpush1.msra.mxu1 %v7497_v62  ;;  %8313 = vmatprep.subr.mxu0 %v7980_v5  ;;  %v7610_v62 = vld [vmem:[#allocation2 + $0x4f8] sm:$0xff]  ;;  %v7569_v5 = vld [vmem:[#allocation2 + $0x3b0] sm:$0xff] }
 0x7e3   :  { %8372 = vmatprep.subr.mxu1 %v7494_v45  ;;  %8314 = vmatpush1.msra.mxu0 %v7979_v52  ;;  %v7609_v45 = vld [vmem:[#allocation2 + $0x4f0] sm:$0xff]  ;;  %v7566_v52 = vld [vmem:[#allocation2 + $0x398] sm:$0xff] }
 0x7e4   :  { %8373 = vmatpush1.msra.mxu1 %v7493_v10  ;;  %8315 = vmatprep.subr.mxu0 %v7976_v23  ;;  %v7606_v10 = vld [vmem:[#allocation2 + $0x4d8] sm:$0xff]  ;;  %v7565_v23 = vld [vmem:[#allocation2 + $0x390] sm:$0xff] }
 0x7e5   :  { %8374 = vmatprep.subr.mxu1 %v7490_v59  ;;  %8316 = vmatpush1.msra.mxu0 %v7975_v47  ;;  %v7605_v59 = vld [vmem:[#allocation2 + $0x4d0] sm:$0xff]  ;;  %v7562_v47 = vld [vmem:[#allocation2 + $0x378] sm:$0xff] }
 0x7e6   :  { %8375 = vmatpush1.msra.mxu1 %v7489_v4  ;;  %8317 = vmatprep.subr.mxu0 %v7972_v44  ;;  %v7602_v4 = vld [vmem:[#allocation2 + $0x4b8] sm:$0xff]  ;;  %v7561_v44 = vld [vmem:[#allocation2 + $0x370] sm:$0xff] }
 0x7e7   :  { %8376 = vmatprep.subr.mxu1 %v7486_v60  ;;  %8318 = vmatpush1.msra.mxu0 %v7971_v55  ;;  %v7601_v60 = vld [vmem:[#allocation2 + $0x4b0] sm:$0xff]  ;;  %v7558_v55 = vld [vmem:[#allocation2 + $0x358] sm:$0xff] }
 0x7e8   :  { %8377 = vmatpush1.msra.mxu1 %v7485_v63  ;;  %8319 = vmatprep.subr.mxu0 %v7968_v41  ;;  %v7598_v63 = vld [vmem:[#allocation2 + $0x498] sm:$0xff]  ;;  %v7557_v41 = vld [vmem:[#allocation2 + $0x350] sm:$0xff] }
 0x7e9   :  { %8378 = vmatprep.subr.mxu1 %v7482_v16  ;;  %8320 = vmatpush1.msra.mxu0 %v7967_v58  ;;  %v7597_v16 = vld [vmem:[#allocation2 + $0x490] sm:$0xff]  ;;  %v7554_v58 = vld [vmem:[#allocation2 + $0x338] sm:$0xff] }
 0x7ea   :  { %8379 = vmatpush1.msra.mxu1 %v7481_v17  ;;  %8321 = vmatprep.subr.mxu0 %v7964_v11  ;;  %v7594_v17 = vld [vmem:[#allocation2 + $0x478] sm:$0xff]  ;;  %v7553_v11 = vld [vmem:[#allocation2 + $0x330] sm:$0xff] }
 0x7eb   :  { %8380 = vmatprep.subr.mxu1 %v7478_v6  ;;  %8322 = vmatpush1.msra.mxu0 %v7963_v7  ;;  %v7550_v7 = vld [vmem:[#allocation2 + $0x318] sm:$0xff] }
 0x7ec   :  { %8355 = vmatprep.mubr.f32.mxu0 %v17391_v43  ;;  %8381 = vmatpush1.msra.mxu1 %v7477_v49  ;;  %v7590_v49 = vld [vmem:[#allocation2 + $0x458] sm:$0xff] }
 0x7ed   :  { %15255 = vmatmul.mubr.msk.f32.vlgmr.msra.gmra.mxu0 %vm8003_vm8, %v21983_v57  ;;  %8382 = vmatprep.subr.mxu1 %v7474_v25  ;;  %v7549_v25 = vld [vmem:[#allocation2 + $0x310] sm:$0xff] }
 0x7ee   :  { %8433 = vmatprep.subr.mxu0 %v7642_v20  ;;  %8383 = vmatpush1.msra.mxu1 %v7473_v0  ;;  %v7589_v20 = vld [vmem:[#allocation2 + $0x450] sm:$0xff]  ;;  %v7546_v0 = vld [vmem:[#allocation2 + $0x2f8] sm:$0xff] }
 0x7ef   :  { %8434 = vmatpush1.msra.mxu0 %v7641_v24  ;;  %8497 = vmatprep.mubr.f32.mxu0 %v21873_v12  ;;  %v7457_v12 = vld [vmem:[#allocation2 + $0x30] sm:$0xff]  ;;  %v7586_v24 = vld [vmem:[#allocation2 + $0x438] sm:$0xff] }
 0x7f0   :  { %8384 = vmatprep.subr.mxu1 %v7470_v37  ;;  %8435 = vmatprep.subr.mxu0 %v7638_v19  ;;  %v7545_v37 = vld [vmem:[#allocation2 + $0x2f0] sm:$0xff] }
 0x7f1   :  { %8385 = vmatpush1.msra.mxu1 %v7469_v3  ;;  %8436 = vmatpush1.msra.mxu0 %v7637_v42  ;;  %v7585_v19 = vld [vmem:[#allocation2 + $0x430] sm:$0xff]  ;;  %v7542_v3 = vld [vmem:[#allocation2 + $0x2d8] sm:$0xff] }
 0x7f2   :  { %8386 = vmatprep.subr.mxu1 %v7466_v30  ;;  %8437 = vmatprep.subr.mxu0 %v7634_v13  ;;  %v7582_v42 = vld [vmem:[#allocation2 + $0x418] sm:$0xff]  ;;  %v7541_v30 = vld [vmem:[#allocation2 + $0x2d0] sm:$0xff] }
 0x7f3   :  { %8387 = vmatpush1.msra.mxu1 %v7465_v18  ;;  %8438 = vmatpush1.msra.mxu0 %v7633_v27  ;;  %v7581_v13 = vld [vmem:[#allocation2 + $0x410] sm:$0xff]  ;;  %v7538_v27 = vld [vmem:[#allocation2 + $0x2b8] sm:$0xff] }
 0x7f4   :  { %8388 = vmatprep.subr.mxu1 %v7462_v29  ;;  %8439 = vmatprep.subr.mxu0 %v7630_v50  ;;  %v7706_v29 = vld [vmem:[#allocation2 + $0x7f8] sm:$0xff] }
 0x7f5   :  { %8389 = vmatpush1.msra.mxu1 %v7461_v48  ;;  %8440 = vmatpush1.msra.mxu0 %v7629_v31  ;;  %v7537_v48 = vld [vmem:[#allocation2 + $0x2b0] sm:$0xff] }
 0x7f6   :  { %8390 = vmatprep.subr.mxu1 %v7458_v61  ;;  %8441 = vmatprep.subr.mxu0 %v7626_v2  ;;  %v7705_v31 = vld [vmem:[#allocation2 + $0x7f0] sm:$0xff]  ;;  %v7534_v61 = vld [vmem:[#allocation2 + $0x298] sm:$0xff] }
 0x7f7   :  { %8391 = vmatpush1.msra.mxu1 %v7457_v12  ;;  %8442 = vmatpush1.msra.mxu0 %v7625_v51  ;;  %v7702_v2 = vld [vmem:[#allocation2 + $0x7d8] sm:$0xff]  ;;  %v7533_v51 = vld [vmem:[#allocation2 + $0x290] sm:$0xff] }
 0x7f8   :  { %8392 = vmatprep.subr.mxu1 %v7454_v22  ;;  %8443 = vmatprep.subr.mxu0 %v7622_v38  ;;  %v7701_v22 = vld [vmem:[#allocation2 + $0x7d0] sm:$0xff] }
 0x7f9   :  { %8393 = vmatpush1.msra.mxu1 %v7453_v53  ;;  %8444 = vmatpush1.msra.mxu0 %v7621_v15  ;;  %v7530_v53 = vld [vmem:[#allocation2 + $0x278] sm:$0xff] }
 0x7fa   :  { %8394 = vmatprep.subr.mxu1 %v7578_v46  ;;  %8445 = vmatprep.subr.mxu0 %v7618_v35  ;;  %v7698_v15 = vld [vmem:[#allocation2 + $0x7b8] sm:$0xff] }
 0x7fb   :  { %8395 = vmatpush2.msra.mxu1 %v7577_v54  ;;  %8446 = vmatpush1.msra.mxu0 %v7617_v36  ;;  %v7529_v54 = vld [vmem:[#allocation2 + $0x270] sm:$0xff] }
 0x7fc   :  { %8396 = vmatprep.subr.mxu1 %v7574_v32  ;;  %8447 = vmatprep.subr.mxu0 %v7614_v28  ;;  %v7697_v36 = vld [vmem:[#allocation2 + $0x7b0] sm:$0xff]  ;;  %v7526_v28 = vld [vmem:[#allocation2 + $0x258] sm:$0xff] }
 0x7fd   :  { %8397 = vmatpush2.msra.mxu1 %v7573_v8  ;;  %8448 = vmatpush1.msra.mxu0 %v7613_v14  ;;  %v7694_v8 = vld [vmem:[#allocation2 + $0x798] sm:$0xff] }
 0x7fe   :  { %8398 = vmatprep.subr.mxu1 %v7570_v40  ;;  %8449 = vmatprep.subr.mxu0 %v7610_v62 }
 0x7ff   :  { %8399 = vmatpush2.msra.mxu1 %v7569_v5  ;;  %8450 = vmatpush1.msra.mxu0 %v7609_v45  ;;  %v7525_v5 = vld [vmem:[#allocation2 + $0x250] sm:$0xff] }
 0x800   :  { %8400 = vmatprep.subr.mxu1 %v7566_v52  ;;  %8451 = vmatprep.subr.mxu0 %v7606_v10  ;;  %v7693_v45 = vld [vmem:[#allocation2 + $0x790] sm:$0xff]  ;;  %v7522_v10 = vld [vmem:[#allocation2 + $0x238] sm:$0xff] }
 0x801   :  { %8401 = vmatpush2.msra.mxu1 %v7565_v23  ;;  %8452 = vmatpush1.msra.mxu0 %v7605_v59  ;;  %v7690_v23 = vld [vmem:[#allocation2 + $0x778] sm:$0xff]  ;;  %v7521_v59 = vld [vmem:[#allocation2 + $0x230] sm:$0xff] }
 0x802   :  { %8402 = vmatprep.subr.mxu1 %v7562_v47  ;;  %8453 = vmatprep.subr.mxu0 %v7602_v4  ;;  %v7689_v47 = vld [vmem:[#allocation2 + $0x770] sm:$0xff] }
 0x803   :  { %8403 = vmatpush2.msra.mxu1 %v7561_v44  ;;  %8454 = vmatpush1.msra.mxu0 %v7601_v60  ;;  %v7283_v6 = vpop.permute.xlu1 %7282  ;;  %v7285_v50 = vpop.permute.xlu0 %7284  ;;  %v7518_v60 = vld [vmem:[#allocation2 + $0x218] sm:$0xff] }
 0x804   :  { %8404 = vmatprep.subr.mxu1 %v7558_v55  ;;  %8455 = vmatprep.subr.mxu0 %v7598_v63  ;;  %v7301_v38 = vsel %vm7300_vm9, %v7283_v6, %v7285_v50  ;;  %v7686_v55 = vld [vmem:[#allocation2 + $0x758] sm:$0xff] }
 0x805   :  { %8405 = vmatpush2.msra.mxu1 %v7557_v41  ;;  %8456 = vmatpush1.msra.mxu0 %v7597_v16  ;;  %v7318_v14 = vsel %vm5825_vm0, %v7301_v38, 0.0  ;;  %v7669_v38 = vld [vmem:[#allocation2 + $0x6d0] sm:$0xff] }
 0x806   :  { %8406 = vmatprep.subr.mxu1 %v7554_v58  ;;  %8457 = vmatprep.subr.mxu0 %v7594_v17  ;;  %v7517_v58 = vld [vmem:[#allocation2 + $0x210] sm:$0xff] }
 0x807   :  { %8407 = vmatpush2.msra.mxu1 %v7553_v11  ;;  %8458 = vmatpush1.msra.mxu0 %v7593_v56  ;;  %v7685_v17 = vld [vmem:[#allocation2 + $0x750] sm:$0xff]  ;;  %v7682_v56 = vld [vmem:[#allocation2 + $0x738] sm:$0xff] }
 0x808   :  { %8408 = vmatprep.subr.mxu1 %v7550_v7  ;;  %8459 = vmatprep.subr.mxu0 %v7590_v49  ;;  %v7770_v49 = vld [vmem:[#allocation2 + $0x9f8] sm:$0xff] }
 0x809   :  { %8409 = vmatpush2.msra.mxu1 %v7549_v25  ;;  %8460 = vmatpush1.msra.mxu0 %v7589_v20  ;;  %v7293_v40 = vpop.permute.xlu0 %7292  ;;  %v7681_v25 = vld [vmem:[#allocation2 + $0x730] sm:$0xff] }
 0x80a   :  { %8410 = vmatprep.subr.mxu1 %v7546_v0  ;;  %8461 = vmatprep.subr.mxu0 %v7586_v24  ;;  %v7287_v18 = vpop.permute.xlu1 %7286  ;;  %v7769_v24 = vld [vmem:[#allocation2 + $0x9f0] sm:$0xff] }
 0x80b   :  { %8411 = vmatpush2.msra.mxu1 %v7545_v37  ;;  %8462 = vmatpush1.msra.mxu0 %v7585_v19  ;;  %v7302_v12 = vsel %vm7300_vm9, %v7285_v50, %v7287_v18  ;;  %v7674_v50 = vld [vmem:[#allocation2 + $0x6f8] sm:$0xff] }
 0x80c   :  { %8412 = vmatprep.subr.mxu1 %v7542_v3  ;;  %8463 = vmatprep.subr.mxu0 %v7582_v42  ;;  %v7319_v35 = vsel %vm5825_vm0, %v7302_v12, 0.0  ;;  %v7678_v3 = vld [vmem:[#allocation2 + $0x718] sm:$0xff] }
 0x80d   :  { %8413 = vmatpush2.msra.mxu1 %v7541_v30  ;;  %8464 = vmatpush1.msra.mxu0 %v7581_v13  ;;  %v7320_v52 = vadd.f32 %v7319_v35, %v7318_v14  ;;  %v7766_v42 = vld [vmem:[#allocation2 + $0x9d8] sm:$0xff]  ;;  %v7665_v35 = vld [vmem:[#allocation2 + $0x6b0] sm:$0xff] }
 0x80e   :  { %8414 = vmatprep.subr.mxu1 %v7538_v27  ;;  %8465 = vmatprep.subr.mxu0 %v7706_v29  ;;  %v7297_v6 = vpop.permute.xlu0 %7296  ;;  %v7765_v27 = vld [vmem:[#allocation2 + $0x9d0] sm:$0xff]  ;;  %v7670_v12 = vld [vmem:[#allocation2 + $0x6d8] sm:$0xff] }
 0x80f   :  { %8415 = vmatpush2.msra.mxu1 %v7537_v48  ;;  %8466 = vmatpush2.msra.mxu0 %v7705_v31  ;;  %v7289_v46 = vpop.permute.xlu1 %7288  ;;  %v7762_v48 = vld [vmem:[#allocation2 + $0x9b8] sm:$0xff]  ;;  %v7673_v31 = vld [vmem:[#allocation2 + $0x6f0] sm:$0xff] }
 0x810   :  { %8416 = vmatprep.subr.mxu1 %v7534_v61  ;;  %8467 = vmatprep.subr.mxu0 %v7702_v2  ;;  %v7303_v32 = vsel %vm7300_vm9, %v7287_v18, %v7289_v46  ;;  %v7677_v18 = vld [vmem:[#allocation2 + $0x710] sm:$0xff] }
 0x811   :  { %8417 = vmatpush2.msra.mxu1 %v7533_v51  ;;  %8468 = vmatpush2.msra.mxu0 %v7701_v22  ;;  %v7321_v62 = vsel %vm5825_vm0, %v7303_v32, 0.0  ;;  %v7761_v61 = vld [vmem:[#allocation2 + $0x9b0] sm:$0xff]  ;;  %v7758_v51 = vld [vmem:[#allocation2 + $0x998] sm:$0xff] }
 0x812   :  { %8418 = vmatprep.subr.mxu1 %v7530_v53  ;;  %8469 = vmatprep.subr.mxu0 %v7698_v15  ;;  %v7322_v44 = vadd.f32 %v7321_v62, %v7320_v52  ;;  %v7757_v53 = vld [vmem:[#allocation2 + $0x990] sm:$0xff]  ;;  %v7666_v15 = vld [vmem:[#allocation2 + $0x6b8] sm:$0xff] }
 0x813   :  { %8419 = vmatpush2.msra.mxu1 %v7529_v54  ;;  %8470 = vmatpush2.msra.mxu0 %v7697_v36  ;;  %v7753_v54 = vld [vmem:[#allocation2 + $0x970] sm:$0xff]  ;;  %v7662_v32 = vld [vmem:[#allocation2 + $0x698] sm:$0xff] }
 0x814   :  { %8420 = vmatprep.subr.mxu1 %v7526_v28  ;;  %8471 = vmatprep.subr.mxu0 %v7694_v8  ;;  %v7291_v4 = vpop.permute.xlu1 %7290  ;;  %v7750_v28 = vld [vmem:[#allocation2 + $0x958] sm:$0xff]  ;;  %v7661_v8 = vld [vmem:[#allocation2 + $0x690] sm:$0xff] }
 0x815   :  { %8421 = vmatpush2.msra.mxu1 %v7525_v5  ;;  %8472 = vmatpush2.msra.mxu0 %v7693_v45  ;;  %v7304_v63 = vsel %vm7300_vm9, %v7289_v46, %v7291_v4  ;;  %v7305_v41 = vsel %vm7300_vm9, %v7291_v4, %v7293_v40  ;;  %v7754_v46 = vld [vmem:[#allocation2 + $0x978] sm:$0xff]  ;;  %v7749_v14 = vld [vmem:[#allocation2 + $0x950] sm:$0xff] }
 0x816   :  { %8422 = vmatprep.subr.mxu1 %v7522_v10  ;;  %8473 = vmatprep.subr.mxu0 %v7690_v23  ;;  %v7323_v16 = vsel %vm5825_vm0, %v7304_v63, 0.0  ;;  %v7325_v7 = vsel %vm5825_vm0, %v7305_v41, 0.0  ;;  %v7658_v62 = vld [vmem:[#allocation2 + $0x678] sm:$0xff]  ;;  %v7657_v45 = vld [vmem:[#allocation2 + $0x670] sm:$0xff] }
 0x817   :  { %8423 = vmatpush2.msra.mxu1 %v7521_v59  ;;  %8474 = vmatpush2.msra.mxu0 %v7689_v47  ;;  %v7324_v11 = vadd.f32 %v7323_v16, %v7322_v44  ;;  %v7746_v5 = vld [vmem:[#allocation2 + $0x938] sm:$0xff]  ;;  %v7745_v52 = vld [vmem:[#allocation2 + $0x930] sm:$0xff] }
 0x818   :  { %8424 = vmatprep.subr.mxu1 %v7518_v60  ;;  %8475 = vmatprep.subr.mxu0 %v7686_v55  ;;  %v7295_v20 = vpop.permute.xlu1 %7294  ;;  %v7654_v23 = vld [vmem:[#allocation2 + $0x658] sm:$0xff]  ;;  %v7653_v47 = vld [vmem:[#allocation2 + $0x650] sm:$0xff] }
 0x819   :  { %v7326_v0 = vadd.f32 %v7325_v7, %v7324_v11  ;;  %8425 = vmatpush2.msra.mxu1 %v7517_v58  ;;  %8476 = vmatpush2.msra.mxu0 %v7685_v17  ;;  %v7306_v37 = vsel %vm7300_vm9, %v7293_v40, %v7295_v20  ;;  %v7307_v19 = vsel %vm7300_vm9, %v7295_v20, %v7297_v6  ;;  %v7742_v59 = vld [vmem:[#allocation2 + $0x918] sm:$0xff]  ;;  %v7741_v4 = vld [vmem:[#allocation2 + $0x910] sm:$0xff] }
 0x81a   :  { %8427 = vmatmul.mubr.f32.vlgmr.msra.gmra.mxu1 %v21879_v39  ;;  %8477 = vmatprep.subr.mxu0 %v7682_v56  ;;  %v7327_v30 = vsel %vm5825_vm0, %v7306_v37, 0.0  ;;  %v7329_v29 = vsel %vm5825_vm0, %v7307_v19, 0.0  ;;  %v7650_v44 = vld [vmem:[#allocation2 + $0x638] sm:$0xff]  ;;  %v7649_v55 = vld [vmem:[#allocation2 + $0x630] sm:$0xff] }
 0x81b   :  { %8504 = vmatprep.subr.mxu1 %v7770_v49  ;;  %8478 = vmatpush2.msra.mxu0 %v7681_v25  ;;  %v7328_v13 = vadd.f32 %v7327_v30, %v7326_v0  ;;  %v7738_v60 = vld [vmem:[#allocation2 + $0x8f8] sm:$0xff]  ;;  %v7737_v63 = vld [vmem:[#allocation2 + $0x8f0] sm:$0xff] }
 0x81c   :  { %8505 = vmatpush1.msra.mxu1 %v7769_v24  ;;  %8568 = vmatprep.mubr.f32.mxu1 %v21897_v9  ;;  %v7646_v41 = vld [vmem:[#allocation2 + $0x618] sm:$0xff]  ;;  %v7645_v58 = vld [vmem:[#allocation2 + $0x610] sm:$0xff] }
 0x81d   :  { %8479 = vmatprep.subr.mxu0 %v7678_v3  ;;  %8506 = vmatprep.subr.mxu1 %v7766_v42  ;;  %v7330_v39 = vadd.f32 %v7329_v29, %v7328_v13  ;;  %v7299_v2 = vpop.permute.xlu1 %7298  ;;  %v7734_v16 = vld [vmem:[#allocation2 + $0x8d8] sm:$0xff]  ;;  %v7733_v17 = vld [vmem:[#allocation2 + $0x8d0] sm:$0xff] }
 0x81e   :  { %8480 = vmatpush2.msra.mxu0 %v7677_v18  ;;  %8507 = vmatpush1.msra.mxu1 %v7765_v27  ;;  %v7308_v22 = vsel %vm7300_vm9, %v7297_v6, %v7299_v2  ;;  %v7334_v40 = vsel %vm7333_vm10, %v7299_v2, 0.0  ;;  %v7730_v11 = vld [vmem:[#allocation2 + $0x8b8] sm:$0xff]  ;;  %v7729_v6 = vld [vmem:[#allocation2 + $0x8b0] sm:$0xff] }
 0x81f   :  { %8481 = vmatprep.subr.mxu0 %v7674_v50  ;;  %8508 = vmatprep.subr.mxu1 %v7762_v48  ;;  %v7331_v9 = vsel %vm5825_vm0, %v7308_v22, 0.0  ;;  %v7898_v56 = vld [vmem:[#allocation2 + $0xdf8] sm:$0xff]  ;;  %v7897_v7 = vld [vmem:[#allocation2 + $0xdf0] sm:$0xff] }
 0x820   :  { %8482 = vmatpush2.msra.mxu0 %v7673_v31  ;;  %8509 = vmatpush1.msra.mxu1 %v7761_v61  ;;  %v7332_v36 = vadd.f32 %v7331_v9, %v7330_v39  ;;  %v7726_v49 = vld [vmem:[#allocation2 + $0x898] sm:$0xff]  ;;  %v7725_v20 = vld [vmem:[#allocation2 + $0x890] sm:$0xff] }
 0x821   :  { %8483 = vmatprep.subr.mxu0 %v7670_v12  ;;  %8510 = vmatprep.subr.mxu1 %v7758_v51  ;;  %v7894_v25 = vld [vmem:[#allocation2 + $0xdd8] sm:$0xff]  ;;  %v7893_v0 = vld [vmem:[#allocation2 + $0xdd0] sm:$0xff] }
 0x822   :  { %8484 = vmatpush2.msra.mxu0 %v7669_v38  ;;  %8511 = vmatpush1.msra.mxu1 %v7757_v53  ;;  %v7335_v10 = vadd.f32 %v7334_v40, %v7332_v36  ;;  %v7722_v24 = vld [vmem:[#allocation2 + $0x878] sm:$0xff]  ;;  %v7721_v19 = vld [vmem:[#allocation2 + $0x870] sm:$0xff] }
 0x823   :  { %8485 = vmatprep.subr.mxu0 %v7666_v15  ;;  %8512 = vmatprep.subr.mxu1 %v7754_v46  ;;  %v7890_v37 = vld [vmem:[#allocation2 + $0xdb8] sm:$0xff]  ;;  %v7889_v3 = vld [vmem:[#allocation2 + $0xdb0] sm:$0xff] }
 0x824   :  { %8486 = vmatpush2.msra.mxu0 %v7665_v35  ;;  %8513 = vmatpush1.msra.mxu1 %v7753_v54  ;;  %v7718_v42 = vld [vmem:[#allocation2 + $0x858] sm:$0xff]  ;;  %v7717_v30 = vld [vmem:[#allocation2 + $0x850] sm:$0xff] }
 0x825   :  { %8487 = vmatprep.subr.mxu0 %v7662_v32  ;;  %8514 = vmatprep.subr.mxu1 %v7750_v28  ;;  %v7885_v13 = vld [vmem:[#allocation2 + $0xd90] sm:$0xff]  ;;  %v7714_v18 = vld [vmem:[#allocation2 + $0x838] sm:$0xff] }
 0x826   :  { %8488 = vmatpush2.msra.mxu0 %v7661_v8  ;;  %8515 = vmatpush1.msra.mxu1 %v7749_v14  ;;  %v7882_v27 = vld [vmem:[#allocation2 + $0xd78] sm:$0xff]  ;;  %v7713_v29 = vld [vmem:[#allocation2 + $0x830] sm:$0xff] }
 0x827   :  { %8489 = vmatprep.subr.mxu0 %v7658_v62  ;;  %8516 = vmatprep.subr.mxu1 %v7746_v5  ;;  %v7710_v50 = vld [vmem:[#allocation2 + $0x818] sm:$0xff]  ;;  %v7709_v39 = vld [vmem:[#allocation2 + $0x810] sm:$0xff] }
 0x828   :  { %8490 = vmatpush2.msra.mxu0 %v7657_v45  ;;  %8517 = vmatpush1.msra.mxu1 %v7745_v52  ;;  %v7878_v48 = vld [vmem:[#allocation2 + $0xd58] sm:$0xff]  ;;  %v7877_v31 = vld [vmem:[#allocation2 + $0xd50] sm:$0xff] }
 0x829   :  { %7336 = vadd.xlane.f32.xlu0 %v7335_v10  ;;  %8491 = vmatprep.subr.mxu0 %v7654_v23  ;;  %v7834_v61 = vld [vmem:[#allocation2 + $0xbf8] sm:$0xff]  ;;  %v7833_v12 = vld [vmem:[#allocation2 + $0xbf0] sm:$0xff] }
 0x82a   :  { %8518 = vmatprep.subr.mxu1 %v7742_v59  ;;  %8492 = vmatpush2.msra.mxu0 %v7653_v47  ;;  %v7874_v2 = vld [vmem:[#allocation2 + $0xd38] sm:$0xff]  ;;  %v7873_v51 = vld [vmem:[#allocation2 + $0xd30] sm:$0xff] }
 0x82b   :  { %8519 = vmatpush1.msra.mxu1 %v7741_v4  ;;  %8493 = vmatprep.subr.mxu0 %v7650_v44  ;;  %v7830_v22 = vld [vmem:[#allocation2 + $0xbd8] sm:$0xff]  ;;  %v7829_v38 = vld [vmem:[#allocation2 + $0xbd0] sm:$0xff] }
 0x82c   :  { %8520 = vmatprep.subr.mxu1 %v7738_v60  ;;  %8494 = vmatpush2.msra.mxu0 %v7649_v55  ;;  %v7870_v9 = vld [vmem:[#allocation2 + $0xd18] sm:$0xff]  ;;  %v7869_v53 = vld [vmem:[#allocation2 + $0xd10] sm:$0xff] }
 0x82d   :  { %8521 = vmatpush1.msra.mxu1 %v7737_v63  ;;  %8495 = vmatprep.subr.mxu0 %v7646_v41  ;;  %v7826_v15 = vld [vmem:[#allocation2 + $0xbb8] sm:$0xff]  ;;  %v7825_v35 = vld [vmem:[#allocation2 + $0xbb0] sm:$0xff] }
 0x82e   :  { %8522 = vmatprep.subr.mxu1 %v7734_v16  ;;  %8496 = vmatpush2.msra.mxu0 %v7645_v58  ;;  %v7866_v46 = vld [vmem:[#allocation2 + $0xcf8] sm:$0xff]  ;;  %v7865_v54 = vld [vmem:[#allocation2 + $0xcf0] sm:$0xff] }
 0x82f   :  { %8523 = vmatpush1.msra.mxu1 %v7733_v17  ;;  %8498 = vmatmul.mubr.f32.vlgmr.msra.gmra.mxu0 %v21881_v1  ;;  %v7886_v1 = vld [vmem:[#allocation2 + $0xd98] sm:$0xff]  ;;  %v7821_v28 = vld [vmem:[#allocation2 + $0xb90] sm:$0xff] }
 0x830   :  { %8524 = vmatprep.subr.mxu1 %v7730_v11  ;;  %8575 = vmatprep.subr.mxu0 %v7898_v56  ;;  %v7822_v36 = vld [vmem:[#allocation2 + $0xb98] sm:$0xff]  ;;  %v7861_v8 = vld [vmem:[#allocation2 + $0xcd0] sm:$0xff] }
 0x831   :  { %8525 = vmatpush1.msra.mxu1 %v7729_v6  ;;  %8576 = vmatpush1.msra.mxu0 %v7897_v7  ;;  %v7862_v32 = vld [vmem:[#allocation2 + $0xcd8] sm:$0xff]  ;;  %v7817_v62 = vld [vmem:[#allocation2 + $0xb70] sm:$0xff] }
 0x832   :  { %8639 = vmatprep.mubr.f32.mxu0 %v21899_v21  ;;  %8526 = vmatprep.subr.mxu1 %v7726_v49  ;;  %v7881_v21 = vld [vmem:[#allocation2 + $0xd70] sm:$0xff]  ;;  %v7818_v14 = vld [vmem:[#allocation2 + $0xb78] sm:$0xff] }
 0x833   :  { %8577 = vmatprep.subr.mxu0 %v7894_v25  ;;  %8527 = vmatpush1.msra.mxu1 %v7725_v20  ;;  %v7858_v40 = vld [vmem:[#allocation2 + $0xcb8] sm:$0xff]  ;;  %v7857_v5 = vld [vmem:[#allocation2 + $0xcb0] sm:$0xff] }
 0x834   :  { %8578 = vmatpush1.msra.mxu0 %v7893_v0  ;;  %8528 = vmatprep.subr.mxu1 %v7722_v24  ;;  %v7814_v45 = vld [vmem:[#allocation2 + $0xb58] sm:$0xff]  ;;  %v7813_v10 = vld [vmem:[#allocation2 + $0xb50] sm:$0xff] }
 0x835   :  { %8579 = vmatprep.subr.mxu0 %v7890_v37  ;;  %8529 = vmatpush1.msra.mxu1 %v7721_v19  ;;  %v7854_v52 = vld [vmem:[#allocation2 + $0xc98] sm:$0xff]  ;;  %v7853_v23 = vld [vmem:[#allocation2 + $0xc90] sm:$0xff] }
 0x836   :  { %8580 = vmatpush1.msra.mxu0 %v7889_v3  ;;  %8530 = vmatprep.subr.mxu1 %v7718_v42  ;;  %v7810_v59 = vld [vmem:[#allocation2 + $0xb38] sm:$0xff]  ;;  %v7809_v4 = vld [vmem:[#allocation2 + $0xb30] sm:$0xff] }
 0x837   :  { %8581 = vmatprep.subr.mxu0 %v7886_v1  ;;  %8531 = vmatpush1.msra.mxu1 %v7717_v30  ;;  %v7850_v47 = vld [vmem:[#allocation2 + $0xc78] sm:$0xff]  ;;  %v7849_v44 = vld [vmem:[#allocation2 + $0xc70] sm:$0xff] }
 0x838   :  { %8582 = vmatpush1.msra.mxu0 %v7885_v13  ;;  %8532 = vmatprep.subr.mxu1 %v7714_v18  ;;  %v7806_v60 = vld [vmem:[#allocation2 + $0xb18] sm:$0xff]  ;;  %v7805_v63 = vld [vmem:[#allocation2 + $0xb10] sm:$0xff] }
 0x839   :  { %8583 = vmatprep.subr.mxu0 %v7882_v27  ;;  %8533 = vmatpush1.msra.mxu1 %v7713_v29  ;;  %v7846_v55 = vld [vmem:[#allocation2 + $0xc58] sm:$0xff]  ;;  %v7845_v41 = vld [vmem:[#allocation2 + $0xc50] sm:$0xff] }
 0x83a   :  { %8584 = vmatpush1.msra.mxu0 %v7881_v21  ;;  %8534 = vmatprep.subr.mxu1 %v7710_v50  ;;  %v7802_v16 = vld [vmem:[#allocation2 + $0xaf8] sm:$0xff]  ;;  %v7801_v17 = vld [vmem:[#allocation2 + $0xaf0] sm:$0xff] }
 0x83b   :  { %8585 = vmatprep.subr.mxu0 %v7878_v48  ;;  %8535 = vmatpush1.msra.mxu1 %v7709_v39  ;;  %v7842_v58 = vld [vmem:[#allocation2 + $0xc38] sm:$0xff]  ;;  %v7841_v11 = vld [vmem:[#allocation2 + $0xc30] sm:$0xff] }
 0x83c   :  { %8586 = vmatpush1.msra.mxu0 %v7877_v31  ;;  %8536 = vmatprep.subr.mxu1 %v7834_v61  ;;  %v7798_v56 = vld [vmem:[#allocation2 + $0xad8] sm:$0xff]  ;;  %v7797_v7 = vld [vmem:[#allocation2 + $0xad0] sm:$0xff] }
 0x83d   :  { %8587 = vmatprep.subr.mxu0 %v7874_v2  ;;  %8537 = vmatpush2.msra.mxu1 %v7833_v12  ;;  %v7838_v6 = vld [vmem:[#allocation2 + $0xc18] sm:$0xff]  ;;  %v7837_v49 = vld [vmem:[#allocation2 + $0xc10] sm:$0xff] }
 0x83e   :  { %8588 = vmatpush1.msra.mxu0 %v7873_v51  ;;  %8538 = vmatprep.subr.mxu1 %v7830_v22  ;;  %v7794_v25 = vld [vmem:[#allocation2 + $0xab8] sm:$0xff]  ;;  %v7793_v0 = vld [vmem:[#allocation2 + $0xab0] sm:$0xff] }
 0x83f   :  { %8589 = vmatprep.subr.mxu0 %v7870_v9  ;;  %8539 = vmatpush2.msra.mxu1 %v7829_v38  ;;  %v7962_v20 = vld [vmem:[#allocation2 + $0xff8] sm:$0xff]  ;;  %v7961_v24 = vld [vmem:[#allocation2 + $0xff0] sm:$0xff] }
 0x840   :  { %8590 = vmatpush1.msra.mxu0 %v7869_v53  ;;  %8540 = vmatprep.subr.mxu1 %v7826_v15  ;;  %v7790_v37 = vld [vmem:[#allocation2 + $0xa98] sm:$0xff]  ;;  %v7789_v3 = vld [vmem:[#allocation2 + $0xa90] sm:$0xff] }
 0x841   :  { %8591 = vmatprep.subr.mxu0 %v7866_v46  ;;  %8541 = vmatpush2.msra.mxu1 %v7825_v35  ;;  %v7958_v19 = vld [vmem:[#allocation2 + $0xfd8] sm:$0xff]  ;;  %v7957_v42 = vld [vmem:[#allocation2 + $0xfd0] sm:$0xff] }
 0x842   :  { %8592 = vmatpush1.msra.mxu0 %v7865_v54  ;;  %8542 = vmatprep.subr.mxu1 %v7822_v36  ;;  %v7786_v1 = vld [vmem:[#allocation2 + $0xa78] sm:$0xff]  ;;  %v7785_v13 = vld [vmem:[#allocation2 + $0xa70] sm:$0xff] }
 0x843   :  { %8593 = vmatprep.subr.mxu0 %v7862_v32  ;;  %8543 = vmatpush2.msra.mxu1 %v7821_v28  ;;  %v7954_v30 = vld [vmem:[#allocation2 + $0xfb8] sm:$0xff]  ;;  %v7953_v18 = vld [vmem:[#allocation2 + $0xfb0] sm:$0xff] }
 0x844   :  { %8594 = vmatpush1.msra.mxu0 %v7861_v8  ;;  %8544 = vmatprep.subr.mxu1 %v7818_v14  ;;  %v7782_v27 = vld [vmem:[#allocation2 + $0xa58] sm:$0xff]  ;;  %v7781_v21 = vld [vmem:[#allocation2 + $0xa50] sm:$0xff] }
 0x845   :  { %8595 = vmatprep.subr.mxu0 %v7858_v40  ;;  %8545 = vmatpush2.msra.mxu1 %v7817_v62  ;;  %v7950_v29 = vld [vmem:[#allocation2 + $0xf98] sm:$0xff]  ;;  %v7949_v50 = vld [vmem:[#allocation2 + $0xf90] sm:$0xff] }
 0x846   :  { %8596 = vmatpush1.msra.mxu0 %v7857_v5  ;;  %8546 = vmatprep.subr.mxu1 %v7814_v45  ;;  %v7778_v48 = vld [vmem:[#allocation2 + $0xa38] sm:$0xff]  ;;  %v7777_v31 = vld [vmem:[#allocation2 + $0xa30] sm:$0xff] }
 0x847   :  { %8597 = vmatprep.subr.mxu0 %v7854_v52  ;;  %8547 = vmatpush2.msra.mxu1 %v7813_v10  ;;  %v7946_v39 = vld [vmem:[#allocation2 + $0xf78] sm:$0xff]  ;;  %v7945_v61 = vld [vmem:[#allocation2 + $0xf70] sm:$0xff] }
 0x848   :  { %8598 = vmatpush1.msra.mxu0 %v7853_v23  ;;  %8548 = vmatprep.subr.mxu1 %v7810_v59  ;;  %v7774_v2 = vld [vmem:[#allocation2 + $0xa18] sm:$0xff]  ;;  %v7773_v51 = vld [vmem:[#allocation2 + $0xa10] sm:$0xff] }
 0x849   :  { %8599 = vmatprep.subr.mxu0 %v7850_v47  ;;  %8549 = vmatpush2.msra.mxu1 %v7809_v4  ;;  %v7942_v12 = vld [vmem:[#allocation2 + $0xf58] sm:$0xff]  ;;  %v7941_v22 = vld [vmem:[#allocation2 + $0xf50] sm:$0xff] }
 0x84a   :  { %8600 = vmatpush1.msra.mxu0 %v7849_v44  ;;  %8550 = vmatprep.subr.mxu1 %v7806_v60  ;;  %v7938_v9 = vld [vmem:[#allocation2 + $0xf38] sm:$0xff]  ;;  %v7937_v53 = vld [vmem:[#allocation2 + $0xf30] sm:$0xff] }
 0x84b   :  { %8601 = vmatprep.subr.mxu0 %v7846_v55  ;;  %8551 = vmatpush2.msra.mxu1 %v7805_v63  ;;  %v8002_v38 = vld [vmem:[#allocation2 + $0x1138] sm:$0xff]  ;;  %v8001_v15 = vld [vmem:[#allocation2 + $0x1130] sm:$0xff] }
 0x84c   :  { %8602 = vmatpush1.msra.mxu0 %v7845_v41  ;;  %8552 = vmatprep.subr.mxu1 %v7802_v16  ;;  %v7934_v46 = vld [vmem:[#allocation2 + $0xf18] sm:$0xff]  ;;  %v7933_v54 = vld [vmem:[#allocation2 + $0xf10] sm:$0xff] }
 0x84d   :  { %8603 = vmatprep.subr.mxu0 %v7842_v58  ;;  %8553 = vmatpush2.msra.mxu1 %v7801_v17  ;;  %v7998_v35 = vld [vmem:[#allocation2 + $0x1118] sm:$0xff]  ;;  %v7997_v36 = vld [vmem:[#allocation2 + $0x1110] sm:$0xff] }
 0x84e   :  { %8604 = vmatpush1.msra.mxu0 %v7841_v11  ;;  %8554 = vmatprep.subr.mxu1 %v7798_v56  ;;  %v7930_v32 = vld [vmem:[#allocation2 + $0xef8] sm:$0xff]  ;;  %v7929_v8 = vld [vmem:[#allocation2 + $0xef0] sm:$0xff] }
 0x84f   :  { %8605 = vmatprep.subr.mxu0 %v7838_v6  ;;  %8555 = vmatpush2.msra.mxu1 %v7797_v7  ;;  %v7994_v28 = vld [vmem:[#allocation2 + $0x10f8] sm:$0xff]  ;;  %v7993_v14 = vld [vmem:[#allocation2 + $0x10f0] sm:$0xff] }
 0x850   :  { %8606 = vmatpush1.msra.mxu0 %v7837_v49  ;;  %8556 = vmatprep.subr.mxu1 %v7794_v25  ;;  %v7926_v40 = vld [vmem:[#allocation2 + $0xed8] sm:$0xff]  ;;  %v7989_v5 = vld [vmem:[#allocation2 + $0x10d0] sm:$0xff]  ;;  %v8889_v25 = vld [vmem:[#allocation5 + $0x540] sm:$0xff] }
 0x851   :  { %8607 = vmatprep.subr.mxu0 %v7962_v20  ;;  %8557 = vmatpush2.msra.mxu1 %v7793_v0  ;;  %v7990_v62 = vld [vmem:[#allocation2 + $0x10d8] sm:$0xff]  ;;  %v7921_v10 = vld [vmem:[#allocation2 + $0xeb0] sm:$0xff]  ;;  %v8901_v20 = vld [vmem:[#allocation5 + $0x5a0] sm:$0xff] }
 0x852   :  { %8608 = vmatpush2.msra.mxu0 %v7961_v24  ;;  %8558 = vmatprep.subr.mxu1 %v7790_v37  ;;  %v7922_v45 = vld [vmem:[#allocation2 + $0xeb8] sm:$0xff]  ;;  %v7985_v23 = vld [vmem:[#allocation2 + $0x10b0] sm:$0xff] }
 0x853   :  { %8609 = vmatprep.subr.mxu0 %v7958_v19  ;;  %8559 = vmatpush2.msra.mxu1 %v7789_v3  ;;  %v7986_v52 = vld [vmem:[#allocation2 + $0x10b8] sm:$0xff]  ;;  %v7917_v4 = vld [vmem:[#allocation2 + $0xe90] sm:$0xff]  ;;  %v8865_v3 = vld [vmem:[#allocation5 + $0x480] sm:$0xff] }
 0x854   :  { %8610 = vmatpush2.msra.mxu0 %v7957_v42  ;;  %8560 = vmatprep.subr.mxu1 %v7786_v1  ;;  %v7918_v59 = vld [vmem:[#allocation2 + $0xe98] sm:$0xff]  ;;  %v7981_v44 = vld [vmem:[#allocation2 + $0x1090] sm:$0xff]  ;;  %v8877_v42 = vld [vmem:[#allocation5 + $0x4e0] sm:$0xff]  ;;  %v15426_v1 = vcombine.high %v8889_v25, %v8901_v20 }
 0x855   :  { %8611 = vmatprep.subr.mxu0 %v7954_v30  ;;  %8561 = vmatpush2.msra.mxu1 %v7785_v13  ;;  %v7982_v47 = vld [vmem:[#allocation2 + $0x1098] sm:$0xff]  ;;  %v7913_v63 = vld [vmem:[#allocation2 + $0xe70] sm:$0xff]  ;;  %v15425_v30 = vcombine.low %v8889_v25, %v8901_v20  ;;  %v15402_v13 = vcombine.high %v8865_v3, %v8877_v42  ;;  %v9057_v25 = vld [vmem:[#allocation5 + $0xa80] sm:$0xff] }
 0x856   :  { %8612 = vmatpush2.msra.mxu0 %v7953_v18  ;;  %8562 = vmatprep.subr.mxu1 %v7782_v27  ;;  %v7914_v60 = vld [vmem:[#allocation2 + $0xe78] sm:$0xff]  ;;  %v7977_v41 = vld [vmem:[#allocation2 + $0x1070] sm:$0xff]  ;;  %v8841_v18 = vld [vmem:[#allocation5 + $0x3c0] sm:$0xff] }
 0x857   :  { %8613 = vmatprep.subr.mxu0 %v7950_v29  ;;  %8563 = vmatpush2.msra.mxu1 %v7781_v21  ;;  %v7978_v55 = vld [vmem:[#allocation2 + $0x1078] sm:$0xff]  ;;  %v7909_v17 = vld [vmem:[#allocation2 + $0xe50] sm:$0xff]  ;;  %v8853_v27 = vld [vmem:[#allocation5 + $0x420] sm:$0xff]  ;;  %v15401_v29 = vcombine.low %v8865_v3, %v8877_v42 }
 0x858   :  { %8614 = vmatpush2.msra.mxu0 %v7949_v50  ;;  %8564 = vmatprep.subr.mxu1 %v7778_v48  ;;  %v7910_v16 = vld [vmem:[#allocation2 + $0xe58] sm:$0xff]  ;;  %v7973_v11 = vld [vmem:[#allocation2 + $0x1050] sm:$0xff]  ;;  %v15378_v21 = vcombine.high %v8841_v18, %v8853_v27  ;;  %v8817_v50 = vld [vmem:[#allocation5 + $0x300] sm:$0xff] }
 0x859   :  { %8615 = vmatprep.subr.mxu0 %v7946_v39  ;;  %8565 = vmatpush2.msra.mxu1 %v7777_v31  ;;  %v7974_v58 = vld [vmem:[#allocation2 + $0x1058] sm:$0xff]  ;;  %v7905_v7 = vld [vmem:[#allocation2 + $0xe30] sm:$0xff]  ;;  %v8829_v48 = vld [vmem:[#allocation5 + $0x360] sm:$0xff] }
 0x85a   :  { %8616 = vmatpush2.msra.mxu0 %v7945_v61  ;;  %8566 = vmatprep.subr.mxu1 %v7774_v2  ;;  %v7906_v56 = vld [vmem:[#allocation2 + $0xe38] sm:$0xff]  ;;  %v7969_v49 = vld [vmem:[#allocation2 + $0x1030] sm:$0xff]  ;;  %v9273_v39 = vld [vmem:[#allocation5 + $0x1140] sm:$0xff]  ;;  %v15377_v61 = vcombine.low %v8841_v18, %v8853_v27 }
 0x85b   :  { %8617 = vmatprep.subr.mxu0 %v7942_v12  ;;  %8567 = vmatpush2.msra.mxu1 %v7773_v51  ;;  %v7970_v6 = vld [vmem:[#allocation2 + $0x1038] sm:$0xff]  ;;  %v7901_v37 = vld [vmem:[#allocation2 + $0xe10] sm:$0xff]  ;;  %v9285_v31 = vld [vmem:[#allocation5 + $0x11a0] sm:$0xff] }
 0x85c   :  { %8618 = vmatpush2.msra.mxu0 %v7941_v22  ;;  %8569 = vmatmul.mubr.f32.vlgmr.msra.gmra.mxu1 %v21970_v33  ;;  %v7925_v33 = vld [vmem:[#allocation2 + $0xed0] sm:$0xff]  ;;  %v7902_v0 = vld [vmem:[#allocation2 + $0xe18] sm:$0xff]  ;;  %v15809_v2 = vcombine.low %v9273_v39, %v9285_v31  ;;  %v8793_v12 = vld [vmem:[#allocation5 + $0x240] sm:$0xff] }
 0x85d   :  { %8619 = vmatprep.subr.mxu0 %v7938_v9  ;;  %8658 = vmatprep.subr.mxu1 %v8002_v38  ;;  %v7966_v24 = vld [vmem:[#allocation2 + $0x1018] sm:$0xff]  ;;  %v7965_v19 = vld [vmem:[#allocation2 + $0x1010] sm:$0xff]  ;;  %v8805_v51 = vld [vmem:[#allocation5 + $0x2a0] sm:$0xff]  ;;  %v15353_v9 = vcombine.low %v8817_v50, %v8829_v48 }
 0x85e   :  { %8620 = vmatpush2.msra.mxu0 %v7937_v53  ;;  %8659 = vmatpush1.msra.mxu1 %v8001_v15  ;;  %v9261_v22 = vld [vmem:[#allocation5 + $0x10e0] sm:$0xff]  ;;  %v15330_v15 = vcombine.high %v8793_v12, %v8805_v51 }
 0x85f   :  { %8621 = vmatprep.subr.mxu0 %v7934_v46  ;;  %8660 = vmatprep.subr.mxu1 %v7998_v35  ;;  %v8769_v46 = vld [vmem:[#allocation5 + $0x180] sm:$0xff] }
 0x860   :  { %8622 = vmatpush2.msra.mxu0 %v7933_v54  ;;  %8661 = vmatpush1.msra.mxu1 %v7997_v36  ;;  %v8781_v35 = vld [vmem:[#allocation5 + $0x1e0] sm:$0xff] }
 0x861   :  { %8623 = vmatprep.subr.mxu0 %v7930_v32  ;;  %8662 = vmatprep.subr.mxu1 %v7994_v28  ;;  %v9225_v54 = vld [vmem:[#allocation5 + $0xfc0] sm:$0xff]  ;;  %v15329_v32 = vcombine.low %v8793_v12, %v8805_v51 }
 0x862   :  { %8624 = vmatpush2.msra.mxu0 %v7929_v8  ;;  %8663 = vmatpush1.msra.mxu1 %v7993_v14  ;;  %v9237_v36 = vld [vmem:[#allocation5 + $0x1020] sm:$0xff]  ;;  %v15306_v14 = vcombine.high %v8769_v46, %v8781_v35 }
 0x863   :  { %8625 = vmatprep.subr.mxu0 %v7926_v40  ;;  %8664 = vmatprep.subr.mxu1 %v7990_v62  ;;  %v15761_v28 = vcombine.low %v9225_v54, %v9237_v36  ;;  %v15762_v8 = vcombine.high %v9225_v54, %v9237_v36  ;;  %v8745_v40 = vld [vmem:[#allocation5 + $0xc0] sm:$0xff] }
 0x864   :  { %8626 = vmatpush2.msra.mxu0 %v7925_v33  ;;  %8665 = vmatpush1.msra.mxu1 %v7989_v5  ;;  %v8757_v62 = vld [vmem:[#allocation5 + $0x120] sm:$0xff] }
 0x865   :  { %8627 = vmatprep.subr.mxu0 %v7922_v45  ;;  %8666 = vmatprep.subr.mxu1 %v7986_v52  ;;  %v9201_v33 = vld [vmem:[#allocation5 + $0xf00] sm:$0xff]  ;;  %v15305_v45 = vcombine.low %v8769_v46, %v8781_v35 }
 0x866   :  { %8628 = vmatpush2.msra.mxu0 %v7921_v10  ;;  %8667 = vmatpush1.msra.mxu1 %v7985_v23  ;;  %v9213_v5 = vld [vmem:[#allocation5 + $0xf60] sm:$0xff]  ;;  %v15282_v23 = vcombine.high %v8745_v40, %v8757_v62 }
 0x867   :  { %8629 = vmatprep.subr.mxu0 %v7918_v59  ;;  %8668 = vmatprep.subr.mxu1 %v7982_v47  ;;  %v15737_v52 = vcombine.low %v9201_v33, %v9213_v5  ;;  %v15738_v10 = vcombine.high %v9201_v33, %v9213_v5  ;;  %v8721_v59 = vld [vmem:[#allocation5] sm:$0xff]  ;;  %v8144_v33 = vpop.f32.mrf.mxu1 }
 0x868   :  { %8630 = vmatpush2.msra.mxu0 %v7917_v4  ;;  %8669 = vmatpush1.msra.mxu1 %v7981_v44  ;;  %v8733_v47 = vld [vmem:[#allocation5 + $0x60] sm:$0xff] }
 0x869   :  { %8631 = vmatprep.subr.mxu0 %v7914_v60  ;;  %8670 = vmatprep.subr.mxu1 %v7978_v55  ;;  %v9177_v4 = vld [vmem:[#allocation5 + $0xe40] sm:$0xff]  ;;  %v15281_v60 = vcombine.low %v8745_v40, %v8757_v62 }
 0x86a   :  { %8632 = vmatpush2.msra.mxu0 %v7913_v63  ;;  %8671 = vmatpush1.msra.mxu1 %v7977_v41  ;;  %v9189_v44 = vld [vmem:[#allocation5 + $0xea0] sm:$0xff]  ;;  %v15258_v41 = vcombine.high %v8721_v59, %v8733_v47 }
 0x86b   :  { %8633 = vmatprep.subr.mxu0 %v7910_v16  ;;  %8672 = vmatprep.subr.mxu1 %v7974_v58  ;;  %v15713_v55 = vcombine.low %v9177_v4, %v9189_v44  ;;  %v15714_v63 = vcombine.high %v9177_v4, %v9189_v44  ;;  %v9081_v16 = vld [vmem:[#allocation5 + $0xb40] sm:$0xff] }
 0x86c   :  { %8634 = vmatpush2.msra.mxu0 %v7909_v17  ;;  %8673 = vmatpush1.msra.mxu1 %v7973_v11  ;;  %v9093_v58 = vld [vmem:[#allocation5 + $0xba0] sm:$0xff] }
 0x86d   :  { %8635 = vmatprep.subr.mxu0 %v7906_v56  ;;  %8674 = vmatprep.subr.mxu1 %v7970_v6  ;;  %v9153_v17 = vld [vmem:[#allocation5 + $0xd80] sm:$0xff]  ;;  %v15257_v56 = vcombine.low %v8721_v59, %v8733_v47 }
 0x86e   :  { %8636 = vmatpush2.msra.mxu0 %v7905_v7  ;;  %8675 = vmatpush1.msra.mxu1 %v7969_v49  ;;  %v9165_v11 = vld [vmem:[#allocation5 + $0xde0] sm:$0xff]  ;;  %v15618_v49 = vcombine.high %v9081_v16, %v9093_v58 }
 0x86f   :  { %8637 = vmatprep.subr.mxu0 %v7902_v0  ;;  %8676 = vmatprep.subr.mxu1 %v7966_v24  ;;  %v15689_v6 = vcombine.low %v9153_v17, %v9165_v11  ;;  %v15690_v7 = vcombine.high %v9153_v17, %v9165_v11  ;;  %v9069_v20 = vld [vmem:[#allocation5 + $0xae0] sm:$0xff] }
 0x870   :  { %8638 = vmatpush2.msra.mxu0 %v7901_v37  ;;  %8677 = vmatpush1.msra.mxu1 %v7965_v19  ;;  %v9129_v0 = vld [vmem:[#allocation5 + $0xcc0] sm:$0xff]  ;;  %v15617_v37 = vcombine.low %v9081_v16, %v9093_v58  ;;  %v15594_v42 = vcombine.high %v9057_v25, %v9069_v20  ;;  %v15593_v27 = vcombine.low %v9057_v25, %v9069_v20 }
 0x871   :  { %8710 = vmatprep.mubr.f32.mxu1 %v17391_v43  ;;  %8640 = vmatmul.mubr.f32.vlgmr.msra.gmra.mxu0 %v21974_v34  ;;  %v15810_v43 = vcombine.high %v9273_v39, %v9285_v31  ;;  %v15354_v34 = vcombine.high %v8817_v50, %v8829_v48  ;;  %v9141_v24 = vld [vmem:[#allocation5 + $0xd20] sm:$0xff] }
 0x872   :  { %15256 = vmatmul.mubr.msk.f32.vlgmr.msra.gmra.mxu1 %vm8003_vm8, %v21983_v57  ;;  %13329 = vmatprep.subr.bf16.mxu0 %v15426_v1  ;;  %v9249_v57 = vld [vmem:[#allocation5 + $0x1080] sm:$0xff]  ;;  %v15665_v19 = vcombine.low %v9129_v0, %v9141_v24  ;;  %v15666_v3 = vcombine.high %v9129_v0, %v9141_v24  ;;  %v8890_v24 = vld [vmem:[#allocation5 + $0x548] sm:$0xff] }
 0x873   :  { %13330 = vmatpush1.bf16.msra.mxu0 %v15425_v30  ;;  %13370 = vmatprep.subr.bf16.mxu1 %v15810_v43  ;;  %v15785_v38 = vcombine.low %v9249_v57, %v9261_v22  ;;  %v15786_v53 = vcombine.high %v9249_v57, %v9261_v22  ;;  %v9033_v1 = vld [vmem:[#allocation5 + $0x9c0] sm:$0xff] }
 0x874   :  { %13331 = vmatprep.subr.bf16.mxu0 %v15402_v13  ;;  %13371 = vmatpush1.bf16.msra.mxu1 %v15809_v2  ;;  %v9045_v30 = vld [vmem:[#allocation5 + $0xa20] sm:$0xff] }
 0x875   :  { %13372 = vmatprep.subr.bf16.mxu1 %v15786_v53  ;;  %v9105_v13 = vld [vmem:[#allocation5 + $0xc00] sm:$0xff]  ;;  %v15570_v50 = vcombine.high %v9033_v1, %v9045_v30  ;;  %v15569_v2 = vcombine.low %v9033_v1, %v9045_v30 }
 0x876   :  { %v9117_v18 = vld [vmem:[#allocation5 + $0xc60] sm:$0xff] }
 0x877   :  { %13332 = vmatpush1.bf16.msra.mxu0 %v15401_v29  ;;  %v15641_v29 = vcombine.low %v9105_v13, %v9117_v18  ;;  %v9009_v48 = vld [vmem:[#allocation5 + $0x900] sm:$0xff] }
 0x878   :  { %13333 = vmatprep.subr.bf16.mxu0 %v15378_v21  ;;  %13373 = vmatpush1.bf16.msra.mxu1 %v15785_v38  ;;  %v15642_v21 = vcombine.high %v9105_v13, %v9117_v18  ;;  %v9021_v39 = vld [vmem:[#allocation5 + $0x960] sm:$0xff] }
 0x879   :  { %13374 = vmatprep.subr.bf16.mxu1 %v15762_v8  ;;  %v9465_v31 = vld [vmem:[#allocation5 + $0x1740] sm:$0xff]  ;;  %v15546_v12 = vcombine.high %v9009_v48, %v9021_v39  ;;  %v15545_v22 = vcombine.low %v9009_v48, %v9021_v39 }
 0x87a   :  { %v8985_v51 = vld [vmem:[#allocation5 + $0x840] sm:$0xff] }
 0x87b   :  { %13334 = vmatpush1.bf16.msra.mxu0 %v15377_v61  ;;  %v9477_v61 = vld [vmem:[#allocation5 + $0x17a0] sm:$0xff] }
 0x87c   :  { %13335 = vmatprep.subr.bf16.mxu0 %v15354_v34  ;;  %13375 = vmatpush1.bf16.msra.mxu1 %v15761_v28  ;;  %v16001_v43 = vcombine.low %v9465_v31, %v9477_v61  ;;  %v16002_v34 = vcombine.high %v9465_v31, %v9477_v61  ;;  %v8997_v57 = vld [vmem:[#allocation5 + $0x8a0] sm:$0xff]  ;;  %v8866_v31 = vld [vmem:[#allocation5 + $0x488] sm:$0xff] }
 0x87d   :  { %13376 = vmatprep.subr.bf16.mxu1 %v15738_v10  ;;  %v9441_v38 = vld [vmem:[#allocation5 + $0x1680] sm:$0xff] }
 0x87e   :  { %v9453_v53 = vld [vmem:[#allocation5 + $0x16e0] sm:$0xff] }
 0x87f   :  { %13336 = vmatpush1.bf16.msra.mxu0 %v15353_v9  ;;  %v15522_v9 = vcombine.high %v8985_v51, %v8997_v57  ;;  %v8961_v46 = vld [vmem:[#allocation5 + $0x780] sm:$0xff]  ;;  %v15977_v54 = vcombine.low %v9441_v38, %v9453_v53  ;;  %v15978_v36 = vcombine.high %v9441_v38, %v9453_v53 }
 0x880   :  { %13337 = vmatprep.subr.bf16.mxu0 %v15330_v15  ;;  %13377 = vmatpush1.bf16.msra.mxu1 %v15737_v52  ;;  %v8073_v15 = vpop.f32.mrf.mxu0  ;;  %v8973_v35 = vld [vmem:[#allocation5 + $0x7e0] sm:$0xff] }
 0x881   :  { %13378 = vmatprep.subr.bf16.mxu1 %v15714_v63  ;;  %v9417_v28 = vld [vmem:[#allocation5 + $0x15c0] sm:$0xff]  ;;  %v15497_v47 = vcombine.low %v8961_v46, %v8973_v35  ;;  %v8145_v17 = vadd.f32 %v8144_v33, %v8073_v15  ;;  %v22021_v33 = vld [vmem:[#allocation5 + $0x1148] sm:$0xff] }
 0x882   :  { %v9429_v8 = vld [vmem:[#allocation5 + $0x1620] sm:$0xff]  ;;  %v8075_v5 = vpop.f32.mrf.mxu0 }
 0x883   :  { %13338 = vmatpush1.bf16.msra.mxu0 %v15329_v32  ;;  %v15521_v32 = vcombine.low %v8985_v51, %v8997_v57  ;;  %v15953_v40 = vcombine.low %v9417_v28, %v9429_v8  ;;  %v15954_v62 = vcombine.high %v9417_v28, %v9429_v8  ;;  %v8949_v52 = vld [vmem:[#allocation5 + $0x720] sm:$0xff] }
 0x884   :  { %13339 = vmatprep.subr.bf16.mxu0 %v15306_v14  ;;  %13379 = vmatpush1.bf16.msra.mxu1 %v15713_v55  ;;  %v15498_v14 = vcombine.high %v8961_v46, %v8973_v35  ;;  %v9393_v10 = vld [vmem:[#allocation5 + $0x1500] sm:$0xff]  ;;  %v8146_v55 = vpop.f32.mrf.mxu1  ;;  %v8842_v46 = vld [vmem:[#allocation5 + $0x3c8] sm:$0xff] }
 0x885   :  { %13380 = vmatprep.subr.bf16.mxu1 %v15690_v7  ;;  %v8913_v63 = vld [vmem:[#allocation5 + $0x600] sm:$0xff]  ;;  %v8147_v7 = vadd.f32 %v8146_v55, %v8075_v5  ;;  %v8854_v35 = vld [vmem:[#allocation5 + $0x428] sm:$0xff] }
 0x886   :  { %v9369_v16 = vld [vmem:[#allocation5 + $0x1440] sm:$0xff]  ;;  %v22023_v5 = vld [vmem:[#allocation5 + $0x11a8] sm:$0xff] }
 0x887   :  { %13340 = vmatpush1.bf16.msra.mxu0 %v15305_v45  ;;  %v8937_v45 = vld [vmem:[#allocation5 + $0x6c0] sm:$0xff]  ;;  %v8782_v55 = vld [vmem:[#allocation5 + $0x1e8] sm:$0xff] }
 0x888   :  { %13341 = vmatprep.subr.bf16.mxu0 %v15282_v23  ;;  %13381 = vmatpush1.bf16.msra.mxu1 %v15689_v6  ;;  %v9405_v23 = vld [vmem:[#allocation5 + $0x1560] sm:$0xff]  ;;  %v15474_v44 = vcombine.high %v8937_v45, %v8949_v52 }
 0x889   :  { %13382 = vmatprep.subr.bf16.mxu1 %v15666_v3  ;;  %v15930_v4 = vcombine.high %v9393_v10, %v9405_v23  ;;  %v9381_v58 = vld [vmem:[#allocation5 + $0x14a0] sm:$0xff] }
 0x88a   :  { %v15906_v6 = vcombine.high %v9369_v16, %v9381_v58  ;;  %v15905_v25 = vcombine.low %v9369_v16, %v9381_v58  ;;  %v9345_v3 = vld [vmem:[#allocation5 + $0x1380] sm:$0xff] }
 0x88b   :  { %13342 = vmatpush1.bf16.msra.mxu0 %v15281_v60  ;;  %v15929_v60 = vcombine.low %v9393_v10, %v9405_v23  ;;  %v15811_v10 = vcombine.low %v22021_v33, %v22023_v5 }
 0x88c   :  { %13343 = vmatprep.subr.bf16.mxu0 %v15258_v41  ;;  %13383 = vmatpush1.bf16.msra.mxu1 %v15665_v19  ;;  %v8925_v41 = vld [vmem:[#allocation5 + $0x660] sm:$0xff] }
 0x88d   :  { %13384 = vmatprep.subr.bf16.mxu1 %v15642_v21  ;;  %v15449_v1 = vcombine.low %v8913_v63, %v8925_v41 }
 0x88f   :  { %13344 = vmatpush1.bf16.msra.mxu0 %v15257_v56  ;;  %v15473_v56 = vcombine.low %v8937_v45, %v8949_v52  ;;  %v15812_v45 = vcombine.high %v22021_v33, %v22023_v5  ;;  %v15379_v52 = vcombine.low %v8842_v46, %v8854_v35 }
 0x890   :  { %13345 = vmatprep.subr.bf16.mxu0 %v15618_v49  ;;  %13385 = vmatpush1.bf16.msra.mxu1 %v15641_v29  ;;  %v15450_v49 = vcombine.high %v8913_v63, %v8925_v41  ;;  %v7360_v41 = vpop.xlane.xlu1 %7359 }
 0x891   :  { %13386 = vmatprep.subr.bf16.mxu1 %v16002_v34  ;;  %v9333_v34 = vld [vmem:[#allocation5 + $0x1320] sm:$0xff] }
 0x893   :  { %13346 = vmatpush2.bf16.msra.mxu0 %v15617_v37  ;;  %v8902_v37 = vld [vmem:[#allocation5 + $0x5a8] sm:$0xff] }
 0x894   :  { %13347 = vmatprep.subr.bf16.mxu0 %v15594_v42  ;;  %13387 = vmatpush2.bf16.msra.mxu1 %v16001_v43  ;;  %v9357_v42 = vld [vmem:[#allocation5 + $0x13e0] sm:$0xff]  ;;  %v15428_v13 = vcombine.high %v8890_v24, %v8902_v37 }
 0x895   :  { %13388 = vmatprep.subr.bf16.mxu1 %v15978_v36  ;;  %v15882_v30 = vcombine.high %v9345_v3, %v9357_v42  ;;  %v15881_v18 = vcombine.low %v9345_v3, %v9357_v42  ;;  %v9321_v43 = vld [vmem:[#allocation5 + $0x12c0] sm:$0xff]  ;;  %v9058_v42 = vld [vmem:[#allocation5 + $0xa88] sm:$0xff] }
 0x896   :  { %v9309_v36 = vld [vmem:[#allocation5 + $0x1260] sm:$0xff] }
 0x897   :  { %13348 = vmatpush2.bf16.msra.mxu0 %v15593_v27  ;;  %v8215_v59 = vpop.f32.mrf.mxu0  ;;  %v8286_v0 = vpop.f32.mrf.mxu1 }
 0x898   :  { %13349 = vmatprep.subr.bf16.mxu0 %v15570_v50  ;;  %13389 = vmatpush2.bf16.msra.mxu1 %v15977_v54  ;;  %v8216_v20 = vadd.f32 %v8215_v59, %v8145_v17  ;;  %v9297_v54 = vld [vmem:[#allocation5 + $0x1200] sm:$0xff]  ;;  %v8794_v59 = vld [vmem:[#allocation5 + $0x248] sm:$0xff] }
 0x899   :  { %13390 = vmatprep.subr.bf16.mxu1 %v15954_v62  ;;  %v8217_v11 = vpop.f32.mrf.mxu0  ;;  %v8288_v29 = vpop.f32.mrf.mxu1  ;;  %v15833_v8 = vcombine.low %v9297_v54, %v9309_v36  ;;  %v8830_v62 = vld [vmem:[#allocation5 + $0x368] sm:$0xff] }
 0x89a   :  { %v8218_v19 = vadd.f32 %v8217_v11, %v8147_v7  ;;  %v8287_v27 = vadd.f32 %v8286_v0, %v8216_v20  ;;  %v8746_v11 = vld [vmem:[#allocation5 + $0xc8] sm:$0xff] }
 0x89b   :  { %13350 = vmatpush2.bf16.msra.mxu0 %v15569_v2  ;;  %v8878_v2 = vld [vmem:[#allocation5 + $0x4e8] sm:$0xff] }
 0x89c   :  { %13351 = vmatprep.subr.bf16.mxu0 %v15546_v12  ;;  %13391 = vmatpush2.bf16.msra.mxu1 %v15953_v40  ;;  %v8289_v50 = vadd.f32 %v8288_v29, %v8218_v19  ;;  %v15858_v12 = vcombine.high %v9321_v43, %v9333_v34  ;;  %v15404_v15 = vcombine.high %v8866_v31, %v8878_v2  ;;  %v8818_v40 = vld [vmem:[#allocation5 + $0x308] sm:$0xff] }
 0x89d   :  { %13392 = vmatprep.subr.bf16.mxu1 %v15930_v4  ;;  %v15403_v28 = vcombine.low %v8866_v31, %v8878_v2  ;;  %v15356_v23 = vcombine.high %v8818_v40, %v8830_v62  ;;  %v15355_v4 = vcombine.low %v8818_v40, %v8830_v62  ;;  %v9034_v29 = vld [vmem:[#allocation5 + $0x9c8] sm:$0xff] }
 0x89e   :  { %v9022_v2 = vld [vmem:[#allocation5 + $0x968] sm:$0xff] }
 0x89f   :  { %13352 = vmatpush2.bf16.msra.mxu0 %v15545_v22  ;;  %v15427_v22 = vcombine.low %v8890_v24, %v8902_v37  ;;  %v9082_v24 = vld [vmem:[#allocation5 + $0xb48] sm:$0xff] }
 0x8a0   :  { %13353 = vmatprep.subr.bf16.mxu0 %v15522_v9  ;;  %13393 = vmatpush2.bf16.msra.mxu1 %v15929_v60  ;;  %v15857_v9 = vcombine.low %v9321_v43, %v9333_v34  ;;  %v8770_v60 = vld [vmem:[#allocation5 + $0x188] sm:$0xff] }
 0x8a1   :  { %13394 = vmatprep.subr.bf16.mxu1 %v15906_v6  ;;  %v15308_v58 = vcombine.high %v8770_v60, %v8782_v55  ;;  %v15307_v6 = vcombine.low %v8770_v60, %v8782_v55  ;;  %v9094_v37 = vld [vmem:[#allocation5 + $0xba8] sm:$0xff]  ;;  %v8879_v60 = vld [vmem:[#allocation5 + $0x4f0] sm:$0xff] }
 0x8a2   :  { %v15620_v3 = vcombine.high %v9082_v24, %v9094_v37  ;;  %v8914_v40 = vld [vmem:[#allocation5 + $0x608] sm:$0xff] }
 0x8a3   :  { %13354 = vmatpush2.bf16.msra.mxu0 %v15521_v32  ;;  %v15834_v32 = vcombine.high %v9297_v54, %v9309_v36  ;;  %v8926_v62 = vld [vmem:[#allocation5 + $0x668] sm:$0xff] }
 0x8a4   :  { %13355 = vmatprep.subr.bf16.mxu0 %v15498_v14  ;;  %13395 = vmatpush2.bf16.msra.mxu1 %v15905_v25  ;;  %v15380_v14 = vcombine.high %v8842_v46, %v8854_v35  ;;  %v8734_v25 = vld [vmem:[#allocation5 + $0x68] sm:$0xff] }
 0x8a5   :  { %13396 = vmatprep.subr.bf16.mxu1 %v15882_v30  ;;  %v8962_v46 = vld [vmem:[#allocation5 + $0x788] sm:$0xff] }
 0x8a6   :  { %v8974_v35 = vld [vmem:[#allocation5 + $0x7e8] sm:$0xff] }
 0x8a7   :  { %13356 = vmatpush2.bf16.msra.mxu0 %v15497_v47  ;;  %v8806_v47 = vld [vmem:[#allocation5 + $0x2a8] sm:$0xff]  ;;  %v15500_v36 = vcombine.high %v8962_v46, %v8974_v35 }
 0x8a8   :  { %13357 = vmatprep.subr.bf16.mxu0 %v15474_v44  ;;  %13397 = vmatpush2.bf16.msra.mxu1 %v15881_v18  ;;  %v15332_v44 = vcombine.high %v8794_v59, %v8806_v47  ;;  %v15331_v16 = vcombine.low %v8794_v59, %v8806_v47  ;;  %v8903_v59 = vld [vmem:[#allocation5 + $0x5b0] sm:$0xff]  ;;  %v15451_v47 = vcombine.low %v8914_v40, %v8926_v62 }
 0x8a9   :  { %13398 = vmatprep.subr.bf16.mxu1 %v15858_v12 }
 0x8ab   :  { %13358 = vmatpush2.bf16.msra.mxu0 %v15473_v56  ;;  %v8758_v56 = vld [vmem:[#allocation5 + $0x128] sm:$0xff] }
 0x8ac   :  { %13359 = vmatprep.subr.bf16.mxu0 %v15450_v49  ;;  %13399 = vmatpush2.bf16.msra.mxu1 %v15857_v9  ;;  %v15284_v7 = vcombine.high %v8746_v11, %v8758_v56  ;;  %v8722_v49 = vld [vmem:[#allocation5 + $0x8] sm:$0xff]  ;;  %v15283_v20 = vcombine.low %v8746_v11, %v8758_v56  ;;  %v8819_v11 = vld [vmem:[#allocation5 + $0x310] sm:$0xff] }
 0x8ad   :  { %v8357_v21 = vpop.f32.mrf.mxu0  ;;  %13400 = vmatprep.subr.bf16.mxu1 %v15834_v32  ;;  %v15260_v0 = vcombine.high %v8722_v49, %v8734_v25  ;;  %v15259_v19 = vcombine.low %v8722_v49, %v8734_v25  ;;  %v8998_v9 = vld [vmem:[#allocation5 + $0x8a8] sm:$0xff]  ;;  %v8831_v56 = vld [vmem:[#allocation5 + $0x370] sm:$0xff] }
 0x8ae   :  { %v8358_v48 = vadd.f32 %v8357_v21, %v8287_v27  ;;  %v9046_v21 = vld [vmem:[#allocation5 + $0xa28] sm:$0xff]  ;;  %v8795_v49 = vld [vmem:[#allocation5 + $0x250] sm:$0xff] }
 0x8af   :  { %v8359_v39 = vpop.f32.mrf.mxu0  ;;  %13360 = vmatpush2.bf16.msra.mxu0 %v15449_v1  ;;  %v9070_v1 = vld [vmem:[#allocation5 + $0xae8] sm:$0xff]  ;;  %v15572_v31 = vcombine.high %v9034_v29, %v9046_v21  ;;  %v15571_v34 = vcombine.low %v9034_v29, %v9046_v21  ;;  %v8807_v25 = vld [vmem:[#allocation5 + $0x2b0] sm:$0xff] }
 0x8b0   :  { %v8360_v61 = vadd.f32 %v8359_v39, %v8289_v50  ;;  %13411 = vmatprep.subr.bf16.mxu0 %v15428_v13  ;;  %v22016_v38 = vpack.c.bf16 %v8358_v48, %v8358_v48  ;;  %13401 = vmatpush2.bf16.msra.mxu1 %v15833_v8  ;;  %v15619_v13 = vcombine.low %v9082_v24, %v9094_v37  ;;  %v8938_v32 = vld [vmem:[#allocation5 + $0x6c8] sm:$0xff]  ;;  %v8771_v24 = vld [vmem:[#allocation5 + $0x190] sm:$0xff] }
 0x8b1   :  { %13452 = vmatprep.subr.bf16.mxu1 %v15812_v45  ;;  %v15596_v18 = vcombine.high %v9058_v42, %v9070_v1  ;;  %v15595_v48 = vcombine.low %v9058_v42, %v9070_v1  ;;  %v15499_v8 = vcombine.low %v8962_v46, %v8974_v35  ;;  %v8783_v37 = vld [vmem:[#allocation5 + $0x1f0] sm:$0xff] }
 0x8b2   :  { %v22014_v51 = vpack.c.bf16 %v8360_v61, %v8360_v61  ;;  %v7337_v57 = vpop.xlane.xlu0 %7336  ;;  %v9010_v61 = vld [vmem:[#allocation5 + $0x908] sm:$0xff]  ;;  %v8747_v42 = vld [vmem:[#allocation5 + $0xd0] sm:$0xff] }
 0x8b3   :  { %v7339_v53 = vmul.f32 0.00091911765, %v7337_v57  ;;  %v15548_v57 = vcombine.high %v9010_v61, %v9022_v2  ;;  %v8759_v1 = vld [vmem:[#allocation5 + $0x130] sm:$0xff] }
 0x8b4   :  { %13361 = vmatprep.mubr.bf16.mxu0 %v22014_v51  ;;  %v15285_v29 = vcombine.low %v8747_v42, %v8759_v1 }
 0x8b5   :  { %17290 = vrcp.f32 %v7339_v53  ;;  %13362 = vmatmul.mubr.bf16.vlgmr.msra.gmra.mxu0 %v22016_v38  ;;  %v15547_v53 = vcombine.low %v9010_v61, %v9022_v2  ;;  %v9059_v61 = vld [vmem:[#allocation5 + $0xa90] sm:$0xff] }
 0x8b6   :  { %13412 = vmatpush1.bf16.msra.mxu0 %v15427_v22  ;;  %13443 = vmatprep.mubr.bf16.mxu0 %v22014_v51  ;;  %v8986_v22 = vld [vmem:[#allocation5 + $0x848] sm:$0xff]  ;;  %v9071_v2 = vld [vmem:[#allocation5 + $0xaf0] sm:$0xff] }
 0x8b7   :  { %13413 = vmatprep.subr.bf16.mxu0 %v15404_v15  ;;  %v15524_v15 = vcombine.high %v8986_v22, %v8998_v9  ;;  %v15523_v54 = vcombine.low %v8986_v22, %v8998_v9  ;;  %v15597_v22 = vcombine.low %v9059_v61, %v9071_v2 }
 0x8ba   :  { %13414 = vmatpush1.bf16.msra.mxu0 %v15403_v28  ;;  %v8950_v28 = vld [vmem:[#allocation5 + $0x728] sm:$0xff] }
 0x8bb   :  { %13415 = vmatprep.subr.bf16.mxu0 %v15380_v14  ;;  %v15476_v14 = vcombine.high %v8938_v32, %v8950_v28  ;;  %v15475_v45 = vcombine.low %v8938_v32, %v8950_v28 }
 0x8be   :  { %13416 = vmatpush1.bf16.msra.mxu0 %v15379_v52  ;;  %v15452_v52 = vcombine.high %v8914_v40, %v8926_v62 }
 0x8bf   :  { %13417 = vmatprep.subr.bf16.mxu0 %v15356_v23  ;;  %v8891_v23 = vld [vmem:[#allocation5 + $0x550] sm:$0xff] }
 0x8c0   :  { %v15429_v55 = vcombine.low %v8891_v23, %v8903_v59 }
 0x8c2   :  { %v17291_v63 = vpop.eup %17290  ;;  %13418 = vmatpush1.bf16.msra.mxu0 %v15355_v4  ;;  %v15430_v4 = vcombine.high %v8891_v23, %v8903_v59 }
 0x8c3   :  { %13419 = vmatprep.subr.bf16.mxu0 %v15332_v44  ;;  %v7362_v17 = vmul.f32 %v17291_v63, %v7360_v41  ;;  %v8867_v44 = vld [vmem:[#allocation5 + $0x490] sm:$0xff] }
 0x8c4   :  { %v15406_v63 = vcombine.high %v8867_v44, %v8879_v60  ;;  %v8843_v41 = vld [vmem:[#allocation5 + $0x3d0] sm:$0xff] }
 0x8c5   :  { %17292 = vlog2.f32 %v7362_v17 }
 0x8c6   :  { %13420 = vmatpush1.bf16.msra.mxu0 %v15331_v16  ;;  %v8855_v16 = vld [vmem:[#allocation5 + $0x430] sm:$0xff] }
 0x8c7   :  { %13421 = vmatprep.subr.bf16.mxu0 %v15308_v58  ;;  %v15405_v58 = vcombine.low %v8867_v44, %v8879_v60  ;;  %v15382_v17 = vcombine.high %v8843_v41, %v8855_v16  ;;  %v8927_v44 = vld [vmem:[#allocation5 + $0x670] sm:$0xff] }
 0x8ca   :  { %13422 = vmatpush1.bf16.msra.mxu0 %v15307_v6  ;;  %v15381_v6 = vcombine.low %v8843_v41, %v8855_v16 }
 0x8cb   :  { %13423 = vmatprep.subr.bf16.mxu0 %v15284_v7  ;;  %v15358_v7 = vcombine.high %v8819_v11, %v8831_v56 }
 0x8ce   :  { %13424 = vmatpush1.bf16.msra.mxu0 %v15283_v20  ;;  %v15357_v20 = vcombine.low %v8819_v11, %v8831_v56 }
 0x8cf   :  { %13425 = vmatprep.subr.bf16.mxu0 %v15260_v0  ;;  %v15334_v0 = vcombine.high %v8795_v49, %v8807_v25 }
 0x8d2   :  { %v17293_v30 = vpop.eup %17292  ;;  %13426 = vmatpush1.bf16.msra.mxu0 %v15259_v19  ;;  %v15333_v19 = vcombine.low %v8795_v49, %v8807_v25 }
 0x8d3   :  { %13427 = vmatprep.subr.bf16.mxu0 %v15620_v3  ;;  %v7364_v27 = vmul.f32 0.6931472, %v17293_v30  ;;  %v15310_v3 = vcombine.high %v8771_v24, %v8783_v37  ;;  %v15309_v30 = vcombine.low %v8771_v24, %v8783_v37  ;;  %v8880_v24 = vld [vmem:[#allocation5 + $0x4f8] sm:$0xff] }
 0x8d5   :  { %v7365_v50 = vmul.f32 4.3429446, %v7364_v27  ;;  %v8735_v27 = vld [vmem:[#allocation5 + $0x70] sm:$0xff] }
 0x8d6   :  { %13428 = vmatpush2.bf16.msra.mxu0 %v15619_v13  ;;  %v15286_v13 = vcombine.high %v8747_v42, %v8759_v1 }
 0x8d7   :  { %13429 = vmatprep.subr.bf16.mxu0 %v15596_v18  ;;  %v15253_v39 = vadd.f32 -8.0, %v7365_v50  ;;  %7367 = vst.msk [vmem:[%s22205_s7] sm:$0x3] %vm7366_vm11, %v7365_v50  ;;  %v8723_v18 = vld [vmem:[#allocation5 + $0x10] sm:$0xff] }
 0x8d8   :  { %v15262_v21 = vcombine.high %v8723_v18, %v8735_v27  ;;  %v9083_v50 = vld [vmem:[#allocation5 + $0xb50] sm:$0xff] }
 0x8d9   :  { %v7369_v43 = vmax.f32 %v15253_v39, 0.0  ;;  %v15261_v39 = vcombine.low %v8723_v18, %v8735_v27  ;;  %v8844_v27 = vld [vmem:[#allocation5 + $0x3d8] sm:$0xff] }
 0x8da   :  { %13430 = vmatpush2.bf16.msra.mxu0 %v15595_v48  ;;  %v9095_v48 = vld [vmem:[#allocation5 + $0xbb0] sm:$0xff]  ;;  %v8428_v23 = vpop.f32.mrf.mxu1 }
 0x8db   :  { %v7370_v12 = vsel %vm7366_vm11, %v7369_v43, 0.0  ;;  %13431 = vmatprep.subr.bf16.mxu0 %v15572_v31  ;;  %v15622_v31 = vcombine.high %v9083_v50, %v9095_v48  ;;  %v15621_v43 = vcombine.low %v9083_v50, %v9095_v48 }
 0x8dc   :  { %7371 = vadd.xlane.f32.xlu0 %v7370_v12  ;;  %v9035_v12 = vld [vmem:[#allocation5 + $0x9d0] sm:$0xff]  ;;  %v8430_v60 = vpop.f32.mrf.mxu1 }
 0x8de   :  { %13432 = vmatpush2.bf16.msra.mxu0 %v15571_v34  ;;  %v15598_v34 = vcombine.high %v9059_v61, %v9071_v2  ;;  %v9262_v61 = vld [vmem:[#allocation5 + $0x10e8] sm:$0xff] }
 0x8df   :  { %13433 = vmatprep.subr.bf16.mxu0 %v15548_v57  ;;  %v9047_v57 = vld [vmem:[#allocation5 + $0xa30] sm:$0xff] }
 0x8e0   :  { %v15574_v9 = vcombine.high %v9035_v12, %v9047_v57  ;;  %v15573_v46 = vcombine.low %v9035_v12, %v9047_v57  ;;  %v8832_v12 = vld [vmem:[#allocation5 + $0x378] sm:$0xff] }
 0x8e2   :  { %13434 = vmatpush2.bf16.msra.mxu0 %v15547_v53  ;;  %v9011_v53 = vld [vmem:[#allocation5 + $0x910] sm:$0xff] }
 0x8e3   :  { %13435 = vmatprep.subr.bf16.mxu0 %v15524_v15  ;;  %v9023_v15 = vld [vmem:[#allocation5 + $0x970] sm:$0xff] }
 0x8e4   :  { %v15550_v35 = vcombine.high %v9011_v53, %v9023_v15  ;;  %v15549_v32 = vcombine.low %v9011_v53, %v9023_v15  ;;  %v9226_v53 = vld [vmem:[#allocation5 + $0xfc8] sm:$0xff] }
 0x8e5   :  { %v9238_v15 = vld [vmem:[#allocation5 + $0x1028] sm:$0xff] }
 0x8e6   :  { %13436 = vmatpush2.bf16.msra.mxu0 %v15523_v54  ;;  %v8987_v54 = vld [vmem:[#allocation5 + $0x850] sm:$0xff] }
 0x8e7   :  { %13437 = vmatprep.subr.bf16.mxu0 %v15500_v36  ;;  %v8999_v36 = vld [vmem:[#allocation5 + $0x8b0] sm:$0xff] }
 0x8e8   :  { %v15526_v28 = vcombine.high %v8987_v54, %v8999_v36  ;;  %v15525_v40 = vcombine.low %v8987_v54, %v8999_v36  ;;  %v8796_v54 = vld [vmem:[#allocation5 + $0x258] sm:$0xff] }
 0x8e9   :  { %v8808_v36 = vld [vmem:[#allocation5 + $0x2b8] sm:$0xff] }
 0x8ea   :  { %13438 = vmatpush2.bf16.msra.mxu0 %v15499_v8  ;;  %v8963_v8 = vld [vmem:[#allocation5 + $0x790] sm:$0xff]  ;;  %v15335_v5 = vcombine.low %v8796_v54, %v8808_v36 }
 0x8eb   :  { %13439 = vmatprep.subr.bf16.mxu0 %v15476_v14  ;;  %v8975_v14 = vld [vmem:[#allocation5 + $0x7f0] sm:$0xff] }
 0x8ec   :  { %v15502_v62 = vcombine.high %v8963_v8, %v8975_v14  ;;  %v15501_v59 = vcombine.low %v8963_v8, %v8975_v14  ;;  %v9202_v8 = vld [vmem:[#allocation5 + $0xf08] sm:$0xff] }
 0x8ed   :  { %v9214_v14 = vld [vmem:[#allocation5 + $0xf68] sm:$0xff] }
 0x8ee   :  { %13440 = vmatpush2.bf16.msra.mxu0 %v15475_v45  ;;  %v8939_v45 = vld [vmem:[#allocation5 + $0x6d0] sm:$0xff]  ;;  %v15740_v33 = vcombine.high %v9202_v8, %v9214_v14 }
 0x8ef   :  { %13441 = vmatprep.subr.bf16.mxu0 %v15452_v52  ;;  %v8951_v52 = vld [vmem:[#allocation5 + $0x730] sm:$0xff] }
 0x8f2   :  { %13442 = vmatpush2.bf16.msra.mxu0 %v15451_v47  ;;  %v15478_v47 = vcombine.high %v8939_v45, %v8951_v52 }
 0x8f3   :  { %13493 = vmatprep.subr.bf16.mxu0 %v15430_v4  ;;  %v8915_v4 = vld [vmem:[#allocation5 + $0x610] sm:$0xff] }
 0x8f4   :  { %v15454_v16 = vcombine.high %v8915_v4, %v8927_v44 }
 0x8f5   :  { %13444 = vmatmul.mubr.bf16.vlgmr.msra.gmra.mxu0 %v22016_v38 }
 0x8f6   :  { %13494 = vmatpush1.bf16.msra.mxu0 %v15429_v55  ;;  %13525 = vmatprep.mubr.bf16.mxu0 %v22014_v51  ;;  %v8499_v55 = vpop.f32.mrf.mxu0 }
 0x8f7   :  { %13495 = vmatprep.subr.bf16.mxu0 %v15406_v63  ;;  %v15477_v63 = vcombine.low %v8939_v45, %v8951_v52  ;;  %v8500_v56 = vadd.f32 %v8499_v55, %v8428_v23  ;;  %v8772_v45 = vld [vmem:[#allocation5 + $0x198] sm:$0xff]  ;;  %v9190_v23 = vld [vmem:[#allocation5 + $0xea8] sm:$0xff] }
 0x8f8   :  { %v8501_v11 = vpop.f32.mrf.mxu0  ;;  %v8784_v52 = vld [vmem:[#allocation5 + $0x1f8] sm:$0xff] }
 0x8f9   :  { %v8502_v25 = vadd.f32 %v8501_v11, %v8430_v60  ;;  %v15311_v55 = vcombine.low %v8772_v45, %v8784_v52  ;;  %v8736_v11 = vld [vmem:[#allocation5 + $0x78] sm:$0xff] }
 0x8fa   :  { %13496 = vmatpush1.bf16.msra.mxu0 %v15405_v58  ;;  %v8892_v58 = vld [vmem:[#allocation5 + $0x558] sm:$0xff] }
 0x8fb   :  { %13497 = vmatprep.subr.bf16.mxu0 %v15382_v17  ;;  %v8904_v17 = vld [vmem:[#allocation5 + $0x5b8] sm:$0xff] }
 0x8fc   :  { %v15432_v49 = vcombine.high %v8892_v58, %v8904_v17  ;;  %v15431_v1 = vcombine.low %v8892_v58, %v8904_v17  ;;  %v8724_v17 = vld [vmem:[#allocation5 + $0x18] sm:$0xff] }
 0x8fe   :  { %13498 = vmatpush1.bf16.msra.mxu0 %v15381_v6  ;;  %v15453_v6 = vcombine.low %v8915_v4, %v8927_v44  ;;  %v8748_v4 = vld [vmem:[#allocation5 + $0xd8] sm:$0xff] }
 0x8ff   :  { %13499 = vmatprep.subr.bf16.mxu0 %v15358_v7  ;;  %v8760_v44 = vld [vmem:[#allocation5 + $0x138] sm:$0xff] }
 0x902   :  { %13500 = vmatpush1.bf16.msra.mxu0 %v15357_v20 }
 0x903   :  { %13501 = vmatprep.subr.bf16.mxu0 %v15334_v0  ;;  %v8868_v0 = vld [vmem:[#allocation5 + $0x498] sm:$0xff] }
 0x906   :  { %13502 = vmatpush1.bf16.msra.mxu0 %v15333_v19 }
 0x907   :  { %13503 = vmatprep.subr.bf16.mxu0 %v15310_v3 }
 0x90a   :  { %13504 = vmatpush1.bf16.msra.mxu0 %v15309_v30 }
 0x90b   :  { %13505 = vmatprep.subr.bf16.mxu0 %v15286_v13  ;;  %v15408_v13 = vcombine.high %v8868_v0, %v8880_v24 }
 0x90e   :  { %13506 = vmatpush1.bf16.msra.mxu0 %v15285_v29  ;;  %v8856_v29 = vld [vmem:[#allocation5 + $0x438] sm:$0xff] }
 0x90f   :  { %13507 = vmatprep.subr.bf16.mxu0 %v15262_v21  ;;  %v15384_v2 = vcombine.high %v8844_v27, %v8856_v29 }
 0x912   :  { %13508 = vmatpush1.bf16.msra.mxu0 %v15261_v39  ;;  %v15407_v39 = vcombine.low %v8868_v0, %v8880_v24  ;;  %v9084_v0 = vld [vmem:[#allocation5 + $0xb58] sm:$0xff] }
 0x913   :  { %13509 = vmatprep.subr.bf16.mxu0 %v15622_v31  ;;  %v9250_v31 = vld [vmem:[#allocation5 + $0x1088] sm:$0xff]  ;;  %v9096_v24 = vld [vmem:[#allocation5 + $0xbb8] sm:$0xff] }
 0x916   :  { %13510 = vmatpush2.bf16.msra.mxu0 %v15621_v43 }
 0x917   :  { %13511 = vmatprep.subr.bf16.mxu0 %v15598_v34  ;;  %v8820_v34 = vld [vmem:[#allocation5 + $0x318] sm:$0xff] }
 0x91a   :  { %13512 = vmatpush2.bf16.msra.mxu0 %v15597_v22  ;;  %v15788_v22 = vcombine.high %v9250_v31, %v9262_v61 }
 0x91b   :  { %13513 = vmatprep.subr.bf16.mxu0 %v15574_v9  ;;  %v15383_v9 = vcombine.low %v8844_v27, %v8856_v29  ;;  %v15623_v29 = vcombine.low %v9084_v0, %v9096_v24 }
 0x91c   :  { %v8570_v41 = vpop.f32.mrf.mxu1 }
 0x91d   :  { %v8571_v20 = vadd.f32 %v8570_v41, %v8500_v56  ;;  %v9166_v41 = vld [vmem:[#allocation5 + $0xde8] sm:$0xff] }
 0x91e   :  { %13514 = vmatpush2.bf16.msra.mxu0 %v15573_v46  ;;  %v8572_v7 = vpop.f32.mrf.mxu1  ;;  %v15360_v46 = vcombine.high %v8820_v34, %v8832_v12 }
 0x91f   :  { %13515 = vmatprep.subr.bf16.mxu0 %v15550_v35  ;;  %v8573_v19 = vadd.f32 %v8572_v7, %v8502_v25  ;;  %v15787_v35 = vcombine.low %v9250_v31, %v9262_v61  ;;  %v9130_v7 = vld [vmem:[#allocation5 + $0xcc8] sm:$0xff]  ;;  %v15264_v25 = vcombine.high %v8724_v17, %v8736_v11  ;;  %v9036_v31 = vld [vmem:[#allocation5 + $0x9d8] sm:$0xff] }
 0x920   :  { %v9048_v61 = vld [vmem:[#allocation5 + $0xa38] sm:$0xff] }
 0x922   :  { %13516 = vmatpush2.bf16.msra.mxu0 %v15549_v32  ;;  %v15764_v32 = vcombine.high %v9226_v53, %v9238_v15 }
 0x923   :  { %13517 = vmatprep.subr.bf16.mxu0 %v15526_v28  ;;  %v15359_v28 = vcombine.low %v8820_v34, %v8832_v12  ;;  %v9442_v12 = vld [vmem:[#allocation5 + $0x1688] sm:$0xff] }
 0x926   :  { %13518 = vmatpush2.bf16.msra.mxu0 %v15525_v40  ;;  %v15336_v40 = vcombine.high %v8796_v54, %v8808_v36  ;;  %v15575_v54 = vcombine.low %v9036_v31, %v9048_v61  ;;  %v9418_v36 = vld [vmem:[#allocation5 + $0x15c8] sm:$0xff] }
 0x927   :  { %13519 = vmatprep.subr.bf16.mxu0 %v15502_v62  ;;  %v15763_v62 = vcombine.low %v9226_v53, %v9238_v15  ;;  %v9012_v15 = vld [vmem:[#allocation5 + $0x918] sm:$0xff] }
 0x92a   :  { %13520 = vmatpush2.bf16.msra.mxu0 %v15501_v59  ;;  %v15312_v59 = vcombine.high %v8772_v45, %v8784_v52  ;;  %v9394_v52 = vld [vmem:[#allocation5 + $0x1508] sm:$0xff] }
 0x92b   :  { %13521 = vmatprep.subr.bf16.mxu0 %v15478_v47  ;;  %v15739_v47 = vcombine.low %v9202_v8, %v9214_v14  ;;  %v8988_v14 = vld [vmem:[#allocation5 + $0x858] sm:$0xff] }
 0x92e   :  { %13522 = vmatpush2.bf16.msra.mxu0 %v15477_v63  ;;  %v9154_v63 = vld [vmem:[#allocation5 + $0xd88] sm:$0xff] }
 0x92f   :  { %13523 = vmatprep.subr.bf16.mxu0 %v15454_v16  ;;  %v15288_v16 = vcombine.high %v8748_v4, %v8760_v44  ;;  %v15692_v56 = vcombine.high %v9154_v63, %v9166_v41 }
 0x931   :  { %v8641_v37 = vpop.f32.mrf.mxu0 }
 0x932   :  { %v8642_v3 = vadd.f32 %v8641_v37, %v8571_v20  ;;  %v8712_v42 = vpop.f32.mrf.mxu1  ;;  %13524 = vmatpush2.bf16.msra.mxu0 %v15453_v6  ;;  %v15287_v6 = vcombine.low %v8748_v4, %v8760_v44  ;;  %v15691_v20 = vcombine.low %v9154_v63, %v9166_v41  ;;  %v9370_v44 = vld [vmem:[#allocation5 + $0x1448] sm:$0xff]  ;;  %v8940_v41 = vld [vmem:[#allocation5 + $0x6d8] sm:$0xff] }
 0x933   :  { %v8643_v30 = vpop.f32.mrf.mxu0  ;;  %13575 = vmatprep.subr.bf16.mxu0 %v15432_v49  ;;  %v9142_v49 = vld [vmem:[#allocation5 + $0xd28] sm:$0xff] }
 0x934   :  { %v8644_v18 = vadd.f32 %v8643_v30, %v8573_v19  ;;  %v8713_v21 = vadd.f32 %v8712_v42, %v8642_v3  ;;  %v8714_v50 = vpop.f32.mrf.mxu1  ;;  %v15668_v37 = vcombine.high %v9130_v7, %v9142_v49  ;;  %v15263_v19 = vcombine.low %v8724_v17, %v8736_v11  ;;  %v9106_v3 = vld [vmem:[#allocation5 + $0xc08] sm:$0xff] }
 0x935   :  { %13526 = vmatmul.mubr.bf16.vlgmr.msra.gmra.mxu0 %v22016_v38  ;;  %v9118_v42 = vld [vmem:[#allocation5 + $0xc68] sm:$0xff]  ;;  %v15667_v30 = vcombine.low %v9130_v7, %v9142_v49 }
 0x936   :  { %v8715_v48 = vadd.f32 %v8714_v50, %v8644_v18  ;;  %13576 = vmatpush1.bf16.msra.mxu0 %v15431_v1  ;;  %13607 = vmatprep.mubr.bf16.mxu0 %v22014_v51  ;;  %v22038_v57 = vpack.c.bf16 %v8713_v21, %v8713_v21  ;;  %v15624_v1 = vcombine.high %v9084_v0, %v9096_v24  ;;  %v9072_v18 = vld [vmem:[#allocation5 + $0xaf8] sm:$0xff]  ;;  %v9466_v21 = vld [vmem:[#allocation5 + $0x1748] sm:$0xff] }
 0x937   :  { %13577 = vmatprep.subr.bf16.mxu0 %v15408_v13  ;;  %v9060_v13 = vld [vmem:[#allocation5 + $0xa98] sm:$0xff]  ;;  %v15644_v27 = vcombine.high %v9106_v3, %v9118_v42  ;;  %v9478_v50 = vld [vmem:[#allocation5 + $0x17a8] sm:$0xff] }
 0x938   :  { %v22036_v43 = vpack.c.bf16 %v8715_v48, %v8715_v48  ;;  %v15600_v48 = vcombine.high %v9060_v13, %v9072_v18  ;;  %v15599_v34 = vcombine.low %v9060_v13, %v9072_v18  ;;  %v16003_v53 = vcombine.low %v9466_v21, %v9478_v50  ;;  %v9358_v7 = vld [vmem:[#allocation5 + $0x13e8] sm:$0xff]  ;;  %v8916_v0 = vld [vmem:[#allocation5 + $0x618] sm:$0xff] }
 0x939   :  { %v8928_v24 = vld [vmem:[#allocation5 + $0x678] sm:$0xff] }
 0x93a   :  { %13402 = vmatprep.mubr.bf16.mxu1 %v22036_v43  ;;  %13578 = vmatpush1.bf16.msra.mxu0 %v15407_v39  ;;  %v15643_v39 = vcombine.low %v9106_v3, %v9118_v42  ;;  %v9322_v42 = vld [vmem:[#allocation5 + $0x12c8] sm:$0xff] }
 0x93b   :  { %13403 = vmatmul.mubr.bf16.vlgmr.msra.gmra.mxu1 %v22038_v57  ;;  %13579 = vmatprep.subr.bf16.mxu0 %v15384_v2  ;;  %v16004_v2 = vcombine.high %v9466_v21, %v9478_v50 }
 0x93c   :  { %13453 = vmatpush1.bf16.msra.mxu1 %v15811_v10  ;;  %13484 = vmatprep.mubr.bf16.mxu1 %v22036_v43  ;;  %v9178_v10 = vld [vmem:[#allocation5 + $0xe48] sm:$0xff] }
 0x93d   :  { %13454 = vmatprep.subr.bf16.mxu1 %v15788_v22  ;;  %v15716_v60 = vcombine.high %v9178_v10, %v9190_v23  ;;  %v15715_v58 = vcombine.low %v9178_v10, %v9190_v23  ;;  %v9454_v22 = vld [vmem:[#allocation5 + $0x16e8] sm:$0xff]  ;;  %v8964_v23 = vld [vmem:[#allocation5 + $0x798] sm:$0xff] }
 0x93e   :  { %13580 = vmatpush1.bf16.msra.mxu0 %v15383_v9  ;;  %v15576_v9 = vcombine.high %v9036_v31, %v9048_v61  ;;  %v15979_v8 = vcombine.low %v9442_v12, %v9454_v22  ;;  %v9310_v31 = vld [vmem:[#allocation5 + $0x1268] sm:$0xff] }
 0x93f   :  { %13581 = vmatprep.subr.bf16.mxu0 %v15360_v46  ;;  %v9024_v46 = vld [vmem:[#allocation5 + $0x978] sm:$0xff] }
 0x940   :  { %13455 = vmatpush1.bf16.msra.mxu1 %v15787_v35  ;;  %v15980_v35 = vcombine.high %v9442_v12, %v9454_v22  ;;  %v15551_v45 = vcombine.low %v9012_v15, %v9024_v46  ;;  %v8869_v12 = vld [vmem:[#allocation5 + $0x4a0] sm:$0xff] }
 0x941   :  { %13456 = vmatprep.subr.bf16.mxu1 %v15764_v32  ;;  %v9430_v32 = vld [vmem:[#allocation5 + $0x1628] sm:$0xff]  ;;  %v8881_v22 = vld [vmem:[#allocation5 + $0x500] sm:$0xff] }
 0x942   :  { %13582 = vmatpush1.bf16.msra.mxu0 %v15359_v28  ;;  %v15552_v28 = vcombine.high %v9012_v15, %v9024_v46  ;;  %v15955_v10 = vcombine.low %v9418_v36, %v9430_v32  ;;  %v9275_v15 = vld [vmem:[#allocation5 + $0x1150] sm:$0xff] }
 0x943   :  { %13583 = vmatprep.subr.bf16.mxu0 %v15336_v40  ;;  %v9000_v40 = vld [vmem:[#allocation5 + $0x8b8] sm:$0xff]  ;;  %v9287_v46 = vld [vmem:[#allocation5 + $0x11b0] sm:$0xff] }
 0x944   :  { %13457 = vmatpush1.bf16.msra.mxu1 %v15763_v62  ;;  %v15956_v62 = vcombine.high %v9418_v36, %v9430_v32  ;;  %v15527_v4 = vcombine.low %v8988_v14, %v9000_v40  ;;  %v8845_v36 = vld [vmem:[#allocation5 + $0x3e0] sm:$0xff] }
 0x945   :  { %13458 = vmatprep.subr.bf16.mxu1 %v15740_v33  ;;  %v9406_v33 = vld [vmem:[#allocation5 + $0x1568] sm:$0xff]  ;;  %v8857_v32 = vld [vmem:[#allocation5 + $0x440] sm:$0xff] }
 0x946   :  { %13584 = vmatpush1.bf16.msra.mxu0 %v15335_v5  ;;  %v15528_v5 = vcombine.high %v8988_v14, %v9000_v40  ;;  %v15931_v63 = vcombine.low %v9394_v52, %v9406_v33  ;;  %v15409_v14 = vcombine.low %v8869_v12, %v8881_v22  ;;  %v9251_v40 = vld [vmem:[#allocation5 + $0x1090] sm:$0xff] }
 0x947   :  { %13585 = vmatprep.subr.bf16.mxu0 %v15312_v59  ;;  %v8976_v59 = vld [vmem:[#allocation5 + $0x7f8] sm:$0xff] }
 0x948   :  { %13459 = vmatpush1.bf16.msra.mxu1 %v15739_v47  ;;  %v15932_v47 = vcombine.high %v9394_v52, %v9406_v33  ;;  %v15386_v52 = vcombine.high %v8845_v36, %v8857_v32  ;;  %v15813_v33 = vcombine.low %v9275_v15, %v9287_v46 }
 0x949   :  { %13460 = vmatprep.subr.bf16.mxu1 %v15716_v60  ;;  %v9382_v60 = vld [vmem:[#allocation5 + $0x14a8] sm:$0xff] }
 0x94a   :  { %13586 = vmatpush1.bf16.msra.mxu0 %v15311_v55  ;;  %v15504_v55 = vcombine.high %v8964_v23, %v8976_v59  ;;  %v15908_v17 = vcombine.high %v9370_v44, %v9382_v60 }
 0x94b   :  { %13587 = vmatprep.subr.bf16.mxu0 %v15288_v16  ;;  %v8952_v16 = vld [vmem:[#allocation5 + $0x738] sm:$0xff] }
 0x94c   :  { %13461 = vmatpush1.bf16.msra.mxu1 %v15715_v58  ;;  %v15480_v49 = vcombine.high %v8940_v41, %v8952_v16  ;;  %v15479_v3 = vcombine.low %v8940_v41, %v8952_v16  ;;  %v8797_v41 = vld [vmem:[#allocation5 + $0x260] sm:$0xff] }
 0x94d   :  { %13462 = vmatprep.subr.bf16.mxu1 %v15692_v56  ;;  %v15503_v56 = vcombine.low %v8964_v23, %v8976_v59  ;;  %v8809_v16 = vld [vmem:[#allocation5 + $0x2c0] sm:$0xff] }
 0x94e   :  { %13588 = vmatpush1.bf16.msra.mxu0 %v15287_v6  ;;  %v9346_v6 = vld [vmem:[#allocation5 + $0x1388] sm:$0xff] }
 0x94f   :  { %13589 = vmatprep.subr.bf16.mxu0 %v15264_v25  ;;  %v15883_v13 = vcombine.low %v9346_v6, %v9358_v7 }
 0x950   :  { %13463 = vmatpush1.bf16.msra.mxu1 %v15691_v20  ;;  %v15907_v20 = vcombine.low %v9370_v44, %v9382_v60  ;;  %v9239_v44 = vld [vmem:[#allocation5 + $0x1030] sm:$0xff] }
 0x951   :  { %13464 = vmatprep.subr.bf16.mxu1 %v15668_v37  ;;  %v15884_v37 = vcombine.high %v9346_v6, %v9358_v7  ;;  %v15338_v6 = vcombine.high %v8797_v41, %v8809_v16 }
 0x952   :  { %13590 = vmatpush1.bf16.msra.mxu0 %v15263_v19 }
 0x953   :  { %13591 = vmatprep.subr.bf16.mxu0 %v15624_v1  ;;  %v9334_v1 = vld [vmem:[#allocation5 + $0x1328] sm:$0xff] }
 0x954   :  { %13465 = vmatpush1.bf16.msra.mxu1 %v15667_v30  ;;  %v15456_v30 = vcombine.high %v8916_v0, %v8928_v24  ;;  %v15860_v21 = vcombine.high %v9322_v42, %v9334_v1 }
 0x955   :  { %13466 = vmatprep.subr.bf16.mxu1 %v15644_v27  ;;  %v8893_v27 = vld [vmem:[#allocation5 + $0x560] sm:$0xff] }
 0x956   :  { %13592 = vmatpush2.bf16.msra.mxu0 %v15623_v29  ;;  %v8905_v29 = vld [vmem:[#allocation5 + $0x5c0] sm:$0xff] }
 0x957   :  { %13593 = vmatprep.subr.bf16.mxu0 %v15600_v48  ;;  %v15455_v48 = vcombine.low %v8916_v0, %v8928_v24  ;;  %v15434_v61 = vcombine.high %v8893_v27, %v8905_v29  ;;  %v15337_v0 = vcombine.low %v8797_v41, %v8809_v16  ;;  %v9179_v24 = vld [vmem:[#allocation5 + $0xe50] sm:$0xff]  ;;  %v9025_v41 = vld [vmem:[#allocation5 + $0x980] sm:$0xff] }
 0x958   :  { %13467 = vmatpush1.bf16.msra.mxu1 %v15643_v39  ;;  %v9298_v39 = vld [vmem:[#allocation5 + $0x1208] sm:$0xff] }
 0x959   :  { %13468 = vmatprep.subr.bf16.mxu1 %v16004_v2  ;;  %v15859_v2 = vcombine.low %v9322_v42, %v9334_v1  ;;  %v8749_v42 = vld [vmem:[#allocation5 + $0xe0] sm:$0xff] }
 0x95a   :  { %13594 = vmatpush2.bf16.msra.mxu0 %v15599_v34  ;;  %v8761_v1 = vld [vmem:[#allocation5 + $0x140] sm:$0xff] }
 0x95b   :  { %13595 = vmatprep.subr.bf16.mxu0 %v15576_v9  ;;  %v15836_v9 = vcombine.high %v9298_v39, %v9310_v31 }
 0x95c   :  { %13469 = vmatpush2.bf16.msra.mxu1 %v16003_v53  ;;  %v15433_v53 = vcombine.low %v8893_v27, %v8905_v29  ;;  %v9167_v27 = vld [vmem:[#allocation5 + $0xdf0] sm:$0xff]  ;;  %v15290_v29 = vcombine.high %v8749_v42, %v8761_v1 }
 0x95d   :  { %13470 = vmatprep.subr.bf16.mxu1 %v15980_v35  ;;  %v15410_v35 = vcombine.high %v8869_v12, %v8881_v22  ;;  %v9085_v22 = vld [vmem:[#allocation5 + $0xb60] sm:$0xff] }
 0x95e   :  { %13596 = vmatpush2.bf16.msra.mxu0 %v15575_v54  ;;  %v15835_v54 = vcombine.low %v9298_v39, %v9310_v31  ;;  %v15289_v31 = vcombine.low %v8749_v42, %v8761_v1  ;;  %v8977_v42 = vld [vmem:[#allocation5 + $0x800] sm:$0xff] }
 0x95f   :  { %13597 = vmatprep.subr.bf16.mxu0 %v15552_v28 }
 0x960   :  { %13471 = vmatpush2.bf16.msra.mxu1 %v15979_v8  ;;  %v15814_v8 = vcombine.high %v9275_v15, %v9287_v46  ;;  %v9107_v46 = vld [vmem:[#allocation5 + $0xc10] sm:$0xff] }
 0x961   :  { %13472 = vmatprep.subr.bf16.mxu1 %v15956_v62  ;;  %v9263_v62 = vld [vmem:[#allocation5 + $0x10f0] sm:$0xff] }
 0x962   :  { %13598 = vmatpush2.bf16.msra.mxu0 %v15551_v45  ;;  %v15790_v59 = vcombine.high %v9251_v40, %v9263_v62 }
 0x963   :  { %13599 = vmatprep.subr.bf16.mxu0 %v15528_v5  ;;  %v8821_v5 = vld [vmem:[#allocation5 + $0x320] sm:$0xff] }
 0x964   :  { %13473 = vmatpush2.bf16.msra.mxu1 %v15955_v10  ;;  %v8833_v10 = vld [vmem:[#allocation5 + $0x380] sm:$0xff] }
 0x965   :  { %13474 = vmatprep.subr.bf16.mxu1 %v15932_v47  ;;  %v7372_v58 = vpop.xlane.xlu0 %7371  ;;  %v15385_v47 = vcombine.low %v8845_v36, %v8857_v32  ;;  %v9061_v32 = vld [vmem:[#allocation5 + $0xaa0] sm:$0xff] }
 0x966   :  { %v7373_v11 = vrot.slane %v7372_v58, 4  ;;  %13600 = vmatpush2.bf16.msra.mxu0 %v15527_v4  ;;  %v9227_v4 = vld [vmem:[#allocation5 + $0xfd0] sm:$0xff] }
 0x967   :  { %13601 = vmatprep.subr.bf16.mxu0 %v15504_v55  ;;  %v15362_v55 = vcombine.high %v8821_v5, %v8833_v10  ;;  %v15765_v7 = vcombine.low %v9227_v4, %v9239_v44 }
 0x968   :  { %v7374_v25 = vadd.f32 %v7373_v11, %v7372_v58  ;;  %13475 = vmatpush2.bf16.msra.mxu1 %v15931_v63  ;;  %v15789_v63 = vcombine.low %v9251_v40, %v9263_v62  ;;  %v15766_v58 = vcombine.high %v9227_v4, %v9239_v44  ;;  %v9203_v11 = vld [vmem:[#allocation5 + $0xf10] sm:$0xff] }
 0x969   :  { %13476 = vmatprep.subr.bf16.mxu1 %v15908_v17  ;;  %v15361_v17 = vcombine.low %v8821_v5, %v8833_v10  ;;  %v9467_v62 = vld [vmem:[#allocation5 + $0x1750] sm:$0xff]  ;;  %v9037_v10 = vld [vmem:[#allocation5 + $0x9e0] sm:$0xff] }
 0x96a   :  { %v7375_v19 = vrot.slane %v7374_v25, 2  ;;  %13602 = vmatpush2.bf16.msra.mxu0 %v15503_v56  ;;  %v9215_v56 = vld [vmem:[#allocation5 + $0xf70] sm:$0xff] }
 0x96b   :  { %13603 = vmatprep.subr.bf16.mxu0 %v15480_v49  ;;  %v8773_v49 = vld [vmem:[#allocation5 + $0x1a0] sm:$0xff]  ;;  %v9443_v4 = vld [vmem:[#allocation5 + $0x1690] sm:$0xff] }
 0x96c   :  { %13477 = vmatpush2.bf16.msra.mxu1 %v15907_v20  ;;  %v7376_v18 = vadd.f32 %v7375_v19, %v7374_v25  ;;  %v8785_v25 = vld [vmem:[#allocation5 + $0x200] sm:$0xff]  ;;  %v15742_v20 = vcombine.high %v9203_v11, %v9215_v56  ;;  %v9455_v44 = vld [vmem:[#allocation5 + $0x16f0] sm:$0xff] }
 0x96d   :  { %13478 = vmatprep.subr.bf16.mxu1 %v15884_v37  ;;  %v9191_v37 = vld [vmem:[#allocation5 + $0xeb0] sm:$0xff]  ;;  %v15314_v19 = vcombine.high %v8773_v49, %v8785_v25  ;;  %v15982_v16 = vcombine.high %v9443_v4, %v9455_v44 }
 0x96e   :  { %13604 = vmatpush2.bf16.msra.mxu0 %v15479_v3  ;;  %v7377_v50 = vrot.slane %v7376_v18, 1  ;;  %v15741_v3 = vcombine.low %v9203_v11, %v9215_v56  ;;  %v9431_v11 = vld [vmem:[#allocation5 + $0x1630] sm:$0xff] }
 0x96f   :  { %13605 = vmatprep.subr.bf16.mxu0 %v15456_v30  ;;  %v15718_v30 = vcombine.high %v9179_v24, %v9191_v37 }
 0x970   :  { %13479 = vmatpush2.bf16.msra.mxu1 %v15883_v13  ;;  %v7378_v34 = vadd.f32 %v7377_v50, %v7376_v18  ;;  %v15313_v13 = vcombine.low %v8773_v49, %v8785_v25  ;;  %v9155_v18 = vld [vmem:[#allocation5 + $0xd90] sm:$0xff]  ;;  %v8725_v50 = vld [vmem:[#allocation5 + $0x20] sm:$0xff] }
 0x971   :  { %13480 = vmatprep.subr.bf16.mxu1 %v15860_v21  ;;  %v15717_v21 = vcombine.low %v9179_v24, %v9191_v37  ;;  %v15694_v39 = vcombine.high %v9155_v18, %v9167_v27  ;;  %v15693_v12 = vcombine.low %v9155_v18, %v9167_v27  ;;  %v9001_v49 = vld [vmem:[#allocation5 + $0x8c0] sm:$0xff]  ;;  %v9407_v24 = vld [vmem:[#allocation5 + $0x1570] sm:$0xff] }
 0x972   :  { %16095 = vpush %v7378_v34  ;;  %13606 = vmatpush2.bf16.msra.mxu0 %v15455_v48  ;;  %v8737_v48 = vld [vmem:[#allocation5 + $0x80] sm:$0xff]  ;;  %v9383_v18 = vld [vmem:[#allocation5 + $0x14b0] sm:$0xff] }
 0x973   :  { %13657 = vmatprep.subr.bf16.mxu0 %v15434_v61  ;;  %v9131_v61 = vld [vmem:[#allocation5 + $0xcd0] sm:$0xff]  ;;  %v15266_v34 = vcombine.high %v8725_v50, %v8737_v48  ;;  %v15265_v15 = vcombine.low %v8725_v50, %v8737_v48  ;;  %v8953_v50 = vld [vmem:[#allocation5 + $0x740] sm:$0xff] }
 0x974   :  { %13481 = vmatpush2.bf16.msra.mxu1 %v15859_v2  ;;  %v9143_v2 = vld [vmem:[#allocation5 + $0xd30] sm:$0xff] }
 0x975   :  { %13482 = vmatprep.subr.bf16.mxu1 %v15836_v9  ;;  %13608 = vmatmul.mubr.bf16.vlgmr.msra.gmra.mxu0 %v22016_v38  ;;  %v22047_v28 = vpop.f32.mrf.mxu0  ;;  %v9097_v9 = vld [vmem:[#allocation5 + $0xbc0] sm:$0xff]  ;;  %v15669_v36 = vcombine.low %v9131_v61, %v9143_v2 }
 0x976   :  { %13658 = vmatpush1.bf16.msra.mxu0 %v15433_v53  ;;  %13689 = vmatprep.mubr.bf16.mxu0 %v22014_v51  ;;  %v15670_v53 = vcombine.high %v9131_v61, %v9143_v2  ;;  %v15625_v40 = vcombine.low %v9085_v22, %v9097_v9  ;;  %v9347_v61 = vld [vmem:[#allocation5 + $0x1390] sm:$0xff] }
 0x977   :  { %v22050_v45 = vpop.f32.mrf.mxu0  ;;  %13659 = vmatprep.subr.bf16.mxu0 %v15410_v35  ;;  %v9119_v35 = vld [vmem:[#allocation5 + $0xc70] sm:$0xff] }
 0x978   :  { %13483 = vmatpush2.bf16.msra.mxu1 %v15835_v54  ;;  %v15626_v54 = vcombine.high %v9085_v22, %v9097_v9  ;;  %v15645_v5 = vcombine.low %v9107_v46, %v9119_v35  ;;  %v9359_v2 = vld [vmem:[#allocation5 + $0x13f0] sm:$0xff]  ;;  %v8917_v22 = vld [vmem:[#allocation5 + $0x620] sm:$0xff] }
 0x979   :  { %13534 = vmatprep.subr.bf16.mxu1 %v15814_v8  ;;  %v13367_v23 = vpop.f32.mrf.mxu0  ;;  %v9073_v8 = vld [vmem:[#allocation5 + $0xb00] sm:$0xff] }
 0x97a   :  { %13660 = vmatpush1.bf16.msra.mxu0 %v15409_v14  ;;  %v15646_v14 = vcombine.high %v9107_v46, %v9119_v35  ;;  %v9049_v23 = vld [vmem:[#allocation5 + $0xa40] sm:$0xff]  ;;  %v9323_v46 = vld [vmem:[#allocation5 + $0x12d0] sm:$0xff] }
 0x97b   :  { %13485 = vmatmul.mubr.bf16.vlgmr.msra.gmra.mxu1 %v22038_v57  ;;  %v13368_v60 = vpop.f32.mrf.mxu0  ;;  %13661 = vmatprep.subr.bf16.mxu0 %v15386_v52  ;;  %v9479_v52 = vld [vmem:[#allocation5 + $0x17b0] sm:$0xff]  ;;  %v8929_v9 = vld [vmem:[#allocation5 + $0x680] sm:$0xff] }
 0x97c   :  { %13535 = vmatpush1.bf16.msra.mxu1 %v15813_v33  ;;  %13566 = vmatprep.mubr.bf16.mxu1 %v22036_v43  ;;  %v15602_v33 = vcombine.high %v9061_v32, %v9073_v8  ;;  %v15578_v60 = vcombine.high %v9037_v10, %v9049_v23  ;;  %v9335_v35 = vld [vmem:[#allocation5 + $0x1330] sm:$0xff] }
 0x97d   :  { %13536 = vmatprep.subr.bf16.mxu1 %v15790_v59  ;;  %v16006_v59 = vcombine.high %v9467_v62, %v9479_v52 }
 0x97e   :  { %13662 = vmatpush1.bf16.msra.mxu0 %v15385_v47  ;;  %v15601_v47 = vcombine.low %v9061_v32, %v9073_v8  ;;  %v8894_v32 = vld [vmem:[#allocation5 + $0x568] sm:$0xff] }
 0x97f   :  { %13663 = vmatprep.subr.bf16.mxu0 %v15362_v55  ;;  %v16005_v55 = vcombine.low %v9467_v62, %v9479_v52  ;;  %v8906_v8 = vld [vmem:[#allocation5 + $0x5c8] sm:$0xff]  ;;  %v9299_v62 = vld [vmem:[#allocation5 + $0x1210] sm:$0xff] }
 0x980   :  { %13537 = vmatpush1.bf16.msra.mxu1 %v15789_v63  ;;  %v9013_v63 = vld [vmem:[#allocation5 + $0x920] sm:$0xff]  ;;  %v9311_v52 = vld [vmem:[#allocation5 + $0x1270] sm:$0xff] }
 0x981   :  { %13538 = vmatprep.subr.bf16.mxu1 %v15766_v58  ;;  %v15577_v58 = vcombine.low %v9037_v10, %v9049_v23  ;;  %v15554_v56 = vcombine.high %v9013_v63, %v9025_v41  ;;  %v8870_v10 = vld [vmem:[#allocation5 + $0x4a8] sm:$0xff] }
 0x982   :  { %13664 = vmatpush1.bf16.msra.mxu0 %v15361_v17  ;;  %v9419_v17 = vld [vmem:[#allocation5 + $0x15d0] sm:$0xff]  ;;  %v8882_v23 = vld [vmem:[#allocation5 + $0x508] sm:$0xff] }
 0x983   :  { %13665 = vmatprep.subr.bf16.mxu0 %v15338_v6  ;;  %v15981_v6 = vcombine.low %v9443_v4, %v9455_v44  ;;  %v15958_v25 = vcombine.high %v9419_v17, %v9431_v11  ;;  %v9276_v4 = vld [vmem:[#allocation5 + $0x1158] sm:$0xff] }
 0x984   :  { %13539 = vmatpush1.bf16.msra.mxu1 %v15765_v7  ;;  %v8989_v7 = vld [vmem:[#allocation5 + $0x860] sm:$0xff]  ;;  %v9288_v44 = vld [vmem:[#allocation5 + $0x11b8] sm:$0xff] }
 0x985   :  { %13540 = vmatprep.subr.bf16.mxu1 %v15742_v20  ;;  %v15553_v20 = vcombine.low %v9013_v63, %v9025_v41  ;;  %v15530_v37 = vcombine.high %v8989_v7, %v9001_v49  ;;  %v8846_v63 = vld [vmem:[#allocation5 + $0x3e8] sm:$0xff] }
 0x986   :  { %13666 = vmatpush1.bf16.msra.mxu0 %v15337_v0  ;;  %v9395_v0 = vld [vmem:[#allocation5 + $0x1510] sm:$0xff]  ;;  %v8858_v41 = vld [vmem:[#allocation5 + $0x448] sm:$0xff] }
 0x987   :  { %13667 = vmatprep.subr.bf16.mxu0 %v15314_v19  ;;  %v15957_v19 = vcombine.low %v9419_v17, %v9431_v11  ;;  %v15934_v1 = vcombine.high %v9395_v0, %v9407_v24  ;;  %v15411_v17 = vcombine.low %v8870_v10, %v8882_v23  ;;  %v9252_v11 = vld [vmem:[#allocation5 + $0x1098] sm:$0xff] }
 0x988   :  { %13541 = vmatpush1.bf16.msra.mxu1 %v15741_v3  ;;  %v8965_v3 = vld [vmem:[#allocation5 + $0x7a0] sm:$0xff] }
 0x989   :  { %13542 = vmatprep.subr.bf16.mxu1 %v15718_v30  ;;  %v15529_v30 = vcombine.low %v8989_v7, %v9001_v49  ;;  %v15506_v27 = vcombine.high %v8965_v3, %v8977_v42  ;;  %v15388_v7 = vcombine.high %v8846_v63, %v8858_v41  ;;  %v15815_v49 = vcombine.low %v9276_v4, %v9288_v44 }
 0x98a   :  { %13668 = vmatpush1.bf16.msra.mxu0 %v15313_v13  ;;  %v9371_v13 = vld [vmem:[#allocation5 + $0x1450] sm:$0xff] }
 0x98b   :  { %13669 = vmatprep.subr.bf16.mxu0 %v15290_v29  ;;  %v15933_v29 = vcombine.low %v9395_v0, %v9407_v24  ;;  %v15910_v48 = vcombine.high %v9371_v13, %v9383_v18 }
 0x98c   :  { %13543 = vmatpush1.bf16.msra.mxu1 %v15717_v21  ;;  %v8941_v21 = vld [vmem:[#allocation5 + $0x6e0] sm:$0xff] }
 0x98d   :  { %13544 = vmatprep.subr.bf16.mxu1 %v15694_v39 }
 0x98e   :  { %13670 = vmatpush1.bf16.msra.mxu0 %v15289_v31  ;;  %v15505_v31 = vcombine.low %v8965_v3, %v8977_v42  ;;  %v9240_v3 = vld [vmem:[#allocation5 + $0x1038] sm:$0xff] }
 0x98f   :  { %13671 = vmatprep.subr.bf16.mxu0 %v15266_v34  ;;  %v15482_v34 = vcombine.high %v8941_v21, %v8953_v50 }
 0x990   :  { %13545 = vmatpush1.bf16.msra.mxu1 %v15693_v12  ;;  %v15909_v12 = vcombine.low %v9371_v13, %v9383_v18  ;;  %v8798_v13 = vld [vmem:[#allocation5 + $0x268] sm:$0xff] }
 0x991   :  { %13546 = vmatprep.subr.bf16.mxu1 %v15670_v53  ;;  %v15886_v53 = vcombine.high %v9347_v61, %v9359_v2  ;;  %v8810_v18 = vld [vmem:[#allocation5 + $0x2c8] sm:$0xff] }
 0x992   :  { %13672 = vmatpush1.bf16.msra.mxu0 %v15265_v15  ;;  %v15481_v15 = vcombine.low %v8941_v21, %v8953_v50  ;;  %v9204_v21 = vld [vmem:[#allocation5 + $0xf18] sm:$0xff] }
 0x993   :  { %13673 = vmatprep.subr.bf16.mxu0 %v15626_v54  ;;  %v15458_v54 = vcombine.high %v8917_v22, %v8929_v9  ;;  %v9216_v50 = vld [vmem:[#allocation5 + $0xf78] sm:$0xff] }
 0x994   :  { %13547 = vmatpush1.bf16.msra.mxu1 %v15669_v36  ;;  %v15885_v36 = vcombine.low %v9347_v61, %v9359_v2  ;;  %v8786_v61 = vld [vmem:[#allocation5 + $0x208] sm:$0xff]  ;;  %v15744_v2 = vcombine.high %v9204_v21, %v9216_v50 }
 0x995   :  { %13548 = vmatprep.subr.bf16.mxu1 %v15646_v14  ;;  %v15862_v14 = vcombine.high %v9323_v46, %v9335_v35 }
 0x996   :  { %13674 = vmatpush2.bf16.msra.mxu0 %v15625_v40  ;;  %v15457_v40 = vcombine.low %v8917_v22, %v8929_v9  ;;  %v9192_v22 = vld [vmem:[#allocation5 + $0xeb8] sm:$0xff] }
 0x997   :  { %13675 = vmatprep.subr.bf16.mxu0 %v15602_v33  ;;  %v15436_v33 = vcombine.high %v8894_v32, %v8906_v8 }
 0x998   :  { %13549 = vmatpush1.bf16.msra.mxu1 %v15645_v5  ;;  %v15861_v5 = vcombine.low %v9323_v46, %v9335_v35  ;;  %v8762_v46 = vld [vmem:[#allocation5 + $0x148] sm:$0xff] }
 0x999   :  { %13550 = vmatprep.subr.bf16.mxu1 %v16006_v59  ;;  %v15838_v59 = vcombine.high %v9299_v62, %v9311_v52 }
 0x99a   :  { %13676 = vmatpush2.bf16.msra.mxu0 %v15601_v47  ;;  %v15435_v47 = vcombine.low %v8894_v32, %v8906_v8  ;;  %v9168_v32 = vld [vmem:[#allocation5 + $0xdf8] sm:$0xff] }
 0x99b   :  { %13677 = vmatprep.subr.bf16.mxu0 %v15578_v60  ;;  %v15412_v60 = vcombine.high %v8870_v10, %v8882_v23  ;;  %v9144_v10 = vld [vmem:[#allocation5 + $0xd38] sm:$0xff] }
 0x99c   :  { %13551 = vmatpush2.bf16.msra.mxu1 %v16005_v55  ;;  %v15837_v55 = vcombine.low %v9299_v62, %v9311_v52  ;;  %v8738_v62 = vld [vmem:[#allocation5 + $0x88] sm:$0xff] }
 0x99d   :  { %13552 = vmatprep.subr.bf16.mxu1 %v15982_v16 }
 0x99e   :  { %13678 = vmatpush2.bf16.msra.mxu0 %v15577_v58  ;;  %v15816_v58 = vcombine.high %v9276_v4, %v9288_v44  ;;  %v9098_v4 = vld [vmem:[#allocation5 + $0xbc8] sm:$0xff] }
 0x99f   :  { %13679 = vmatprep.subr.bf16.mxu0 %v15554_v56  ;;  %v9264_v56 = vld [vmem:[#allocation5 + $0x10f8] sm:$0xff] }
 0x9a0   :  { %13553 = vmatpush2.bf16.msra.mxu1 %v15981_v6  ;;  %v15792_v24 = vcombine.high %v9252_v11, %v9264_v56 }
 0x9a1   :  { %13554 = vmatprep.subr.bf16.mxu1 %v15958_v25  ;;  %v8822_v25 = vld [vmem:[#allocation5 + $0x328] sm:$0xff] }
 0x9a2   :  { %13680 = vmatpush2.bf16.msra.mxu0 %v15553_v20  ;;  %v8834_v20 = vld [vmem:[#allocation5 + $0x388] sm:$0xff] }
 0x9a3   :  { %s16096_s7 = spop %16095  ;;  %13681 = vmatprep.subr.bf16.mxu0 %v15530_v37  ;;  %v15387_v37 = vcombine.low %v8846_v63, %v8858_v41  ;;  %v9120_v63 = vld [vmem:[#allocation5 + $0xc78] sm:$0xff] }
 0x9a4   :  { %13555 = vmatpush2.bf16.msra.mxu1 %v15957_v19  ;;  %s7382_s0 = smul.f32 0.5, %s16096_s7  ;;  %v9228_v19 = vld [vmem:[#allocation5 + $0xfd8] sm:$0xff] }
 0x9a5   :  { %13556 = vmatprep.subr.bf16.mxu1 %v15934_v1  ;;  %v15364_v1 = vcombine.high %v8822_v25, %v8834_v20 }
 0x9a6   :  { %v7383_v39 = vstv %s7382_s0  ;;  %13682 = vmatpush2.bf16.msra.mxu0 %v15529_v30  ;;  %v15791_v30 = vcombine.low %v9252_v11, %v9264_v56  ;;  %v9074_v11 = vld [vmem:[#allocation5 + $0xb08] sm:$0xff] }
 0x9a7   :  { %13683 = vmatprep.subr.bf16.mxu0 %v15506_v27  ;;  %7385 = vst.msk [vmem:[#allocation8] sm:$0x1] %vm7384_vm12, %v7383_v39  ;;  %v15768_v27 = vcombine.high %v9228_v19, %v9240_v3  ;;  %v15767_v39 = vcombine.low %v9228_v19, %v9240_v3 }
 0x9a8   :  { %13557 = vmatpush2.bf16.msra.mxu1 %v15933_v29  ;;  %v15363_v29 = vcombine.low %v8822_v25, %v8834_v20  ;;  %v9480_v25 = vld [vmem:[#allocation5 + $0x17b8] sm:$0xff] }
 0x9a9   :  { %13558 = vmatprep.subr.bf16.mxu1 %v15910_v48  ;;  %v15340_v48 = vcombine.high %v8798_v13, %v8810_v18 }
 0x9aa   :  { %13684 = vmatpush2.bf16.msra.mxu0 %v15505_v31  ;;  %v8774_v31 = vld [vmem:[#allocation5 + $0x1a8] sm:$0xff] }
 0x9ab   :  { %13685 = vmatprep.subr.bf16.mxu0 %v15482_v34  ;;  %v15339_v34 = vcombine.low %v8798_v13, %v8810_v18  ;;  %v15316_v9 = vcombine.high %v8774_v31, %v8786_v61  ;;  %v9014_v18 = vld [vmem:[#allocation5 + $0x928] sm:$0xff] }
 0x9ac   :  { %13559 = vmatpush2.bf16.msra.mxu1 %v15909_v12  ;;  %v9180_v12 = vld [vmem:[#allocation5 + $0xe58] sm:$0xff] }
 0x9ad   :  { %13560 = vmatprep.subr.bf16.mxu1 %v15886_v53  ;;  %v15743_v53 = vcombine.low %v9204_v21, %v9216_v50  ;;  %v15720_v35 = vcombine.high %v9180_v12, %v9192_v22  ;;  %v9420_v50 = vld [vmem:[#allocation5 + $0x15d8] sm:$0xff] }
 0x9ae   :  { %13686 = vmatpush2.bf16.msra.mxu0 %v15481_v15  ;;  %v8750_v15 = vld [vmem:[#allocation5 + $0xe8] sm:$0xff] }
 0x9af   :  { %13687 = vmatprep.subr.bf16.mxu0 %v15458_v54  ;;  %v15315_v54 = vcombine.low %v8774_v31, %v8786_v61  ;;  %v15292_v8 = vcombine.high %v8750_v15, %v8762_v46  ;;  %v8990_v61 = vld [vmem:[#allocation5 + $0x868] sm:$0xff] }
 0x9b0   :  { %13561 = vmatpush2.bf16.msra.mxu1 %v15885_v36  ;;  %v9156_v36 = vld [vmem:[#allocation5 + $0xd98] sm:$0xff] }
 0x9b1   :  { %13562 = vmatprep.subr.bf16.mxu1 %v15862_v14  ;;  %v15719_v14 = vcombine.low %v9180_v12, %v9192_v22  ;;  %v15696_v52 = vcombine.high %v9156_v36, %v9168_v32  ;;  %v9396_v22 = vld [vmem:[#allocation5 + $0x1518] sm:$0xff] }
 0x9b2   :  { %13688 = vmatpush2.bf16.msra.mxu0 %v15457_v40  ;;  %v8726_v40 = vld [vmem:[#allocation5 + $0x28] sm:$0xff] }
 0x9b3   :  { %13739 = vmatprep.subr.bf16.mxu0 %v15436_v33  ;;  %v15291_v33 = vcombine.low %v8750_v15, %v8762_v46  ;;  %v15268_v23 = vcombine.high %v8726_v40, %v8738_v62  ;;  %v8966_v46 = vld [vmem:[#allocation5 + $0x7a8] sm:$0xff] }
 0x9b4   :  { %13563 = vmatpush2.bf16.msra.mxu1 %v15861_v5  ;;  %v9132_v5 = vld [vmem:[#allocation5 + $0xcd8] sm:$0xff] }
 0x9b5   :  { %13564 = vmatprep.subr.bf16.mxu1 %v15838_v59  ;;  %v22054_v16 = vpop.f32.mrf.mxu0  ;;  %13690 = vmatmul.mubr.bf16.vlgmr.msra.gmra.mxu0 %v22016_v38  ;;  %v15695_v59 = vcombine.low %v9156_v36, %v9168_v32  ;;  %v15672_v44 = vcombine.high %v9132_v5, %v9144_v10  ;;  %v9372_v32 = vld [vmem:[#allocation5 + $0x1458] sm:$0xff] }
 0x9b6   :  { %13740 = vmatpush1.bf16.msra.mxu0 %v15435_v47  ;;  %13771 = vmatprep.mubr.bf16.mxu0 %v22014_v51  ;;  %v9086_v47 = vld [vmem:[#allocation5 + $0xb68] sm:$0xff] }
 0x9b7   :  { %v22058_v6 = vpop.f32.mrf.mxu0  ;;  %13741 = vmatprep.subr.bf16.mxu0 %v15412_v60  ;;  %v15267_v60 = vcombine.low %v8726_v40, %v8738_v62  ;;  %v15628_v41 = vcombine.high %v9086_v47, %v9098_v4  ;;  %v8942_v62 = vld [vmem:[#allocation5 + $0x6e8] sm:$0xff] }
 0x9b8   :  { %13565 = vmatpush2.bf16.msra.mxu1 %v15837_v55  ;;  %v9108_v55 = vld [vmem:[#allocation5 + $0xc18] sm:$0xff] }
 0x9b9   :  { %13616 = vmatprep.subr.bf16.mxu1 %v15816_v58  ;;  %v13449_v0 = vpop.f32.mrf.mxu0  ;;  %v15671_v58 = vcombine.low %v9132_v5, %v9144_v10  ;;  %v15648_v56 = vcombine.high %v9108_v55, %v9120_v63  ;;  %v9348_v10 = vld [vmem:[#allocation5 + $0x1398] sm:$0xff] }
 0x9ba   :  { %13742 = vmatpush1.bf16.msra.mxu0 %v15411_v17  ;;  %v9062_v17 = vld [vmem:[#allocation5 + $0xaa8] sm:$0xff]  ;;  %v15647_v0 = vcombine.low %v9108_v55, %v9120_v63  ;;  %v9324_v63 = vld [vmem:[#allocation5 + $0x12d8] sm:$0xff] }
 0x9bb   :  { %13567 = vmatmul.mubr.bf16.vlgmr.msra.gmra.mxu1 %v22038_v57  ;;  %v13450_v42 = vpop.f32.mrf.mxu0  ;;  %13743 = vmatprep.subr.bf16.mxu0 %v15388_v7  ;;  %v15627_v7 = vcombine.low %v9086_v47, %v9098_v4  ;;  %v15604_v20 = vcombine.high %v9062_v17, %v9074_v11  ;;  %v15603_v3 = vcombine.low %v9062_v17, %v9074_v11  ;;  %v8918_v4 = vld [vmem:[#allocation5 + $0x628] sm:$0xff]  ;;  %v8895_v11 = vld [vmem:[#allocation5 + $0x570] sm:$0xff] }
 0x9bc   :  { %13617 = vmatpush1.bf16.msra.mxu1 %v15815_v49  ;;  %13648 = vmatprep.mubr.bf16.mxu1 %v22036_v43  ;;  %v9468_v49 = vld [vmem:[#allocation5 + $0x1758] sm:$0xff] }
 0x9bd   :  { %13618 = vmatprep.subr.bf16.mxu1 %v15792_v24  ;;  %v9038_v24 = vld [vmem:[#allocation5 + $0x9e8] sm:$0xff]  ;;  %v16008_v19 = vcombine.high %v9468_v49, %v9480_v25  ;;  %v9444_v42 = vld [vmem:[#allocation5 + $0x1698] sm:$0xff]  ;;  %v16007_v13 = vcombine.low %v9468_v49, %v9480_v25 }
 0x9be   :  { %13744 = vmatpush1.bf16.msra.mxu0 %v15387_v37  ;;  %v9050_v37 = vld [vmem:[#allocation5 + $0xa48] sm:$0xff]  ;;  %v9300_v25 = vld [vmem:[#allocation5 + $0x1218] sm:$0xff] }
 0x9bf   :  { %13745 = vmatprep.subr.bf16.mxu0 %v15364_v1  ;;  %v9456_v1 = vld [vmem:[#allocation5 + $0x16f8] sm:$0xff]  ;;  %v15579_v21 = vcombine.low %v9038_v24, %v9050_v37 }
 0x9c0   :  { %13619 = vmatpush1.bf16.msra.mxu1 %v15791_v30  ;;  %v15580_v30 = vcombine.high %v9038_v24, %v9050_v37  ;;  %v15983_v31 = vcombine.low %v9444_v42, %v9456_v1  ;;  %v8871_v37 = vld [vmem:[#allocation5 + $0x4b0] sm:$0xff] }
 0x9c1   :  { %13620 = vmatprep.subr.bf16.mxu1 %v15768_v27  ;;  %v9026_v27 = vld [vmem:[#allocation5 + $0x988] sm:$0xff] }
 0x9c2   :  { %13746 = vmatpush1.bf16.msra.mxu0 %v15363_v29  ;;  %v15984_v29 = vcombine.high %v9444_v42, %v9456_v1  ;;  %v15555_v12 = vcombine.low %v9014_v18, %v9026_v27  ;;  %v9277_v1 = vld [vmem:[#allocation5 + $0x1160] sm:$0xff] }
 0x9c3   :  { %13747 = vmatprep.subr.bf16.mxu0 %v15340_v48  ;;  %v9432_v48 = vld [vmem:[#allocation5 + $0x1638] sm:$0xff] }
 0x9c4   :  { %13621 = vmatpush1.bf16.msra.mxu1 %v15767_v39  ;;  %v15556_v39 = vcombine.high %v9014_v18, %v9026_v27  ;;  %v15959_v15 = vcombine.low %v9420_v50, %v9432_v48  ;;  %v8847_v27 = vld [vmem:[#allocation5 + $0x3f0] sm:$0xff] }
 0x9c5   :  { %13622 = vmatprep.subr.bf16.mxu1 %v15744_v2  ;;  %v9002_v2 = vld [vmem:[#allocation5 + $0x8c8] sm:$0xff] }
 0x9c6   :  { %13748 = vmatpush1.bf16.msra.mxu0 %v15339_v34  ;;  %v15960_v34 = vcombine.high %v9420_v50, %v9432_v48  ;;  %v15531_v36 = vcombine.low %v8990_v61, %v9002_v2 }
 0x9c7   :  { %13749 = vmatprep.subr.bf16.mxu0 %v15316_v9  ;;  %v9408_v9 = vld [vmem:[#allocation5 + $0x1578] sm:$0xff] }
 0x9c8   :  { %13623 = vmatpush1.bf16.msra.mxu1 %v15743_v53  ;;  %v15532_v53 = vcombine.high %v8990_v61, %v9002_v2  ;;  %v15935_v40 = vcombine.low %v9396_v22, %v9408_v9 }
 0x9c9   :  { %13624 = vmatprep.subr.bf16.mxu1 %v15720_v35  ;;  %v8978_v35 = vld [vmem:[#allocation5 + $0x808] sm:$0xff] }
 0x9ca   :  { %13750 = vmatpush1.bf16.msra.mxu0 %v15315_v54  ;;  %v15936_v54 = vcombine.high %v9396_v22, %v9408_v9  ;;  %v15507_v5 = vcombine.low %v8966_v46, %v8978_v35  ;;  %v8835_v22 = vld [vmem:[#allocation5 + $0x390] sm:$0xff] }
 0x9cb   :  { %13751 = vmatprep.subr.bf16.mxu0 %v15292_v8  ;;  %v9384_v8 = vld [vmem:[#allocation5 + $0x14b8] sm:$0xff] }
 0x9cc   :  { %13625 = vmatpush1.bf16.msra.mxu1 %v15719_v14  ;;  %v15508_v14 = vcombine.high %v8966_v46, %v8978_v35  ;;  %v15911_v47 = vcombine.low %v9372_v32, %v9384_v8  ;;  %v9229_v46 = vld [vmem:[#allocation5 + $0xfe0] sm:$0xff] }
 0x9cd   :  { %13626 = vmatprep.subr.bf16.mxu1 %v15696_v52  ;;  %v8954_v52 = vld [vmem:[#allocation5 + $0x748] sm:$0xff]  ;;  %v9241_v35 = vld [vmem:[#allocation5 + $0x1040] sm:$0xff] }
 0x9ce   :  { %13752 = vmatpush1.bf16.msra.mxu0 %v15291_v33  ;;  %v15912_v33 = vcombine.high %v9372_v32, %v9384_v8  ;;  %v15483_v55 = vcombine.low %v8942_v62, %v8954_v52 }
 0x9cf   :  { %13753 = vmatprep.subr.bf16.mxu0 %v15268_v23  ;;  %v9360_v23 = vld [vmem:[#allocation5 + $0x13f8] sm:$0xff] }
 0x9d0   :  { %13627 = vmatpush1.bf16.msra.mxu1 %v15695_v59  ;;  %v15484_v59 = vcombine.high %v8942_v62, %v8954_v52  ;;  %v15887_v17 = vcombine.low %v9348_v10, %v9360_v23  ;;  %v15770_v52 = vcombine.high %v9229_v46, %v9241_v35 }
 0x9d1   :  { %13628 = vmatprep.subr.bf16.mxu1 %v15672_v44  ;;  %v8930_v44 = vld [vmem:[#allocation5 + $0x688] sm:$0xff] }
 0x9d2   :  { %13754 = vmatpush1.bf16.msra.mxu0 %v15267_v60  ;;  %v15888_v60 = vcombine.high %v9348_v10, %v9360_v23  ;;  %v15459_v49 = vcombine.low %v8918_v4, %v8930_v44  ;;  %v9205_v23 = vld [vmem:[#allocation5 + $0xf20] sm:$0xff] }
 0x9d3   :  { %13755 = vmatprep.subr.bf16.mxu0 %v15628_v41  ;;  %v9336_v41 = vld [vmem:[#allocation5 + $0x1338] sm:$0xff] }
 0x9d4   :  { %13629 = vmatpush1.bf16.msra.mxu1 %v15671_v58  ;;  %v15460_v58 = vcombine.high %v8918_v4, %v8930_v44  ;;  %v15863_v24 = vcombine.low %v9324_v63, %v9336_v41 }
 0x9d5   :  { %13630 = vmatprep.subr.bf16.mxu1 %v15648_v56  ;;  %v8907_v56 = vld [vmem:[#allocation5 + $0x5d0] sm:$0xff] }
 0x9d6   :  { %13756 = vmatpush2.bf16.msra.mxu0 %v15627_v7  ;;  %v15864_v7 = vcombine.high %v9324_v63, %v9336_v41  ;;  %v15437_v42 = vcombine.low %v8895_v11, %v8907_v56  ;;  %v8787_v63 = vld [vmem:[#allocation5 + $0x210] sm:$0xff] }
 0x9d7   :  { %13757 = vmatprep.subr.bf16.mxu0 %v15604_v20  ;;  %v9312_v20 = vld [vmem:[#allocation5 + $0x1278] sm:$0xff] }
 0x9d8   :  { %13631 = vmatpush1.bf16.msra.mxu1 %v15647_v0  ;;  %v15438_v0 = vcombine.high %v8895_v11, %v8907_v56  ;;  %v15839_v18 = vcombine.low %v9300_v25, %v9312_v20 }
 0x9d9   :  { %13632 = vmatprep.subr.bf16.mxu1 %v16008_v19  ;;  %v8883_v19 = vld [vmem:[#allocation5 + $0x510] sm:$0xff] }
 0x9da   :  { %13758 = vmatpush2.bf16.msra.mxu0 %v15603_v3  ;;  %v15840_v3 = vcombine.high %v9300_v25, %v9312_v20  ;;  %v15413_v48 = vcombine.low %v8871_v37, %v8883_v19 }
 0x9db   :  { %13759 = vmatprep.subr.bf16.mxu0 %v15580_v30  ;;  %v9289_v30 = vld [vmem:[#allocation5 + $0x11c0] sm:$0xff] }
 0x9dc   :  { %13633 = vmatpush2.bf16.msra.mxu1 %v16007_v13  ;;  %v15414_v13 = vcombine.high %v8871_v37, %v8883_v19  ;;  %v15818_v50 = vcombine.high %v9277_v1, %v9289_v30 }
 0x9dd   :  { %13634 = vmatprep.subr.bf16.mxu1 %v15984_v29  ;;  %v8859_v29 = vld [vmem:[#allocation5 + $0x450] sm:$0xff] }
 0x9de   :  { %13760 = vmatpush2.bf16.msra.mxu0 %v15579_v21  ;;  %v15390_v2 = vcombine.high %v8847_v27, %v8859_v29 }
 0x9df   :  { %13761 = vmatprep.subr.bf16.mxu0 %v15556_v39  ;;  %v9253_v39 = vld [vmem:[#allocation5 + $0x10a0] sm:$0xff] }
 0x9e0   :  { %13635 = vmatpush2.bf16.msra.mxu1 %v15983_v31  ;;  %v9265_v31 = vld [vmem:[#allocation5 + $0x1100] sm:$0xff] }
 0x9e1   :  { %13636 = vmatprep.subr.bf16.mxu1 %v15960_v34  ;;  %v15817_v34 = vcombine.low %v9277_v1, %v9289_v30  ;;  %v15793_v8 = vcombine.low %v9253_v39, %v9265_v31 }
 0x9e2   :  { %13762 = vmatpush2.bf16.msra.mxu0 %v15555_v12  ;;  %v8823_v12 = vld [vmem:[#allocation5 + $0x330] sm:$0xff] }
 0x9e3   :  { %13763 = vmatprep.subr.bf16.mxu0 %v15532_v53  ;;  %v15794_v53 = vcombine.high %v9253_v39, %v9265_v31  ;;  %v15366_v32 = vcombine.high %v8823_v12, %v8835_v22  ;;  %v15365_v10 = vcombine.low %v8823_v12, %v8835_v22 }
 0x9e4   :  { %13637 = vmatpush2.bf16.msra.mxu1 %v15959_v15  ;;  %v15389_v15 = vcombine.low %v8847_v27, %v8859_v29 }
 0x9e5   :  { %13638 = vmatprep.subr.bf16.mxu1 %v15936_v54 }
 0x9e6   :  { %13764 = vmatpush2.bf16.msra.mxu0 %v15531_v36 }
 0x9e7   :  { %13765 = vmatprep.subr.bf16.mxu0 %v15508_v14  ;;  %v8799_v14 = vld [vmem:[#allocation5 + $0x270] sm:$0xff] }
 0x9e8   :  { %13639 = vmatpush2.bf16.msra.mxu1 %v15935_v40  ;;  %v8811_v40 = vld [vmem:[#allocation5 + $0x2d0] sm:$0xff] }
 0x9e9   :  { %13640 = vmatprep.subr.bf16.mxu1 %v15912_v33  ;;  %v15342_v4 = vcombine.high %v8799_v14, %v8811_v40 }
 0x9ea   :  { %13766 = vmatpush2.bf16.msra.mxu0 %v15507_v5 }
 0x9eb   :  { %13767 = vmatprep.subr.bf16.mxu0 %v15484_v59  ;;  %v9217_v59 = vld [vmem:[#allocation5 + $0xf80] sm:$0xff] }
 0x9ec   :  { %13641 = vmatpush2.bf16.msra.mxu1 %v15911_v47  ;;  %v15745_v56 = vcombine.low %v9205_v23, %v9217_v59 }
 0x9ed   :  { %13642 = vmatprep.subr.bf16.mxu1 %v15888_v60  ;;  %v15769_v60 = vcombine.low %v9229_v46, %v9241_v35  ;;  %v9469_v35 = vld [vmem:[#allocation5 + $0x1760] sm:$0xff] }
 0x9ee   :  { %13768 = vmatpush2.bf16.msra.mxu0 %v15483_v55  ;;  %v8775_v55 = vld [vmem:[#allocation5 + $0x1b0] sm:$0xff] }
 0x9ef   :  { %13769 = vmatprep.subr.bf16.mxu0 %v15460_v58  ;;  %v9181_v58 = vld [vmem:[#allocation5 + $0xe60] sm:$0xff]  ;;  %v15318_v11 = vcombine.high %v8775_v55, %v8787_v63  ;;  %v15317_v20 = vcombine.low %v8775_v55, %v8787_v63 }
 0x9f0   :  { %13643 = vmatpush2.bf16.msra.mxu1 %v15887_v17  ;;  %v9193_v17 = vld [vmem:[#allocation5 + $0xec0] sm:$0xff] }
 0x9f1   :  { %13644 = vmatprep.subr.bf16.mxu1 %v15864_v7  ;;  %v8751_v7 = vld [vmem:[#allocation5 + $0xf0] sm:$0xff]  ;;  %v15722_v25 = vcombine.high %v9181_v58, %v9193_v17  ;;  %v15721_v19 = vcombine.low %v9181_v58, %v9193_v17  ;;  %v9421_v63 = vld [vmem:[#allocation5 + $0x15e0] sm:$0xff] }
 0x9f2   :  { %13770 = vmatpush2.bf16.msra.mxu0 %v15459_v49  ;;  %v8763_v49 = vld [vmem:[#allocation5 + $0x150] sm:$0xff] }
 0x9f3   :  { %13821 = vmatprep.subr.bf16.mxu0 %v15438_v0  ;;  %v9157_v0 = vld [vmem:[#allocation5 + $0xda0] sm:$0xff]  ;;  %v15294_v37 = vcombine.high %v8751_v7, %v8763_v49  ;;  %v15293_v30 = vcombine.low %v8751_v7, %v8763_v49  ;;  %v8991_v58 = vld [vmem:[#allocation5 + $0x870] sm:$0xff] }
 0x9f4   :  { %13645 = vmatpush2.bf16.msra.mxu1 %v15863_v24  ;;  %v9169_v24 = vld [vmem:[#allocation5 + $0xe00] sm:$0xff]  ;;  %v9003_v17 = vld [vmem:[#allocation5 + $0x8d0] sm:$0xff] }
 0x9f5   :  { %13646 = vmatprep.subr.bf16.mxu1 %v15840_v3  ;;  %v22062_v21 = vpop.f32.mrf.mxu0  ;;  %13772 = vmatmul.mubr.bf16.vlgmr.msra.gmra.mxu0 %v22016_v38  ;;  %v8727_v3 = vld [vmem:[#allocation5 + $0x30] sm:$0xff]  ;;  %v15698_v1 = vcombine.high %v9157_v0, %v9169_v24  ;;  %v15697_v29 = vcombine.low %v9157_v0, %v9169_v24  ;;  %v9397_v7 = vld [vmem:[#allocation5 + $0x1520] sm:$0xff] }
 0x9f6   :  { %13822 = vmatpush1.bf16.msra.mxu0 %v15437_v42  ;;  %13853 = vmatprep.mubr.bf16.mxu0 %v22014_v51  ;;  %v8739_v42 = vld [vmem:[#allocation5 + $0x90] sm:$0xff]  ;;  %v9409_v49 = vld [vmem:[#allocation5 + $0x1580] sm:$0xff] }
 0x9f7   :  { %v22066_v61 = vpop.f32.mrf.mxu0  ;;  %13823 = vmatprep.subr.bf16.mxu0 %v15414_v13  ;;  %v9133_v13 = vld [vmem:[#allocation5 + $0xce0] sm:$0xff]  ;;  %v15270_v27 = vcombine.high %v8727_v3, %v8739_v42  ;;  %v15269_v31 = vcombine.low %v8727_v3, %v8739_v42  ;;  %v8967_v0 = vld [vmem:[#allocation5 + $0x7b0] sm:$0xff] }
 0x9f8   :  { %13647 = vmatpush2.bf16.msra.mxu1 %v15839_v18  ;;  %v9145_v18 = vld [vmem:[#allocation5 + $0xd40] sm:$0xff]  ;;  %v8979_v24 = vld [vmem:[#allocation5 + $0x810] sm:$0xff] }
 0x9f9   :  { %13698 = vmatprep.subr.bf16.mxu1 %v15818_v50  ;;  %v13531_v9 = vpop.f32.mrf.mxu0  ;;  %v9087_v50 = vld [vmem:[#allocation5 + $0xb70] sm:$0xff]  ;;  %v15674_v39 = vcombine.high %v9133_v13, %v9145_v18  ;;  %v15673_v22 = vcombine.low %v9133_v13, %v9145_v18  ;;  %v9373_v3 = vld [vmem:[#allocation5 + $0x1460] sm:$0xff] }
 0x9fa   :  { %13824 = vmatpush1.bf16.msra.mxu0 %v15413_v48  ;;  %v9099_v48 = vld [vmem:[#allocation5 + $0xbd0] sm:$0xff]  ;;  %v9385_v42 = vld [vmem:[#allocation5 + $0x14c0] sm:$0xff] }
 0x9fb   :  { %13649 = vmatmul.mubr.bf16.vlgmr.msra.gmra.mxu1 %v22038_v57  ;;  %v13404_v54 = vpop.f32.mrf.mxu1  ;;  %v13532_v36 = vpop.f32.mrf.mxu0  ;;  %13825 = vmatprep.subr.bf16.mxu0 %v15390_v2  ;;  %v9109_v2 = vld [vmem:[#allocation5 + $0xc20] sm:$0xff]  ;;  %v15630_v12 = vcombine.high %v9087_v50, %v9099_v48  ;;  %v9063_v9 = vld [vmem:[#allocation5 + $0xab0] sm:$0xff]  ;;  %v15629_v46 = vcombine.low %v9087_v50, %v9099_v48 }
 0x9fc   :  { %13699 = vmatpush1.bf16.msra.mxu1 %v15817_v34  ;;  %13730 = vmatprep.mubr.bf16.mxu1 %v22036_v43  ;;  %v22071_v33 = vadd.f32 %v13404_v54, %v22047_v28  ;;  %v15746_v28 = vcombine.high %v9205_v23, %v9217_v59  ;;  %v9121_v34 = vld [vmem:[#allocation5 + $0xc80] sm:$0xff]  ;;  %v8943_v13 = vld [vmem:[#allocation5 + $0x6f0] sm:$0xff] }
 0x9fd   :  { %v13406_v62 = vpop.f32.mrf.mxu1  ;;  %13700 = vmatprep.subr.bf16.mxu1 %v15794_v53  ;;  %v9075_v53 = vld [vmem:[#allocation5 + $0xb10] sm:$0xff]  ;;  %v9481_v54 = vld [vmem:[#allocation5 + $0x17c0] sm:$0xff] }
 0x9fe   :  { %v22074_v5 = vadd.f32 %v13406_v62, %v22050_v45  ;;  %13826 = vmatpush1.bf16.msra.mxu0 %v15389_v15  ;;  %v15341_v45 = vcombine.low %v8799_v14, %v8811_v40  ;;  %v15650_v15 = vcombine.high %v9109_v2, %v9121_v34  ;;  %v15606_v36 = vcombine.high %v9063_v9, %v9075_v53  ;;  %v9051_v14 = vld [vmem:[#allocation5 + $0xa50] sm:$0xff]  ;;  %v9349_v50 = vld [vmem:[#allocation5 + $0x13a0] sm:$0xff] }
 0x9ff   :  { %v13408_v47 = vpop.f32.mrf.mxu1  ;;  %13827 = vmatprep.subr.bf16.mxu0 %v15366_v32  ;;  %v15649_v32 = vcombine.low %v9109_v2, %v9121_v34  ;;  %v16010_v40 = vcombine.high %v9469_v35, %v9481_v54  ;;  %v15605_v62 = vcombine.low %v9063_v9, %v9075_v53  ;;  %v16009_v59 = vcombine.low %v9469_v35, %v9481_v54  ;;  %v8955_v18 = vld [vmem:[#allocation5 + $0x750] sm:$0xff]  ;;  %v9361_v48 = vld [vmem:[#allocation5 + $0x1400] sm:$0xff]  ;;  %v8896_v35 = vld [vmem:[#allocation5 + $0x578] sm:$0xff] }
 0xa00   :  { %v14337_v44 = vcombine.low %v22071_v33, %v22074_v5  ;;  %13701 = vmatpush1.bf16.msra.mxu1 %v15793_v8  ;;  %v9039_v8 = vld [vmem:[#allocation5 + $0x9f0] sm:$0xff]  ;;  %v9325_v9 = vld [vmem:[#allocation5 + $0x12e0] sm:$0xff]  ;;  %v8908_v54 = vld [vmem:[#allocation5 + $0x5d8] sm:$0xff] }
 0xa01   :  { %v13409_v41 = vpop.f32.mrf.mxu1  ;;  %13702 = vmatprep.subr.bf16.mxu1 %v15770_v52  ;;  %v9445_v52 = vld [vmem:[#allocation5 + $0x16a0] sm:$0xff]  ;;  %v15582_v23 = vcombine.high %v9039_v8, %v9051_v14  ;;  %v9015_v47 = vld [vmem:[#allocation5 + $0x930] sm:$0xff]  ;;  %v15581_v55 = vcombine.low %v9039_v8, %v9051_v14  ;;  %v9158_v33 = vld [vmem:[#allocation5 + $0xda8] sm:$0xff] }
 0xa02   :  { %13828 = vmatpush1.bf16.msra.mxu0 %v15365_v10  ;;  %v9457_v10 = vld [vmem:[#allocation5 + $0x1700] sm:$0xff]  ;;  %v8919_v2 = vld [vmem:[#allocation5 + $0x630] sm:$0xff]  ;;  %v9170_v5 = vld [vmem:[#allocation5 + $0xe08] sm:$0xff] }
 0xa03   :  { %13829 = vmatprep.subr.bf16.mxu0 %v15342_v4  ;;  %v9027_v4 = vld [vmem:[#allocation5 + $0x990] sm:$0xff]  ;;  %v9433_v41 = vld [vmem:[#allocation5 + $0x1640] sm:$0xff] }
 0xa04   :  { %13703 = vmatpush1.bf16.msra.mxu1 %v15769_v60  ;;  %v15986_v60 = vcombine.high %v9445_v52, %v9457_v10  ;;  %v8931_v34 = vld [vmem:[#allocation5 + $0x690] sm:$0xff]  ;;  %v9337_v53 = vld [vmem:[#allocation5 + $0x1340] sm:$0xff] }
 0xa05   :  { %13704 = vmatprep.subr.bf16.mxu1 %v15746_v28  ;;  %v15558_v28 = vcombine.high %v9015_v47, %v9027_v4  ;;  %v9301_v8 = vld [vmem:[#allocation5 + $0x1220] sm:$0xff] }
 0xa06   :  { %13830 = vmatpush1.bf16.msra.mxu0 %v15341_v45  ;;  %v15985_v45 = vcombine.low %v9445_v52, %v9457_v10  ;;  %v9313_v14 = vld [vmem:[#allocation5 + $0x1280] sm:$0xff]  ;;  %v8872_v52 = vld [vmem:[#allocation5 + $0x4b8] sm:$0xff] }
 0xa07   :  { %13831 = vmatprep.subr.bf16.mxu0 %v15318_v11  ;;  %v15962_v11 = vcombine.high %v9421_v63, %v9433_v41  ;;  %v8884_v10 = vld [vmem:[#allocation5 + $0x518] sm:$0xff] }
 0xa08   :  { %13705 = vmatpush1.bf16.msra.mxu1 %v15745_v56  ;;  %v15557_v56 = vcombine.low %v9015_v47, %v9027_v4  ;;  %v9278_v47 = vld [vmem:[#allocation5 + $0x1168] sm:$0xff] }
 0xa09   :  { %13706 = vmatprep.subr.bf16.mxu1 %v15722_v25  ;;  %v15534_v25 = vcombine.high %v8991_v58, %v9003_v17  ;;  %v9290_v4 = vld [vmem:[#allocation5 + $0x11c8] sm:$0xff] }
 0xa0a   :  { %13832 = vmatpush1.bf16.msra.mxu0 %v15317_v20  ;;  %v15961_v20 = vcombine.low %v9421_v63, %v9433_v41  ;;  %v8848_v63 = vld [vmem:[#allocation5 + $0x3f8] sm:$0xff] }
 0xa0b   :  { %13833 = vmatprep.subr.bf16.mxu0 %v15294_v37  ;;  %v15938_v37 = vcombine.high %v9397_v7, %v9409_v49  ;;  %v8860_v41 = vld [vmem:[#allocation5 + $0x458] sm:$0xff] }
 0xa0c   :  { %13707 = vmatpush1.bf16.msra.mxu1 %v15721_v19  ;;  %v15533_v19 = vcombine.low %v8991_v58, %v9003_v17  ;;  %v15415_v58 = vcombine.low %v8872_v52, %v8884_v10  ;;  %v9254_v17 = vld [vmem:[#allocation5 + $0x10a8] sm:$0xff] }
 0xa0d   :  { %13708 = vmatprep.subr.bf16.mxu1 %v15698_v1  ;;  %v15510_v1 = vcombine.high %v8967_v0, %v8979_v24 }
 0xa0e   :  { %13834 = vmatpush1.bf16.msra.mxu0 %v15293_v30  ;;  %v15937_v30 = vcombine.low %v9397_v7, %v9409_v49  ;;  %v15392_v7 = vcombine.high %v8848_v63, %v8860_v41  ;;  %v15819_v49 = vcombine.low %v9278_v47, %v9290_v4 }
 0xa0f   :  { %13835 = vmatprep.subr.bf16.mxu0 %v15270_v27  ;;  %v15914_v27 = vcombine.high %v9373_v3, %v9385_v42 }
 0xa10   :  { %13709 = vmatpush1.bf16.msra.mxu1 %v15697_v29  ;;  %v15509_v29 = vcombine.low %v8967_v0, %v8979_v24 }
 0xa11   :  { %13710 = vmatprep.subr.bf16.mxu1 %v15674_v39  ;;  %v15486_v39 = vcombine.high %v8943_v13, %v8955_v18 }
 0xa12   :  { %13836 = vmatpush1.bf16.msra.mxu0 %v15269_v31  ;;  %v15913_v31 = vcombine.low %v9373_v3, %v9385_v42  ;;  %v9242_v3 = vld [vmem:[#allocation5 + $0x1048] sm:$0xff] }
 0xa13   :  { %13837 = vmatprep.subr.bf16.mxu0 %v15630_v12  ;;  %v15890_v12 = vcombine.high %v9349_v50, %v9361_v48 }
 0xa14   :  { %13711 = vmatpush1.bf16.msra.mxu1 %v15673_v22  ;;  %v15485_v22 = vcombine.low %v8943_v13, %v8955_v18  ;;  %v8800_v18 = vld [vmem:[#allocation5 + $0x278] sm:$0xff] }
 0xa15   :  { %13712 = vmatprep.subr.bf16.mxu1 %v15650_v15  ;;  %v15462_v15 = vcombine.high %v8919_v2, %v8931_v34 }
 0xa16   :  { %13838 = vmatpush2.bf16.msra.mxu0 %v15629_v46  ;;  %v15889_v46 = vcombine.low %v9349_v50, %v9361_v48 }
 0xa17   :  { %13839 = vmatprep.subr.bf16.mxu0 %v15606_v36  ;;  %v15866_v36 = vcombine.high %v9325_v9, %v9337_v53 }
 0xa18   :  { %13713 = vmatpush1.bf16.msra.mxu1 %v15649_v32  ;;  %v15461_v32 = vcombine.low %v8919_v2, %v8931_v34  ;;  %v9206_v2 = vld [vmem:[#allocation5 + $0xf28] sm:$0xff] }
 0xa19   :  { %13714 = vmatprep.subr.bf16.mxu1 %v16010_v40  ;;  %v15440_v40 = vcombine.high %v8896_v35, %v8908_v54  ;;  %v9218_v34 = vld [vmem:[#allocation5 + $0xf88] sm:$0xff] }
 0xa1a   :  { %13840 = vmatpush2.bf16.msra.mxu0 %v15605_v62  ;;  %v15865_v62 = vcombine.low %v9325_v9, %v9337_v53 }
 0xa1b   :  { %13841 = vmatprep.subr.bf16.mxu0 %v15582_v23  ;;  %v15842_v23 = vcombine.high %v9301_v8, %v9313_v14 }
 0xa1c   :  { %13715 = vmatpush2.bf16.msra.mxu1 %v16009_v59  ;;  %v15439_v59 = vcombine.low %v8896_v35, %v8908_v54  ;;  %v15748_v54 = vcombine.high %v9206_v2, %v9218_v34 }
 0xa1d   :  { %13716 = vmatprep.subr.bf16.mxu1 %v15986_v60  ;;  %v15416_v60 = vcombine.high %v8872_v52, %v8884_v10  ;;  %v8752_v52 = vld [vmem:[#allocation5 + $0xf8] sm:$0xff] }
 0xa1e   :  { %13842 = vmatpush2.bf16.msra.mxu0 %v15581_v55  ;;  %v15841_v55 = vcombine.low %v9301_v8, %v9313_v14  ;;  %v9194_v8 = vld [vmem:[#allocation5 + $0xec8] sm:$0xff]  ;;  %v8764_v10 = vld [vmem:[#allocation5 + $0x158] sm:$0xff] }
 0xa1f   :  { %13843 = vmatprep.subr.bf16.mxu0 %v15558_v28 }
 0xa20   :  { %13717 = vmatpush2.bf16.msra.mxu1 %v15985_v45  ;;  %v15820_v45 = vcombine.high %v9278_v47, %v9290_v4  ;;  %v8728_v4 = vld [vmem:[#allocation5 + $0x38] sm:$0xff] }
 0xa21   :  { %13718 = vmatprep.subr.bf16.mxu1 %v15962_v11  ;;  %v9266_v11 = vld [vmem:[#allocation5 + $0x1108] sm:$0xff] }
 0xa22   :  { %13844 = vmatpush2.bf16.msra.mxu0 %v15557_v56  ;;  %v15796_v24 = vcombine.high %v9254_v17, %v9266_v11  ;;  %v15795_v13 = vcombine.low %v9254_v17, %v9266_v11  ;;  %v15699_v17 = vcombine.low %v9158_v33, %v9170_v5  ;;  %v9088_v11 = vld [vmem:[#allocation5 + $0xb78] sm:$0xff] }
 0xa23   :  { %13845 = vmatprep.subr.bf16.mxu0 %v15534_v25  ;;  %v8824_v25 = vld [vmem:[#allocation5 + $0x338] sm:$0xff] }
 0xa24   :  { %13719 = vmatpush2.bf16.msra.mxu1 %v15961_v20  ;;  %v8836_v20 = vld [vmem:[#allocation5 + $0x398] sm:$0xff] }
 0xa25   :  { %13720 = vmatprep.subr.bf16.mxu1 %v15938_v37  ;;  %v15391_v37 = vcombine.low %v8848_v63, %v8860_v41  ;;  %v15295_v63 = vcombine.low %v8752_v52, %v8764_v10  ;;  %v9134_v41 = vld [vmem:[#allocation5 + $0xce8] sm:$0xff] }
 0xa26   :  { %13846 = vmatpush2.bf16.msra.mxu0 %v15533_v19  ;;  %v9230_v19 = vld [vmem:[#allocation5 + $0xfe8] sm:$0xff] }
 0xa27   :  { %13847 = vmatprep.subr.bf16.mxu0 %v15510_v1  ;;  %v15772_v50 = vcombine.high %v9230_v19, %v9242_v3  ;;  %v15771_v53 = vcombine.low %v9230_v19, %v9242_v3  ;;  %v9064_v19 = vld [vmem:[#allocation5 + $0xab8] sm:$0xff] }
 0xa28   :  { %13721 = vmatpush2.bf16.msra.mxu1 %v15937_v30  ;;  %v15368_v30 = vcombine.high %v8824_v25, %v8836_v20  ;;  %v9076_v3 = vld [vmem:[#allocation5 + $0xb18] sm:$0xff] }
 0xa29   :  { %13722 = vmatprep.subr.bf16.mxu1 %v15914_v27  ;;  %v8812_v27 = vld [vmem:[#allocation5 + $0x2d8] sm:$0xff] }
 0xa2a   :  { %13848 = vmatpush2.bf16.msra.mxu0 %v15509_v29 }
 0xa2b   :  { %13849 = vmatprep.subr.bf16.mxu0 %v15486_v39 }
 0xa2c   :  { %13723 = vmatpush2.bf16.msra.mxu1 %v15913_v31  ;;  %v15367_v31 = vcombine.low %v8824_v25, %v8836_v20  ;;  %v9110_v20 = vld [vmem:[#allocation5 + $0xc28] sm:$0xff] }
 0xa2d   :  { %13724 = vmatprep.subr.bf16.mxu1 %v15890_v12 }
 0xa2e   :  { %13850 = vmatpush2.bf16.msra.mxu0 %v15485_v22  ;;  %v15344_v22 = vcombine.high %v8800_v18, %v8812_v27 }
 0xa2f   :  { %13851 = vmatprep.subr.bf16.mxu0 %v15462_v15  ;;  %v8776_v15 = vld [vmem:[#allocation5 + $0x1b8] sm:$0xff] }
 0xa30   :  { %13725 = vmatpush2.bf16.msra.mxu1 %v15889_v46  ;;  %v8788_v46 = vld [vmem:[#allocation5 + $0x218] sm:$0xff] }
 0xa31   :  { %13726 = vmatprep.subr.bf16.mxu1 %v15866_v36  ;;  %v15343_v36 = vcombine.low %v8800_v18, %v8812_v27  ;;  %v15320_v14 = vcombine.high %v8776_v15, %v8788_v46  ;;  %v15608_v18 = vcombine.high %v9064_v19, %v9076_v3 }
 0xa32   :  { %13852 = vmatpush2.bf16.msra.mxu0 %v15461_v32  ;;  %v9182_v32 = vld [vmem:[#allocation5 + $0xe68] sm:$0xff] }
 0xa33   :  { %13903 = vmatprep.subr.bf16.mxu0 %v15440_v40  ;;  %v15723_v47 = vcombine.low %v9182_v32, %v9194_v8 }
 0xa34   :  { %13727 = vmatpush2.bf16.msra.mxu1 %v15865_v62  ;;  %v15747_v62 = vcombine.low %v9206_v2, %v9218_v34  ;;  %v9458_v2 = vld [vmem:[#allocation5 + $0x1708] sm:$0xff] }
 0xa35   :  { %13728 = vmatprep.subr.bf16.mxu1 %v15842_v23  ;;  %v22078_v28 = vpop.f32.mrf.mxu0  ;;  %13854 = vmatmul.mubr.bf16.vlgmr.msra.gmra.mxu0 %v22016_v38  ;;  %v15724_v23 = vcombine.high %v9182_v32, %v9194_v8 }
 0xa36   :  { %13904 = vmatpush1.bf16.msra.mxu0 %v15439_v59  ;;  %13935 = vmatprep.mubr.bf16.mxu0 %v22014_v51  ;;  %v15319_v59 = vcombine.low %v8776_v15, %v8788_v46  ;;  %v9422_v46 = vld [vmem:[#allocation5 + $0x15e8] sm:$0xff] }
 0xa37   :  { %v22082_v56 = vpop.f32.mrf.mxu0  ;;  %13905 = vmatprep.subr.bf16.mxu0 %v15416_v60  ;;  %v8740_v60 = vld [vmem:[#allocation5 + $0x98] sm:$0xff] }
 0xa38   :  { %13729 = vmatpush2.bf16.msra.mxu1 %v15841_v55  ;;  %v15700_v55 = vcombine.high %v9158_v33, %v9170_v5  ;;  %v15271_v25 = vcombine.low %v8728_v4, %v8740_v60  ;;  %v9374_v5 = vld [vmem:[#allocation5 + $0x1468] sm:$0xff] }
 0xa39   :  { %13780 = vmatprep.subr.bf16.mxu1 %v15820_v45  ;;  %v13613_v0 = vpop.f32.mrf.mxu0  ;;  %v9146_v45 = vld [vmem:[#allocation5 + $0xd48] sm:$0xff] }
 0xa3a   :  { %13906 = vmatpush1.bf16.msra.mxu0 %v15415_v58  ;;  %v15272_v58 = vcombine.high %v8728_v4, %v8740_v60  ;;  %v9122_v0 = vld [vmem:[#allocation5 + $0xc88] sm:$0xff]  ;;  %v8944_v60 = vld [vmem:[#allocation5 + $0x6f8] sm:$0xff] }
 0xa3b   :  { %v13486_v42 = vpop.f32.mrf.mxu1  ;;  %13731 = vmatmul.mubr.bf16.vlgmr.msra.gmra.mxu1 %v22038_v57  ;;  %v13614_v1 = vpop.f32.mrf.mxu0  ;;  %13907 = vmatprep.subr.bf16.mxu0 %v15392_v7  ;;  %v9100_v7 = vld [vmem:[#allocation5 + $0xbd8] sm:$0xff]  ;;  %v15651_v27 = vcombine.low %v9110_v20, %v9122_v0 }
 0xa3c   :  { %13781 = vmatpush1.bf16.msra.mxu1 %v15819_v49  ;;  %13812 = vmatprep.mubr.bf16.mxu1 %v22036_v43  ;;  %v13487_v48 = vadd.f32 %v13486_v42, %v22054_v16  ;;  %v14345_v16 = vrot.slane %v14337_v44, %v21837_v26  ;;  %v15296_v44 = vcombine.high %v8752_v52, %v8764_v10  ;;  %v8968_v10 = vld [vmem:[#allocation5 + $0x7b8] sm:$0xff] }
 0xa3d   :  { %v13488_v29 = vpop.f32.mrf.mxu1  ;;  %13782 = vmatprep.subr.bf16.mxu1 %v15796_v24  ;;  %v15676_v49 = vcombine.high %v9134_v41, %v9146_v45  ;;  %v15632_v24 = vcombine.high %v9088_v11, %v9100_v7  ;;  %v15652_v42 = vcombine.high %v9110_v20, %v9122_v0  ;;  %v15631_v1 = vcombine.low %v9088_v11, %v9100_v7  ;;  %v8920_v7 = vld [vmem:[#allocation5 + $0x638] sm:$0xff]  ;;  %v9326_v0 = vld [vmem:[#allocation5 + $0x12e8] sm:$0xff] }
 0xa3e   :  { %v13489_v39 = vadd.f32 %v13488_v29, %v22058_v6  ;;  %13908 = vmatpush1.bf16.msra.mxu0 %v15391_v37  ;;  %v15675_v37 = vcombine.low %v9134_v41, %v9146_v45  ;;  %v9040_v29 = vld [vmem:[#allocation5 + $0x9f8] sm:$0xff]  ;;  %v9350_v45 = vld [vmem:[#allocation5 + $0x13a8] sm:$0xff] }
 0xa3f   :  { %v13490_v12 = vpop.f32.mrf.mxu1  ;;  %13909 = vmatprep.subr.bf16.mxu0 %v15368_v30  ;;  %v9470_v30 = vld [vmem:[#allocation5 + $0x1768] sm:$0xff] }
 0xa40   :  { %v14338_v9 = vcombine.low %v13487_v48, %v13489_v39  ;;  %13783 = vmatpush1.bf16.msra.mxu1 %v15795_v13  ;;  %v9482_v13 = vld [vmem:[#allocation5 + $0x17c8] sm:$0xff]  ;;  %v15607_v39 = vcombine.low %v9064_v19, %v9076_v3  ;;  %v8897_v3 = vld [vmem:[#allocation5 + $0x580] sm:$0xff] }
 0xa41   :  { %v13491_v35 = vpop.f32.mrf.mxu1  ;;  %13784 = vmatprep.subr.bf16.mxu1 %v15772_v50  ;;  %v9052_v50 = vld [vmem:[#allocation5 + $0xa58] sm:$0xff]  ;;  %v16012_v48 = vcombine.high %v9470_v30, %v9482_v13  ;;  %v16011_v12 = vcombine.low %v9470_v30, %v9482_v13  ;;  %v9302_v13 = vld [vmem:[#allocation5 + $0x1228] sm:$0xff] }
 0xa42   :  { %v14352_v6 = vrot.slane %v14338_v9, %v21837_v26  ;;  %13910 = vmatpush1.bf16.msra.mxu0 %v15367_v31  ;;  %v9446_v31 = vld [vmem:[#allocation5 + $0x16a8] sm:$0xff]  ;;  %v15584_v34 = vcombine.high %v9040_v29, %v9052_v50  ;;  %v9028_v9 = vld [vmem:[#allocation5 + $0x998] sm:$0xff]  ;;  %v15583_v15 = vcombine.low %v9040_v29, %v9052_v50  ;;  %v8873_v50 = vld [vmem:[#allocation5 + $0x4c0] sm:$0xff] }
 0xa43   :  { %13911 = vmatprep.subr.bf16.mxu0 %v15344_v22  ;;  %v9016_v22 = vld [vmem:[#allocation5 + $0x938] sm:$0xff]  ;;  %v9434_v35 = vld [vmem:[#allocation5 + $0x1648] sm:$0xff] }
 0xa44   :  { %v14353_v40 = vcombine.low %v14345_v16, %v14352_v6  ;;  %13785 = vmatpush1.bf16.msra.mxu1 %v15771_v53  ;;  %v15988_v53 = vcombine.high %v9446_v31, %v9458_v2  ;;  %v15987_v16 = vcombine.low %v9446_v31, %v9458_v2  ;;  %v8992_v6 = vld [vmem:[#allocation5 + $0x878] sm:$0xff]  ;;  %v15964_v32 = vcombine.high %v9422_v46, %v9434_v35  ;;  %v9279_v2 = vld [vmem:[#allocation5 + $0x1170] sm:$0xff] }
 0xa45   :  { %13786 = vmatprep.subr.bf16.mxu1 %v15748_v54  ;;  %v15560_v54 = vcombine.high %v9016_v22, %v9028_v9  ;;  %v15559_v8 = vcombine.low %v9016_v22, %v9028_v9  ;;  %v15963_v52 = vcombine.low %v9422_v46, %v9434_v35  ;;  %v8849_v9 = vld [vmem:[#allocation5 + $0x400] sm:$0xff] }
 0xa46   :  { %14445 = vst [vmem:[#allocation7] sm:$0xff] %v14353_v40  ;;  %13912 = vmatpush1.bf16.msra.mxu0 %v15343_v36  ;;  %v9004_v36 = vld [vmem:[#allocation5 + $0x8d8] sm:$0xff]  ;;  %v9410_v40 = vld [vmem:[#allocation5 + $0x1588] sm:$0xff] }
 0xa47   :  { %13913 = vmatprep.subr.bf16.mxu0 %v15320_v14  ;;  %v9398_v14 = vld [vmem:[#allocation5 + $0x1528] sm:$0xff]  ;;  %v15535_v33 = vcombine.low %v8992_v6, %v9004_v36 }
 0xa48   :  { %13787 = vmatpush1.bf16.msra.mxu1 %v15747_v62  ;;  %v15536_v62 = vcombine.high %v8992_v6, %v9004_v36  ;;  %v15939_v4 = vcombine.low %v9398_v14, %v9410_v40 }
 0xa49   :  { %13788 = vmatprep.subr.bf16.mxu1 %v15724_v23  ;;  %v8980_v23 = vld [vmem:[#allocation5 + $0x818] sm:$0xff] }
 0xa4a   :  { %13914 = vmatpush1.bf16.msra.mxu0 %v15319_v59  ;;  %v15940_v59 = vcombine.high %v9398_v14, %v9410_v40  ;;  %v15511_v41 = vcombine.low %v8968_v10, %v8980_v23  ;;  %v8837_v14 = vld [vmem:[#allocation5 + $0x3a0] sm:$0xff] }
 0xa4b   :  { %13915 = vmatprep.subr.bf16.mxu0 %v15296_v44  ;;  %v9386_v44 = vld [vmem:[#allocation5 + $0x14c8] sm:$0xff] }
 0xa4c   :  { %13789 = vmatpush1.bf16.msra.mxu1 %v15723_v47  ;;  %v15512_v47 = vcombine.high %v8968_v10, %v8980_v23  ;;  %v15915_v11 = vcombine.low %v9374_v5, %v9386_v44  ;;  %v9231_v10 = vld [vmem:[#allocation5 + $0xff0] sm:$0xff] }
 0xa4d   :  { %13790 = vmatprep.subr.bf16.mxu1 %v15700_v55  ;;  %v8956_v55 = vld [vmem:[#allocation5 + $0x758] sm:$0xff]  ;;  %v9243_v23 = vld [vmem:[#allocation5 + $0x1050] sm:$0xff] }
 0xa4e   :  { %13916 = vmatpush1.bf16.msra.mxu0 %v15295_v63  ;;  %v15916_v63 = vcombine.high %v9374_v5, %v9386_v44  ;;  %v15487_v20 = vcombine.low %v8944_v60, %v8956_v55 }
 0xa4f   :  { %13917 = vmatprep.subr.bf16.mxu0 %v15272_v58  ;;  %v9362_v58 = vld [vmem:[#allocation5 + $0x1408] sm:$0xff] }
 0xa50   :  { %13791 = vmatpush1.bf16.msra.mxu1 %v15699_v17  ;;  %v15488_v17 = vcombine.high %v8944_v60, %v8956_v55  ;;  %v15891_v19 = vcombine.low %v9350_v45, %v9362_v58  ;;  %v15774_v55 = vcombine.high %v9231_v10, %v9243_v23 }
 0xa51   :  { %13792 = vmatprep.subr.bf16.mxu1 %v15676_v49  ;;  %v8932_v49 = vld [vmem:[#allocation5 + $0x698] sm:$0xff] }
 0xa52   :  { %13918 = vmatpush1.bf16.msra.mxu0 %v15271_v25  ;;  %v15892_v25 = vcombine.high %v9350_v45, %v9362_v58  ;;  %v15463_v30 = vcombine.low %v8920_v7, %v8932_v49  ;;  %v9207_v58 = vld [vmem:[#allocation5 + $0xf30] sm:$0xff] }
 0xa53   :  { %13919 = vmatprep.subr.bf16.mxu0 %v15632_v24  ;;  %v9338_v24 = vld [vmem:[#allocation5 + $0x1348] sm:$0xff] }
 0xa54   :  { %13793 = vmatpush1.bf16.msra.mxu1 %v15675_v37  ;;  %v15464_v37 = vcombine.high %v8920_v7, %v8932_v49  ;;  %v15867_v29 = vcombine.low %v9326_v0, %v9338_v24 }
 0xa55   :  { %13794 = vmatprep.subr.bf16.mxu1 %v15652_v42  ;;  %v8909_v42 = vld [vmem:[#allocation5 + $0x5e0] sm:$0xff] }
 0xa56   :  { %13920 = vmatpush2.bf16.msra.mxu0 %v15631_v1  ;;  %v15868_v1 = vcombine.high %v9326_v0, %v9338_v24  ;;  %v15441_v31 = vcombine.low %v8897_v3, %v8909_v42  ;;  %v8789_v0 = vld [vmem:[#allocation5 + $0x220] sm:$0xff] }
 0xa57   :  { %13921 = vmatprep.subr.bf16.mxu0 %v15608_v18  ;;  %v9314_v18 = vld [vmem:[#allocation5 + $0x1288] sm:$0xff] }
 0xa58   :  { %13795 = vmatpush1.bf16.msra.mxu1 %v15651_v27  ;;  %v15442_v27 = vcombine.high %v8897_v3, %v8909_v42  ;;  %v15843_v22 = vcombine.low %v9302_v13, %v9314_v18 }
 0xa59   :  { %13796 = vmatprep.subr.bf16.mxu1 %v16012_v48  ;;  %v8885_v48 = vld [vmem:[#allocation5 + $0x520] sm:$0xff] }
 0xa5a   :  { %13922 = vmatpush2.bf16.msra.mxu0 %v15607_v39  ;;  %v15844_v39 = vcombine.high %v9302_v13, %v9314_v18  ;;  %v15417_v35 = vcombine.low %v8873_v50, %v8885_v48 }
 0xa5b   :  { %13923 = vmatprep.subr.bf16.mxu0 %v15584_v34  ;;  %v9291_v34 = vld [vmem:[#allocation5 + $0x11d0] sm:$0xff] }
 0xa5c   :  { %13797 = vmatpush2.bf16.msra.mxu1 %v16011_v12  ;;  %v15418_v12 = vcombine.high %v8873_v50, %v8885_v48  ;;  %v15822_v46 = vcombine.high %v9279_v2, %v9291_v34 }
 0xa5d   :  { %13798 = vmatprep.subr.bf16.mxu1 %v15988_v53  ;;  %v8861_v53 = vld [vmem:[#allocation5 + $0x460] sm:$0xff] }
 0xa5e   :  { %13924 = vmatpush2.bf16.msra.mxu0 %v15583_v15  ;;  %v15394_v36 = vcombine.high %v8849_v9, %v8861_v53 }
 0xa5f   :  { %13925 = vmatprep.subr.bf16.mxu0 %v15560_v54  ;;  %v9255_v54 = vld [vmem:[#allocation5 + $0x10b0] sm:$0xff] }
 0xa60   :  { %13799 = vmatpush2.bf16.msra.mxu1 %v15987_v16  ;;  %v9267_v16 = vld [vmem:[#allocation5 + $0x1110] sm:$0xff] }
 0xa61   :  { %13800 = vmatprep.subr.bf16.mxu1 %v15964_v32  ;;  %v15821_v32 = vcombine.low %v9279_v2, %v9291_v34  ;;  %v15797_v44 = vcombine.low %v9255_v54, %v9267_v16 }
 0xa62   :  { %13926 = vmatpush2.bf16.msra.mxu0 %v15559_v8  ;;  %v8825_v8 = vld [vmem:[#allocation5 + $0x340] sm:$0xff] }
 0xa63   :  { %13927 = vmatprep.subr.bf16.mxu0 %v15536_v62  ;;  %v15798_v62 = vcombine.high %v9255_v54, %v9267_v16  ;;  %v15370_v5 = vcombine.high %v8825_v8, %v8837_v14  ;;  %v15369_v45 = vcombine.low %v8825_v8, %v8837_v14 }
 0xa64   :  { %13801 = vmatpush2.bf16.msra.mxu1 %v15963_v52  ;;  %v15393_v52 = vcombine.low %v8849_v9, %v8861_v53 }
 0xa65   :  { %13802 = vmatprep.subr.bf16.mxu1 %v15940_v59 }
 0xa66   :  { %13928 = vmatpush2.bf16.msra.mxu0 %v15535_v33 }
 0xa67   :  { %13929 = vmatprep.subr.bf16.mxu0 %v15512_v47  ;;  %v8801_v47 = vld [vmem:[#allocation5 + $0x280] sm:$0xff] }
 0xa68   :  { %13803 = vmatpush2.bf16.msra.mxu1 %v15939_v4  ;;  %v8813_v4 = vld [vmem:[#allocation5 + $0x2e0] sm:$0xff] }
 0xa69   :  { %13804 = vmatprep.subr.bf16.mxu1 %v15916_v63  ;;  %v15346_v7 = vcombine.high %v8801_v47, %v8813_v4 }
 0xa6a   :  { %13930 = vmatpush2.bf16.msra.mxu0 %v15511_v41 }
 0xa6b   :  { %13931 = vmatprep.subr.bf16.mxu0 %v15488_v17  ;;  %v9219_v17 = vld [vmem:[#allocation5 + $0xf90] sm:$0xff] }
 0xa6c   :  { %13805 = vmatpush2.bf16.msra.mxu1 %v15915_v11  ;;  %v15749_v42 = vcombine.low %v9207_v58, %v9219_v17 }
 0xa6d   :  { %13806 = vmatprep.subr.bf16.mxu1 %v15892_v25  ;;  %v15773_v25 = vcombine.low %v9231_v10, %v9243_v23  ;;  %v9471_v23 = vld [vmem:[#allocation5 + $0x1770] sm:$0xff] }
 0xa6e   :  { %13932 = vmatpush2.bf16.msra.mxu0 %v15487_v20  ;;  %v8777_v20 = vld [vmem:[#allocation5 + $0x1c0] sm:$0xff] }
 0xa6f   :  { %13933 = vmatprep.subr.bf16.mxu0 %v15464_v37  ;;  %v9183_v37 = vld [vmem:[#allocation5 + $0xe70] sm:$0xff]  ;;  %v15322_v3 = vcombine.high %v8777_v20, %v8789_v0  ;;  %v15321_v18 = vcombine.low %v8777_v20, %v8789_v0 }
 0xa70   :  { %13807 = vmatpush2.bf16.msra.mxu1 %v15891_v19  ;;  %v9195_v19 = vld [vmem:[#allocation5 + $0xed0] sm:$0xff] }
 0xa71   :  { %13808 = vmatprep.subr.bf16.mxu1 %v15868_v1  ;;  %v8753_v1 = vld [vmem:[#allocation5 + $0x100] sm:$0xff]  ;;  %v15726_v13 = vcombine.high %v9183_v37, %v9195_v19  ;;  %v15725_v48 = vcombine.low %v9183_v37, %v9195_v19  ;;  %v9423_v0 = vld [vmem:[#allocation5 + $0x15f0] sm:$0xff] }
 0xa72   :  { %13934 = vmatpush2.bf16.msra.mxu0 %v15463_v30  ;;  %v8765_v30 = vld [vmem:[#allocation5 + $0x160] sm:$0xff] }
 0xa73   :  { %13985 = vmatprep.subr.bf16.mxu0 %v15442_v27  ;;  %v9159_v27 = vld [vmem:[#allocation5 + $0xdb0] sm:$0xff]  ;;  %v15298_v50 = vcombine.high %v8753_v1, %v8765_v30  ;;  %v15297_v34 = vcombine.low %v8753_v1, %v8765_v30  ;;  %v8993_v37 = vld [vmem:[#allocation5 + $0x880] sm:$0xff] }
 0xa74   :  { %13809 = vmatpush2.bf16.msra.mxu1 %v15867_v29  ;;  %v9171_v29 = vld [vmem:[#allocation5 + $0xe10] sm:$0xff]  ;;  %v9005_v19 = vld [vmem:[#allocation5 + $0x8e0] sm:$0xff] }
 0xa75   :  { %13810 = vmatprep.subr.bf16.mxu1 %v15844_v39  ;;  %v22093_v15 = vpop.f32.mrf.mxu0  ;;  %13936 = vmatmul.mubr.bf16.vlgmr.msra.gmra.mxu0 %v22016_v38  ;;  %v8729_v39 = vld [vmem:[#allocation5 + $0x40] sm:$0xff]  ;;  %v15702_v2 = vcombine.high %v9159_v27, %v9171_v29  ;;  %v15701_v53 = vcombine.low %v9159_v27, %v9171_v29  ;;  %v9399_v1 = vld [vmem:[#allocation5 + $0x1530] sm:$0xff] }
 0xa76   :  { %13986 = vmatpush1.bf16.msra.mxu0 %v15441_v31  ;;  %14017 = vmatprep.mubr.bf16.mxu0 %v22014_v51  ;;  %v8741_v31 = vld [vmem:[#allocation5 + $0xa0] sm:$0xff]  ;;  %v9411_v30 = vld [vmem:[#allocation5 + $0x1590] sm:$0xff] }
 0xa77   :  { %v22097_v6 = vpop.f32.mrf.mxu0  ;;  %13987 = vmatprep.subr.bf16.mxu0 %v15418_v12  ;;  %v9135_v12 = vld [vmem:[#allocation5 + $0xcf0] sm:$0xff]  ;;  %v15274_v9 = vcombine.high %v8729_v39, %v8741_v31  ;;  %v15273_v16 = vcombine.low %v8729_v39, %v8741_v31  ;;  %v8969_v27 = vld [vmem:[#allocation5 + $0x7c0] sm:$0xff] }
 0xa78   :  { %13811 = vmatpush2.bf16.msra.mxu1 %v15843_v22  ;;  %v9147_v22 = vld [vmem:[#allocation5 + $0xd50] sm:$0xff]  ;;  %v8981_v29 = vld [vmem:[#allocation5 + $0x820] sm:$0xff] }
 0xa79   :  { %13862 = vmatprep.subr.bf16.mxu1 %v15822_v46  ;;  %v13695_v40 = vpop.f32.mrf.mxu0  ;;  %v9089_v46 = vld [vmem:[#allocation5 + $0xb80] sm:$0xff]  ;;  %v15678_v54 = vcombine.high %v9135_v12, %v9147_v22  ;;  %v15677_v14 = vcombine.low %v9135_v12, %v9147_v22  ;;  %v9375_v39 = vld [vmem:[#allocation5 + $0x1470] sm:$0xff] }
 0xa7a   :  { %13988 = vmatpush1.bf16.msra.mxu0 %v15417_v35  ;;  %v9101_v35 = vld [vmem:[#allocation5 + $0xbe0] sm:$0xff]  ;;  %v9387_v31 = vld [vmem:[#allocation5 + $0x14d0] sm:$0xff] }
 0xa7b   :  { %v13568_v59 = vpop.f32.mrf.mxu1  ;;  %13813 = vmatmul.mubr.bf16.vlgmr.msra.gmra.mxu1 %v22038_v57  ;;  %v13696_v33 = vpop.f32.mrf.mxu0  ;;  %13989 = vmatprep.subr.bf16.mxu0 %v15394_v36  ;;  %v9111_v36 = vld [vmem:[#allocation5 + $0xc30] sm:$0xff]  ;;  %v15634_v8 = vcombine.high %v9089_v46, %v9101_v35  ;;  %v9065_v40 = vld [vmem:[#allocation5 + $0xac0] sm:$0xff]  ;;  %v15633_v10 = vcombine.low %v9089_v46, %v9101_v35 }
 0xa7c   :  { %13863 = vmatpush1.bf16.msra.mxu1 %v15821_v32  ;;  %13894 = vmatprep.mubr.bf16.mxu1 %v22036_v43  ;;  %v22102_v63 = vadd.f32 %v13568_v59, %v22062_v21  ;;  %v15750_v21 = vcombine.high %v9207_v58, %v9219_v17  ;;  %v9123_v32 = vld [vmem:[#allocation5 + $0xc90] sm:$0xff]  ;;  %v8945_v12 = vld [vmem:[#allocation5 + $0x700] sm:$0xff] }
 0xa7d   :  { %v13570_v60 = vpop.f32.mrf.mxu1  ;;  %13864 = vmatprep.subr.bf16.mxu1 %v15798_v62  ;;  %v9077_v62 = vld [vmem:[#allocation5 + $0xb20] sm:$0xff]  ;;  %v9483_v59 = vld [vmem:[#allocation5 + $0x17d0] sm:$0xff] }
 0xa7e   :  { %v22105_v41 = vadd.f32 %v13570_v60, %v22066_v61  ;;  %13990 = vmatpush1.bf16.msra.mxu0 %v15393_v52  ;;  %v15345_v61 = vcombine.low %v8801_v47, %v8813_v4  ;;  %v15654_v52 = vcombine.high %v9111_v36, %v9123_v32  ;;  %v15610_v33 = vcombine.high %v9065_v40, %v9077_v62  ;;  %v9053_v47 = vld [vmem:[#allocation5 + $0xa60] sm:$0xff]  ;;  %v9351_v46 = vld [vmem:[#allocation5 + $0x13b0] sm:$0xff] }
 0xa7f   :  { %v13572_v11 = vpop.f32.mrf.mxu1  ;;  %13991 = vmatprep.subr.bf16.mxu0 %v15370_v5  ;;  %v15653_v5 = vcombine.low %v9111_v36, %v9123_v32  ;;  %v16014_v4 = vcombine.high %v9471_v23, %v9483_v59  ;;  %v15609_v60 = vcombine.low %v9065_v40, %v9077_v62  ;;  %v16013_v17 = vcombine.low %v9471_v23, %v9483_v59  ;;  %v8957_v22 = vld [vmem:[#allocation5 + $0x760] sm:$0xff]  ;;  %v9363_v35 = vld [vmem:[#allocation5 + $0x1410] sm:$0xff]  ;;  %v8898_v23 = vld [vmem:[#allocation5 + $0x588] sm:$0xff] }
 0xa80   :  { %v14354_v49 = vcombine.low %v22102_v63, %v22105_v41  ;;  %13865 = vmatpush1.bf16.msra.mxu1 %v15797_v44  ;;  %v9041_v44 = vld [vmem:[#allocation5 + $0xa00] sm:$0xff]  ;;  %v9327_v40 = vld [vmem:[#allocation5 + $0x12f0] sm:$0xff]  ;;  %v8910_v59 = vld [vmem:[#allocation5 + $0x5e8] sm:$0xff] }
 0xa81   :  { %v13573_v24 = vpop.f32.mrf.mxu1  ;;  %13866 = vmatprep.subr.bf16.mxu1 %v15774_v55  ;;  %v9447_v55 = vld [vmem:[#allocation5 + $0x16b0] sm:$0xff]  ;;  %v15586_v58 = vcombine.high %v9041_v44, %v9053_v47  ;;  %v9017_v11 = vld [vmem:[#allocation5 + $0x940] sm:$0xff]  ;;  %v15585_v20 = vcombine.low %v9041_v44, %v9053_v47  ;;  %v9160_v63 = vld [vmem:[#allocation5 + $0xdb8] sm:$0xff] }
 0xa82   :  { %13992 = vmatpush1.bf16.msra.mxu0 %v15369_v45  ;;  %v9459_v45 = vld [vmem:[#allocation5 + $0x1710] sm:$0xff]  ;;  %v8921_v36 = vld [vmem:[#allocation5 + $0x640] sm:$0xff]  ;;  %v9172_v41 = vld [vmem:[#allocation5 + $0xe18] sm:$0xff] }
 0xa83   :  { %13993 = vmatprep.subr.bf16.mxu0 %v15346_v7  ;;  %v9029_v7 = vld [vmem:[#allocation5 + $0x9a0] sm:$0xff]  ;;  %v9435_v24 = vld [vmem:[#allocation5 + $0x1650] sm:$0xff] }
 0xa84   :  { %13867 = vmatpush1.bf16.msra.mxu1 %v15773_v25  ;;  %v15990_v25 = vcombine.high %v9447_v55, %v9459_v45  ;;  %v8933_v32 = vld [vmem:[#allocation5 + $0x6a0] sm:$0xff]  ;;  %v9339_v62 = vld [vmem:[#allocation5 + $0x1350] sm:$0xff] }
 0xa85   :  { %13868 = vmatprep.subr.bf16.mxu1 %v15750_v21  ;;  %v15562_v21 = vcombine.high %v9017_v11, %v9029_v7  ;;  %v9303_v44 = vld [vmem:[#allocation5 + $0x1230] sm:$0xff] }
 0xa86   :  { %13994 = vmatpush1.bf16.msra.mxu0 %v15345_v61  ;;  %v15989_v61 = vcombine.low %v9447_v55, %v9459_v45  ;;  %v9315_v47 = vld [vmem:[#allocation5 + $0x1290] sm:$0xff]  ;;  %v8874_v55 = vld [vmem:[#allocation5 + $0x4c8] sm:$0xff] }
 0xa87   :  { %13995 = vmatprep.subr.bf16.mxu0 %v15322_v3  ;;  %v15966_v3 = vcombine.high %v9423_v0, %v9435_v24  ;;  %v8886_v45 = vld [vmem:[#allocation5 + $0x528] sm:$0xff] }
 0xa88   :  { %13869 = vmatpush1.bf16.msra.mxu1 %v15749_v42  ;;  %v15561_v42 = vcombine.low %v9017_v11, %v9029_v7  ;;  %v9280_v11 = vld [vmem:[#allocation5 + $0x1178] sm:$0xff] }
 0xa89   :  { %13870 = vmatprep.subr.bf16.mxu1 %v15726_v13  ;;  %v15538_v13 = vcombine.high %v8993_v37, %v9005_v19  ;;  %v9292_v7 = vld [vmem:[#allocation5 + $0x11d8] sm:$0xff] }
 0xa8a   :  { %13996 = vmatpush1.bf16.msra.mxu0 %v15321_v18  ;;  %v15965_v18 = vcombine.low %v9423_v0, %v9435_v24  ;;  %v8850_v0 = vld [vmem:[#allocation5 + $0x408] sm:$0xff] }
 0xa8b   :  { %13997 = vmatprep.subr.bf16.mxu0 %v15298_v50  ;;  %v15942_v50 = vcombine.high %v9399_v1, %v9411_v30  ;;  %v8862_v24 = vld [vmem:[#allocation5 + $0x468] sm:$0xff] }
 0xa8c   :  { %13871 = vmatpush1.bf16.msra.mxu1 %v15725_v48  ;;  %v15537_v48 = vcombine.low %v8993_v37, %v9005_v19  ;;  %v15419_v37 = vcombine.low %v8874_v55, %v8886_v45  ;;  %v9256_v19 = vld [vmem:[#allocation5 + $0x10b8] sm:$0xff] }
 0xa8d   :  { %13872 = vmatprep.subr.bf16.mxu1 %v15702_v2  ;;  %v15514_v2 = vcombine.high %v8969_v27, %v8981_v29 }
 0xa8e   :  { %13998 = vmatpush1.bf16.msra.mxu0 %v15297_v34  ;;  %v15941_v34 = vcombine.low %v9399_v1, %v9411_v30  ;;  %v15396_v1 = vcombine.high %v8850_v0, %v8862_v24  ;;  %v15823_v30 = vcombine.low %v9280_v11, %v9292_v7 }
 0xa8f   :  { %13999 = vmatprep.subr.bf16.mxu0 %v15274_v9  ;;  %v15918_v9 = vcombine.high %v9375_v39, %v9387_v31 }
 0xa90   :  { %13873 = vmatpush1.bf16.msra.mxu1 %v15701_v53  ;;  %v15513_v53 = vcombine.low %v8969_v27, %v8981_v29 }
 0xa91   :  { %13874 = vmatprep.subr.bf16.mxu1 %v15678_v54  ;;  %v15490_v54 = vcombine.high %v8945_v12, %v8957_v22 }
 0xa92   :  { %14000 = vmatpush1.bf16.msra.mxu0 %v15273_v16  ;;  %v15917_v16 = vcombine.low %v9375_v39, %v9387_v31  ;;  %v9244_v39 = vld [vmem:[#allocation5 + $0x1058] sm:$0xff] }
 0xa93   :  { %14001 = vmatprep.subr.bf16.mxu0 %v15634_v8  ;;  %v15894_v8 = vcombine.high %v9351_v46, %v9363_v35 }
 0xa94   :  { %13875 = vmatpush1.bf16.msra.mxu1 %v15677_v14  ;;  %v15489_v14 = vcombine.low %v8945_v12, %v8957_v22  ;;  %v8802_v22 = vld [vmem:[#allocation5 + $0x288] sm:$0xff] }
 0xa95   :  { %13876 = vmatprep.subr.bf16.mxu1 %v15654_v52  ;;  %v15466_v52 = vcombine.high %v8921_v36, %v8933_v32 }
 0xa96   :  { %14002 = vmatpush2.bf16.msra.mxu0 %v15633_v10  ;;  %v15893_v10 = vcombine.low %v9351_v46, %v9363_v35 }
 0xa97   :  { %14003 = vmatprep.subr.bf16.mxu0 %v15610_v33  ;;  %v15870_v33 = vcombine.high %v9327_v40, %v9339_v62 }
 0xa98   :  { %13877 = vmatpush1.bf16.msra.mxu1 %v15653_v5  ;;  %v15465_v5 = vcombine.low %v8921_v36, %v8933_v32  ;;  %v9208_v36 = vld [vmem:[#allocation5 + $0xf38] sm:$0xff] }
 0xa99   :  { %13878 = vmatprep.subr.bf16.mxu1 %v16014_v4  ;;  %v15444_v4 = vcombine.high %v8898_v23, %v8910_v59  ;;  %v9220_v32 = vld [vmem:[#allocation5 + $0xf98] sm:$0xff] }
 0xa9a   :  { %14004 = vmatpush2.bf16.msra.mxu0 %v15609_v60  ;;  %v15869_v60 = vcombine.low %v9327_v40, %v9339_v62 }
 0xa9b   :  { %14005 = vmatprep.subr.bf16.mxu0 %v15586_v58  ;;  %v15846_v58 = vcombine.high %v9303_v44, %v9315_v47 }
 0xa9c   :  { %13879 = vmatpush2.bf16.msra.mxu1 %v16013_v17  ;;  %v15443_v17 = vcombine.low %v8898_v23, %v8910_v59  ;;  %v15752_v59 = vcombine.high %v9208_v36, %v9220_v32 }
 0xa9d   :  { %13880 = vmatprep.subr.bf16.mxu1 %v15990_v25  ;;  %v15420_v25 = vcombine.high %v8874_v55, %v8886_v45  ;;  %v8754_v55 = vld [vmem:[#allocation5 + $0x108] sm:$0xff] }
 0xa9e   :  { %14006 = vmatpush2.bf16.msra.mxu0 %v15585_v20  ;;  %v15845_v20 = vcombine.low %v9303_v44, %v9315_v47  ;;  %v9196_v44 = vld [vmem:[#allocation5 + $0xed8] sm:$0xff]  ;;  %v8766_v45 = vld [vmem:[#allocation5 + $0x168] sm:$0xff] }
 0xa9f   :  { %14007 = vmatprep.subr.bf16.mxu0 %v15562_v21 }
 0xaa0   :  { %13881 = vmatpush2.bf16.msra.mxu1 %v15989_v61  ;;  %v15824_v61 = vcombine.high %v9280_v11, %v9292_v7  ;;  %v8730_v7 = vld [vmem:[#allocation5 + $0x48] sm:$0xff] }
 0xaa1   :  { %13882 = vmatprep.subr.bf16.mxu1 %v15966_v3  ;;  %v9268_v3 = vld [vmem:[#allocation5 + $0x1118] sm:$0xff] }
 0xaa2   :  { %14008 = vmatpush2.bf16.msra.mxu0 %v15561_v42  ;;  %v15800_v29 = vcombine.high %v9256_v19, %v9268_v3  ;;  %v15799_v12 = vcombine.low %v9256_v19, %v9268_v3  ;;  %v15703_v19 = vcombine.low %v9160_v63, %v9172_v41  ;;  %v9090_v3 = vld [vmem:[#allocation5 + $0xb88] sm:$0xff] }
 0xaa3   :  { %14009 = vmatprep.subr.bf16.mxu0 %v15538_v13  ;;  %v8826_v13 = vld [vmem:[#allocation5 + $0x348] sm:$0xff] }
 0xaa4   :  { %13883 = vmatpush2.bf16.msra.mxu1 %v15965_v18  ;;  %v8838_v18 = vld [vmem:[#allocation5 + $0x3a8] sm:$0xff] }
 0xaa5   :  { %13884 = vmatprep.subr.bf16.mxu1 %v15942_v50  ;;  %v15395_v50 = vcombine.low %v8850_v0, %v8862_v24  ;;  %v15299_v0 = vcombine.low %v8754_v55, %v8766_v45  ;;  %v9136_v24 = vld [vmem:[#allocation5 + $0xcf8] sm:$0xff] }
 0xaa6   :  { %14010 = vmatpush2.bf16.msra.mxu0 %v15537_v48  ;;  %v9232_v48 = vld [vmem:[#allocation5 + $0xff8] sm:$0xff] }
 0xaa7   :  { %14011 = vmatprep.subr.bf16.mxu0 %v15514_v2  ;;  %v15776_v46 = vcombine.high %v9232_v48, %v9244_v39  ;;  %v15775_v62 = vcombine.low %v9232_v48, %v9244_v39  ;;  %v9066_v48 = vld [vmem:[#allocation5 + $0xac8] sm:$0xff] }
 0xaa8   :  { %13885 = vmatpush2.bf16.msra.mxu1 %v15941_v34  ;;  %v15372_v34 = vcombine.high %v8826_v13, %v8838_v18  ;;  %v9078_v39 = vld [vmem:[#allocation5 + $0xb28] sm:$0xff] }
 0xaa9   :  { %13886 = vmatprep.subr.bf16.mxu1 %v15918_v9  ;;  %v8814_v9 = vld [vmem:[#allocation5 + $0x2e8] sm:$0xff] }
 0xaaa   :  { %14012 = vmatpush2.bf16.msra.mxu0 %v15513_v53 }
 0xaab   :  { %14013 = vmatprep.subr.bf16.mxu0 %v15490_v54 }
 0xaac   :  { %13887 = vmatpush2.bf16.msra.mxu1 %v15917_v16  ;;  %v15371_v16 = vcombine.low %v8826_v13, %v8838_v18  ;;  %v9112_v18 = vld [vmem:[#allocation5 + $0xc38] sm:$0xff] }
 0xaad   :  { %13888 = vmatprep.subr.bf16.mxu1 %v15894_v8 }
 0xaae   :  { %14014 = vmatpush2.bf16.msra.mxu0 %v15489_v14  ;;  %v15348_v14 = vcombine.high %v8802_v22, %v8814_v9 }
 0xaaf   :  { %14015 = vmatprep.subr.bf16.mxu0 %v15466_v52  ;;  %v8778_v52 = vld [vmem:[#allocation5 + $0x1c8] sm:$0xff] }
 0xab0   :  { %13889 = vmatpush2.bf16.msra.mxu1 %v15893_v10  ;;  %v8790_v10 = vld [vmem:[#allocation5 + $0x228] sm:$0xff] }
 0xab1   :  { %13890 = vmatprep.subr.bf16.mxu1 %v15870_v33  ;;  %v15347_v33 = vcombine.low %v8802_v22, %v8814_v9  ;;  %v15324_v47 = vcombine.high %v8778_v52, %v8790_v10  ;;  %v15612_v22 = vcombine.high %v9066_v48, %v9078_v39 }
 0xab2   :  { %14016 = vmatpush2.bf16.msra.mxu0 %v15465_v5  ;;  %v9184_v5 = vld [vmem:[#allocation5 + $0xe78] sm:$0xff] }
 0xab3   :  { %14067 = vmatprep.subr.bf16.mxu0 %v15444_v4  ;;  %v15727_v11 = vcombine.low %v9184_v5, %v9196_v44 }
 0xab4   :  { %13891 = vmatpush2.bf16.msra.mxu1 %v15869_v60  ;;  %v15751_v60 = vcombine.low %v9208_v36, %v9220_v32  ;;  %v9460_v36 = vld [vmem:[#allocation5 + $0x1718] sm:$0xff] }
 0xab5   :  { %13892 = vmatprep.subr.bf16.mxu1 %v15846_v58  ;;  %v22109_v21 = vpop.f32.mrf.mxu0  ;;  %14018 = vmatmul.mubr.bf16.vlgmr.msra.gmra.mxu0 %v22016_v38  ;;  %v15728_v58 = vcombine.high %v9184_v5, %v9196_v44 }
 0xab6   :  { %14068 = vmatpush1.bf16.msra.mxu0 %v15443_v17  ;;  %14099 = vmatprep.mubr.bf16.mxu0 %v22014_v51  ;;  %v15323_v17 = vcombine.low %v8778_v52, %v8790_v10  ;;  %v9424_v10 = vld [vmem:[#allocation5 + $0x15f8] sm:$0xff] }
 0xab7   :  { %v22113_v42 = vpop.f32.mrf.mxu0  ;;  %14069 = vmatprep.subr.bf16.mxu0 %v15420_v25  ;;  %v8742_v25 = vld [vmem:[#allocation5 + $0xa8] sm:$0xff] }
 0xab8   :  { %13893 = vmatpush2.bf16.msra.mxu1 %v15845_v20  ;;  %v15704_v20 = vcombine.high %v9160_v63, %v9172_v41  ;;  %v15275_v13 = vcombine.low %v8730_v7, %v8742_v25  ;;  %v9376_v41 = vld [vmem:[#allocation5 + $0x1478] sm:$0xff] }
 0xab9   :  { %13944 = vmatprep.subr.bf16.mxu1 %v15824_v61  ;;  %v13777_v27 = vpop.f32.mrf.mxu0  ;;  %v9148_v61 = vld [vmem:[#allocation5 + $0xd58] sm:$0xff] }
 0xaba   :  { %14070 = vmatpush1.bf16.msra.mxu0 %v15419_v37  ;;  %v15276_v37 = vcombine.high %v8730_v7, %v8742_v25  ;;  %v9124_v27 = vld [vmem:[#allocation5 + $0xc98] sm:$0xff]  ;;  %v8946_v25 = vld [vmem:[#allocation5 + $0x708] sm:$0xff] }
 0xabb   :  { %v13650_v31 = vpop.f32.mrf.mxu1  ;;  %13895 = vmatmul.mubr.bf16.vlgmr.msra.gmra.mxu1 %v22038_v57  ;;  %v13778_v2 = vpop.f32.mrf.mxu0  ;;  %14071 = vmatprep.subr.bf16.mxu0 %v15396_v1  ;;  %v9102_v1 = vld [vmem:[#allocation5 + $0xbe8] sm:$0xff]  ;;  %v15655_v9 = vcombine.low %v9112_v18, %v9124_v27 }
 0xabc   :  { %13945 = vmatpush1.bf16.msra.mxu1 %v15823_v30  ;;  %13976 = vmatprep.mubr.bf16.mxu1 %v22036_v43  ;;  %v13651_v35 = vadd.f32 %v13650_v31, %v22078_v28  ;;  %v14362_v28 = vrot.slane %v14354_v49, %v21837_v26  ;;  %v15300_v49 = vcombine.high %v8754_v55, %v8766_v45  ;;  %v8970_v45 = vld [vmem:[#allocation5 + $0x7c8] sm:$0xff] }
 0xabd   :  { %v13652_v53 = vpop.f32.mrf.mxu1  ;;  %13946 = vmatprep.subr.bf16.mxu1 %v15800_v29  ;;  %v15680_v30 = vcombine.high %v9136_v24, %v9148_v61  ;;  %v15636_v29 = vcombine.high %v9090_v3, %v9102_v1  ;;  %v15656_v31 = vcombine.high %v9112_v18, %v9124_v27  ;;  %v15635_v2 = vcombine.low %v9090_v3, %v9102_v1  ;;  %v8922_v1 = vld [vmem:[#allocation5 + $0x648] sm:$0xff]  ;;  %v9328_v27 = vld [vmem:[#allocation5 + $0x12f8] sm:$0xff] }
 0xabe   :  { %v13653_v54 = vadd.f32 %v13652_v53, %v22082_v56  ;;  %14072 = vmatpush1.bf16.msra.mxu0 %v15395_v50  ;;  %v15679_v50 = vcombine.low %v9136_v24, %v9148_v61  ;;  %v9042_v53 = vld [vmem:[#allocation5 + $0xa08] sm:$0xff]  ;;  %v9352_v61 = vld [vmem:[#allocation5 + $0x13b8] sm:$0xff] }
 0xabf   :  { %v13654_v8 = vpop.f32.mrf.mxu1  ;;  %14073 = vmatprep.subr.bf16.mxu0 %v15372_v34  ;;  %v9472_v34 = vld [vmem:[#allocation5 + $0x1778] sm:$0xff] }
 0xac0   :  { %v14355_v40 = vcombine.low %v13651_v35, %v13653_v54  ;;  %13947 = vmatpush1.bf16.msra.mxu1 %v15799_v12  ;;  %v9484_v12 = vld [vmem:[#allocation5 + $0x17d8] sm:$0xff]  ;;  %v15611_v54 = vcombine.low %v9066_v48, %v9078_v39  ;;  %v8899_v39 = vld [vmem:[#allocation5 + $0x590] sm:$0xff] }
 0xac1   :  { %v13655_v23 = vpop.f32.mrf.mxu1  ;;  %13948 = vmatprep.subr.bf16.mxu1 %v15776_v46  ;;  %v9054_v46 = vld [vmem:[#allocation5 + $0xa68] sm:$0xff]  ;;  %v16016_v35 = vcombine.high %v9472_v34, %v9484_v12  ;;  %v16015_v8 = vcombine.low %v9472_v34, %v9484_v12  ;;  %v9304_v12 = vld [vmem:[#allocation5 + $0x1238] sm:$0xff] }
 0xac2   :  { %v14369_v56 = vrot.slane %v14355_v40, %v21837_v26  ;;  %14074 = vmatpush1.bf16.msra.mxu0 %v15371_v16  ;;  %v9448_v16 = vld [vmem:[#allocation5 + $0x16b8] sm:$0xff]  ;;  %v15588_v32 = vcombine.high %v9042_v53, %v9054_v46  ;;  %v9030_v40 = vld [vmem:[#allocation5 + $0x9a8] sm:$0xff]  ;;  %v15587_v52 = vcombine.low %v9042_v53, %v9054_v46  ;;  %v8875_v46 = vld [vmem:[#allocation5 + $0x4d0] sm:$0xff] }
 0xac3   :  { %14075 = vmatprep.subr.bf16.mxu0 %v15348_v14  ;;  %v9018_v14 = vld [vmem:[#allocation5 + $0x948] sm:$0xff]  ;;  %v9436_v23 = vld [vmem:[#allocation5 + $0x1658] sm:$0xff] }
 0xac4   :  { %v14370_v4 = vcombine.low %v14362_v28, %v14369_v56  ;;  %13949 = vmatpush1.bf16.msra.mxu1 %v15775_v62  ;;  %v15992_v62 = vcombine.high %v9448_v16, %v9460_v36  ;;  %v15991_v28 = vcombine.low %v9448_v16, %v9460_v36  ;;  %v8994_v56 = vld [vmem:[#allocation5 + $0x888] sm:$0xff]  ;;  %v15968_v5 = vcombine.high %v9424_v10, %v9436_v23  ;;  %v9281_v36 = vld [vmem:[#allocation5 + $0x1180] sm:$0xff] }
 0xac5   :  { %13950 = vmatprep.subr.bf16.mxu1 %v15752_v59  ;;  %v15564_v59 = vcombine.high %v9018_v14, %v9030_v40  ;;  %v15563_v44 = vcombine.low %v9018_v14, %v9030_v40  ;;  %v15967_v55 = vcombine.low %v9424_v10, %v9436_v23  ;;  %v8851_v40 = vld [vmem:[#allocation5 + $0x410] sm:$0xff] }
 0xac6   :  { %14446 = vst [vmem:[#allocation7 + $0x8] sm:$0xff] %v14370_v4  ;;  %14076 = vmatpush1.bf16.msra.mxu0 %v15347_v33  ;;  %v9006_v33 = vld [vmem:[#allocation5 + $0x8e8] sm:$0xff]  ;;  %v9412_v4 = vld [vmem:[#allocation5 + $0x1598] sm:$0xff] }
 0xac7   :  { %14077 = vmatprep.subr.bf16.mxu0 %v15324_v47  ;;  %v9400_v47 = vld [vmem:[#allocation5 + $0x1538] sm:$0xff]  ;;  %v15539_v63 = vcombine.low %v8994_v56, %v9006_v33 }
 0xac8   :  { %13951 = vmatpush1.bf16.msra.mxu1 %v15751_v60  ;;  %v15540_v60 = vcombine.high %v8994_v56, %v9006_v33  ;;  %v15943_v7 = vcombine.low %v9400_v47, %v9412_v4 }
 0xac9   :  { %13952 = vmatprep.subr.bf16.mxu1 %v15728_v58  ;;  %v8982_v58 = vld [vmem:[#allocation5 + $0x828] sm:$0xff] }
 0xaca   :  { %14078 = vmatpush1.bf16.msra.mxu0 %v15323_v17  ;;  %v15944_v17 = vcombine.high %v9400_v47, %v9412_v4  ;;  %v15515_v24 = vcombine.low %v8970_v45, %v8982_v58  ;;  %v8839_v47 = vld [vmem:[#allocation5 + $0x3b0] sm:$0xff] }
 0xacb   :  { %14079 = vmatprep.subr.bf16.mxu0 %v15300_v49  ;;  %v9388_v49 = vld [vmem:[#allocation5 + $0x14d8] sm:$0xff] }
 0xacc   :  { %13953 = vmatpush1.bf16.msra.mxu1 %v15727_v11  ;;  %v15516_v11 = vcombine.high %v8970_v45, %v8982_v58  ;;  %v15919_v3 = vcombine.low %v9376_v41, %v9388_v49  ;;  %v9233_v45 = vld [vmem:[#allocation5 + $0x1000] sm:$0xff] }
 0xacd   :  { %13954 = vmatprep.subr.bf16.mxu1 %v15704_v20  ;;  %v8958_v20 = vld [vmem:[#allocation5 + $0x768] sm:$0xff]  ;;  %v9245_v58 = vld [vmem:[#allocation5 + $0x1060] sm:$0xff] }
 0xace   :  { %14080 = vmatpush1.bf16.msra.mxu0 %v15299_v0  ;;  %v15920_v0 = vcombine.high %v9376_v41, %v9388_v49  ;;  %v15491_v18 = vcombine.low %v8946_v25, %v8958_v20 }
 0xacf   :  { %14081 = vmatprep.subr.bf16.mxu0 %v15276_v37  ;;  %v9364_v37 = vld [vmem:[#allocation5 + $0x1418] sm:$0xff] }
 0xad0   :  { %13955 = vmatpush1.bf16.msra.mxu1 %v15703_v19  ;;  %v15492_v19 = vcombine.high %v8946_v25, %v8958_v20  ;;  %v15895_v48 = vcombine.low %v9352_v61, %v9364_v37  ;;  %v15778_v20 = vcombine.high %v9233_v45, %v9245_v58 }
 0xad1   :  { %13956 = vmatprep.subr.bf16.mxu1 %v15680_v30  ;;  %v8934_v30 = vld [vmem:[#allocation5 + $0x6a8] sm:$0xff] }
 0xad2   :  { %14082 = vmatpush1.bf16.msra.mxu0 %v15275_v13  ;;  %v15896_v13 = vcombine.high %v9352_v61, %v9364_v37  ;;  %v15467_v34 = vcombine.low %v8922_v1, %v8934_v30  ;;  %v9209_v37 = vld [vmem:[#allocation5 + $0xf40] sm:$0xff] }
 0xad3   :  { %14083 = vmatprep.subr.bf16.mxu0 %v15636_v29  ;;  %v9340_v29 = vld [vmem:[#allocation5 + $0x1358] sm:$0xff] }
 0xad4   :  { %13957 = vmatpush1.bf16.msra.mxu1 %v15679_v50  ;;  %v15468_v50 = vcombine.high %v8922_v1, %v8934_v30  ;;  %v15871_v53 = vcombine.low %v9328_v27, %v9340_v29 }
 0xad5   :  { %13958 = vmatprep.subr.bf16.mxu1 %v15656_v31  ;;  %v8911_v31 = vld [vmem:[#allocation5 + $0x5f0] sm:$0xff] }
 0xad6   :  { %14084 = vmatpush2.bf16.msra.mxu0 %v15635_v2  ;;  %v15872_v2 = vcombine.high %v9328_v27, %v9340_v29  ;;  %v15445_v16 = vcombine.low %v8899_v39, %v8911_v31  ;;  %v8791_v27 = vld [vmem:[#allocation5 + $0x230] sm:$0xff] }
 0xad7   :  { %14085 = vmatprep.subr.bf16.mxu0 %v15612_v22  ;;  %v9316_v22 = vld [vmem:[#allocation5 + $0x1298] sm:$0xff] }
 0xad8   :  { %13959 = vmatpush1.bf16.msra.mxu1 %v15655_v9  ;;  %v15446_v9 = vcombine.high %v8899_v39, %v8911_v31  ;;  %v15847_v14 = vcombine.low %v9304_v12, %v9316_v22 }
 0xad9   :  { %13960 = vmatprep.subr.bf16.mxu1 %v16016_v35  ;;  %v8887_v35 = vld [vmem:[#allocation5 + $0x530] sm:$0xff] }
 0xada   :  { %14086 = vmatpush2.bf16.msra.mxu0 %v15611_v54  ;;  %v15848_v54 = vcombine.high %v9304_v12, %v9316_v22  ;;  %v15421_v23 = vcombine.low %v8875_v46, %v8887_v35 }
 0xadb   :  { %14087 = vmatprep.subr.bf16.mxu0 %v15588_v32  ;;  %v9293_v32 = vld [vmem:[#allocation5 + $0x11e0] sm:$0xff] }
 0xadc   :  { %13961 = vmatpush2.bf16.msra.mxu1 %v16015_v8  ;;  %v15422_v8 = vcombine.high %v8875_v46, %v8887_v35  ;;  %v15826_v10 = vcombine.high %v9281_v36, %v9293_v32 }
 0xadd   :  { %13962 = vmatprep.subr.bf16.mxu1 %v15992_v62  ;;  %v8863_v62 = vld [vmem:[#allocation5 + $0x470] sm:$0xff] }
 0xade   :  { %14088 = vmatpush2.bf16.msra.mxu0 %v15587_v52  ;;  %v15398_v33 = vcombine.high %v8851_v40, %v8863_v62 }
 0xadf   :  { %14089 = vmatprep.subr.bf16.mxu0 %v15564_v59  ;;  %v9257_v59 = vld [vmem:[#allocation5 + $0x10c0] sm:$0xff] }
 0xae0   :  { %13963 = vmatpush2.bf16.msra.mxu1 %v15991_v28  ;;  %v9269_v28 = vld [vmem:[#allocation5 + $0x1120] sm:$0xff] }
 0xae1   :  { %13964 = vmatprep.subr.bf16.mxu1 %v15968_v5  ;;  %v15825_v5 = vcombine.low %v9281_v36, %v9293_v32  ;;  %v15801_v49 = vcombine.low %v9257_v59, %v9269_v28 }
 0xae2   :  { %14090 = vmatpush2.bf16.msra.mxu0 %v15563_v44  ;;  %v8827_v44 = vld [vmem:[#allocation5 + $0x350] sm:$0xff] }
 0xae3   :  { %14091 = vmatprep.subr.bf16.mxu0 %v15540_v60  ;;  %v15802_v60 = vcombine.high %v9257_v59, %v9269_v28  ;;  %v15374_v41 = vcombine.high %v8827_v44, %v8839_v47  ;;  %v15373_v61 = vcombine.low %v8827_v44, %v8839_v47 }
 0xae4   :  { %13965 = vmatpush2.bf16.msra.mxu1 %v15967_v55  ;;  %v15397_v55 = vcombine.low %v8851_v40, %v8863_v62 }
 0xae5   :  { %13966 = vmatprep.subr.bf16.mxu1 %v15944_v17 }
 0xae6   :  { %14092 = vmatpush2.bf16.msra.mxu0 %v15539_v63 }
 0xae7   :  { %14093 = vmatprep.subr.bf16.mxu0 %v15516_v11  ;;  %v8803_v11 = vld [vmem:[#allocation5 + $0x290] sm:$0xff] }
 0xae8   :  { %13967 = vmatpush2.bf16.msra.mxu1 %v15943_v7  ;;  %v8815_v7 = vld [vmem:[#allocation5 + $0x2f0] sm:$0xff] }
 0xae9   :  { %13968 = vmatprep.subr.bf16.mxu1 %v15920_v0  ;;  %v15350_v1 = vcombine.high %v8803_v11, %v8815_v7 }
 0xaea   :  { %14094 = vmatpush2.bf16.msra.mxu0 %v15515_v24 }
 0xaeb   :  { %14095 = vmatprep.subr.bf16.mxu0 %v15492_v19  ;;  %v9221_v19 = vld [vmem:[#allocation5 + $0xfa0] sm:$0xff] }
 0xaec   :  { %13969 = vmatpush2.bf16.msra.mxu1 %v15919_v3  ;;  %v15753_v31 = vcombine.low %v9209_v37, %v9221_v19 }
 0xaed   :  { %13970 = vmatprep.subr.bf16.mxu1 %v15896_v13  ;;  %v15777_v13 = vcombine.low %v9233_v45, %v9245_v58  ;;  %v9473_v58 = vld [vmem:[#allocation5 + $0x1780] sm:$0xff] }
 0xaee   :  { %14096 = vmatpush2.bf16.msra.mxu0 %v15491_v18  ;;  %v8779_v18 = vld [vmem:[#allocation5 + $0x1d0] sm:$0xff] }
 0xaef   :  { %14097 = vmatprep.subr.bf16.mxu0 %v15468_v50  ;;  %v9185_v50 = vld [vmem:[#allocation5 + $0xe80] sm:$0xff]  ;;  %v15326_v39 = vcombine.high %v8779_v18, %v8791_v27  ;;  %v15325_v22 = vcombine.low %v8779_v18, %v8791_v27 }
 0xaf0   :  { %13971 = vmatpush2.bf16.msra.mxu1 %v15895_v48  ;;  %v9197_v48 = vld [vmem:[#allocation5 + $0xee0] sm:$0xff] }
 0xaf1   :  { %13972 = vmatprep.subr.bf16.mxu1 %v15872_v2  ;;  %v8755_v2 = vld [vmem:[#allocation5 + $0x110] sm:$0xff]  ;;  %v15730_v12 = vcombine.high %v9185_v50, %v9197_v48  ;;  %v15729_v35 = vcombine.low %v9185_v50, %v9197_v48  ;;  %v9425_v27 = vld [vmem:[#allocation5 + $0x1600] sm:$0xff] }
 0xaf2   :  { %14098 = vmatpush2.bf16.msra.mxu0 %v15467_v34  ;;  %v8767_v34 = vld [vmem:[#allocation5 + $0x170] sm:$0xff] }
 0xaf3   :  { %14149 = vmatprep.subr.bf16.mxu0 %v15446_v9  ;;  %v9161_v9 = vld [vmem:[#allocation5 + $0xdc0] sm:$0xff]  ;;  %v15302_v46 = vcombine.high %v8755_v2, %v8767_v34  ;;  %v15301_v32 = vcombine.low %v8755_v2, %v8767_v34  ;;  %v8995_v50 = vld [vmem:[#allocation5 + $0x890] sm:$0xff] }
 0xaf4   :  { %13973 = vmatpush2.bf16.msra.mxu1 %v15871_v53  ;;  %v9173_v53 = vld [vmem:[#allocation5 + $0xe20] sm:$0xff]  ;;  %v9007_v48 = vld [vmem:[#allocation5 + $0x8f0] sm:$0xff] }
 0xaf5   :  { %13974 = vmatprep.subr.bf16.mxu1 %v15848_v54  ;;  %v22124_v52 = vpop.f32.mrf.mxu0  ;;  %14100 = vmatmul.mubr.bf16.vlgmr.msra.gmra.mxu0 %v22016_v38  ;;  %v8731_v54 = vld [vmem:[#allocation5 + $0x50] sm:$0xff]  ;;  %v15706_v36 = vcombine.high %v9161_v9, %v9173_v53  ;;  %v15705_v62 = vcombine.low %v9161_v9, %v9173_v53  ;;  %v9401_v2 = vld [vmem:[#allocation5 + $0x1540] sm:$0xff] }
 0xaf6   :  { %14150 = vmatpush1.bf16.msra.mxu0 %v15445_v16  ;;  %14181 = vmatprep.mubr.bf16.mxu0 %v22014_v51  ;;  %v8743_v16 = vld [vmem:[#allocation5 + $0xb0] sm:$0xff]  ;;  %v9413_v34 = vld [vmem:[#allocation5 + $0x15a0] sm:$0xff] }
 0xaf7   :  { %v22128_v56 = vpop.f32.mrf.mxu0  ;;  %14151 = vmatprep.subr.bf16.mxu0 %v15422_v8  ;;  %v9137_v8 = vld [vmem:[#allocation5 + $0xd00] sm:$0xff]  ;;  %v15278_v40 = vcombine.high %v8731_v54, %v8743_v16  ;;  %v15277_v28 = vcombine.low %v8731_v54, %v8743_v16  ;;  %v8971_v9 = vld [vmem:[#allocation5 + $0x7d0] sm:$0xff] }
 0xaf8   :  { %13975 = vmatpush2.bf16.msra.mxu1 %v15847_v14  ;;  %v9149_v14 = vld [vmem:[#allocation5 + $0xd60] sm:$0xff]  ;;  %v8983_v53 = vld [vmem:[#allocation5 + $0x830] sm:$0xff] }
 0xaf9   :  { %14026 = vmatprep.subr.bf16.mxu1 %v15826_v10  ;;  %v13859_v4 = vpop.f32.mrf.mxu0  ;;  %v9091_v10 = vld [vmem:[#allocation5 + $0xb90] sm:$0xff]  ;;  %v15682_v59 = vcombine.high %v9137_v8, %v9149_v14  ;;  %v15681_v47 = vcombine.low %v9137_v8, %v9149_v14  ;;  %v9377_v54 = vld [vmem:[#allocation5 + $0x1480] sm:$0xff] }
 0xafa   :  { %14152 = vmatpush1.bf16.msra.mxu0 %v15421_v23  ;;  %v9103_v23 = vld [vmem:[#allocation5 + $0xbf0] sm:$0xff]  ;;  %v9389_v16 = vld [vmem:[#allocation5 + $0x14e0] sm:$0xff] }
 0xafb   :  { %v13732_v17 = vpop.f32.mrf.mxu1  ;;  %13977 = vmatmul.mubr.bf16.vlgmr.msra.gmra.mxu1 %v22038_v57  ;;  %v13860_v63 = vpop.f32.mrf.mxu0  ;;  %14153 = vmatprep.subr.bf16.mxu0 %v15398_v33  ;;  %v9113_v33 = vld [vmem:[#allocation5 + $0xc40] sm:$0xff]  ;;  %v15638_v44 = vcombine.high %v9091_v10, %v9103_v23  ;;  %v9067_v4 = vld [vmem:[#allocation5 + $0xad0] sm:$0xff]  ;;  %v15637_v45 = vcombine.low %v9091_v10, %v9103_v23 }
 0xafc   :  { %14027 = vmatpush1.bf16.msra.mxu1 %v15825_v5  ;;  %14058 = vmatprep.mubr.bf16.mxu1 %v22036_v43  ;;  %v22133_v0 = vadd.f32 %v13732_v17, %v22093_v15  ;;  %v15754_v15 = vcombine.high %v9209_v37, %v9221_v19  ;;  %v9125_v5 = vld [vmem:[#allocation5 + $0xca0] sm:$0xff]  ;;  %v8947_v8 = vld [vmem:[#allocation5 + $0x710] sm:$0xff] }
 0xafd   :  { %v13734_v25 = vpop.f32.mrf.mxu1  ;;  %14028 = vmatprep.subr.bf16.mxu1 %v15802_v60  ;;  %v9079_v60 = vld [vmem:[#allocation5 + $0xb30] sm:$0xff]  ;;  %v9485_v17 = vld [vmem:[#allocation5 + $0x17e0] sm:$0xff] }
 0xafe   :  { %v22136_v24 = vadd.f32 %v13734_v25, %v22097_v6  ;;  %14154 = vmatpush1.bf16.msra.mxu0 %v15397_v55  ;;  %v15349_v6 = vcombine.low %v8803_v11, %v8815_v7  ;;  %v15658_v55 = vcombine.high %v9113_v33, %v9125_v5  ;;  %v15614_v63 = vcombine.high %v9067_v4, %v9079_v60  ;;  %v9055_v11 = vld [vmem:[#allocation5 + $0xa70] sm:$0xff]  ;;  %v9353_v10 = vld [vmem:[#allocation5 + $0x13c0] sm:$0xff] }
 0xaff   :  { %v13736_v3 = vpop.f32.mrf.mxu1  ;;  %14155 = vmatprep.subr.bf16.mxu0 %v15374_v41  ;;  %v15657_v41 = vcombine.low %v9113_v33, %v9125_v5  ;;  %v16018_v7 = vcombine.high %v9473_v58, %v9485_v17  ;;  %v15613_v25 = vcombine.low %v9067_v4, %v9079_v60  ;;  %v16017_v19 = vcombine.low %v9473_v58, %v9485_v17  ;;  %v8959_v14 = vld [vmem:[#allocation5 + $0x770] sm:$0xff]  ;;  %v9365_v23 = vld [vmem:[#allocation5 + $0x1420] sm:$0xff]  ;;  %v8900_v58 = vld [vmem:[#allocation5 + $0x598] sm:$0xff] }
 0xb00   :  { %v14371_v30 = vcombine.low %v22133_v0, %v22136_v24  ;;  %14029 = vmatpush1.bf16.msra.mxu1 %v15801_v49  ;;  %v9043_v49 = vld [vmem:[#allocation5 + $0xa10] sm:$0xff]  ;;  %v9329_v4 = vld [vmem:[#allocation5 + $0x1300] sm:$0xff]  ;;  %v8912_v17 = vld [vmem:[#allocation5 + $0x5f8] sm:$0xff] }
 0xb01   :  { %v13737_v29 = vpop.f32.mrf.mxu1  ;;  %14030 = vmatprep.subr.bf16.mxu1 %v15778_v20  ;;  %v9449_v20 = vld [vmem:[#allocation5 + $0x16c0] sm:$0xff]  ;;  %v15590_v37 = vcombine.high %v9043_v49, %v9055_v11  ;;  %v9019_v3 = vld [vmem:[#allocation5 + $0x950] sm:$0xff]  ;;  %v15589_v18 = vcombine.low %v9043_v49, %v9055_v11  ;;  %v9162_v0 = vld [vmem:[#allocation5 + $0xdc8] sm:$0xff] }
 0xb02   :  { %14156 = vmatpush1.bf16.msra.mxu0 %v15373_v61  ;;  %v9461_v61 = vld [vmem:[#allocation5 + $0x1720] sm:$0xff]  ;;  %v8923_v33 = vld [vmem:[#allocation5 + $0x650] sm:$0xff]  ;;  %v9174_v24 = vld [vmem:[#allocation5 + $0xe28] sm:$0xff] }
 0xb03   :  { %14157 = vmatprep.subr.bf16.mxu0 %v15350_v1  ;;  %v9031_v1 = vld [vmem:[#allocation5 + $0x9b0] sm:$0xff]  ;;  %v9437_v29 = vld [vmem:[#allocation5 + $0x1660] sm:$0xff] }
 0xb04   :  { %14031 = vmatpush1.bf16.msra.mxu1 %v15777_v13  ;;  %v15994_v13 = vcombine.high %v9449_v20, %v9461_v61  ;;  %v8935_v5 = vld [vmem:[#allocation5 + $0x6b0] sm:$0xff]  ;;  %v9341_v60 = vld [vmem:[#allocation5 + $0x1360] sm:$0xff] }
 0xb05   :  { %14032 = vmatprep.subr.bf16.mxu1 %v15754_v15  ;;  %v15566_v15 = vcombine.high %v9019_v3, %v9031_v1  ;;  %v9305_v49 = vld [vmem:[#allocation5 + $0x1240] sm:$0xff] }
 0xb06   :  { %14158 = vmatpush1.bf16.msra.mxu0 %v15349_v6  ;;  %v15993_v6 = vcombine.low %v9449_v20, %v9461_v61  ;;  %v9317_v11 = vld [vmem:[#allocation5 + $0x12a0] sm:$0xff]  ;;  %v8876_v20 = vld [vmem:[#allocation5 + $0x4d8] sm:$0xff] }
 0xb07   :  { %14159 = vmatprep.subr.bf16.mxu0 %v15326_v39  ;;  %v15970_v39 = vcombine.high %v9425_v27, %v9437_v29  ;;  %v8888_v61 = vld [vmem:[#allocation5 + $0x538] sm:$0xff] }
 0xb08   :  { %14033 = vmatpush1.bf16.msra.mxu1 %v15753_v31  ;;  %v15565_v31 = vcombine.low %v9019_v3, %v9031_v1  ;;  %v9282_v3 = vld [vmem:[#allocation5 + $0x1188] sm:$0xff] }
 0xb09   :  { %14034 = vmatprep.subr.bf16.mxu1 %v15730_v12  ;;  %v15542_v12 = vcombine.high %v8995_v50, %v9007_v48  ;;  %v9294_v1 = vld [vmem:[#allocation5 + $0x11e8] sm:$0xff] }
 0xb0a   :  { %14160 = vmatpush1.bf16.msra.mxu0 %v15325_v22  ;;  %v15969_v22 = vcombine.low %v9425_v27, %v9437_v29  ;;  %v8852_v27 = vld [vmem:[#allocation5 + $0x418] sm:$0xff] }
 0xb0b   :  { %14161 = vmatprep.subr.bf16.mxu0 %v15302_v46  ;;  %v15946_v46 = vcombine.high %v9401_v2, %v9413_v34  ;;  %v8864_v29 = vld [vmem:[#allocation5 + $0x478] sm:$0xff] }
 0xb0c   :  { %14035 = vmatpush1.bf16.msra.mxu1 %v15729_v35  ;;  %v15541_v35 = vcombine.low %v8995_v50, %v9007_v48  ;;  %v15423_v50 = vcombine.low %v8876_v20, %v8888_v61  ;;  %v9258_v48 = vld [vmem:[#allocation5 + $0x10c8] sm:$0xff] }
 0xb0d   :  { %14036 = vmatprep.subr.bf16.mxu1 %v15706_v36  ;;  %v15518_v36 = vcombine.high %v8971_v9, %v8983_v53 }
 0xb0e   :  { %14162 = vmatpush1.bf16.msra.mxu0 %v15301_v32  ;;  %v15945_v32 = vcombine.low %v9401_v2, %v9413_v34  ;;  %v15400_v2 = vcombine.high %v8852_v27, %v8864_v29  ;;  %v15827_v34 = vcombine.low %v9282_v3, %v9294_v1 }
 0xb0f   :  { %14163 = vmatprep.subr.bf16.mxu0 %v15278_v40  ;;  %v15922_v40 = vcombine.high %v9377_v54, %v9389_v16 }
 0xb10   :  { %14037 = vmatpush1.bf16.msra.mxu1 %v15705_v62  ;;  %v15517_v62 = vcombine.low %v8971_v9, %v8983_v53 }
 0xb11   :  { %14038 = vmatprep.subr.bf16.mxu1 %v15682_v59  ;;  %v15494_v59 = vcombine.high %v8947_v8, %v8959_v14 }
 0xb12   :  { %14164 = vmatpush1.bf16.msra.mxu0 %v15277_v28  ;;  %v15921_v28 = vcombine.low %v9377_v54, %v9389_v16  ;;  %v9246_v54 = vld [vmem:[#allocation5 + $0x1068] sm:$0xff] }
 0xb13   :  { %14165 = vmatprep.subr.bf16.mxu0 %v15638_v44  ;;  %v15898_v44 = vcombine.high %v9353_v10, %v9365_v23 }
 0xb14   :  { %14039 = vmatpush1.bf16.msra.mxu1 %v15681_v47  ;;  %v15493_v47 = vcombine.low %v8947_v8, %v8959_v14  ;;  %v8804_v8 = vld [vmem:[#allocation5 + $0x298] sm:$0xff] }
 0xb15   :  { %14040 = vmatprep.subr.bf16.mxu1 %v15658_v55  ;;  %v15470_v55 = vcombine.high %v8923_v33, %v8935_v5  ;;  %v8816_v14 = vld [vmem:[#allocation5 + $0x2f8] sm:$0xff] }
 0xb16   :  { %14166 = vmatpush2.bf16.msra.mxu0 %v15637_v45  ;;  %v15897_v45 = vcombine.low %v9353_v10, %v9365_v23 }
 0xb17   :  { %14167 = vmatprep.subr.bf16.mxu0 %v15614_v63  ;;  %v15874_v63 = vcombine.high %v9329_v4, %v9341_v60 }
 0xb18   :  { %14041 = vmatpush1.bf16.msra.mxu1 %v15657_v41  ;;  %v15469_v41 = vcombine.low %v8923_v33, %v8935_v5  ;;  %v9222_v33 = vld [vmem:[#allocation5 + $0xfa8] sm:$0xff] }
 0xb19   :  { %14042 = vmatprep.subr.bf16.mxu1 %v16018_v7  ;;  %v15448_v7 = vcombine.high %v8900_v58, %v8912_v17 }
 0xb1a   :  { %14168 = vmatpush2.bf16.msra.mxu0 %v15613_v25  ;;  %v15873_v25 = vcombine.low %v9329_v4, %v9341_v60  ;;  %v8780_v60 = vld [vmem:[#allocation5 + $0x1d8] sm:$0xff] }
 0xb1b   :  { %14169 = vmatprep.subr.bf16.mxu0 %v15590_v37  ;;  %v15850_v37 = vcombine.high %v9305_v49, %v9317_v11 }
 0xb1c   :  { %14043 = vmatpush2.bf16.msra.mxu1 %v16017_v19  ;;  %v15447_v19 = vcombine.low %v8900_v58, %v8912_v17  ;;  %v15351_v17 = vcombine.low %v8804_v8, %v8816_v14 }
 0xb1d   :  { %14044 = vmatprep.subr.bf16.mxu1 %v15994_v13  ;;  %v15424_v13 = vcombine.high %v8876_v20, %v8888_v61  ;;  %v8768_v20 = vld [vmem:[#allocation5 + $0x178] sm:$0xff] }
 0xb1e   :  { %14170 = vmatpush2.bf16.msra.mxu0 %v15589_v18  ;;  %v15849_v18 = vcombine.low %v9305_v49, %v9317_v11 }
 0xb1f   :  { %14171 = vmatprep.subr.bf16.mxu0 %v15566_v15 }
 0xb20   :  { %14045 = vmatpush2.bf16.msra.mxu1 %v15993_v6  ;;  %v15828_v6 = vcombine.high %v9282_v3, %v9294_v1  ;;  %v8732_v3 = vld [vmem:[#allocation5 + $0x58] sm:$0xff] }
 0xb21   :  { %14046 = vmatprep.subr.bf16.mxu1 %v15970_v39  ;;  %v9270_v39 = vld [vmem:[#allocation5 + $0x1128] sm:$0xff]  ;;  %v8744_v1 = vld [vmem:[#allocation5 + $0xb8] sm:$0xff] }
 0xb22   :  { %14172 = vmatpush2.bf16.msra.mxu0 %v15565_v31  ;;  %v15804_v53 = vcombine.high %v9258_v48, %v9270_v39 }
 0xb23   :  { %14173 = vmatprep.subr.bf16.mxu0 %v15542_v12  ;;  %v8828_v12 = vld [vmem:[#allocation5 + $0x358] sm:$0xff] }
 0xb24   :  { %14047 = vmatpush2.bf16.msra.mxu1 %v15969_v22  ;;  %v8840_v22 = vld [vmem:[#allocation5 + $0x3b8] sm:$0xff] }
 0xb25   :  { %14048 = vmatprep.subr.bf16.mxu1 %v15946_v46  ;;  %v15399_v46 = vcombine.low %v8852_v27, %v8864_v29  ;;  %v9138_v27 = vld [vmem:[#allocation5 + $0xd08] sm:$0xff] }
 0xb26   :  { %14174 = vmatpush2.bf16.msra.mxu0 %v15541_v35  ;;  %v9234_v35 = vld [vmem:[#allocation5 + $0x1008] sm:$0xff] }
 0xb27   :  { %14175 = vmatprep.subr.bf16.mxu0 %v15518_v36  ;;  %v15376_v36 = vcombine.high %v8828_v12, %v8840_v22  ;;  %v15779_v4 = vcombine.low %v9234_v35, %v9246_v54  ;;  %v9150_v29 = vld [vmem:[#allocation5 + $0xd68] sm:$0xff] }
 0xb28   :  { %14049 = vmatpush2.bf16.msra.mxu1 %v15945_v32  ;;  %v15803_v32 = vcombine.low %v9258_v48, %v9270_v39  ;;  %v9092_v48 = vld [vmem:[#allocation5 + $0xb98] sm:$0xff] }
 0xb29   :  { %14050 = vmatprep.subr.bf16.mxu1 %v15922_v40  ;;  %v9104_v39 = vld [vmem:[#allocation5 + $0xbf8] sm:$0xff] }
 0xb2a   :  { %14176 = vmatpush2.bf16.msra.mxu0 %v15517_v62  ;;  %v15780_v62 = vcombine.high %v9234_v35, %v9246_v54  ;;  %v9080_v35 = vld [vmem:[#allocation5 + $0xb38] sm:$0xff] }
 0xb2b   :  { %14177 = vmatprep.subr.bf16.mxu0 %v15494_v59  ;;  %v15375_v59 = vcombine.low %v8828_v12, %v8840_v22  ;;  %v9114_v12 = vld [vmem:[#allocation5 + $0xc48] sm:$0xff] }
 0xb2c   :  { %14051 = vmatpush2.bf16.msra.mxu1 %v15921_v28  ;;  %v9210_v28 = vld [vmem:[#allocation5 + $0xf48] sm:$0xff] }
 0xb2d   :  { %14052 = vmatprep.subr.bf16.mxu1 %v15898_v44  ;;  %v15352_v44 = vcombine.high %v8804_v8, %v8816_v14  ;;  %v15756_v58 = vcombine.high %v9210_v28, %v9222_v33  ;;  %v9126_v22 = vld [vmem:[#allocation5 + $0xca8] sm:$0xff]  ;;  %v9044_v14 = vld [vmem:[#allocation5 + $0xa18] sm:$0xff] }
 0xb2e   :  { %14178 = vmatpush2.bf16.msra.mxu0 %v15493_v47  ;;  %v15660_v54 = vcombine.high %v9114_v12, %v9126_v22  ;;  %v15659_v8 = vcombine.low %v9114_v12, %v9126_v22  ;;  %v9330_v12 = vld [vmem:[#allocation5 + $0x1308] sm:$0xff] }
 0xb2f   :  { %14179 = vmatprep.subr.bf16.mxu0 %v15470_v55  ;;  %v8792_v55 = vld [vmem:[#allocation5 + $0x238] sm:$0xff]  ;;  %v9342_v22 = vld [vmem:[#allocation5 + $0x1368] sm:$0xff] }
 0xb30   :  { %14053 = vmatpush2.bf16.msra.mxu1 %v15897_v45  ;;  %v15328_v49 = vcombine.high %v8780_v60, %v8792_v55 }
 0xb31   :  { %14054 = vmatprep.subr.bf16.mxu1 %v15874_v63  ;;  %v9186_v63 = vld [vmem:[#allocation5 + $0xe88] sm:$0xff] }
 0xb32   :  { %14180 = vmatpush2.bf16.msra.mxu0 %v15469_v41  ;;  %v9198_v41 = vld [vmem:[#allocation5 + $0xee8] sm:$0xff] }
 0xb33   :  { %14231 = vmatprep.subr.bf16.mxu0 %v15448_v7  ;;  %v15755_v7 = vcombine.low %v9210_v28, %v9222_v33  ;;  %v15732_v61 = vcombine.high %v9186_v63, %v9198_v41 }
 0xb34   :  { %14055 = vmatpush2.bf16.msra.mxu1 %v15873_v25  ;;  %v8756_v25 = vld [vmem:[#allocation5 + $0x118] sm:$0xff] }
 0xb35   :  { %14056 = vmatprep.subr.bf16.mxu1 %v15850_v37  ;;  %v22140_v15 = vpop.f32.mrf.mxu0  ;;  %14182 = vmatmul.mubr.bf16.vlgmr.msra.gmra.mxu0 %v22016_v38  ;;  %v15327_v37 = vcombine.low %v8780_v60, %v8792_v55  ;;  %v9426_v60 = vld [vmem:[#allocation5 + $0x1608] sm:$0xff] }
 0xb36   :  { %14232 = vmatpush1.bf16.msra.mxu0 %v15447_v19  ;;  %14263 = vmatprep.mubr.bf16.mxu0 %v22014_v51  ;;  %v15731_v19 = vcombine.low %v9186_v63, %v9198_v41  ;;  %v9438_v55 = vld [vmem:[#allocation5 + $0x1668] sm:$0xff] }
 0xb37   :  { %v22144_v31 = vpop.f32.mrf.mxu0  ;;  %14233 = vmatprep.subr.bf16.mxu0 %v15424_v13  ;;  %v15708_v13 = vcombine.high %v9162_v0, %v9174_v24  ;;  %v9402_v41 = vld [vmem:[#allocation5 + $0x1548] sm:$0xff] }
 0xb38   :  { %14057 = vmatpush2.bf16.msra.mxu1 %v15849_v18  ;;  %v15303_v18 = vcombine.low %v8756_v25, %v8768_v20 }
 0xb39   :  { %14108 = vmatprep.subr.bf16.mxu1 %v15828_v6  ;;  %v13941_v9 = vpop.f32.mrf.mxu0  ;;  %v15280_v6 = vcombine.high %v8732_v3, %v8744_v1 }
 0xb3a   :  { %14234 = vmatpush1.bf16.msra.mxu0 %v15423_v50  ;;  %v15707_v50 = vcombine.low %v9162_v0, %v9174_v24  ;;  %v15640_v9 = vcombine.high %v9092_v48, %v9104_v39  ;;  %v9378_v0 = vld [vmem:[#allocation5 + $0x1488] sm:$0xff] }
 0xb3b   :  { %v13814_v16 = vpop.f32.mrf.mxu1  ;;  %14059 = vmatmul.mubr.bf16.vlgmr.msra.gmra.mxu1 %v22038_v57  ;;  %v13942_v51 = vpop.f32.mrf.mxu0  ;;  %14235 = vmatprep.subr.bf16.mxu0 %v15400_v2  ;;  %v15684_v2 = vcombine.high %v9138_v27, %v9150_v29  ;;  %v9390_v24 = vld [vmem:[#allocation5 + $0x14e8] sm:$0xff] }
 0xb3c   :  { %14109 = vmatpush1.bf16.msra.mxu1 %v15827_v34  ;;  %14140 = vmatprep.mubr.bf16.mxu1 %v22036_v43  ;;  %v13815_v10 = vadd.f32 %v13814_v16, %v22109_v21  ;;  %v14379_v21 = vrot.slane %v14371_v30, %v21837_v26  ;;  %v15304_v30 = vcombine.high %v8756_v25, %v8768_v20  ;;  %v9474_v51 = vld [vmem:[#allocation5 + $0x1788] sm:$0xff]  ;;  %v8972_v25 = vld [vmem:[#allocation5 + $0x7d8] sm:$0xff] }
 0xb3d   :  { %v13816_v40 = vpop.f32.mrf.mxu1  ;;  %14110 = vmatprep.subr.bf16.mxu1 %v15804_v53  ;;  %v15279_v34 = vcombine.low %v8732_v3, %v8744_v1  ;;  %v15683_v53 = vcombine.low %v9138_v27, %v9150_v29  ;;  %v15639_v16 = vcombine.low %v9092_v48, %v9104_v39  ;;  %v8984_v20 = vld [vmem:[#allocation5 + $0x838] sm:$0xff]  ;;  %v9354_v27 = vld [vmem:[#allocation5 + $0x13c8] sm:$0xff] }
 0xb3e   :  { %v13817_v23 = vadd.f32 %v13816_v40, %v22113_v42  ;;  %14236 = vmatpush1.bf16.msra.mxu0 %v15399_v46  ;;  %v9068_v46 = vld [vmem:[#allocation5 + $0xad8] sm:$0xff]  ;;  %v9366_v29 = vld [vmem:[#allocation5 + $0x1428] sm:$0xff] }
 0xb3f   :  { %v13818_v5 = vpop.f32.mrf.mxu1  ;;  %14237 = vmatprep.subr.bf16.mxu0 %v15376_v36  ;;  %v9486_v36 = vld [vmem:[#allocation5 + $0x17e8] sm:$0xff]  ;;  %v9056_v40 = vld [vmem:[#allocation5 + $0xa78] sm:$0xff] }
 0xb40   :  { %v14372_v47 = vcombine.low %v13815_v10, %v13817_v23  ;;  %14111 = vmatpush1.bf16.msra.mxu1 %v15803_v32  ;;  %v15616_v32 = vcombine.high %v9068_v46, %v9080_v35  ;;  %v15615_v10 = vcombine.low %v9068_v46, %v9080_v35  ;;  %v9450_v23 = vld [vmem:[#allocation5 + $0x16c8] sm:$0xff]  ;;  %v15592_v28 = vcombine.high %v9044_v14, %v9056_v40  ;;  %v9020_v5 = vld [vmem:[#allocation5 + $0x958] sm:$0xff] }
 0xb41   :  { %v13819_v45 = vpop.f32.mrf.mxu1  ;;  %14112 = vmatprep.subr.bf16.mxu1 %v15780_v62  ;;  %v16020_v62 = vcombine.high %v9474_v51, %v9486_v36  ;;  %v16019_v33 = vcombine.low %v9474_v51, %v9486_v36  ;;  %v8948_v3 = vld [vmem:[#allocation5 + $0x718] sm:$0xff]  ;;  %v15876_v46 = vcombine.high %v9330_v12, %v9342_v22  ;;  %v15875_v51 = vcombine.low %v9330_v12, %v9342_v22 }
 0xb42   :  { %v14386_v42 = vrot.slane %v14372_v47, %v21837_v26  ;;  %14238 = vmatpush1.bf16.msra.mxu0 %v15375_v59  ;;  %v9462_v59 = vld [vmem:[#allocation5 + $0x1728] sm:$0xff]  ;;  %v8960_v1 = vld [vmem:[#allocation5 + $0x778] sm:$0xff] }
 0xb43   :  { %14239 = vmatprep.subr.bf16.mxu0 %v15352_v44  ;;  %v9032_v44 = vld [vmem:[#allocation5 + $0x9b8] sm:$0xff]  ;;  %v15996_v47 = vcombine.high %v9450_v23, %v9462_v59 }
 0xb44   :  { %v14387_v11 = vcombine.low %v14379_v21, %v14386_v42  ;;  %14113 = vmatpush1.bf16.msra.mxu1 %v15779_v4  ;;  %v15591_v4 = vcombine.low %v9044_v14, %v9056_v40  ;;  %v15568_v45 = vcombine.high %v9020_v5, %v9032_v44  ;;  %v8996_v21 = vld [vmem:[#allocation5 + $0x898] sm:$0xff]  ;;  %v15567_v63 = vcombine.low %v9020_v5, %v9032_v44  ;;  %v9235_v44 = vld [vmem:[#allocation5 + $0x1010] sm:$0xff] }
 0xb45   :  { %14114 = vmatprep.subr.bf16.mxu1 %v15756_v58  ;;  %v15995_v58 = vcombine.low %v9450_v23, %v9462_v59  ;;  %v9008_v42 = vld [vmem:[#allocation5 + $0x8f8] sm:$0xff]  ;;  %v9271_v23 = vld [vmem:[#allocation5 + $0x1130] sm:$0xff] }
 0xb46   :  { %14447 = vst [vmem:[#allocation7 + $0x10] sm:$0xff] %v14387_v11  ;;  %14240 = vmatpush1.bf16.msra.mxu0 %v15351_v17  ;;  %v15972_v17 = vcombine.high %v9426_v60, %v9438_v55  ;;  %v15544_v11 = vcombine.high %v8996_v21, %v9008_v42  ;;  %v8924_v48 = vld [vmem:[#allocation5 + $0x658] sm:$0xff] }
 0xb47   :  { %14241 = vmatprep.subr.bf16.mxu0 %v15328_v49  ;;  %v9414_v49 = vld [vmem:[#allocation5 + $0x15a8] sm:$0xff]  ;;  %v8936_v39 = vld [vmem:[#allocation5 + $0x6b8] sm:$0xff] }
 0xb48   :  { %14115 = vmatpush1.bf16.msra.mxu1 %v15755_v7  ;;  %v15971_v7 = vcombine.low %v9426_v60, %v9438_v55  ;;  %v15471_v35 = vcombine.low %v8924_v48, %v8936_v39 }
 0xb49   :  { %14116 = vmatprep.subr.bf16.mxu1 %v15732_v61  ;;  %v15948_v61 = vcombine.high %v9402_v41, %v9414_v49 }
 0xb4a   :  { %14242 = vmatpush1.bf16.msra.mxu0 %v15327_v37  ;;  %v15543_v37 = vcombine.low %v8996_v21, %v9008_v42  ;;  %v9211_v42 = vld [vmem:[#allocation5 + $0xf50] sm:$0xff] }
 0xb4b   :  { %14243 = vmatprep.subr.bf16.mxu0 %v15304_v30  ;;  %v15520_v30 = vcombine.high %v8972_v25, %v8984_v20 }
 0xb4c   :  { %14117 = vmatpush1.bf16.msra.mxu1 %v15731_v19  ;;  %v15947_v19 = vcombine.low %v9402_v41, %v9414_v49 }
 0xb4d   :  { %14118 = vmatprep.subr.bf16.mxu1 %v15708_v13  ;;  %v15924_v13 = vcombine.high %v9378_v0, %v9390_v24 }
 0xb4e   :  { %14244 = vmatpush1.bf16.msra.mxu0 %v15303_v18  ;;  %v15519_v18 = vcombine.low %v8972_v25, %v8984_v20  ;;  %v9187_v25 = vld [vmem:[#allocation5 + $0xe90] sm:$0xff] }
 0xb4f   :  { %14245 = vmatprep.subr.bf16.mxu0 %v15280_v6  ;;  %v15496_v6 = vcombine.high %v8948_v3, %v8960_v1  ;;  %v9199_v20 = vld [vmem:[#allocation5 + $0xef0] sm:$0xff] }
 0xb50   :  { %14119 = vmatpush1.bf16.msra.mxu1 %v15707_v50  ;;  %v15923_v50 = vcombine.low %v9378_v0, %v9390_v24  ;;  %v15733_v0 = vcombine.low %v9187_v25, %v9199_v20 }
 0xb51   :  { %14120 = vmatprep.subr.bf16.mxu1 %v15684_v2  ;;  %v15900_v2 = vcombine.high %v9354_v27, %v9366_v29 }
 0xb52   :  { %14246 = vmatpush1.bf16.msra.mxu0 %v15279_v34  ;;  %v15495_v34 = vcombine.low %v8948_v3, %v8960_v1 }
 0xb53   :  { %14247 = vmatprep.subr.bf16.mxu0 %v15640_v9  ;;  %v15472_v9 = vcombine.high %v8924_v48, %v8936_v39 }
 0xb54   :  { %14121 = vmatpush1.bf16.msra.mxu1 %v15683_v53  ;;  %v15899_v53 = vcombine.low %v9354_v27, %v9366_v29 }
 0xb55   :  { %14122 = vmatprep.subr.bf16.mxu1 %v15660_v54  ;;  %v9306_v54 = vld [vmem:[#allocation5 + $0x1248] sm:$0xff] }
 0xb56   :  { %14248 = vmatpush2.bf16.msra.mxu0 %v15639_v16  ;;  %v9318_v16 = vld [vmem:[#allocation5 + $0x12a8] sm:$0xff] }
 0xb57   :  { %14249 = vmatprep.subr.bf16.mxu0 %v15616_v32  ;;  %v15852_v36 = vcombine.high %v9306_v54, %v9318_v16  ;;  %v9283_v32 = vld [vmem:[#allocation5 + $0x1190] sm:$0xff]  ;;  %v15851_v14 = vcombine.low %v9306_v54, %v9318_v16 }
 0xb58   :  { %14123 = vmatpush1.bf16.msra.mxu1 %v15659_v8  ;;  %v9295_v8 = vld [vmem:[#allocation5 + $0x11f0] sm:$0xff] }
 0xb59   :  { %14124 = vmatprep.subr.bf16.mxu1 %v16020_v62  ;;  %v15830_v62 = vcombine.high %v9283_v32, %v9295_v8  ;;  %v9403_v54 = vld [vmem:[#allocation5 + $0x1550] sm:$0xff] }
 0xb5a   :  { %14250 = vmatpush2.bf16.msra.mxu0 %v15615_v10  ;;  %v9259_v10 = vld [vmem:[#allocation5 + $0x10d0] sm:$0xff] }
 0xb5b   :  { %14251 = vmatprep.subr.bf16.mxu0 %v15592_v28  ;;  %v15829_v28 = vcombine.low %v9283_v32, %v9295_v8  ;;  %v15806_v5 = vcombine.high %v9259_v10, %v9271_v23  ;;  %v9415_v16 = vld [vmem:[#allocation5 + $0x15b0] sm:$0xff] }
 0xb5c   :  { %14125 = vmatpush2.bf16.msra.mxu1 %v16019_v33  ;;  %v9379_v32 = vld [vmem:[#allocation5 + $0x1490] sm:$0xff] }
 0xb5d   :  { %14126 = vmatprep.subr.bf16.mxu1 %v15996_v47  ;;  %v9247_v47 = vld [vmem:[#allocation5 + $0x1070] sm:$0xff] }
 0xb5e   :  { %14252 = vmatpush2.bf16.msra.mxu0 %v15591_v4  ;;  %v15781_v49 = vcombine.low %v9235_v44, %v9247_v47  ;;  %v9391_v8 = vld [vmem:[#allocation5 + $0x14f0] sm:$0xff] }
 0xb5f   :  { %14253 = vmatprep.subr.bf16.mxu0 %v15568_v45  ;;  %v15782_v45 = vcombine.high %v9235_v44, %v9247_v47  ;;  %v9343_v44 = vld [vmem:[#allocation5 + $0x1370] sm:$0xff] }
 0xb60   :  { %14127 = vmatpush2.bf16.msra.mxu1 %v15995_v58 }
 0xb61   :  { %14128 = vmatprep.subr.bf16.mxu1 %v15972_v17  ;;  %v9223_v17 = vld [vmem:[#allocation5 + $0xfb0] sm:$0xff] }
 0xb62   :  { %14254 = vmatpush2.bf16.msra.mxu0 %v15567_v63 }
 0xb63   :  { %14255 = vmatprep.subr.bf16.mxu0 %v15544_v11 }
 0xb64   :  { %14129 = vmatpush2.bf16.msra.mxu1 %v15971_v7  ;;  %v15758_v7 = vcombine.high %v9211_v42, %v9223_v17 }
 0xb65   :  { %14130 = vmatprep.subr.bf16.mxu1 %v15948_v61  ;;  %v15757_v61 = vcombine.low %v9211_v42, %v9223_v17  ;;  %v9284_v42 = vld [vmem:[#allocation5 + $0x1198] sm:$0xff] }
 0xb66   :  { %14256 = vmatpush2.bf16.msra.mxu0 %v15543_v37  ;;  %v9163_v37 = vld [vmem:[#allocation5 + $0xdd0] sm:$0xff]  ;;  %v9296_v17 = vld [vmem:[#allocation5 + $0x11f8] sm:$0xff] }
 0xb67   :  { %14257 = vmatprep.subr.bf16.mxu0 %v15520_v30  ;;  %v9139_v30 = vld [vmem:[#allocation5 + $0xd10] sm:$0xff] }
 0xb68   :  { %14131 = vmatpush2.bf16.msra.mxu1 %v15947_v19  ;;  %v9151_v19 = vld [vmem:[#allocation5 + $0xd70] sm:$0xff] }
 0xb69   :  { %14132 = vmatprep.subr.bf16.mxu1 %v15924_v13  ;;  %v15686_v1 = vcombine.high %v9139_v30, %v9151_v19  ;;  %v9115_v13 = vld [vmem:[#allocation5 + $0xc50] sm:$0xff]  ;;  %v15685_v27 = vcombine.low %v9139_v30, %v9151_v19 }
 0xb6a   :  { %14258 = vmatpush2.bf16.msra.mxu0 %v15519_v18  ;;  %v9127_v18 = vld [vmem:[#allocation5 + $0xcb0] sm:$0xff] }
 0xb6b   :  { %14259 = vmatprep.subr.bf16.mxu0 %v15496_v6  ;;  %v15662_v29 = vcombine.high %v9115_v13, %v9127_v18  ;;  %v9475_v6 = vld [vmem:[#allocation5 + $0x1790] sm:$0xff]  ;;  %v15661_v48 = vcombine.low %v9115_v13, %v9127_v18 }
 0xb6c   :  { %14133 = vmatpush2.bf16.msra.mxu1 %v15923_v50  ;;  %v9487_v50 = vld [vmem:[#allocation5 + $0x17f0] sm:$0xff] }
 0xb6d   :  { %14134 = vmatprep.subr.bf16.mxu1 %v15900_v2  ;;  %v16022_v39 = vcombine.high %v9475_v6, %v9487_v50  ;;  %v9451_v2 = vld [vmem:[#allocation5 + $0x16d0] sm:$0xff]  ;;  %v16021_v12 = vcombine.low %v9475_v6, %v9487_v50 }
 0xb6e   :  { %14260 = vmatpush2.bf16.msra.mxu0 %v15495_v34  ;;  %v9463_v34 = vld [vmem:[#allocation5 + $0x1730] sm:$0xff] }
 0xb6f   :  { %14261 = vmatprep.subr.bf16.mxu0 %v15472_v9  ;;  %v15998_v22 = vcombine.high %v9451_v2, %v9463_v34  ;;  %v9427_v9 = vld [vmem:[#allocation5 + $0x1610] sm:$0xff] }
 0xb70   :  { %14135 = vmatpush2.bf16.msra.mxu1 %v15899_v53  ;;  %v9439_v53 = vld [vmem:[#allocation5 + $0x1670] sm:$0xff] }
 0xb71   :  { %14136 = vmatprep.subr.bf16.mxu1 %v15876_v46  ;;  %v15997_v46 = vcombine.low %v9451_v2, %v9463_v34 }
 0xb72   :  { %14262 = vmatpush2.bf16.msra.mxu0 %v15471_v35  ;;  %v15974_v35 = vcombine.high %v9427_v9, %v9439_v53 }
 0xb74   :  { %14137 = vmatpush2.bf16.msra.mxu1 %v15875_v51  ;;  %v15973_v51 = vcombine.low %v9427_v9, %v9439_v53  ;;  %v9164_v53 = vld [vmem:[#allocation5 + $0xdd8] sm:$0xff] }
 0xb75   :  { %14138 = vmatprep.subr.bf16.mxu1 %v15852_v36  ;;  %v22155_v40 = vpop.f32.mrf.mxu0  ;;  %14264 = vmatmul.mubr.bf16.vlgmr.msra.gmra.mxu0 %v22016_v38  ;;  %v15805_v38 = vcombine.low %v9259_v10, %v9271_v23  ;;  %v15950_v36 = vcombine.high %v9403_v54, %v9415_v16  ;;  %v9355_v10 = vld [vmem:[#allocation5 + $0x13d0] sm:$0xff] }
 0xb76   :  { %v9367_v23 = vld [vmem:[#allocation5 + $0x1430] sm:$0xff] }
 0xb77   :  { %v22158_v59 = vpop.f32.mrf.mxu0  ;;  %v15901_v47 = vcombine.low %v9355_v10, %v9367_v23 }
 0xb78   :  { %14139 = vmatpush2.bf16.msra.mxu1 %v15851_v14  ;;  %v15949_v14 = vcombine.low %v9403_v54, %v9415_v16  ;;  %v9140_v16 = vld [vmem:[#allocation5 + $0xd18] sm:$0xff] }
 0xb79   :  { %14190 = vmatprep.subr.bf16.mxu1 %v15830_v62  ;;  %v14023_v33 = vpop.f32.mrf.mxu0  ;;  %v15926_v62 = vcombine.high %v9379_v32, %v9391_v8 }
 0xb7a   :  { %v15902_v33 = vcombine.high %v9355_v10, %v9367_v23 }
 0xb7b   :  { %v13896_v4 = vpop.f32.mrf.mxu1  ;;  %14141 = vmatmul.mubr.bf16.vlgmr.msra.gmra.mxu1 %v22038_v57  ;;  %v14024_v60 = vpop.f32.mrf.mxu0 }
 0xb7c   :  { %14191 = vmatpush1.bf16.msra.mxu1 %v15829_v28  ;;  %14222 = vmatprep.mubr.bf16.mxu1 %v22036_v43  ;;  %v22163_v58 = vadd.f32 %v13896_v4, %v22124_v52  ;;  %v15734_v52 = vcombine.high %v9187_v25, %v9199_v20  ;;  %v15925_v28 = vcombine.low %v9379_v32, %v9391_v8  ;;  %v9307_v60 = vld [vmem:[#allocation5 + $0x1250] sm:$0xff]  ;;  %v9272_v25 = vld [vmem:[#allocation5 + $0x1138] sm:$0xff] }
 0xb7d   :  { %v13898_v55 = vpop.f32.mrf.mxu1  ;;  %14192 = vmatprep.subr.bf16.mxu1 %v15806_v5  ;;  %v9331_v5 = vld [vmem:[#allocation5 + $0x1310] sm:$0xff] }
 0xb7e   :  { %v22166_v21 = vadd.f32 %v13898_v55, %v22128_v56  ;;  %v9175_v56 = vld [vmem:[#allocation5 + $0xe30] sm:$0xff]  ;;  %v15878_v4 = vcombine.high %v9331_v5, %v9343_v44  ;;  %v15877_v55 = vcombine.low %v9331_v5, %v9343_v44 }
 0xb7f   :  { %v13900_v63 = vpop.f32.mrf.mxu1  ;;  %v15710_v24 = vcombine.high %v9163_v37, %v9175_v56  ;;  %v15709_v3 = vcombine.low %v9163_v37, %v9175_v56  ;;  %v9236_v56 = vld [vmem:[#allocation5 + $0x1018] sm:$0xff] }
 0xb80   :  { %v14388_v41 = vcombine.low %v22163_v58, %v22166_v21  ;;  %14193 = vmatpush1.bf16.msra.mxu1 %v15805_v38  ;;  %v9319_v38 = vld [vmem:[#allocation5 + $0x12b0] sm:$0xff] }
 0xb81   :  { %v13901_v11 = vpop.f32.mrf.mxu1  ;;  %14194 = vmatprep.subr.bf16.mxu1 %v15782_v45  ;;  %v15854_v45 = vcombine.high %v9307_v60, %v9319_v38  ;;  %v15853_v63 = vcombine.low %v9307_v60, %v9319_v38 }
 0xb82   :  { %v15832_v11 = vcombine.high %v9284_v42, %v9296_v17 }
 0xb84   :  { %14195 = vmatpush1.bf16.msra.mxu1 %v15781_v49 }
 0xb85   :  { %14196 = vmatprep.subr.bf16.mxu1 %v15758_v7  ;;  %v9260_v7 = vld [vmem:[#allocation5 + $0x10d8] sm:$0xff] }
 0xb86   :  { %v15808_v37 = vcombine.high %v9260_v7, %v9272_v25  ;;  %v15807_v19 = vcombine.low %v9260_v7, %v9272_v25 }
 0xb88   :  { %14197 = vmatpush1.bf16.msra.mxu1 %v15757_v61  ;;  %v15831_v61 = vcombine.low %v9284_v42, %v9296_v17 }
 0xb89   :  { %14198 = vmatprep.subr.bf16.mxu1 %v15734_v52 }
 0xb8c   :  { %14199 = vmatpush1.bf16.msra.mxu1 %v15733_v0  ;;  %v9248_v0 = vld [vmem:[#allocation5 + $0x1078] sm:$0xff] }
 0xb8d   :  { %14200 = vmatprep.subr.bf16.mxu1 %v15710_v24 }
 0xb90   :  { %14201 = vmatpush1.bf16.msra.mxu1 %v15709_v3 }
 0xb91   :  { %14202 = vmatprep.subr.bf16.mxu1 %v15686_v1  ;;  %v15784_v1 = vcombine.high %v9236_v56, %v9248_v0 }
 0xb94   :  { %14203 = vmatpush1.bf16.msra.mxu1 %v15685_v27  ;;  %v9212_v27 = vld [vmem:[#allocation5 + $0xf58] sm:$0xff] }
 0xb95   :  { %14204 = vmatprep.subr.bf16.mxu1 %v15662_v29  ;;  %v9224_v29 = vld [vmem:[#allocation5 + $0xfb8] sm:$0xff] }
 0xb96   :  { %v15760_v2 = vcombine.high %v9212_v27, %v9224_v29 }
 0xb98   :  { %14205 = vmatpush1.bf16.msra.mxu1 %v15661_v48  ;;  %v15783_v48 = vcombine.low %v9236_v56, %v9248_v0  ;;  %v9332_v0 = vld [vmem:[#allocation5 + $0x1318] sm:$0xff] }
 0xb99   :  { %14206 = vmatprep.subr.bf16.mxu1 %v16022_v39 }
 0xb9c   :  { %14207 = vmatpush2.bf16.msra.mxu1 %v16021_v12  ;;  %v9188_v12 = vld [vmem:[#allocation5 + $0xe98] sm:$0xff] }
 0xb9d   :  { %14208 = vmatprep.subr.bf16.mxu1 %v15998_v22 }
 0xba0   :  { %14209 = vmatpush2.bf16.msra.mxu1 %v15997_v46  ;;  %v9176_v46 = vld [vmem:[#allocation5 + $0xe38] sm:$0xff] }
 0xba1   :  { %14210 = vmatprep.subr.bf16.mxu1 %v15974_v35  ;;  %v15712_v54 = vcombine.high %v9164_v53, %v9176_v46  ;;  %v15711_v58 = vcombine.low %v9164_v53, %v9176_v46 }
 0xba4   :  { %14211 = vmatpush2.bf16.msra.mxu1 %v15973_v51  ;;  %v9152_v51 = vld [vmem:[#allocation5 + $0xd78] sm:$0xff] }
 0xba5   :  { %14212 = vmatprep.subr.bf16.mxu1 %v15950_v36  ;;  %v15688_v21 = vcombine.high %v9140_v16, %v9152_v51  ;;  %v9128_v36 = vld [vmem:[#allocation5 + $0xcb8] sm:$0xff]  ;;  %v15687_v32 = vcombine.low %v9140_v16, %v9152_v51 }
 0xba8   :  { %14213 = vmatpush2.bf16.msra.mxu1 %v15949_v14  ;;  %v9476_v14 = vld [vmem:[#allocation5 + $0x1798] sm:$0xff] }
 0xba9   :  { %14214 = vmatprep.subr.bf16.mxu1 %v15926_v62  ;;  %v9488_v62 = vld [vmem:[#allocation5 + $0x17f8] sm:$0xff] }
 0xbaa   :  { %v16024_v23 = vcombine.high %v9476_v14, %v9488_v62  ;;  %v16023_v5 = vcombine.low %v9476_v14, %v9488_v62 }
 0xbac   :  { %14215 = vmatpush2.bf16.msra.mxu1 %v15925_v28  ;;  %v9452_v28 = vld [vmem:[#allocation5 + $0x16d8] sm:$0xff] }
 0xbad   :  { %14216 = vmatprep.subr.bf16.mxu1 %v15902_v33  ;;  %v9464_v33 = vld [vmem:[#allocation5 + $0x1738] sm:$0xff] }
 0xbae   :  { %v16000_v44 = vcombine.high %v9452_v28, %v9464_v33  ;;  %v15999_v60 = vcombine.low %v9452_v28, %v9464_v33 }
 0xbb0   :  { %14217 = vmatpush2.bf16.msra.mxu1 %v15901_v47  ;;  %v9428_v47 = vld [vmem:[#allocation5 + $0x1618] sm:$0xff] }
 0xbb1   :  { %14218 = vmatprep.subr.bf16.mxu1 %v15878_v4  ;;  %v9440_v4 = vld [vmem:[#allocation5 + $0x1678] sm:$0xff] }
 0xbb2   :  { %v15976_v38 = vcombine.high %v9428_v47, %v9440_v4  ;;  %v15975_v42 = vcombine.low %v9428_v47, %v9440_v4 }
 0xbb4   :  { %14219 = vmatpush2.bf16.msra.mxu1 %v15877_v55  ;;  %v9404_v55 = vld [vmem:[#allocation5 + $0x1558] sm:$0xff] }
 0xbb5   :  { %14220 = vmatprep.subr.bf16.mxu1 %v15854_v45  ;;  %v22170_v49 = vpop.f32.mrf.mxu0  ;;  %v9416_v45 = vld [vmem:[#allocation5 + $0x15b8] sm:$0xff] }
 0xbb6   :  { %v15952_v17 = vcombine.high %v9404_v55, %v9416_v45  ;;  %v15951_v7 = vcombine.low %v9404_v55, %v9416_v45 }
 0xbb7   :  { %v22172_v20 = vpop.f32.mrf.mxu0 }
 0xbb8   :  { %14221 = vmatpush2.bf16.msra.mxu1 %v15853_v63  ;;  %v9380_v63 = vld [vmem:[#allocation5 + $0x1498] sm:$0xff] }
 0xbb9   :  { %14272 = vmatprep.subr.bf16.mxu1 %v15832_v11  ;;  %v14105_v52 = vpop.f32.mrf.mxu0  ;;  %v9392_v11 = vld [vmem:[#allocation5 + $0x14f8] sm:$0xff] }
 0xbba   :  { %v15928_v25 = vcombine.high %v9380_v63, %v9392_v11  ;;  %v9368_v52 = vld [vmem:[#allocation5 + $0x1438] sm:$0xff] }
 0xbbb   :  { %v13978_v24 = vpop.f32.mrf.mxu1  ;;  %14223 = vmatmul.mubr.bf16.vlgmr.msra.gmra.mxu1 %v22038_v57  ;;  %v14106_v30 = vpop.f32.mrf.mxu0 }
 0xbbc   :  { %14273 = vmatpush1.bf16.msra.mxu1 %v15831_v61  ;;  %14304 = vmatprep.mubr.bf16.mxu1 %v22036_v43  ;;  %v13979_v13 = vadd.f32 %v13978_v24, %v22140_v15  ;;  %v14396_v43 = vrot.slane %v14388_v41, %v21837_v26  ;;  %v9200_v15 = vld [vmem:[#allocation5 + $0xef8] sm:$0xff] }
 0xbbd   :  { %v13980_v3 = vpop.f32.mrf.mxu1  ;;  %14274 = vmatprep.subr.bf16.mxu1 %v15808_v37  ;;  %v15736_v9 = vcombine.high %v9188_v12, %v9200_v15  ;;  %v15735_v35 = vcombine.low %v9188_v12, %v9200_v15  ;;  %v9116_v41 = vld [vmem:[#allocation5 + $0xc58] sm:$0xff]  ;;  %v15927_v37 = vcombine.low %v9380_v63, %v9392_v11 }
 0xbbe   :  { %v13981_v18 = vadd.f32 %v13980_v3, %v22144_v31  ;;  %v15759_v31 = vcombine.low %v9212_v27, %v9224_v29  ;;  %v15664_v8 = vcombine.high %v9116_v41, %v9128_v36  ;;  %v15663_v10 = vcombine.low %v9116_v41, %v9128_v36  ;;  %v9356_v61 = vld [vmem:[#allocation5 + $0x13d8] sm:$0xff] }
 0xbbf   :  { %v13982_v6 = vpop.f32.mrf.mxu1  ;;  %v15904_v56 = vcombine.high %v9356_v61, %v9368_v52  ;;  %v9344_v24 = vld [vmem:[#allocation5 + $0x1378] sm:$0xff]  ;;  %v15903_v30 = vcombine.low %v9356_v61, %v9368_v52 }
 0xbc0   :  { %v14389_v50 = vcombine.low %v13979_v13, %v13981_v18  ;;  %14275 = vmatpush1.bf16.msra.mxu1 %v15807_v19  ;;  %v15880_v19 = vcombine.high %v9332_v0, %v9344_v24  ;;  %v9308_v3 = vld [vmem:[#allocation5 + $0x1258] sm:$0xff]  ;;  %v15879_v13 = vcombine.low %v9332_v0, %v9344_v24 }
 0xbc1   :  { %v13983_v39 = vpop.f32.mrf.mxu1  ;;  %14276 = vmatprep.subr.bf16.mxu1 %v15784_v1  ;;  %v9320_v1 = vld [vmem:[#allocation5 + $0x12b8] sm:$0xff] }
 0xbc2   :  { %v14403_v34 = vrot.slane %v14389_v50, %v21837_v26  ;;  %v15856_v18 = vcombine.high %v9308_v3, %v9320_v1  ;;  %v15855_v27 = vcombine.low %v9308_v3, %v9320_v1 }
 0xbc4   :  { %v14404_v22 = vcombine.low %v14396_v43, %v14403_v34  ;;  %14277 = vmatpush1.bf16.msra.mxu1 %v15783_v48 }
 0xbc5   :  { %14278 = vmatprep.subr.bf16.mxu1 %v15760_v2 }
 0xbc6   :  { %14448 = vst [vmem:[#allocation7 + $0x18] sm:$0xff] %v14404_v22 }
 0xbc8   :  { %14279 = vmatpush1.bf16.msra.mxu1 %v15759_v31 }
 0xbc9   :  { %14280 = vmatprep.subr.bf16.mxu1 %v15736_v9 }
 0xbcc   :  { %14281 = vmatpush1.bf16.msra.mxu1 %v15735_v35 }
 0xbcd   :  { %14282 = vmatprep.subr.bf16.mxu1 %v15712_v54 }
 0xbd0   :  { %14283 = vmatpush1.bf16.msra.mxu1 %v15711_v58 }
 0xbd1   :  { %14284 = vmatprep.subr.bf16.mxu1 %v15688_v21 }
 0xbd4   :  { %14285 = vmatpush1.bf16.msra.mxu1 %v15687_v32 }
 0xbd5   :  { %14286 = vmatprep.subr.bf16.mxu1 %v15664_v8 }
 0xbd8   :  { %14287 = vmatpush1.bf16.msra.mxu1 %v15663_v10 }
 0xbd9   :  { %14288 = vmatprep.subr.bf16.mxu1 %v16024_v23 }
 0xbdc   :  { %14289 = vmatpush2.bf16.msra.mxu1 %v16023_v5 }
 0xbdd   :  { %14290 = vmatprep.subr.bf16.mxu1 %v16000_v44 }
 0xbe0   :  { %14291 = vmatpush2.bf16.msra.mxu1 %v15999_v60 }
 0xbe1   :  { %14292 = vmatprep.subr.bf16.mxu1 %v15976_v38 }
 0xbe4   :  { %14293 = vmatpush2.bf16.msra.mxu1 %v15975_v42 }
 0xbe5   :  { %14294 = vmatprep.subr.bf16.mxu1 %v15952_v17 }
 0xbe8   :  { %14295 = vmatpush2.bf16.msra.mxu1 %v15951_v7 }
 0xbe9   :  { %14296 = vmatprep.subr.bf16.mxu1 %v15928_v25 }
 0xbec   :  { %14297 = vmatpush2.bf16.msra.mxu1 %v15927_v37 }
 0xbed   :  { %14298 = vmatprep.subr.bf16.mxu1 %v15904_v56 }
 0xbf0   :  { %14299 = vmatpush2.bf16.msra.mxu1 %v15903_v30 }
 0xbf1   :  { %14300 = vmatprep.subr.bf16.mxu1 %v15880_v19 }
 0xbf4   :  { %14301 = vmatpush2.bf16.msra.mxu1 %v15879_v13 }
 0xbf5   :  { %14302 = vmatprep.subr.bf16.mxu1 %v15856_v18  ;;  %v14183_v29 = vpop.f32.mrf.mxu0 }
 0xbf7   :  { %v14185_v6 = vpop.f32.mrf.mxu0 }
 0xbf8   :  { %14303 = vmatpush2.bf16.msra.mxu1 %v15855_v27 }
 0xbf9   :  { %v14187_v50 = vpop.f32.mrf.mxu0 }
 0xbfb   :  { %v14060_v48 = vpop.f32.mrf.mxu1  ;;  %14305 = vmatmul.mubr.bf16.vlgmr.msra.gmra.mxu1 %v22038_v57  ;;  %v14188_v39 = vpop.f32.mrf.mxu0 }
 0xbfc   :  { %v14061_v43 = vadd.f32 %v14060_v48, %v22155_v40 }
 0xbfd   :  { %v14062_v2 = vpop.f32.mrf.mxu1 }
 0xbfe   :  { %v14063_v34 = vadd.f32 %v14062_v2, %v22158_v59 }
 0xbff   :  { %v14064_v12 = vpop.f32.mrf.mxu1 }
 0xc00   :  { %v14405_v15 = vcombine.low %v14061_v43, %v14063_v34 }
 0xc01   :  { %v14065_v22 = vpop.f32.mrf.mxu1 }
 0xc02   :  { %v14413_v40 = vrot.slane %v14405_v15, %v21837_v26 }
 0xc35   :  { %v14265_v31 = vpop.f32.mrf.mxu0 }
 0xc37   :  { %v14267_v9 = vpop.f32.mrf.mxu0 }
 0xc39   :  { %v14269_v53 = vpop.f32.mrf.mxu0 }
 0xc3b   :  { %v14142_v46 = vpop.f32.mrf.mxu1  ;;  %v14270_v35 = vpop.f32.mrf.mxu0 }
 0xc3c   :  { %v14143_v16 = vadd.f32 %v14142_v46, %v22170_v49 }
 0xc3d   :  { %v14144_v54 = vpop.f32.mrf.mxu1 }
 0xc3e   :  { %v14145_v51 = vadd.f32 %v14144_v54, %v22172_v20 }
 0xc3f   :  { %v14146_v57 = vpop.f32.mrf.mxu1 }
 0xc40   :  { %v14406_v58 = vcombine.low %v14143_v16, %v14145_v51 }
 0xc41   :  { %v14147_v21 = vpop.f32.mrf.mxu1 }
 0xc42   :  { %v14420_v59 = vrot.slane %v14406_v58, %v21837_v26 }
 0xc44   :  { %v14421_v41 = vcombine.low %v14413_v40, %v14420_v59 }
 0xc46   :  { %14449 = vst [vmem:[#allocation7 + $0x20] sm:$0xff] %v14421_v41 }
 0xc47   :  { %17345 = shalt.err (!%p17342_p0)
}
 0xc48   :  { %14472 = dma.vmem_to_hbm [thread:$0]  %s14470_s21, 16, %s22206_s8, [#allocation9]  }
 0xc49   :  { %s17393_s5 = smov [#allocation7]  }
 0xc4a   :  { %s14457_s26 = sshll.u32 %s17393_s5, 4  ;;  %s14458_s26 = int_to_ptr.vmem [resolvable:$true] %s14457_s26 }
 0xc4b   :  { %s17354_s8 = scalar_lea.vmem %s14458_s26, 768  ;;  %p17359_p2 = scmp.lt.s32.totalorder %s14458_s26, %s14458_s26 }
 0xc4c   :  { %p17355_p1 = scmp.ne.s32.totalorder %s14458_s26, %s17354_s8  ;;  %p17360_p3 = scmp.lt.s32.totalorder %s17354_s8, %s17354_s8 }
 0xc4e   :  { %p17361_p4 = por %p17360_p3, %p17359_p2 }
 0xc50   :  { %p17362_p5 = pnand %p17361_p4, %p17355_p1 }
 0xc7b   :  { %v14224_v49 = vpop.f32.mrf.mxu1 }
 0xc7c   :  { %v14225_v36 = vadd.f32 %v14224_v49, %v14183_v29 }
 0xc7d   :  { %v14226_v20 = vpop.f32.mrf.mxu1 }
 0xc7e   :  { %v14227_v32 = vadd.f32 %v14226_v20, %v14185_v6 }
 0xc7f   :  { %v14228_v8 = vpop.f32.mrf.mxu1 }
 0xc80   :  { %v14422_v14 = vcombine.low %v14225_v36, %v14227_v32 }
 0xc81   :  { %v14229_v62 = vpop.f32.mrf.mxu1 }
 0xc82   :  { %v14430_v4 = vrot.slane %v14422_v14, %v21837_v26 }
 0xcbb   :  { %v14306_v10 = vpop.f32.mrf.mxu1 }
 0xcbc   :  { %v14307_v28 = vadd.f32 %v14306_v10, %v14265_v31 }
 0xcbd   :  { %v14308_v23 = vpop.f32.mrf.mxu1 }
 0xcbe   :  { %v14309_v33 = vadd.f32 %v14308_v23, %v14267_v9 }
 0xcbf   :  { %v14310_v5 = vpop.f32.mrf.mxu1 }
 0xcc0   :  { %v14423_v44 = vcombine.low %v14307_v28, %v14309_v33 }
 0xcc1   :  { %v14311_v47 = vpop.f32.mrf.mxu1 }
 0xcc2   :  { %v14437_v60 = vrot.slane %v14423_v44, %v21837_v26 }
 0xcc4   :  { %v14438_v38 = vcombine.low %v14430_v4, %v14437_v60 }
 0xcc6   :  { %14450 = vst [vmem:[#allocation7 + $0x28] sm:$0xff] %v14438_v38 }
 0xcc7   :  { %17365 = shalt.err (!%p17362_p5)
}
 0xcc8   :  { %14460 = dma.vmem_to_hbm [thread:$0]  %s14458_s26, 768, %s22204_s6, [#allocation4]  }
 0xcc9   :  { %17378 = dma.done.wait [#allocation4], 768  }
 0xcca   :  { %17379 = vsyncadd [#allocation4], 4294966528 }
 0xccb   :  { %17380 = dma.done.wait [#allocation9], 16  }
 0xccc   :  { %17381 = vsyncadd [#allocation9], 4294967280 }
 0xccd   :  { %14481 = vsyncpa [#allocation3], 1 }
 0xcce   :  { %14482 = vsyncpa [#allocation6], 1 }
 0xccf   :  { %14483 = vsyncpa [#allocation4], 1 }
 0xcd0   :  { %14484 = vsyncpa [#allocation9], 1 }

</bundles_post_ra>
